<compile_context>
chip_gen: v7x
topology: tpu7x:2x2x1
jax: 0.10.0
libtpu: 0.0.40
codegen_flags: <defaults>
</compile_context>

<pallas_src>
import functools

import jax
import jax.numpy as jnp
from jax.experimental import pallas as pl
from jax.experimental.pallas import tpu as pltpu


def _neural_cde_kernel(
    # SMEM
    dt2_ref,                       # (T2-1,) f32  step sizes of `terminal_time`
    # VMEM
    fidx_ref,                      # (B, 1) i32
    x0_ref,                        # (B, Cin)       X(times[0])  (= spline coeff a[:, 0])
    bx_ref,                        # (T-1, B, Cin)  spline derivative, pre-scaled by dt
    w_in_ref, b_in_ref,            # initial_network : Linear(Cin -> H)
    w_f1_ref, b_f1_ref,            # func (CDE field) layer 1 : Linear(H -> Hm)
    w_f2_ref, b_f2_ref,            # func layer 2, fused : (Hm, Cin*H), (1, Cin*H)
    e_sel_ref, s_sel_ref,          # constant selectors : (Cin, Cin*H), (Cin*H, H)
    w_fc_ref, b_fc_ref,            # self.fc : Linear(H -> H)
    w_o1_ref, b_o1_ref,            # func_f (ODE drift) layer 1 : Linear(H -> Hm)
    w_o2_ref, b_o2_ref,            # func_f layer 2 : Linear(Hm -> H)
    w_o1t_ref, w_o2t_ref,          # host transposes of w_o1 / w_o2 (Jacobian term)
    w_g_ref, b_g_ref,              # func_g (CDE field) : Linear(H -> H*H)
    sel_g_ref,                     # (H*H, H) block-diagonal contraction selector
    w_l_ref, b_l_ref,              # self.linear : Linear(H -> Cout)
    # outputs
    pred_ref,                      # (B, Cout)
    reg_ref,                       # (1, 1)
    *, T, T2, B, Cin, H, Hm, Cout, ke_coef, jac_coef,
):
    f32 = jnp.float32

    # ---- z0 = initial_network(X(times[0])) -------------------------------------------
    z0 = jnp.dot(x0_ref[...], w_in_ref[...], preferred_element_type=f32) + b_in_ref[...]
    fidx = fidx_ref[...]

    w_f1 = w_f1_ref[...]; b_f1 = b_f1_ref[...]
    w_f2 = w_f2_ref[...]; b_f2 = b_f2_ref[...]
    e_sel = e_sel_ref[...]; s_sel = s_sel_ref[...]

    # ---- stage 1: cdeint, left-endpoint Euler over `times` (fully unrolled) ----------
    z = z0
    enc = z0                                   # Encoder[b] = z(times[final_index[b]]); fidx==0 -> z0
    for k in range(T - 1):                     # static unroll
        hid = jnp.maximum(jnp.dot(z, w_f1, preferred_element_type=f32) + b_f1, 0.0)
        # all Cin output heads in one lane-dense matmul + one tanh
        fvals = jnp.tanh(jnp.dot(hid, w_f2, preferred_element_type=f32) + b_f2)    # (B, Cin*H)
        dxe = jnp.dot(bx_ref[k], e_sel, preferred_element_type=f32)                # (B, Cin*H), incl. dt
        z = z + jnp.dot(fvals * dxe, s_sel, preferred_element_type=f32)            # (B, H)
        enc = jnp.where(fidx == (k + 1), z, enc)

    # ---- h0 = fc(Encoder) --------------------------------------------------------------
    h = jnp.dot(enc, w_fc_ref[...], preferred_element_type=f32) + b_fc_ref[...]

    w_o1 = w_o1_ref[...]; b_o1 = b_o1_ref[...]
    w_o2 = w_o2_ref[...]; b_o2 = b_o2_ref[...]
    w_o1t = w_o1t_ref[...]; w_o2t = w_o2t_ref[...]

    # ---- stage 2a: ODE for h (independent of z) + regularisation (unrolled) -----------
    dh_tiled = []                              # dh * dt pre-tiled to (B, H*H) for the z-CDE below
    reg = f32(0.0)
    for k in range(T2 - 1):                    # static unroll
        dt = dt2_ref[k]
        a_mid = jnp.tanh(jnp.dot(h, w_o1, preferred_element_type=f32) + b_o1)      # (B, Hm)
        dh = jnp.tanh(jnp.dot(a_mid, w_o2, preferred_element_type=f32) + b_o2)     # (B, H)

        # J[b,i,j] = d2[b,j] * sum_m w_o1[i,m] * d1[b,m] * w_o2[m,j]
        # computed as one wide (B*H, Hm) @ (Hm, H) matmul; J itself is never stored per batch.
        d1 = 1.0 - a_mid * a_mid                                                   # (B, Hm)
        d2 = 1.0 - dh * dh                                                         # (B, H)
        v = (d1[:, None, :] * w_o2t[None, :, :]) * d2[:, :, None]                  # (B, H, Hm)
        r = jnp.dot(v.reshape(B * H, Hm), w_o1t, preferred_element_type=f32)       # (B*H, H)
        reg = reg + dt * (ke_coef * jnp.sum(dh * dh) + jac_coef * jnp.sum(r * r)) / B

        dh_tiled.append(jnp.tile(dh * dt, (1, H)))                                 # (B, H*H)
        h = h + dh * dt

    # ---- stage 2b: CDE for z, driven by dh/dt (unrolled) -------------------------------
    w_g = w_g_ref[...]; b_g = b_g_ref[...]; sel_g = sel_g_ref[...]
    z = z0
    for k in range(T2 - 1):                    # static unroll; dh*dt already precomputed above
        gflat = jnp.tanh(jnp.dot(z, w_g, preferred_element_type=f32) + b_g)        # (B, H*H)
        z = z + jnp.dot(gflat * dh_tiled[k], sel_g, preferred_element_type=f32)    # (B, H)

    # ---- outputs ------------------------------------------------------------------------
    pred_ref[...] = jnp.dot(z, w_l_ref[...], preferred_element_type=f32) + b_l_ref[...]
    reg_ref[...] = reg.reshape(1, 1)


def neural_cde_idea4_forward(times, terminal_time, coeffs, final_index, params,
                             kinetic_energy_coef=0.01, jacobian_norm2_coef=0.01):
    a, b, _c2, _d3 = coeffs        # c2/d3 unused by the left-endpoint Euler integrator
    B, Tm1, Cin = a.shape
    T = Tm1 + 1
    T2 = terminal_time.shape[0]
    H = params['w_fc'].shape[0]
    Hm = params['w_f1'].shape[1]
    Cout = params['w_l'].shape[1]
    f32 = jnp.float32

    times = times.astype(f32)
    tt = terminal_time.astype(f32)
    dt1 = times[1:] - times[:-1]                                            # (T-1,)
    dt2 = tt[1:] - tt[:-1]                                                  # (T2-1,)

    # only a[:, 0] (value at t0) and the dt-scaled derivative b*dt are needed in-kernel
    x0 = a[:, 0, :].astype(f32)                                             # (B, Cin)
    bx = jnp.transpose(b, (1, 0, 2)).astype(f32) * dt1[:, None, None]       # (T-1, B, Cin)
    fidx = final_index.astype(jnp.int32).reshape(B, 1)

    # fuse func's Cin per-channel output heads into one (Hm, Cin*H) matrix
    w_f2f = jnp.transpose(params['w_f2'], (1, 0, 2)).reshape(Hm, Cin * H).astype(f32)
    b_f2f = params['b_f2'].reshape(1, Cin * H).astype(f32)

    # constant selectors (host-built, VMEM-resident)
    col = jnp.arange(Cin * H)
    e_sel = (jnp.arange(Cin)[:, None] == (col[None, :] // H)).astype(f32)   # (Cin, Cin*H) expand dX
    s_sel = ((col[:, None] % H) == jnp.arange(H)[None, :]).astype(f32)      # (Cin*H, H) block sum
    sel_g = ((jnp.arange(H * H)[:, None] // H) == jnp.arange(H)[None, :]).astype(f32)  # (H*H, H)

    w_o1t = jnp.transpose(params['w_o1']).astype(f32)                       # (Hm, H)
    w_o2t = jnp.transpose(params['w_o2']).astype(f32)                       # (H, Hm)

    smem = pl.BlockSpec(memory_space=pltpu.MemorySpace.SMEM)
    vmem = pl.BlockSpec(memory_space=pltpu.MemorySpace.VMEM)

    kern = functools.partial(
        _neural_cde_kernel,
        T=T, T2=T2, B=B, Cin=Cin, H=H, Hm=Hm, Cout=Cout,
        ke_coef=float(kinetic_energy_coef), jac_coef=float(jacobian_norm2_coef))

    # TODO(synk): at large T/B stream `bx` with memory_space=pl.ANY + manual double buffering
    # (and cap vmem_limit_bytes) to fit v7x's smaller VMEM; at these shapes everything fits.
    pred, reg = pl.pallas_call(
        kern,
        out_shape=(jax.ShapeDtypeStruct((B, Cout), f32),
                   jax.ShapeDtypeStruct((1, 1), f32)),
        in_specs=[smem] + [vmem] * 24,
        out_specs=(vmem, vmem),
    )(dt2, fidx, x0, bx,
      params['w_in'].astype(f32), params['b_in'].astype(f32),
      params['w_f1'].astype(f32), params['b_f1'].astype(f32),
      w_f2f, b_f2f, e_sel, s_sel,
      params['w_fc'].astype(f32), params['b_fc'].astype(f32),
      params['w_o1'].astype(f32), params['b_o1'].astype(f32),
      params['w_o2'].astype(f32), params['b_o2'].astype(f32),
      w_o1t, w_o2t,
      params['w_g'].astype(f32), params['b_g'].astype(f32), sel_g,
      params['w_l'].astype(f32), params['b_l'].astype(f32))
    return pred, reg[0, 0]


def init_params(key, Cin, H, Hm, Cout):
    ks = jax.random.split(key, 8)

    def lin(k, fan_in, shape):
        return (jax.random.normal(k, shape, jnp.float32) / jnp.sqrt(fan_in)).astype(jnp.float32)

    z = lambda *s: jnp.zeros(s, jnp.float32)
    return dict(
        w_in=lin(ks[0], Cin, (Cin, H)),      b_in=z(1, H),
        w_f1=lin(ks[1], H, (H, Hm)),         b_f1=z(1, Hm),
        w_f2=lin(ks[2], Hm, (Cin, Hm, H)),   b_f2=z(Cin, 1, H),
        w_fc=lin(ks[3], H, (H, H)),          b_fc=z(1, H),
        w_o1=lin(ks[4], H, (H, Hm)),         b_o1=z(1, Hm),
        w_o2=lin(ks[5], Hm, (Hm, H)),        b_o2=z(1, H),
        w_g=lin(ks[6], H, (H, H * H)),       b_g=z(1, H * H),
        w_l=lin(ks[7], H, (H, Cout)),        b_l=z(1, Cout),
    )


if __name__ == "__main__":
    key = jax.random.PRNGKey(0)
    B, Cin, H, Hm, Cout = 8, 4, 32, 32, 2
    T, T2 = 8, 6

    k_coef, k_fi, k_par = jax.random.split(key, 3)
    ck = jax.random.split(k_coef, 4)
    coeffs = tuple(0.5 * jax.random.normal(ck[i], (B, T - 1, Cin), jnp.float32)
                   for i in range(4))
    times = jnp.linspace(0.0, 1.0, T).astype(jnp.float32)
    terminal_time = jnp.linspace(1.0, 2.0, T2).astype(jnp.float32)
    final_index = jax.random.randint(k_fi, (B,), 0, T)
    params = init_params(k_par, Cin, H, Hm, Cout)

    pred_y, reg = neural_cde_idea4_forward(
        times, terminal_time, coeffs, final_index, params,
        kinetic_energy_coef=0.01, jacobian_norm2_coef=0.01)
    jax.block_until_ready((pred_y, reg))
    assert pred_y.shape == (B, Cout) and reg.shape == ()
    print("KERNEL_OK")
</pallas_src>

<mosaic_0001>
module attributes {stable_mosaic.version = 11 : i64} {
  func.func @_neural_cde_kernel(%arg0: memref<5xf32, #tpu.memory_space<smem>>, %arg1: memref<8x1xi32, #tpu.memory_space<vmem>>, %arg2: memref<8x4xf32, #tpu.memory_space<vmem>>, %arg3: memref<7x8x4xf32, #tpu.memory_space<vmem>>, %arg4: memref<4x32xf32, #tpu.memory_space<vmem>>, %arg5: memref<1x32xf32, #tpu.memory_space<vmem>>, %arg6: memref<32x32xf32, #tpu.memory_space<vmem>>, %arg7: memref<1x32xf32, #tpu.memory_space<vmem>>, %arg8: memref<32x128xf32, #tpu.memory_space<vmem>>, %arg9: memref<1x128xf32, #tpu.memory_space<vmem>>, %arg10: memref<4x128xf32, #tpu.memory_space<vmem>>, %arg11: memref<128x32xf32, #tpu.memory_space<vmem>>, %arg12: memref<32x32xf32, #tpu.memory_space<vmem>>, %arg13: memref<1x32xf32, #tpu.memory_space<vmem>>, %arg14: memref<32x32xf32, #tpu.memory_space<vmem>>, %arg15: memref<1x32xf32, #tpu.memory_space<vmem>>, %arg16: memref<32x32xf32, #tpu.memory_space<vmem>>, %arg17: memref<1x32xf32, #tpu.memory_space<vmem>>, %arg18: memref<32x32xf32, #tpu.memory_space<vmem>>, %arg19: memref<32x32xf32, #tpu.memory_space<vmem>>, %arg20: memref<32x1024xf32, #tpu.memory_space<vmem>>, %arg21: memref<1x1024xf32, #tpu.memory_space<vmem>>, %arg22: memref<1024x32xf32, #tpu.memory_space<vmem>>, %arg23: memref<32x2xf32, #tpu.memory_space<vmem>>, %arg24: memref<1x2xf32, #tpu.memory_space<vmem>>, %arg25: memref<8x2xf32, #tpu.memory_space<vmem>>, %arg26: memref<1x1xf32, #tpu.memory_space<vmem>>) attributes {dimension_semantics = [], scalar_prefetch = 0 : i64, scratch_operands = 0 : i64, tpu.core_type = #tpu.core_type<tc>} {
    %c0 = arith.constant 0 : index
    %c0_0 = arith.constant 0 : index
    %0 = vector.load %arg2[%c0, %c0_0] : memref<8x4xf32, #tpu.memory_space<vmem>>, vector<8x4xf32>
    %c0_1 = arith.constant 0 : index
    %c0_2 = arith.constant 0 : index
    %1 = vector.load %arg4[%c0_1, %c0_2] : memref<4x32xf32, #tpu.memory_space<vmem>>, vector<4x32xf32>
    %cst = arith.constant dense<0.000000e+00> : vector<8x32xf32>
    %2 = tpu.matmul %0, %1, %cst {dimension_numbers = #tpu.dot_dimension_numbers<[1], [0], [0], [1], [0, 0, 1, 1], [], []>} : vector<8x4xf32>, vector<4x32xf32>, vector<8x32xf32> -> vector<8x32xf32>
    %c0_3 = arith.constant 0 : index
    %c0_4 = arith.constant 0 : index
    %3 = vector.load %arg5[%c0_3, %c0_4] : memref<1x32xf32, #tpu.memory_space<vmem>>, vector<1x32xf32>
    %4 = vector.broadcast %3 : vector<1x32xf32> to vector<8x32xf32>
    %5 = arith.addf %2, %4 : vector<8x32xf32>
    %c0_5 = arith.constant 0 : index
    %c0_6 = arith.constant 0 : index
    %6 = vector.load %arg1[%c0_5, %c0_6] : memref<8x1xi32, #tpu.memory_space<vmem>>, vector<8x1xi32>
    %c0_7 = arith.constant 0 : index
    %c0_8 = arith.constant 0 : index
    %7 = vector.load %arg6[%c0_7, %c0_8] : memref<32x32xf32, #tpu.memory_space<vmem>>, vector<32x32xf32>
    %c0_9 = arith.constant 0 : index
    %c0_10 = arith.constant 0 : index
    %8 = vector.load %arg7[%c0_9, %c0_10] : memref<1x32xf32, #tpu.memory_space<vmem>>, vector<1x32xf32>
    %c0_11 = arith.constant 0 : index
    %c0_12 = arith.constant 0 : index
    %9 = vector.load %arg8[%c0_11, %c0_12] : memref<32x128xf32, #tpu.memory_space<vmem>>, vector<32x128xf32>
    %c0_13 = arith.constant 0 : index
    %c0_14 = arith.constant 0 : index
    %10 = vector.load %arg9[%c0_13, %c0_14] : memref<1x128xf32, #tpu.memory_space<vmem>>, vector<1x128xf32>
    %c0_15 = arith.constant 0 : index
    %c0_16 = arith.constant 0 : index
    %11 = vector.load %arg10[%c0_15, %c0_16] : memref<4x128xf32, #tpu.memory_space<vmem>>, vector<4x128xf32>
    %c0_17 = arith.constant 0 : index
    %c0_18 = arith.constant 0 : index
    %12 = vector.load %arg11[%c0_17, %c0_18] : memref<128x32xf32, #tpu.memory_space<vmem>>, vector<128x32xf32>
    %cst_19 = arith.constant dense<0.000000e+00> : vector<8x32xf32>
    %13 = tpu.matmul %5, %7, %cst_19 {dimension_numbers = #tpu.dot_dimension_numbers<[1], [0], [0], [1], [0, 0, 1, 1], [], []>} : vector<8x32xf32>, vector<32x32xf32>, vector<8x32xf32> -> vector<8x32xf32>
    %14 = vector.broadcast %8 : vector<1x32xf32> to vector<8x32xf32>
    %15 = arith.addf %13, %14 : vector<8x32xf32>
    %cst_20 = arith.constant 0.000000e+00 : f32
    %16 = vector.broadcast %cst_20 : f32 to vector<8x32xf32>
    %17 = arith.maximumf %15, %16 : vector<8x32xf32>
    %cst_21 = arith.constant dense<0.000000e+00> : vector<8x128xf32>
    %18 = tpu.matmul %17, %9, %cst_21 {dimension_numbers = #tpu.dot_dimension_numbers<[1], [0], [0], [1], [0, 0, 1, 1], [], []>} : vector<8x32xf32>, vector<32x128xf32>, vector<8x128xf32> -> vector<8x128xf32>
    %19 = vector.broadcast %10 : vector<1x128xf32> to vector<8x128xf32>
    %20 = arith.addf %18, %19 : vector<8x128xf32>
    %21 = math.tanh %20 : vector<8x128xf32>
    %c0_22 = arith.constant 0 : index
    %c0_23 = arith.constant 0 : index
    %c0_24 = arith.constant 0 : index
    %22 = vector.load %arg3[%c0_22, %c0_23, %c0_24] : memref<7x8x4xf32, #tpu.memory_space<vmem>>, vector<1x8x4xf32>
    %23 = vector.shape_cast %22 : vector<1x8x4xf32> to vector<8x4xf32>
    %cst_25 = arith.constant dense<0.000000e+00> : vector<8x128xf32>
    %24 = tpu.matmul %23, %11, %cst_25 {dimension_numbers = #tpu.dot_dimension_numbers<[1], [0], [0], [1], [0, 0, 1, 1], [], []>} : vector<8x4xf32>, vector<4x128xf32>, vector<8x128xf32> -> vector<8x128xf32>
    %25 = arith.mulf %21, %24 : vector<8x128xf32>
    %cst_26 = arith.constant dense<0.000000e+00> : vector<8x32xf32>
    %26 = tpu.matmul %25, %12, %cst_26 {dimension_numbers = #tpu.dot_dimension_numbers<[1], [0], [0], [1], [0, 0, 1, 1], [], []>} : vector<8x128xf32>, vector<128x32xf32>, vector<8x32xf32> -> vector<8x32xf32>
    %27 = arith.addf %5, %26 : vector<8x32xf32>
    %c1_i32 = arith.constant 1 : i32
    %28 = vector.broadcast %c1_i32 : i32 to vector<8x1xi32>
    %29 = arith.cmpi eq, %6, %28 : vector<8x1xi32>
    %30 = vector.shape_cast %29 : vector<8x1xi1> to vector<8x1xi1>
    %31 = vector.broadcast %30 : vector<8x1xi1> to vector<8x32xi1>
    %32 = arith.select %31, %27, %5 : vector<8x32xi1>, vector<8x32xf32>
    %cst_27 = arith.constant dense<0.000000e+00> : vector<8x32xf32>
    %33 = tpu.matmul %27, %7, %cst_27 {dimension_numbers = #tpu.dot_dimension_numbers<[1], [0], [0], [1], [0, 0, 1, 1], [], []>} : vector<8x32xf32>, vector<32x32xf32>, vector<8x32xf32> -> vector<8x32xf32>
    %34 = vector.broadcast %8 : vector<1x32xf32> to vector<8x32xf32>
    %35 = arith.addf %33, %34 : vector<8x32xf32>
    %cst_28 = arith.constant 0.000000e+00 : f32
    %36 = vector.broadcast %cst_28 : f32 to vector<8x32xf32>
    %37 = arith.maximumf %35, %36 : vector<8x32xf32>
    %cst_29 = arith.constant dense<0.000000e+00> : vector<8x128xf32>
    %38 = tpu.matmul %37, %9, %cst_29 {dimension_numbers = #tpu.dot_dimension_numbers<[1], [0], [0], [1], [0, 0, 1, 1], [], []>} : vector<8x32xf32>, vector<32x128xf32>, vector<8x128xf32> -> vector<8x128xf32>
    %39 = vector.broadcast %10 : vector<1x128xf32> to vector<8x128xf32>
    %40 = arith.addf %38, %39 : vector<8x128xf32>
    %41 = math.tanh %40 : vector<8x128xf32>
    %c1 = arith.constant 1 : index
    %c0_30 = arith.constant 0 : index
    %c0_31 = arith.constant 0 : index
    %42 = vector.load %arg3[%c1, %c0_30, %c0_31] : memref<7x8x4xf32, #tpu.memory_space<vmem>>, vector<1x8x4xf32>
    %43 = vector.shape_cast %42 : vector<1x8x4xf32> to vector<8x4xf32>
    %cst_32 = arith.constant dense<0.000000e+00> : vector<8x128xf32>
    %44 = tpu.matmul %43, %11, %cst_32 {dimension_numbers = #tpu.dot_dimension_numbers<[1], [0], [0], [1], [0, 0, 1, 1], [], []>} : vector<8x4xf32>, vector<4x128xf32>, vector<8x128xf32> -> vector<8x128xf32>
    %45 = arith.mulf %41, %44 : vector<8x128xf32>
    %cst_33 = arith.constant dense<0.000000e+00> : vector<8x32xf32>
    %46 = tpu.matmul %45, %12, %cst_33 {dimension_numbers = #tpu.dot_dimension_numbers<[1], [0], [0], [1], [0, 0, 1, 1], [], []>} : vector<8x128xf32>, vector<128x32xf32>, vector<8x32xf32> -> vector<8x32xf32>
    %47 = arith.addf %27, %46 : vector<8x32xf32>
    %c2_i32 = arith.constant 2 : i32
    %48 = vector.broadcast %c2_i32 : i32 to vector<8x1xi32>
    %49 = arith.cmpi eq, %6, %48 : vector<8x1xi32>
    %50 = vector.shape_cast %49 : vector<8x1xi1> to vector<8x1xi1>
    %51 = vector.broadcast %50 : vector<8x1xi1> to vector<8x32xi1>
    %52 = arith.select %51, %47, %32 : vector<8x32xi1>, vector<8x32xf32>
    %cst_34 = arith.constant dense<0.000000e+00> : vector<8x32xf32>
    %53 = tpu.matmul %47, %7, %cst_34 {dimension_numbers = #tpu.dot_dimension_numbers<[1], [0], [0], [1], [0, 0, 1, 1], [], []>} : vector<8x32xf32>, vector<32x32xf32>, vector<8x32xf32> -> vector<8x32xf32>
    %54 = vector.broadcast %8 : vector<1x32xf32> to vector<8x32xf32>
    %55 = arith.addf %53, %54 : vector<8x32xf32>
    %cst_35 = arith.constant 0.000000e+00 : f32
    %56 = vector.broadcast %cst_35 : f32 to vector<8x32xf32>
    %57 = arith.maximumf %55, %56 : vector<8x32xf32>
    %cst_36 = arith.constant dense<0.000000e+00> : vector<8x128xf32>
    %58 = tpu.matmul %57, %9, %cst_36 {dimension_numbers = #tpu.dot_dimension_numbers<[1], [0], [0], [1], [0, 0, 1, 1], [], []>} : vector<8x32xf32>, vector<32x128xf32>, vector<8x128xf32> -> vector<8x128xf32>
    %59 = vector.broadcast %10 : vector<1x128xf32> to vector<8x128xf32>
    %60 = arith.addf %58, %59 : vector<8x128xf32>
    %61 = math.tanh %60 : vector<8x128xf32>
    %c2 = arith.constant 2 : index
    %c0_37 = arith.constant 0 : index
    %c0_38 = arith.constant 0 : index
    %62 = vector.load %arg3[%c2, %c0_37, %c0_38] : memref<7x8x4xf32, #tpu.memory_space<vmem>>, vector<1x8x4xf32>
    %63 = vector.shape_cast %62 : vector<1x8x4xf32> to vector<8x4xf32>
    %cst_39 = arith.constant dense<0.000000e+00> : vector<8x128xf32>
    %64 = tpu.matmul %63, %11, %cst_39 {dimension_numbers = #tpu.dot_dimension_numbers<[1], [0], [0], [1], [0, 0, 1, 1], [], []>} : vector<8x4xf32>, vector<4x128xf32>, vector<8x128xf32> -> vector<8x128xf32>
    %65 = arith.mulf %61, %64 : vector<8x128xf32>
    %cst_40 = arith.constant dense<0.000000e+00> : vector<8x32xf32>
    %66 = tpu.matmul %65, %12, %cst_40 {dimension_numbers = #tpu.dot_dimension_numbers<[1], [0], [0], [1], [0, 0, 1, 1], [], []>} : vector<8x128xf32>, vector<128x32xf32>, vector<8x32xf32> -> vector<8x32xf32>
    %67 = arith.addf %47, %66 : vector<8x32xf32>
    %c3_i32 = arith.constant 3 : i32
    %68 = vector.broadcast %c3_i32 : i32 to vector<8x1xi32>
    %69 = arith.cmpi eq, %6, %68 : vector<8x1xi32>
    %70 = vector.shape_cast %69 : vector<8x1xi1> to vector<8x1xi1>
    %71 = vector.broadcast %70 : vector<8x1xi1> to vector<8x32xi1>
    %72 = arith.select %71, %67, %52 : vector<8x32xi1>, vector<8x32xf32>
    %cst_41 = arith.constant dense<0.000000e+00> : vector<8x32xf32>
    %73 = tpu.matmul %67, %7, %cst_41 {dimension_numbers = #tpu.dot_dimension_numbers<[1], [0], [0], [1], [0, 0, 1, 1], [], []>} : vector<8x32xf32>, vector<32x32xf32>, vector<8x32xf32> -> vector<8x32xf32>
    %74 = vector.broadcast %8 : vector<1x32xf32> to vector<8x32xf32>
    %75 = arith.addf %73, %74 : vector<8x32xf32>
    %cst_42 = arith.constant 0.000000e+00 : f32
    %76 = vector.broadcast %cst_42 : f32 to vector<8x32xf32>
    %77 = arith.maximumf %75, %76 : vector<8x32xf32>
    %cst_43 = arith.constant dense<0.000000e+00> : vector<8x128xf32>
    %78 = tpu.matmul %77, %9, %cst_43 {dimension_numbers = #tpu.dot_dimension_numbers<[1], [0], [0], [1], [0, 0, 1, 1], [], []>} : vector<8x32xf32>, vector<32x128xf32>, vector<8x128xf32> -> vector<8x128xf32>
    %79 = vector.broadcast %10 : vector<1x128xf32> to vector<8x128xf32>
    %80 = arith.addf %78, %79 : vector<8x128xf32>
    %81 = math.tanh %80 : vector<8x128xf32>
    %c3 = arith.constant 3 : index
    %c0_44 = arith.constant 0 : index
    %c0_45 = arith.constant 0 : index
    %82 = vector.load %arg3[%c3, %c0_44, %c0_45] : memref<7x8x4xf32, #tpu.memory_space<vmem>>, vector<1x8x4xf32>
    %83 = vector.shape_cast %82 : vector<1x8x4xf32> to vector<8x4xf32>
    %cst_46 = arith.constant dense<0.000000e+00> : vector<8x128xf32>
    %84 = tpu.matmul %83, %11, %cst_46 {dimension_numbers = #tpu.dot_dimension_numbers<[1], [0], [0], [1], [0, 0, 1, 1], [], []>} : vector<8x4xf32>, vector<4x128xf32>, vector<8x128xf32> -> vector<8x128xf32>
    %85 = arith.mulf %81, %84 : vector<8x128xf32>
    %cst_47 = arith.constant dense<0.000000e+00> : vector<8x32xf32>
    %86 = tpu.matmul %85, %12, %cst_47 {dimension_numbers = #tpu.dot_dimension_numbers<[1], [0], [0], [1], [0, 0, 1, 1], [], []>} : vector<8x128xf32>, vector<128x32xf32>, vector<8x32xf32> -> vector<8x32xf32>
    %87 = arith.addf %67, %86 : vector<8x32xf32>
    %c4_i32 = arith.constant 4 : i32
    %88 = vector.broadcast %c4_i32 : i32 to vector<8x1xi32>
    %89 = arith.cmpi eq, %6, %88 : vector<8x1xi32>
    %90 = vector.shape_cast %89 : vector<8x1xi1> to vector<8x1xi1>
    %91 = vector.broadcast %90 : vector<8x1xi1> to vector<8x32xi1>
    %92 = arith.select %91, %87, %72 : vector<8x32xi1>, vector<8x32xf32>
    %cst_48 = arith.constant dense<0.000000e+00> : vector<8x32xf32>
    %93 = tpu.matmul %87, %7, %cst_48 {dimension_numbers = #tpu.dot_dimension_numbers<[1], [0], [0], [1], [0, 0, 1, 1], [], []>} : vector<8x32xf32>, vector<32x32xf32>, vector<8x32xf32> -> vector<8x32xf32>
    %94 = vector.broadcast %8 : vector<1x32xf32> to vector<8x32xf32>
    %95 = arith.addf %93, %94 : vector<8x32xf32>
    %cst_49 = arith.constant 0.000000e+00 : f32
    %96 = vector.broadcast %cst_49 : f32 to vector<8x32xf32>
    %97 = arith.maximumf %95, %96 : vector<8x32xf32>
    %cst_50 = arith.constant dense<0.000000e+00> : vector<8x128xf32>
    %98 = tpu.matmul %97, %9, %cst_50 {dimension_numbers = #tpu.dot_dimension_numbers<[1], [0], [0], [1], [0, 0, 1, 1], [], []>} : vector<8x32xf32>, vector<32x128xf32>, vector<8x128xf32> -> vector<8x128xf32>
    %99 = vector.broadcast %10 : vector<1x128xf32> to vector<8x128xf32>
    %100 = arith.addf %98, %99 : vector<8x128xf32>
    %101 = math.tanh %100 : vector<8x128xf32>
    %c4 = arith.constant 4 : index
    %c0_51 = arith.constant 0 : index
    %c0_52 = arith.constant 0 : index
    %102 = vector.load %arg3[%c4, %c0_51, %c0_52] : memref<7x8x4xf32, #tpu.memory_space<vmem>>, vector<1x8x4xf32>
    %103 = vector.shape_cast %102 : vector<1x8x4xf32> to vector<8x4xf32>
    %cst_53 = arith.constant dense<0.000000e+00> : vector<8x128xf32>
    %104 = tpu.matmul %103, %11, %cst_53 {dimension_numbers = #tpu.dot_dimension_numbers<[1], [0], [0], [1], [0, 0, 1, 1], [], []>} : vector<8x4xf32>, vector<4x128xf32>, vector<8x128xf32> -> vector<8x128xf32>
    %105 = arith.mulf %101, %104 : vector<8x128xf32>
    %cst_54 = arith.constant dense<0.000000e+00> : vector<8x32xf32>
    %106 = tpu.matmul %105, %12, %cst_54 {dimension_numbers = #tpu.dot_dimension_numbers<[1], [0], [0], [1], [0, 0, 1, 1], [], []>} : vector<8x128xf32>, vector<128x32xf32>, vector<8x32xf32> -> vector<8x32xf32>
    %107 = arith.addf %87, %106 : vector<8x32xf32>
    %c5_i32 = arith.constant 5 : i32
    %108 = vector.broadcast %c5_i32 : i32 to vector<8x1xi32>
    %109 = arith.cmpi eq, %6, %108 : vector<8x1xi32>
    %110 = vector.shape_cast %109 : vector<8x1xi1> to vector<8x1xi1>
    %111 = vector.broadcast %110 : vector<8x1xi1> to vector<8x32xi1>
    %112 = arith.select %111, %107, %92 : vector<8x32xi1>, vector<8x32xf32>
    %cst_55 = arith.constant dense<0.000000e+00> : vector<8x32xf32>
    %113 = tpu.matmul %107, %7, %cst_55 {dimension_numbers = #tpu.dot_dimension_numbers<[1], [0], [0], [1], [0, 0, 1, 1], [], []>} : vector<8x32xf32>, vector<32x32xf32>, vector<8x32xf32> -> vector<8x32xf32>
    %114 = vector.broadcast %8 : vector<1x32xf32> to vector<8x32xf32>
    %115 = arith.addf %113, %114 : vector<8x32xf32>
    %cst_56 = arith.constant 0.000000e+00 : f32
    %116 = vector.broadcast %cst_56 : f32 to vector<8x32xf32>
    %117 = arith.maximumf %115, %116 : vector<8x32xf32>
    %cst_57 = arith.constant dense<0.000000e+00> : vector<8x128xf32>
    %118 = tpu.matmul %117, %9, %cst_57 {dimension_numbers = #tpu.dot_dimension_numbers<[1], [0], [0], [1], [0, 0, 1, 1], [], []>} : vector<8x32xf32>, vector<32x128xf32>, vector<8x128xf32> -> vector<8x128xf32>
    %119 = vector.broadcast %10 : vector<1x128xf32> to vector<8x128xf32>
    %120 = arith.addf %118, %119 : vector<8x128xf32>
    %121 = math.tanh %120 : vector<8x128xf32>
    %c5 = arith.constant 5 : index
    %c0_58 = arith.constant 0 : index
    %c0_59 = arith.constant 0 : index
    %122 = vector.load %arg3[%c5, %c0_58, %c0_59] : memref<7x8x4xf32, #tpu.memory_space<vmem>>, vector<1x8x4xf32>
    %123 = vector.shape_cast %122 : vector<1x8x4xf32> to vector<8x4xf32>
    %cst_60 = arith.constant dense<0.000000e+00> : vector<8x128xf32>
    %124 = tpu.matmul %123, %11, %cst_60 {dimension_numbers = #tpu.dot_dimension_numbers<[1], [0], [0], [1], [0, 0, 1, 1], [], []>} : vector<8x4xf32>, vector<4x128xf32>, vector<8x128xf32> -> vector<8x128xf32>
    %125 = arith.mulf %121, %124 : vector<8x128xf32>
    %cst_61 = arith.constant dense<0.000000e+00> : vector<8x32xf32>
    %126 = tpu.matmul %125, %12, %cst_61 {dimension_numbers = #tpu.dot_dimension_numbers<[1], [0], [0], [1], [0, 0, 1, 1], [], []>} : vector<8x128xf32>, vector<128x32xf32>, vector<8x32xf32> -> vector<8x32xf32>
    %127 = arith.addf %107, %126 : vector<8x32xf32>
    %c6_i32 = arith.constant 6 : i32
    %128 = vector.broadcast %c6_i32 : i32 to vector<8x1xi32>
    %129 = arith.cmpi eq, %6, %128 : vector<8x1xi32>
    %130 = vector.shape_cast %129 : vector<8x1xi1> to vector<8x1xi1>
    %131 = vector.broadcast %130 : vector<8x1xi1> to vector<8x32xi1>
    %132 = arith.select %131, %127, %112 : vector<8x32xi1>, vector<8x32xf32>
    %cst_62 = arith.constant dense<0.000000e+00> : vector<8x32xf32>
    %133 = tpu.matmul %127, %7, %cst_62 {dimension_numbers = #tpu.dot_dimension_numbers<[1], [0], [0], [1], [0, 0, 1, 1], [], []>} : vector<8x32xf32>, vector<32x32xf32>, vector<8x32xf32> -> vector<8x32xf32>
    %134 = vector.broadcast %8 : vector<1x32xf32> to vector<8x32xf32>
    %135 = arith.addf %133, %134 : vector<8x32xf32>
    %cst_63 = arith.constant 0.000000e+00 : f32
    %136 = vector.broadcast %cst_63 : f32 to vector<8x32xf32>
    %137 = arith.maximumf %135, %136 : vector<8x32xf32>
    %cst_64 = arith.constant dense<0.000000e+00> : vector<8x128xf32>
    %138 = tpu.matmul %137, %9, %cst_64 {dimension_numbers = #tpu.dot_dimension_numbers<[1], [0], [0], [1], [0, 0, 1, 1], [], []>} : vector<8x32xf32>, vector<32x128xf32>, vector<8x128xf32> -> vector<8x128xf32>
    %139 = vector.broadcast %10 : vector<1x128xf32> to vector<8x128xf32>
    %140 = arith.addf %138, %139 : vector<8x128xf32>
    %141 = math.tanh %140 : vector<8x128xf32>
    %c6 = arith.constant 6 : index
    %c0_65 = arith.constant 0 : index
    %c0_66 = arith.constant 0 : index
    %142 = vector.load %arg3[%c6, %c0_65, %c0_66] : memref<7x8x4xf32, #tpu.memory_space<vmem>>, vector<1x8x4xf32>
    %143 = vector.shape_cast %142 : vector<1x8x4xf32> to vector<8x4xf32>
    %cst_67 = arith.constant dense<0.000000e+00> : vector<8x128xf32>
    %144 = tpu.matmul %143, %11, %cst_67 {dimension_numbers = #tpu.dot_dimension_numbers<[1], [0], [0], [1], [0, 0, 1, 1], [], []>} : vector<8x4xf32>, vector<4x128xf32>, vector<8x128xf32> -> vector<8x128xf32>
    %145 = arith.mulf %141, %144 : vector<8x128xf32>
    %cst_68 = arith.constant dense<0.000000e+00> : vector<8x32xf32>
    %146 = tpu.matmul %145, %12, %cst_68 {dimension_numbers = #tpu.dot_dimension_numbers<[1], [0], [0], [1], [0, 0, 1, 1], [], []>} : vector<8x128xf32>, vector<128x32xf32>, vector<8x32xf32> -> vector<8x32xf32>
    %147 = arith.addf %127, %146 : vector<8x32xf32>
    %c7_i32 = arith.constant 7 : i32
    %148 = vector.broadcast %c7_i32 : i32 to vector<8x1xi32>
    %149 = arith.cmpi eq, %6, %148 : vector<8x1xi32>
    %150 = vector.shape_cast %149 : vector<8x1xi1> to vector<8x1xi1>
    %151 = vector.broadcast %150 : vector<8x1xi1> to vector<8x32xi1>
    %152 = arith.select %151, %147, %132 : vector<8x32xi1>, vector<8x32xf32>
    %c0_69 = arith.constant 0 : index
    %c0_70 = arith.constant 0 : index
    %153 = vector.load %arg12[%c0_69, %c0_70] : memref<32x32xf32, #tpu.memory_space<vmem>>, vector<32x32xf32>
    %cst_71 = arith.constant dense<0.000000e+00> : vector<8x32xf32>
    %154 = tpu.matmul %152, %153, %cst_71 {dimension_numbers = #tpu.dot_dimension_numbers<[1], [0], [0], [1], [0, 0, 1, 1], [], []>} : vector<8x32xf32>, vector<32x32xf32>, vector<8x32xf32> -> vector<8x32xf32>
    %c0_72 = arith.constant 0 : index
    %c0_73 = arith.constant 0 : index
    %155 = vector.load %arg13[%c0_72, %c0_73] : memref<1x32xf32, #tpu.memory_space<vmem>>, vector<1x32xf32>
    %156 = vector.broadcast %155 : vector<1x32xf32> to vector<8x32xf32>
    %157 = arith.addf %154, %156 : vector<8x32xf32>
    %c0_74 = arith.constant 0 : index
    %c0_75 = arith.constant 0 : index
    %158 = vector.load %arg14[%c0_74, %c0_75] : memref<32x32xf32, #tpu.memory_space<vmem>>, vector<32x32xf32>
    %c0_76 = arith.constant 0 : index
    %c0_77 = arith.constant 0 : index
    %159 = vector.load %arg15[%c0_76, %c0_77] : memref<1x32xf32, #tpu.memory_space<vmem>>, vector<1x32xf32>
    %c0_78 = arith.constant 0 : index
    %c0_79 = arith.constant 0 : index
    %160 = vector.load %arg16[%c0_78, %c0_79] : memref<32x32xf32, #tpu.memory_space<vmem>>, vector<32x32xf32>
    %c0_80 = arith.constant 0 : index
    %c0_81 = arith.constant 0 : index
    %161 = vector.load %arg17[%c0_80, %c0_81] : memref<1x32xf32, #tpu.memory_space<vmem>>, vector<1x32xf32>
    %c0_82 = arith.constant 0 : index
    %c0_83 = arith.constant 0 : index
    %162 = vector.load %arg18[%c0_82, %c0_83] : memref<32x32xf32, #tpu.memory_space<vmem>>, vector<32x32xf32>
    %c0_84 = arith.constant 0 : index
    %c0_85 = arith.constant 0 : index
    %163 = vector.load %arg19[%c0_84, %c0_85] : memref<32x32xf32, #tpu.memory_space<vmem>>, vector<32x32xf32>
    %c0_86 = arith.constant 0 : index
    %164 = memref.load %arg0[%c0_86] : memref<5xf32, #tpu.memory_space<smem>>
    %cst_87 = arith.constant dense<0.000000e+00> : vector<8x32xf32>
    %165 = tpu.matmul %157, %158, %cst_87 {dimension_numbers = #tpu.dot_dimension_numbers<[1], [0], [0], [1], [0, 0, 1, 1], [], []>} : vector<8x32xf32>, vector<32x32xf32>, vector<8x32xf32> -> vector<8x32xf32>
    %166 = vector.broadcast %159 : vector<1x32xf32> to vector<8x32xf32>
    %167 = arith.addf %165, %166 : vector<8x32xf32>
    %168 = math.tanh %167 : vector<8x32xf32>
    %cst_88 = arith.constant dense<0.000000e+00> : vector<8x32xf32>
    %169 = tpu.matmul %168, %160, %cst_88 {dimension_numbers = #tpu.dot_dimension_numbers<[1], [0], [0], [1], [0, 0, 1, 1], [], []>} : vector<8x32xf32>, vector<32x32xf32>, vector<8x32xf32> -> vector<8x32xf32>
    %170 = vector.broadcast %161 : vector<1x32xf32> to vector<8x32xf32>
    %171 = arith.addf %169, %170 : vector<8x32xf32>
    %172 = math.tanh %171 : vector<8x32xf32>
    %173 = arith.mulf %168, %168 : vector<8x32xf32>
    %cst_89 = arith.constant 1.000000e+00 : f32
    %174 = vector.broadcast %cst_89 : f32 to vector<8x32xf32>
    %175 = arith.subf %174, %173 : vector<8x32xf32>
    %176 = arith.mulf %172, %172 : vector<8x32xf32>
    %cst_90 = arith.constant 1.000000e+00 : f32
    %177 = vector.broadcast %cst_90 : f32 to vector<8x32xf32>
    %178 = arith.subf %177, %176 : vector<8x32xf32>
    %179 = vector.shape_cast %175 : vector<8x32xf32> to vector<8x1x32xf32>
    %180 = vector.shape_cast %163 : vector<32x32xf32> to vector<1x32x32xf32>
    %181 = vector.broadcast %179 : vector<8x1x32xf32> to vector<8x32x32xf32>
    %182 = vector.broadcast %180 : vector<1x32x32xf32> to vector<8x32x32xf32>
    %183 = arith.mulf %181, %182 : vector<8x32x32xf32>
    %184 = vector.shape_cast %178 : vector<8x32xf32> to vector<8x32x1xf32>
    %185 = vector.broadcast %184 : vector<8x32x1xf32> to vector<8x32x32xf32>
    %186 = arith.mulf %183, %185 : vector<8x32x32xf32>
    %187 = vector.shape_cast %186 : vector<8x32x32xf32> to vector<256x32xf32>
    %cst_91 = arith.constant dense<0.000000e+00> : vector<256x32xf32>
    %188 = tpu.matmul %187, %162, %cst_91 {dimension_numbers = #tpu.dot_dimension_numbers<[1], [0], [0], [1], [0, 0, 1, 1], [], []>} : vector<256x32xf32>, vector<32x32xf32>, vector<256x32xf32> -> vector<256x32xf32>
    %189 = arith.mulf %172, %172 : vector<8x32xf32>
    %190 = vector.shape_cast %189 : vector<8x32xf32> to vector<1x8x32xf32>
    %cst_92 = arith.constant dense<0.000000e+00> : vector<1xf32>
    %191 = vector.multi_reduction <add>, %190, %cst_92 [1, 2] : vector<1x8x32xf32> to vector<1xf32>
    %192 = vector.shape_cast %191 : vector<1xf32> to vector<1x1x1xf32>
    %193 = vector.extract %192[0, 0, 0] : f32 from vector<1x1x1xf32>
    %cst_93 = arith.constant 0.00999999977 : f32
    %194 = arith.mulf %cst_93, %193 : f32
    %195 = arith.mulf %188, %188 : vector<256x32xf32>
    %196 = vector.shape_cast %195 : vector<256x32xf32> to vector<1x256x32xf32>
    %cst_94 = arith.constant dense<0.000000e+00> : vector<1xf32>
    %197 = vector.multi_reduction <add>, %196, %cst_94 [1, 2] : vector<1x256x32xf32> to vector<1xf32>
    %198 = vector.shape_cast %197 : vector<1xf32> to vector<1x1x1xf32>
    %199 = vector.extract %198[0, 0, 0] : f32 from vector<1x1x1xf32>
    %cst_95 = arith.constant 0.00999999977 : f32
    %200 = arith.mulf %cst_95, %199 : f32
    %201 = arith.addf %194, %200 : f32
    %202 = arith.mulf %164, %201 : f32
    %cst_96 = arith.constant 8.000000e+00 : f32
    %203 = arith.divf %202, %cst_96 : f32
    %cst_97 = arith.constant 0.000000e+00 : f32
    %204 = arith.addf %cst_97, %203 : f32
    %205 = vector.broadcast %164 : f32 to vector<8x32xf32>
    %206 = arith.mulf %172, %205 : vector<8x32xf32>
    %207 = tpu.concatenate %206, %206, %206, %206, %206, %206, %206, %206, %206, %206, %206, %206, %206, %206, %206, %206, %206, %206, %206, %206, %206, %206, %206, %206, %206, %206, %206, %206, %206, %206, %206, %206 in 1 : vector<8x32xf32>, vector<8x32xf32>, vector<8x32xf32>, vector<8x32xf32>, vector<8x32xf32>, vector<8x32xf32>, vector<8x32xf32>, vector<8x32xf32>, vector<8x32xf32>, vector<8x32xf32>, vector<8x32xf32>, vector<8x32xf32>, vector<8x32xf32>, vector<8x32xf32>, vector<8x32xf32>, vector<8x32xf32>, vector<8x32xf32>, vector<8x32xf32>, vector<8x32xf32>, vector<8x32xf32>, vector<8x32xf32>, vector<8x32xf32>, vector<8x32xf32>, vector<8x32xf32>, vector<8x32xf32>, vector<8x32xf32>, vector<8x32xf32>, vector<8x32xf32>, vector<8x32xf32>, vector<8x32xf32>, vector<8x32xf32>, vector<8x32xf32> -> vector<8x1024xf32>
    %208 = vector.broadcast %164 : f32 to vector<8x32xf32>
    %209 = arith.mulf %172, %208 : vector<8x32xf32>
    %210 = arith.addf %157, %209 : vector<8x32xf32>
    %c1_98 = arith.constant 1 : index
    %211 = memref.load %arg0[%c1_98] : memref<5xf32, #tpu.memory_space<smem>>
    %cst_99 = arith.constant dense<0.000000e+00> : vector<8x32xf32>
    %212 = tpu.matmul %210, %158, %cst_99 {dimension_numbers = #tpu.dot_dimension_numbers<[1], [0], [0], [1], [0, 0, 1, 1], [], []>} : vector<8x32xf32>, vector<32x32xf32>, vector<8x32xf32> -> vector<8x32xf32>
    %213 = vector.broadcast %159 : vector<1x32xf32> to vector<8x32xf32>
    %214 = arith.addf %212, %213 : vector<8x32xf32>
    %215 = math.tanh %214 : vector<8x32xf32>
    %cst_100 = arith.constant dense<0.000000e+00> : vector<8x32xf32>
    %216 = tpu.matmul %215, %160, %cst_100 {dimension_numbers = #tpu.dot_dimension_numbers<[1], [0], [0], [1], [0, 0, 1, 1], [], []>} : vector<8x32xf32>, vector<32x32xf32>, vector<8x32xf32> -> vector<8x32xf32>
    %217 = vector.broadcast %161 : vector<1x32xf32> to vector<8x32xf32>
    %218 = arith.addf %216, %217 : vector<8x32xf32>
    %219 = math.tanh %218 : vector<8x32xf32>
    %220 = arith.mulf %215, %215 : vector<8x32xf32>
    %cst_101 = arith.constant 1.000000e+00 : f32
    %221 = vector.broadcast %cst_101 : f32 to vector<8x32xf32>
    %222 = arith.subf %221, %220 : vector<8x32xf32>
    %223 = arith.mulf %219, %219 : vector<8x32xf32>
    %cst_102 = arith.constant 1.000000e+00 : f32
    %224 = vector.broadcast %cst_102 : f32 to vector<8x32xf32>
    %225 = arith.subf %224, %223 : vector<8x32xf32>
    %226 = vector.shape_cast %222 : vector<8x32xf32> to vector<8x1x32xf32>
    %227 = vector.shape_cast %163 : vector<32x32xf32> to vector<1x32x32xf32>
    %228 = vector.broadcast %226 : vector<8x1x32xf32> to vector<8x32x32xf32>
    %229 = vector.broadcast %227 : vector<1x32x32xf32> to vector<8x32x32xf32>
    %230 = arith.mulf %228, %229 : vector<8x32x32xf32>
    %231 = vector.shape_cast %225 : vector<8x32xf32> to vector<8x32x1xf32>
    %232 = vector.broadcast %231 : vector<8x32x1xf32> to vector<8x32x32xf32>
    %233 = arith.mulf %230, %232 : vector<8x32x32xf32>
    %234 = vector.shape_cast %233 : vector<8x32x32xf32> to vector<256x32xf32>
    %cst_103 = arith.constant dense<0.000000e+00> : vector<256x32xf32>
    %235 = tpu.matmul %234, %162, %cst_103 {dimension_numbers = #tpu.dot_dimension_numbers<[1], [0], [0], [1], [0, 0, 1, 1], [], []>} : vector<256x32xf32>, vector<32x32xf32>, vector<256x32xf32> -> vector<256x32xf32>
    %236 = arith.mulf %219, %219 : vector<8x32xf32>
    %237 = vector.shape_cast %236 : vector<8x32xf32> to vector<1x8x32xf32>
    %cst_104 = arith.constant dense<0.000000e+00> : vector<1xf32>
    %238 = vector.multi_reduction <add>, %237, %cst_104 [1, 2] : vector<1x8x32xf32> to vector<1xf32>
    %239 = vector.shape_cast %238 : vector<1xf32> to vector<1x1x1xf32>
    %240 = vector.extract %239[0, 0, 0] : f32 from vector<1x1x1xf32>
    %cst_105 = arith.constant 0.00999999977 : f32
    %241 = arith.mulf %cst_105, %240 : f32
    %242 = arith.mulf %235, %235 : vector<256x32xf32>
    %243 = vector.shape_cast %242 : vector<256x32xf32> to vector<1x256x32xf32>
    %cst_106 = arith.constant dense<0.000000e+00> : vector<1xf32>
    %244 = vector.multi_reduction <add>, %243, %cst_106 [1, 2] : vector<1x256x32xf32> to vector<1xf32>
    %245 = vector.shape_cast %244 : vector<1xf32> to vector<1x1x1xf32>
    %246 = vector.extract %245[0, 0, 0] : f32 from vector<1x1x1xf32>
    %cst_107 = arith.constant 0.00999999977 : f32
    %247 = arith.mulf %cst_107, %246 : f32
    %248 = arith.addf %241, %247 : f32
    %249 = arith.mulf %211, %248 : f32
    %cst_108 = arith.constant 8.000000e+00 : f32
    %250 = arith.divf %249, %cst_108 : f32
    %251 = arith.addf %204, %250 : f32
    %252 = vector.broadcast %211 : f32 to vector<8x32xf32>
    %253 = arith.mulf %219, %252 : vector<8x32xf32>
    %254 = tpu.concatenate %253, %253, %253, %253, %253, %253, %253, %253, %253, %253, %253, %253, %253, %253, %253, %253, %253, %253, %253, %253, %253, %253, %253, %253, %253, %253, %253, %253, %253, %253, %253, %253 in 1 : vector<8x32xf32>, vector<8x32xf32>, vector<8x32xf32>, vector<8x32xf32>, vector<8x32xf32>, vector<8x32xf32>, vector<8x32xf32>, vector<8x32xf32>, vector<8x32xf32>, vector<8x32xf32>, vector<8x32xf32>, vector<8x32xf32>, vector<8x32xf32>, vector<8x32xf32>, vector<8x32xf32>, vector<8x32xf32>, vector<8x32xf32>, vector<8x32xf32>, vector<8x32xf32>, vector<8x32xf32>, vector<8x32xf32>, vector<8x32xf32>, vector<8x32xf32>, vector<8x32xf32>, vector<8x32xf32>, vector<8x32xf32>, vector<8x32xf32>, vector<8x32xf32>, vector<8x32xf32>, vector<8x32xf32>, vector<8x32xf32>, vector<8x32xf32> -> vector<8x1024xf32>
    %255 = vector.broadcast %211 : f32 to vector<8x32xf32>
    %256 = arith.mulf %219, %255 : vector<8x32xf32>
    %257 = arith.addf %210, %256 : vector<8x32xf32>
    %c2_109 = arith.constant 2 : index
    %258 = memref.load %arg0[%c2_109] : memref<5xf32, #tpu.memory_space<smem>>
    %cst_110 = arith.constant dense<0.000000e+00> : vector<8x32xf32>
    %259 = tpu.matmul %257, %158, %cst_110 {dimension_numbers = #tpu.dot_dimension_numbers<[1], [0], [0], [1], [0, 0, 1, 1], [], []>} : vector<8x32xf32>, vector<32x32xf32>, vector<8x32xf32> -> vector<8x32xf32>
    %260 = vector.broadcast %159 : vector<1x32xf32> to vector<8x32xf32>
    %261 = arith.addf %259, %260 : vector<8x32xf32>
    %262 = math.tanh %261 : vector<8x32xf32>
    %cst_111 = arith.constant dense<0.000000e+00> : vector<8x32xf32>
    %263 = tpu.matmul %262, %160, %cst_111 {dimension_numbers = #tpu.dot_dimension_numbers<[1], [0], [0], [1], [0, 0, 1, 1], [], []>} : vector<8x32xf32>, vector<32x32xf32>, vector<8x32xf32> -> vector<8x32xf32>
    %264 = vector.broadcast %161 : vector<1x32xf32> to vector<8x32xf32>
    %265 = arith.addf %263, %264 : vector<8x32xf32>
    %266 = math.tanh %265 : vector<8x32xf32>
    %267 = arith.mulf %262, %262 : vector<8x32xf32>
    %cst_112 = arith.constant 1.000000e+00 : f32
    %268 = vector.broadcast %cst_112 : f32 to vector<8x32xf32>
    %269 = arith.subf %268, %267 : vector<8x32xf32>
    %270 = arith.mulf %266, %266 : vector<8x32xf32>
    %cst_113 = arith.constant 1.000000e+00 : f32
    %271 = vector.broadcast %cst_113 : f32 to vector<8x32xf32>
    %272 = arith.subf %271, %270 : vector<8x32xf32>
    %273 = vector.shape_cast %269 : vector<8x32xf32> to vector<8x1x32xf32>
    %274 = vector.shape_cast %163 : vector<32x32xf32> to vector<1x32x32xf32>
    %275 = vector.broadcast %273 : vector<8x1x32xf32> to vector<8x32x32xf32>
    %276 = vector.broadcast %274 : vector<1x32x32xf32> to vector<8x32x32xf32>
    %277 = arith.mulf %275, %276 : vector<8x32x32xf32>
    %278 = vector.shape_cast %272 : vector<8x32xf32> to vector<8x32x1xf32>
    %279 = vector.broadcast %278 : vector<8x32x1xf32> to vector<8x32x32xf32>
    %280 = arith.mulf %277, %279 : vector<8x32x32xf32>
    %281 = vector.shape_cast %280 : vector<8x32x32xf32> to vector<256x32xf32>
    %cst_114 = arith.constant dense<0.000000e+00> : vector<256x32xf32>
    %282 = tpu.matmul %281, %162, %cst_114 {dimension_numbers = #tpu.dot_dimension_numbers<[1], [0], [0], [1], [0, 0, 1, 1], [], []>} : vector<256x32xf32>, vector<32x32xf32>, vector<256x32xf32> -> vector<256x32xf32>
    %283 = arith.mulf %266, %266 : vector<8x32xf32>
    %284 = vector.shape_cast %283 : vector<8x32xf32> to vector<1x8x32xf32>
    %cst_115 = arith.constant dense<0.000000e+00> : vector<1xf32>
    %285 = vector.multi_reduction <add>, %284, %cst_115 [1, 2] : vector<1x8x32xf32> to vector<1xf32>
    %286 = vector.shape_cast %285 : vector<1xf32> to vector<1x1x1xf32>
    %287 = vector.extract %286[0, 0, 0] : f32 from vector<1x1x1xf32>
    %cst_116 = arith.constant 0.00999999977 : f32
    %288 = arith.mulf %cst_116, %287 : f32
    %289 = arith.mulf %282, %282 : vector<256x32xf32>
    %290 = vector.shape_cast %289 : vector<256x32xf32> to vector<1x256x32xf32>
    %cst_117 = arith.constant dense<0.000000e+00> : vector<1xf32>
    %291 = vector.multi_reduction <add>, %290, %cst_117 [1, 2] : vector<1x256x32xf32> to vector<1xf32>
    %292 = vector.shape_cast %291 : vector<1xf32> to vector<1x1x1xf32>
    %293 = vector.extract %292[0, 0, 0] : f32 from vector<1x1x1xf32>
    %cst_118 = arith.constant 0.00999999977 : f32
    %294 = arith.mulf %cst_118, %293 : f32
    %295 = arith.addf %288, %294 : f32
    %296 = arith.mulf %258, %295 : f32
    %cst_119 = arith.constant 8.000000e+00 : f32
    %297 = arith.divf %296, %cst_119 : f32
    %298 = arith.addf %251, %297 : f32
    %299 = vector.broadcast %258 : f32 to vector<8x32xf32>
    %300 = arith.mulf %266, %299 : vector<8x32xf32>
    %301 = tpu.concatenate %300, %300, %300, %300, %300, %300, %300, %300, %300, %300, %300, %300, %300, %300, %300, %300, %300, %300, %300, %300, %300, %300, %300, %300, %300, %300, %300, %300, %300, %300, %300, %300 in 1 : vector<8x32xf32>, vector<8x32xf32>, vector<8x32xf32>, vector<8x32xf32>, vector<8x32xf32>, vector<8x32xf32>, vector<8x32xf32>, vector<8x32xf32>, vector<8x32xf32>, vector<8x32xf32>, vector<8x32xf32>, vector<8x32xf32>, vector<8x32xf32>, vector<8x32xf32>, vector<8x32xf32>, vector<8x32xf32>, vector<8x32xf32>, vector<8x32xf32>, vector<8x32xf32>, vector<8x32xf32>, vector<8x32xf32>, vector<8x32xf32>, vector<8x32xf32>, vector<8x32xf32>, vector<8x32xf32>, vector<8x32xf32>, vector<8x32xf32>, vector<8x32xf32>, vector<8x32xf32>, vector<8x32xf32>, vector<8x32xf32>, vector<8x32xf32> -> vector<8x1024xf32>
    %302 = vector.broadcast %258 : f32 to vector<8x32xf32>
    %303 = arith.mulf %266, %302 : vector<8x32xf32>
    %304 = arith.addf %257, %303 : vector<8x32xf32>
    %c3_120 = arith.constant 3 : index
    %305 = memref.load %arg0[%c3_120] : memref<5xf32, #tpu.memory_space<smem>>
    %cst_121 = arith.constant dense<0.000000e+00> : vector<8x32xf32>
    %306 = tpu.matmul %304, %158, %cst_121 {dimension_numbers = #tpu.dot_dimension_numbers<[1], [0], [0], [1], [0, 0, 1, 1], [], []>} : vector<8x32xf32>, vector<32x32xf32>, vector<8x32xf32> -> vector<8x32xf32>
    %307 = vector.broadcast %159 : vector<1x32xf32> to vector<8x32xf32>
    %308 = arith.addf %306, %307 : vector<8x32xf32>
    %309 = math.tanh %308 : vector<8x32xf32>
    %cst_122 = arith.constant dense<0.000000e+00> : vector<8x32xf32>
    %310 = tpu.matmul %309, %160, %cst_122 {dimension_numbers = #tpu.dot_dimension_numbers<[1], [0], [0], [1], [0, 0, 1, 1], [], []>} : vector<8x32xf32>, vector<32x32xf32>, vector<8x32xf32> -> vector<8x32xf32>
    %311 = vector.broadcast %161 : vector<1x32xf32> to vector<8x32xf32>
    %312 = arith.addf %310, %311 : vector<8x32xf32>
    %313 = math.tanh %312 : vector<8x32xf32>
    %314 = arith.mulf %309, %309 : vector<8x32xf32>
    %cst_123 = arith.constant 1.000000e+00 : f32
    %315 = vector.broadcast %cst_123 : f32 to vector<8x32xf32>
    %316 = arith.subf %315, %314 : vector<8x32xf32>
    %317 = arith.mulf %313, %313 : vector<8x32xf32>
    %cst_124 = arith.constant 1.000000e+00 : f32
    %318 = vector.broadcast %cst_124 : f32 to vector<8x32xf32>
    %319 = arith.subf %318, %317 : vector<8x32xf32>
    %320 = vector.shape_cast %316 : vector<8x32xf32> to vector<8x1x32xf32>
    %321 = vector.shape_cast %163 : vector<32x32xf32> to vector<1x32x32xf32>
    %322 = vector.broadcast %320 : vector<8x1x32xf32> to vector<8x32x32xf32>
    %323 = vector.broadcast %321 : vector<1x32x32xf32> to vector<8x32x32xf32>
    %324 = arith.mulf %322, %323 : vector<8x32x32xf32>
    %325 = vector.shape_cast %319 : vector<8x32xf32> to vector<8x32x1xf32>
    %326 = vector.broadcast %325 : vector<8x32x1xf32> to vector<8x32x32xf32>
    %327 = arith.mulf %324, %326 : vector<8x32x32xf32>
    %328 = vector.shape_cast %327 : vector<8x32x32xf32> to vector<256x32xf32>
    %cst_125 = arith.constant dense<0.000000e+00> : vector<256x32xf32>
    %329 = tpu.matmul %328, %162, %cst_125 {dimension_numbers = #tpu.dot_dimension_numbers<[1], [0], [0], [1], [0, 0, 1, 1], [], []>} : vector<256x32xf32>, vector<32x32xf32>, vector<256x32xf32> -> vector<256x32xf32>
    %330 = arith.mulf %313, %313 : vector<8x32xf32>
    %331 = vector.shape_cast %330 : vector<8x32xf32> to vector<1x8x32xf32>
    %cst_126 = arith.constant dense<0.000000e+00> : vector<1xf32>
    %332 = vector.multi_reduction <add>, %331, %cst_126 [1, 2] : vector<1x8x32xf32> to vector<1xf32>
    %333 = vector.shape_cast %332 : vector<1xf32> to vector<1x1x1xf32>
    %334 = vector.extract %333[0, 0, 0] : f32 from vector<1x1x1xf32>
    %cst_127 = arith.constant 0.00999999977 : f32
    %335 = arith.mulf %cst_127, %334 : f32
    %336 = arith.mulf %329, %329 : vector<256x32xf32>
    %337 = vector.shape_cast %336 : vector<256x32xf32> to vector<1x256x32xf32>
    %cst_128 = arith.constant dense<0.000000e+00> : vector<1xf32>
    %338 = vector.multi_reduction <add>, %337, %cst_128 [1, 2] : vector<1x256x32xf32> to vector<1xf32>
    %339 = vector.shape_cast %338 : vector<1xf32> to vector<1x1x1xf32>
    %340 = vector.extract %339[0, 0, 0] : f32 from vector<1x1x1xf32>
    %cst_129 = arith.constant 0.00999999977 : f32
    %341 = arith.mulf %cst_129, %340 : f32
    %342 = arith.addf %335, %341 : f32
    %343 = arith.mulf %305, %342 : f32
    %cst_130 = arith.constant 8.000000e+00 : f32
    %344 = arith.divf %343, %cst_130 : f32
    %345 = arith.addf %298, %344 : f32
    %346 = vector.broadcast %305 : f32 to vector<8x32xf32>
    %347 = arith.mulf %313, %346 : vector<8x32xf32>
    %348 = tpu.concatenate %347, %347, %347, %347, %347, %347, %347, %347, %347, %347, %347, %347, %347, %347, %347, %347, %347, %347, %347, %347, %347, %347, %347, %347, %347, %347, %347, %347, %347, %347, %347, %347 in 1 : vector<8x32xf32>, vector<8x32xf32>, vector<8x32xf32>, vector<8x32xf32>, vector<8x32xf32>, vector<8x32xf32>, vector<8x32xf32>, vector<8x32xf32>, vector<8x32xf32>, vector<8x32xf32>, vector<8x32xf32>, vector<8x32xf32>, vector<8x32xf32>, vector<8x32xf32>, vector<8x32xf32>, vector<8x32xf32>, vector<8x32xf32>, vector<8x32xf32>, vector<8x32xf32>, vector<8x32xf32>, vector<8x32xf32>, vector<8x32xf32>, vector<8x32xf32>, vector<8x32xf32>, vector<8x32xf32>, vector<8x32xf32>, vector<8x32xf32>, vector<8x32xf32>, vector<8x32xf32>, vector<8x32xf32>, vector<8x32xf32>, vector<8x32xf32> -> vector<8x1024xf32>
    %349 = vector.broadcast %305 : f32 to vector<8x32xf32>
    %350 = arith.mulf %313, %349 : vector<8x32xf32>
    %351 = arith.addf %304, %350 : vector<8x32xf32>
    %c4_131 = arith.constant 4 : index
    %352 = memref.load %arg0[%c4_131] : memref<5xf32, #tpu.memory_space<smem>>
    %cst_132 = arith.constant dense<0.000000e+00> : vector<8x32xf32>
    %353 = tpu.matmul %351, %158, %cst_132 {dimension_numbers = #tpu.dot_dimension_numbers<[1], [0], [0], [1], [0, 0, 1, 1], [], []>} : vector<8x32xf32>, vector<32x32xf32>, vector<8x32xf32> -> vector<8x32xf32>
    %354 = vector.broadcast %159 : vector<1x32xf32> to vector<8x32xf32>
    %355 = arith.addf %353, %354 : vector<8x32xf32>
    %356 = math.tanh %355 : vector<8x32xf32>
    %cst_133 = arith.constant dense<0.000000e+00> : vector<8x32xf32>
    %357 = tpu.matmul %356, %160, %cst_133 {dimension_numbers = #tpu.dot_dimension_numbers<[1], [0], [0], [1], [0, 0, 1, 1], [], []>} : vector<8x32xf32>, vector<32x32xf32>, vector<8x32xf32> -> vector<8x32xf32>
    %358 = vector.broadcast %161 : vector<1x32xf32> to vector<8x32xf32>
    %359 = arith.addf %357, %358 : vector<8x32xf32>
    %360 = math.tanh %359 : vector<8x32xf32>
    %361 = arith.mulf %356, %356 : vector<8x32xf32>
    %cst_134 = arith.constant 1.000000e+00 : f32
    %362 = vector.broadcast %cst_134 : f32 to vector<8x32xf32>
    %363 = arith.subf %362, %361 : vector<8x32xf32>
    %364 = arith.mulf %360, %360 : vector<8x32xf32>
    %cst_135 = arith.constant 1.000000e+00 : f32
    %365 = vector.broadcast %cst_135 : f32 to vector<8x32xf32>
    %366 = arith.subf %365, %364 : vector<8x32xf32>
    %367 = vector.shape_cast %363 : vector<8x32xf32> to vector<8x1x32xf32>
    %368 = vector.shape_cast %163 : vector<32x32xf32> to vector<1x32x32xf32>
    %369 = vector.broadcast %367 : vector<8x1x32xf32> to vector<8x32x32xf32>
    %370 = vector.broadcast %368 : vector<1x32x32xf32> to vector<8x32x32xf32>
    %371 = arith.mulf %369, %370 : vector<8x32x32xf32>
    %372 = vector.shape_cast %366 : vector<8x32xf32> to vector<8x32x1xf32>
    %373 = vector.broadcast %372 : vector<8x32x1xf32> to vector<8x32x32xf32>
    %374 = arith.mulf %371, %373 : vector<8x32x32xf32>
    %375 = vector.shape_cast %374 : vector<8x32x32xf32> to vector<256x32xf32>
    %cst_136 = arith.constant dense<0.000000e+00> : vector<256x32xf32>
    %376 = tpu.matmul %375, %162, %cst_136 {dimension_numbers = #tpu.dot_dimension_numbers<[1], [0], [0], [1], [0, 0, 1, 1], [], []>} : vector<256x32xf32>, vector<32x32xf32>, vector<256x32xf32> -> vector<256x32xf32>
    %377 = arith.mulf %360, %360 : vector<8x32xf32>
    %378 = vector.shape_cast %377 : vector<8x32xf32> to vector<1x8x32xf32>
    %cst_137 = arith.constant dense<0.000000e+00> : vector<1xf32>
    %379 = vector.multi_reduction <add>, %378, %cst_137 [1, 2] : vector<1x8x32xf32> to vector<1xf32>
    %380 = vector.shape_cast %379 : vector<1xf32> to vector<1x1x1xf32>
    %381 = vector.extract %380[0, 0, 0] : f32 from vector<1x1x1xf32>
    %cst_138 = arith.constant 0.00999999977 : f32
    %382 = arith.mulf %cst_138, %381 : f32
    %383 = arith.mulf %376, %376 : vector<256x32xf32>
    %384 = vector.shape_cast %383 : vector<256x32xf32> to vector<1x256x32xf32>
    %cst_139 = arith.constant dense<0.000000e+00> : vector<1xf32>
    %385 = vector.multi_reduction <add>, %384, %cst_139 [1, 2] : vector<1x256x32xf32> to vector<1xf32>
    %386 = vector.shape_cast %385 : vector<1xf32> to vector<1x1x1xf32>
    %387 = vector.extract %386[0, 0, 0] : f32 from vector<1x1x1xf32>
    %cst_140 = arith.constant 0.00999999977 : f32
    %388 = arith.mulf %cst_140, %387 : f32
    %389 = arith.addf %382, %388 : f32
    %390 = arith.mulf %352, %389 : f32
    %cst_141 = arith.constant 8.000000e+00 : f32
    %391 = arith.divf %390, %cst_141 : f32
    %392 = arith.addf %345, %391 : f32
    %393 = vector.broadcast %352 : f32 to vector<8x32xf32>
    %394 = arith.mulf %360, %393 : vector<8x32xf32>
    %395 = tpu.concatenate %394, %394, %394, %394, %394, %394, %394, %394, %394, %394, %394, %394, %394, %394, %394, %394, %394, %394, %394, %394, %394, %394, %394, %394, %394, %394, %394, %394, %394, %394, %394, %394 in 1 : vector<8x32xf32>, vector<8x32xf32>, vector<8x32xf32>, vector<8x32xf32>, vector<8x32xf32>, vector<8x32xf32>, vector<8x32xf32>, vector<8x32xf32>, vector<8x32xf32>, vector<8x32xf32>, vector<8x32xf32>, vector<8x32xf32>, vector<8x32xf32>, vector<8x32xf32>, vector<8x32xf32>, vector<8x32xf32>, vector<8x32xf32>, vector<8x32xf32>, vector<8x32xf32>, vector<8x32xf32>, vector<8x32xf32>, vector<8x32xf32>, vector<8x32xf32>, vector<8x32xf32>, vector<8x32xf32>, vector<8x32xf32>, vector<8x32xf32>, vector<8x32xf32>, vector<8x32xf32>, vector<8x32xf32>, vector<8x32xf32>, vector<8x32xf32> -> vector<8x1024xf32>
    %c0_142 = arith.constant 0 : index
    %c0_143 = arith.constant 0 : index
    %396 = vector.load %arg20[%c0_142, %c0_143] : memref<32x1024xf32, #tpu.memory_space<vmem>>, vector<32x1024xf32>
    %c0_144 = arith.constant 0 : index
    %c0_145 = arith.constant 0 : index
    %397 = vector.load %arg21[%c0_144, %c0_145] : memref<1x1024xf32, #tpu.memory_space<vmem>>, vector<1x1024xf32>
    %c0_146 = arith.constant 0 : index
    %c0_147 = arith.constant 0 : index
    %398 = vector.load %arg22[%c0_146, %c0_147] : memref<1024x32xf32, #tpu.memory_space<vmem>>, vector<1024x32xf32>
    %cst_148 = arith.constant dense<0.000000e+00> : vector<8x1024xf32>
    %399 = tpu.matmul %5, %396, %cst_148 {dimension_numbers = #tpu.dot_dimension_numbers<[1], [0], [0], [1], [0, 0, 1, 1], [], []>} : vector<8x32xf32>, vector<32x1024xf32>, vector<8x1024xf32> -> vector<8x1024xf32>
    %400 = vector.broadcast %397 : vector<1x1024xf32> to vector<8x1024xf32>
    %401 = arith.addf %399, %400 : vector<8x1024xf32>
    %402 = math.tanh %401 : vector<8x1024xf32>
    %403 = arith.mulf %402, %207 : vector<8x1024xf32>
    %cst_149 = arith.constant dense<0.000000e+00> : vector<8x32xf32>
    %404 = tpu.matmul %403, %398, %cst_149 {dimension_numbers = #tpu.dot_dimension_numbers<[1], [0], [0], [1], [0, 0, 1, 1], [], []>} : vector<8x1024xf32>, vector<1024x32xf32>, vector<8x32xf32> -> vector<8x32xf32>
    %405 = arith.addf %5, %404 : vector<8x32xf32>
    %cst_150 = arith.constant dense<0.000000e+00> : vector<8x1024xf32>
    %406 = tpu.matmul %405, %396, %cst_150 {dimension_numbers = #tpu.dot_dimension_numbers<[1], [0], [0], [1], [0, 0, 1, 1], [], []>} : vector<8x32xf32>, vector<32x1024xf32>, vector<8x1024xf32> -> vector<8x1024xf32>
    %407 = vector.broadcast %397 : vector<1x1024xf32> to vector<8x1024xf32>
    %408 = arith.addf %406, %407 : vector<8x1024xf32>
    %409 = math.tanh %408 : vector<8x1024xf32>
    %410 = arith.mulf %409, %254 : vector<8x1024xf32>
    %cst_151 = arith.constant dense<0.000000e+00> : vector<8x32xf32>
    %411 = tpu.matmul %410, %398, %cst_151 {dimension_numbers = #tpu.dot_dimension_numbers<[1], [0], [0], [1], [0, 0, 1, 1], [], []>} : vector<8x1024xf32>, vector<1024x32xf32>, vector<8x32xf32> -> vector<8x32xf32>
    %412 = arith.addf %405, %411 : vector<8x32xf32>
    %cst_152 = arith.constant dense<0.000000e+00> : vector<8x1024xf32>
    %413 = tpu.matmul %412, %396, %cst_152 {dimension_numbers = #tpu.dot_dimension_numbers<[1], [0], [0], [1], [0, 0, 1, 1], [], []>} : vector<8x32xf32>, vector<32x1024xf32>, vector<8x1024xf32> -> vector<8x1024xf32>
    %414 = vector.broadcast %397 : vector<1x1024xf32> to vector<8x1024xf32>
    %415 = arith.addf %413, %414 : vector<8x1024xf32>
    %416 = math.tanh %415 : vector<8x1024xf32>
    %417 = arith.mulf %416, %301 : vector<8x1024xf32>
    %cst_153 = arith.constant dense<0.000000e+00> : vector<8x32xf32>
    %418 = tpu.matmul %417, %398, %cst_153 {dimension_numbers = #tpu.dot_dimension_numbers<[1], [0], [0], [1], [0, 0, 1, 1], [], []>} : vector<8x1024xf32>, vector<1024x32xf32>, vector<8x32xf32> -> vector<8x32xf32>
    %419 = arith.addf %412, %418 : vector<8x32xf32>
    %cst_154 = arith.constant dense<0.000000e+00> : vector<8x1024xf32>
    %420 = tpu.matmul %419, %396, %cst_154 {dimension_numbers = #tpu.dot_dimension_numbers<[1], [0], [0], [1], [0, 0, 1, 1], [], []>} : vector<8x32xf32>, vector<32x1024xf32>, vector<8x1024xf32> -> vector<8x1024xf32>
    %421 = vector.broadcast %397 : vector<1x1024xf32> to vector<8x1024xf32>
    %422 = arith.addf %420, %421 : vector<8x1024xf32>
    %423 = math.tanh %422 : vector<8x1024xf32>
    %424 = arith.mulf %423, %348 : vector<8x1024xf32>
    %cst_155 = arith.constant dense<0.000000e+00> : vector<8x32xf32>
    %425 = tpu.matmul %424, %398, %cst_155 {dimension_numbers = #tpu.dot_dimension_numbers<[1], [0], [0], [1], [0, 0, 1, 1], [], []>} : vector<8x1024xf32>, vector<1024x32xf32>, vector<8x32xf32> -> vector<8x32xf32>
    %426 = arith.addf %419, %425 : vector<8x32xf32>
    %cst_156 = arith.constant dense<0.000000e+00> : vector<8x1024xf32>
    %427 = tpu.matmul %426, %396, %cst_156 {dimension_numbers = #tpu.dot_dimension_numbers<[1], [0], [0], [1], [0, 0, 1, 1], [], []>} : vector<8x32xf32>, vector<32x1024xf32>, vector<8x1024xf32> -> vector<8x1024xf32>
    %428 = vector.broadcast %397 : vector<1x1024xf32> to vector<8x1024xf32>
    %429 = arith.addf %427, %428 : vector<8x1024xf32>
    %430 = math.tanh %429 : vector<8x1024xf32>
    %431 = arith.mulf %430, %395 : vector<8x1024xf32>
    %cst_157 = arith.constant dense<0.000000e+00> : vector<8x32xf32>
    %432 = tpu.matmul %431, %398, %cst_157 {dimension_numbers = #tpu.dot_dimension_numbers<[1], [0], [0], [1], [0, 0, 1, 1], [], []>} : vector<8x1024xf32>, vector<1024x32xf32>, vector<8x32xf32> -> vector<8x32xf32>
    %433 = arith.addf %426, %432 : vector<8x32xf32>
    %c0_158 = arith.constant 0 : index
    %c0_159 = arith.constant 0 : index
    %434 = vector.load %arg23[%c0_158, %c0_159] : memref<32x2xf32, #tpu.memory_space<vmem>>, vector<32x2xf32>
    %cst_160 = arith.constant dense<0.000000e+00> : vector<8x2xf32>
    %435 = tpu.matmul %433, %434, %cst_160 {dimension_numbers = #tpu.dot_dimension_numbers<[1], [0], [0], [1], [0, 0, 1, 1], [], []>} : vector<8x32xf32>, vector<32x2xf32>, vector<8x2xf32> -> vector<8x2xf32>
    %c0_161 = arith.constant 0 : index
    %c0_162 = arith.constant 0 : index
    %436 = vector.load %arg24[%c0_161, %c0_162] : memref<1x2xf32, #tpu.memory_space<vmem>>, vector<1x2xf32>
    %437 = vector.broadcast %436 : vector<1x2xf32> to vector<8x2xf32>
    %438 = arith.addf %435, %437 : vector<8x2xf32>
    %c0_163 = arith.constant 0 : index
    %c0_164 = arith.constant 0 : index
    %439 = vector.load %arg25[%c0_163, %c0_164] : memref<8x2xf32, #tpu.memory_space<vmem>>, vector<8x2xf32>
    tpu.vector_store %arg25[%c0_163, %c0_164], %438 {strides = array<i32>} : memref<8x2xf32, #tpu.memory_space<vmem>>, vector<8x2xf32>,
    %440 = vector.broadcast %392 : f32 to vector<1x1xf32>
    %c0_165 = arith.constant 0 : index
    %c0_166 = arith.constant 0 : index
    %441 = vector.load %arg26[%c0_165, %c0_166] : memref<1x1xf32, #tpu.memory_space<vmem>>, vector<1x1xf32>
    tpu.vector_store %arg26[%c0_165, %c0_166], %440 {strides = array<i32>} : memref<1x1xf32, #tpu.memory_space<vmem>>, vector<1x1xf32>,
    return
  }
}

</mosaic_0001>

<bundles_post_ra>
// kernel: tpu_custom_call.1
= control target key start
LH: loop header
LB: loop body
LE: loop exit
PB: predicated region body
PF: predicated region fallthrough
CT: control target
= control target key end

     0   :  { %s16871_s0 = inlined_call_operand.vmem [shape: f32[5], index: 0, kind: input, shape index: {}]   ;;  %s16872_s1 = inlined_call_operand.vmem [shape: s32[8,1], index: 1, kind: input, shape index: {}]   ;;  %s16873_s2 = inlined_call_operand.vmem [shape: f32[8,4], index: 2, kind: input, shape index: {}]   ;;  %s16874_s3 = inlined_call_operand.vmem [shape: f32[7,8,4], index: 3, kind: input, shape index: {}]   ;;  %s16875_s4 = inlined_call_operand.vmem [shape: f32[4,32], index: 4, kind: input, shape index: {}]   ;;  %s16876_s5 = inlined_call_operand.vmem [shape: f32[1,32], index: 5, kind: input, shape index: {}]   ;;  %s16877_s6 = inlined_call_operand.vmem [shape: f32[32,32], index: 6, kind: input, shape index: {}]   ;;  %s16878_s7 = inlined_call_operand.vmem [shape: f32[1,32], index: 7, kind: input, shape index: {}]   ;;  %s16879_s8 = inlined_call_operand.vmem [shape: f32[32,128], index: 8, kind: input, shape index: {}]   ;;  %s16880_s9 = inlined_call_operand.vmem [shape: f32[1,128], index: 9, kind: input, shape index: {}]   ;;  %s16881_s10 = inlined_call_operand.vmem [shape: f32[4,128], index: 10, kind: input, shape index: {}]   ;;  %s16882_s11 = inlined_call_operand.vmem [shape: f32[128,32], index: 11, kind: input, shape index: {}]   ;;  %s16883_s12 = inlined_call_operand.vmem [shape: f32[32,32], index: 12, kind: input, shape index: {}]   ;;  %s16884_s13 = inlined_call_operand.vmem [shape: f32[1,32], index: 13, kind: input, shape index: {}]   ;;  %s16885_s14 = inlined_call_operand.vmem [shape: f32[32,32], index: 14, kind: input, shape index: {}]   ;;  %s16886_s15 = inlined_call_operand.vmem [shape: f32[1,32], index: 15, kind: input, shape index: {}]   ;;  %s16887_s16 = inlined_call_operand.vmem [shape: f32[32,32], index: 16, kind: input, shape index: {}]   ;;  %s16888_s17 = inlined_call_operand.vmem [shape: f32[1,32], index: 17, kind: input, shape index: {}]   ;;  %s16889_s18 = inlined_call_operand.vmem [shape: f32[32,32], index: 18, kind: input, shape index: {}]   ;;  %s16890_s19 = inlined_call_operand.vmem [shape: f32[32,32], index: 19, kind: input, shape index: {}]   ;;  %s16891_s20 = inlined_call_operand.vmem [shape: f32[32,1024], index: 20, kind: input, shape index: {}]   ;;  %s16892_s21 = inlined_call_operand.vmem [shape: f32[1,1024], index: 21, kind: input, shape index: {}]   ;;  %s16893_s22 = inlined_call_operand.vmem [shape: f32[1024,32], index: 22, kind: input, shape index: {}]   ;;  %s16894_s23 = inlined_call_operand.vmem [shape: f32[32,2], index: 23, kind: input, shape index: {}]   ;;  %s16895_s24 = inlined_call_operand.vmem [shape: f32[1,2], index: 24, kind: input, shape index: {}]   ;;  %s16896_s25 = inlined_call_operand.vmem [shape: f32[8,2], index: 25, kind: output, shape index: {0}]   ;;  %s16897_s26 = inlined_call_operand.hbm [shape: f32[1,1], index: 26, kind: output, shape index: {1}]  }
   0x1   :  { %17046 = sst [smem:[#allocation80_spill]] %s16871_s0 }
   0x2   :  { %17047 = sst [smem:[#allocation81_spill]] %s16872_s1 }
   0x3   :  { %17048 = sst [smem:[#allocation82_spill]] %s16873_s2 }
   0x4   :  { %17049 = sst [smem:[#allocation83_spill]] %s16874_s3 }
   0x5   :  { %17050 = sst [smem:[#allocation84_spill]] %s16875_s4 }
   0x6   :  { %17051 = sst [smem:[#allocation85_spill]] %s16876_s5 }
   0x7   :  { %17052 = sst [smem:[#allocation86_spill]] %s16877_s6 }
   0x8   :  { %17053 = sst [smem:[#allocation87_spill]] %s16878_s7 }
   0x9   :  { %17054 = sst [smem:[#allocation88_spill]] %s16879_s8 }
   0xa   :  { %17055 = sst [smem:[#allocation89_spill]] %s16880_s9 }
   0xb   :  { %17056 = sst [smem:[#allocation90_spill]] %s16881_s10 }
   0xc   :  { %17057 = sst [smem:[#allocation91_spill]] %s16894_s23 }
   0xd   :  { %17058 = sst [smem:[#allocation92_spill]] %s16895_s24 }
   0xe   :  { %17059 = sst [smem:[#allocation93_spill]] %s16896_s25 }
   0xf   :  { %17060 = sst [smem:[#allocation94_spill]] %s16897_s26 }
  0x10   :  { %32 = vsyncpa [#allocation4], 0 }
  0x11   :  { %33 = vsyncpa [#allocation3], 0  ;;  %s17061_s7 = sld [smem:[#allocation80_spill]] }
  0x17   :  { %s40_s28 = sshll.u32 %s17061_s7, 4  ;;  %s41_s28 = int_to_ptr.vmem [resolvable:$true] %s40_s28 }
  0x18   :  { %s13829_s8 = scalar_lea.vmem %s41_s28, 16  ;;  %p13834_p1 = scmp.lt.s32.totalorder %s41_s28, %s41_s28 }
  0x19   :  { %p13830_p0 = scmp.ne.s32.totalorder %s41_s28, %s13829_s8  ;;  %p13835_p2 = scmp.lt.s32.totalorder %s13829_s8, %s13829_s8 }
  0x1b   :  { %p13836_p3 = por %p13835_p2, %p13834_p1 }
  0x1d   :  { %p13837_p4 = pnand %p13836_p3, %p13830_p0 }
  0x1f   :  { %13840 = shalt.err (!%p13837_p4)
}
  0x20   :  { %s13867_s4 = smov [#allocation2]  }
  0x21   :  { %43 = dma.vmem_to_smem %s41_s28, 16, %s13867_s4, [#allocation4]  }
  0x22   :  { %13863 = dma.done.wait [#allocation4], 16  }
  0x23   :  { %13864 = vsyncadd [#allocation4], 4294967280 }
  0x24   :  { %95 = sfence }
  0x25   :  { %s17062_s9 = sld [smem:[#allocation84_spill]]  ;;  %vm109_vm0 = vcmask 1043456   ;;  %s17063_s5 = sld [smem:[#allocation82_spill]]  ;;  %v16903_v2 = vmov 0.0   ;;  %vm13869_vm1 = vmmov 0   ;;  %vm105_vm2 = vcmask 31744  }
  0x26   :  { %11656 = vmatprep.subr.mxu1 %v16903_v2  ;;  %11658 = vmatprep.mubr.msk.f32.mxu1 %vm13869_vm1, %v16903_v2  ;;  %s17064_s1 = sld [smem:[#allocation86_spill]]  ;;  %v16901_v6 = vmov 0.0|0.0   ;;  %s17066_s6 = sld [smem:[#allocation85_spill]]  ;;  %vm217_vm3 = vcmask 261120   ;;  %v195_v23 = vld [vmem:[%s16882_s11] sm:$0xff]  ;;  %v196_v24 = vld [vmem:[%s16882_s11 + $0x8] sm:$0xff] }
  0x27   :  { %12513 = vmatprep.subr.bf16.mxu0 %v16901_v6  ;;  %11680 = vmatprep.mubr.msk.f32.mxu0 %vm13869_vm1, %v16903_v2  ;;  %s17068_s4 = sld [smem:[#allocation90_spill]]  ;;  %s17069_s30 = sld [smem:[#allocation83_spill]]  ;;  %v14111_v28 = vpack.c.bf16 %v196_v24, %v195_v23  ;;  %v197_v30 = vld [vmem:[%s16882_s11 + $0x10] sm:$0xff]  ;;  %v198_v31 = vld [vmem:[%s16882_s11 + $0x18] sm:$0xff]  ;;  %v199_v33 = vld [vmem:[%s16882_s11 + $0x20] sm:$0xff]  ;;  %v13871_v54 = vmov 0  }
  0x28   :  { %v14121_v32 = vpack.c.bf16 %v198_v31, %v197_v30  ;;  %v200_v34 = vld [vmem:[%s16882_s11 + $0x28] sm:$0xff]  ;;  %v201_v36 = vld [vmem:[%s16882_s11 + $0x30] sm:$0xff]  ;;  %v202_v37 = vld [vmem:[%s16882_s11 + $0x38] sm:$0xff]  ;;  %s17071_s28 = sld [smem:[#allocation81_spill]]  ;;  %13701 = vset.pattern.permute.xlu0 %v13871_v54  ;;  %13702 = vset.pattern.permute.xlu1 %v13871_v54  ;;  %s14817_s2 = sld [smem:[#allocation2 + $0x1]] }
  0x29   :  { %v14133_v35 = vpack.c.bf16 %v200_v34, %v199_v33  ;;  %v14143_v38 = vpack.c.bf16 %v202_v37, %v201_v36  ;;  %v203_v39 = vld [vmem:[%s16882_s11 + $0x40] sm:$0xff]  ;;  %v204_v40 = vld [vmem:[%s16882_s11 + $0x48] sm:$0xff]  ;;  %v205_v42 = vld [vmem:[%s16882_s11 + $0x50] sm:$0xff]  ;;  %s15162_s8 = sld [smem:[#allocation2 + $0x3]] }
  0x2a   :  { %v14154_v41 = vpack.c.bf16 %v204_v40, %v203_v39  ;;  %v206_v43 = vld [vmem:[%s16882_s11 + $0x58] sm:$0xff]  ;;  %v207_v45 = vld [vmem:[%s16882_s11 + $0x60] sm:$0xff]  ;;  %v208_v46 = vld [vmem:[%s16882_s11 + $0x68] sm:$0xff] }
  0x2b   :  { %v97_v0 = vld [vmem:[%s17062_s9] sm:$0xf]  ;;  %s17065_s9 = sld [smem:[#allocation88_spill]]  ;;  %v14164_v44 = vpack.c.bf16 %v206_v43, %v205_v42  ;;  %v14173_v49 = vpack.c.bf16 %v208_v46, %v207_v45  ;;  %v209_v50 = vld [vmem:[%s16882_s11 + $0x70] sm:$0xff]  ;;  %v210_v51 = vld [vmem:[%s16882_s11 + $0x78] sm:$0xff] }
  0x2c   :  { %v96_v1 = vld [vmem:[%s17063_s5] sm:$0xff]  ;;  %v185_v4 = vld [vmem:[%s17064_s1 + $0x8] sm:$0xff]  ;;  %11657 = vmatpush3.msk.msra.mxu1 %vm109_vm0, %v97_v0  ;;  %v186_v7 = vld [vmem:[%s17064_s1 + $0x10] sm:$0xff]  ;;  %s17070_s5 = sld [smem:[#allocation87_spill]]  ;;  %v14184_v52 = vpack.c.bf16 %v210_v51, %v209_v50 }
  0x2d   :  { %v184_v3 = vld [vmem:[%s17064_s1] sm:$0xff]  ;;  %11659 = vmatmul.mubr.msk.f32.vlgmr.msra.gmra.mrb[0].mxu1 %vm105_vm2, %v96_v1  ;;  %12507 = vmatprep.subr.bf16.mxu1 %v16901_v6  ;;  %v187_v8 = vld [vmem:[%s17064_s1 + $0x18] sm:$0xff]  ;;  %v10288_v31 = vld [vmem:[%s17069_s30 + $0x10] sm:$0xff]  ;;  %s14985_s1 = sld [smem:[#allocation2 + $0x2]] }
  0x2e   :  { %v14031_v5 = vpack.c.bf16 %v185_v4, %v184_v3  ;;  %11669 = vmatprep.mubr.msk.f32.mxu1 %vm13869_vm1, %v16903_v2  ;;  %v14048_v9 = vpack.c.bf16 %v187_v8, %v186_v7  ;;  %v10272_v13 = vld [vmem:[%s17066_s6] ss:$0 sm:$0xff]  ;;  %v10283_v8 = vld [vmem:[%s17069_s30 + $0x8] sm:$0xff]  ;;  %s13875_s6 = smov 96  }
  0x2f   :  { %v14084_v20 = vld [vmem:[%s17068_s4] sm:$0xf]  ;;  %s17072_s4 = sld [smem:[#allocation89_spill]] }
  0x30   :  { %12509 = vmatpush3.bf16.msra.mxu1 %v14031_v5  ;;  %v372_v21 = vld [vmem:[%s17069_s30] sm:$0xff] }
  0x31   :  { %12510 = vmatprep.subr.bf16.mxu1 %v16901_v6  ;;  %v189_v10 = vld [vmem:[%s17065_s9] sm:$0xff]  ;;  %v190_v11 = vld [vmem:[%s17065_s9 + $0x8] sm:$0xff]  ;;  %v191_v17 = vld [vmem:[%s17065_s9 + $0x10] sm:$0xff] }
  0x32   :  { %v14058_v12 = vpack.c.bf16 %v190_v11, %v189_v10  ;;  %v192_v18 = vld [vmem:[%s17065_s9 + $0x18] sm:$0xff]  ;;  %v14102_v22 = vld [vmem:[%s17070_s5] ss:$0 sm:$0xff]  ;;  %s13873_s9 = smov 64   ;;  %s13874_s5 = smov 32  }
  0x33   :  { %v14077_v19 = vpack.c.bf16 %v192_v18, %v191_v17  ;;  %v14191_v53 = vld [vmem:[%s17071_s28] sm:$0xff] }
  0x34   :  { %12512 = vmatpush3.bf16.msra.mxu1 %v14048_v9  ;;  %12515 = vmatpush3.bf16.msra.mxu0 %v14058_v12  ;;  %vm521_vm4 = vcmp.eq.s32.totalorder %v14191_v53, 1  ;;  %vm823_vm5 = vcmp.eq.s32.totalorder %v14191_v53, 2  ;;  %vm1125_vm6 = vcmp.eq.s32.totalorder %v14191_v53, 3  ;;  %vm1427_vm7 = vcmp.eq.s32.totalorder %v14191_v53, 4 }
  0x35   :  { %11683 = vmatprep.subr.mxu1 %v16903_v2  ;;  %12516 = vmatprep.subr.bf16.mxu0 %v16901_v6  ;;  %v522_v55 = vsel %vm521_vm4, 1, %v13871_v54  ;;  %v14200_v56 = vld [vmem:[%s17072_s4] ss:$0 sm:$0xff]  ;;  %v824_v10 = vsel %vm823_vm5, 1, %v13871_v54  ;;  %v1126_v33 = vsel %vm1125_vm6, 1, %v13871_v54  ;;  %vm1729_vm8 = vcmp.eq.s32.totalorder %v14191_v53, 5 }
  0x36   :  { %524 = vperm.xlu0 %13701, %v522_v55   ;;  %1128 = vperm.xlu1 %13702, %v1126_v33   ;;  %vm2031_vm9 = vcmp.eq.s32.totalorder %v14191_v53, 6  ;;  %vm2333_vm10 = vcmp.eq.s32.totalorder %v14191_v53, 7  ;;  %v2342_v53 = vld [vmem:[%s16883_s12 + $0x10] sm:$0xff]  ;;  %vm3369_vm4 = vcmask 523264   ;;  %vm3371_vm5 = vcmask 785408  }
  0x37   :  { %vm10251_vm6 = vcmask 0  }
  0x38   :  { %12518 = vmatpush3.bf16.msra.mxu0 %v14077_v19 }
  0x39   :  { %12519 = vmatprep.subr.bf16.mxu0 %v16901_v6 }
  0x3a   :  { %826 = vperm.xlu0 %13701, %v824_v10  }
 0x100   :  { %v179_v14 = vpop.f32.mrb[0].mxu1 }
 0x101   :  { %v14065_v15 = vadd.f32 %v10272_v13, %v179_v14  ;;  %v11660_v16 = vpop.f32.mrb[1].mxu1 }
 0x103   :  { %17067 = vst [vmem:[#allocation8_spill] sm:$0xff] %v14065_v15  ;;  %11670 = vmatmul.mubr.msk.f32.vlgmr.msra.gmra.mrb[2].mxu1 %vm217_vm3, %v14065_v15 }
 0x104   :  { %11685 = vmatprep.mubr.msk.f32.mxu1 %vm13869_vm1, %v16903_v2  ;;  %11684 = vmatpush3.msk.msra.mxu1 %vm109_vm0, %v14084_v20 }
 0x105   :  { %12543 = vmatprep.subr.bf16.mxu1 %v16901_v6 }
 0x107   :  { %11686 = vmatmul.mubr.msk.f32.vlgmr.msra.gmra.mrb[4].mxu1 %vm105_vm2, %v372_v21 }
 0x108   :  { %12545 = vmatpush3.bf16.msra.mxu1 %v14031_v5  ;;  %11731 = vmatprep.mubr.msk.f32.mxu1 %vm13869_vm1, %v16903_v2 }
 0x109   :  { %12546 = vmatprep.subr.bf16.mxu1 %v16901_v6 }
 0x10c   :  { %12548 = vmatpush3.bf16.msra.mxu1 %v14048_v9 }
 0x10d   :  { %12549 = vmatprep.subr.bf16.mxu1 %v16901_v6 }
 0x1d6   :  { %v287_v25 = vpop.f32.mrb[2].mxu1 }
 0x1d7   :  { %v288_v26 = vadd.f32 %v14102_v22, %v287_v25  ;;  %v11671_v27 = vpop.f32.mrb[3].mxu1 }
 0x1d9   :  { %v291_v29 = vmax.f32 %v288_v26, 0.0 }
 0x1da   :  { %v445_v47 = vpop.f32.mrb[4].mxu1 }
 0x1db   :  { %11681 = vmatmul.mubr.msk.f32.vlgmr.msra.gmra.mrb[0].mxu0 %vm217_vm3, %v291_v29  ;;  %v11687_v48 = vpop.f32.mrb[5].mxu1 }
 0x1dc   :  { %12521 = vmatpush3.bf16.msra.mxu0 %v14111_v28  ;;  %11720 = vmatprep.mubr.msk.f32.mxu0 %vm13869_vm1, %v16903_v2 }
 0x1dd   :  { %12522 = vmatprep.subr.bf16.mxu0 %v16901_v6 }
 0x1e0   :  { %12524 = vmatpush3.bf16.msra.mxu0 %v14121_v32 }
 0x1e1   :  { %12525 = vmatprep.subr.bf16.mxu0 %v16901_v6 }
 0x1e4   :  { %12527 = vmatpush3.bf16.msra.mxu0 %v14133_v35 }
 0x1e5   :  { %12528 = vmatprep.subr.bf16.mxu0 %v16901_v6 }
 0x1e8   :  { %12530 = vmatpush3.bf16.msra.mxu0 %v14143_v38 }
 0x1e9   :  { %12531 = vmatprep.subr.bf16.mxu0 %v16901_v6 }
 0x1ec   :  { %12533 = vmatpush3.bf16.msra.mxu0 %v14154_v41 }
 0x1ed   :  { %12534 = vmatprep.subr.bf16.mxu0 %v16901_v6 }
 0x1f0   :  { %12536 = vmatpush3.bf16.msra.mxu0 %v14164_v44 }
 0x1f1   :  { %12537 = vmatprep.subr.bf16.mxu0 %v16901_v6 }
 0x1f4   :  { %12539 = vmatpush3.bf16.msra.mxu0 %v14173_v49 }
 0x1f5   :  { %12540 = vmatprep.subr.bf16.mxu0 %v16901_v6 }
 0x1f8   :  { %12542 = vmatpush3.bf16.msra.mxu0 %v14184_v52 }
 0x1f9   :  { %12579 = vmatprep.subr.bf16.mxu0 %v16901_v6 }
 0x2ae   :  { %v367_v57 = vpop.f32.mrb[0].mxu0 }
 0x2af   :  { %v368_v58 = vadd.f32 %v14200_v56, %v367_v57  ;;  %v11682_v59 = vpop.f32.mrb[1].mxu0  ;;  %v10293_v57 = vld [vmem:[%s17069_s30 + $0x18] sm:$0xff] }
 0x2b1   :  { %13703 = vtanh.f32 %v368_v58  ;;  %v1428_v58 = vsel %vm1427_vm7, 1, %v13871_v54 }
 0x2b2   :  { %1430 = vperm.xlu1 %13702, %v1428_v58  }
 0x2bb   :  { %v13704_v60 = vpop.eup %13703 }
 0x2bc   :  { %v449_v61 = vmul.f32 %v13704_v60, %v445_v47 }
 0x2be   :  { %11721 = vmatmul.mubr.f32.vlgmr.msra.gmra.mrb[2].mxu0 %v449_v61 }
 0x2bf   :  { %12581 = vmatpush3.bf16.msra.mxu0 %v14031_v5  ;;  %11793 = vmatprep.mubr.msk.f32.mxu0 %vm13869_vm1, %v16903_v2 }
 0x2c0   :  { %12582 = vmatprep.subr.bf16.mxu0 %v16901_v6 }
 0x2c3   :  { %12584 = vmatpush3.bf16.msra.mxu0 %v14048_v9 }
 0x2c4   :  { %12585 = vmatprep.subr.bf16.mxu0 %v16901_v6 }
 0x391   :  { %v516_v62 = vpop.f32.mrb[2].mxu0 }
 0x392   :  { %v14210_v63 = vadd.f32 %v516_v62, %v14065_v15  ;;  %v11722_v0 = vpop.f32.mrb[3].mxu0 }
 0x394   :  { %11732 = vmatmul.mubr.msk.f32.vlgmr.msra.gmra.mrb[6].mxu1 %vm217_vm3, %v14210_v63 }
 0x395   :  { %12551 = vmatpush3.bf16.msra.mxu1 %v14058_v12  ;;  %11742 = vmatprep.mubr.msk.f32.mxu1 %vm13869_vm1, %v16903_v2 }
 0x396   :  { %12552 = vmatprep.subr.bf16.mxu1 %v16901_v6 }
 0x399   :  { %12554 = vmatpush3.bf16.msra.mxu1 %v14077_v19 }
 0x39a   :  { %11745 = vmatprep.subr.mxu1 %v16903_v2 }
 0x467   :  { %v597_v1 = vpop.f32.mrb[6].mxu1 }
 0x468   :  { %v598_v3 = vadd.f32 %v14102_v22, %v597_v1  ;;  %v11733_v4 = vpop.f32.mrb[7].mxu1 }
 0x46a   :  { %v601_v7 = vmax.f32 %v598_v3, 0.0 }
 0x46c   :  { %11743 = vmatmul.mubr.msk.f32.vlgmr.msra.gmra.mrb[8].mxu1 %vm217_vm3, %v601_v7 }
 0x46d   :  { %11746 = vmatpush3.msk.msra.mxu1 %vm109_vm0, %v14084_v20  ;;  %11747 = vmatprep.mubr.msk.f32.mxu1 %vm13869_vm1, %v16903_v2 }
 0x46e   :  { %12555 = vmatprep.subr.bf16.mxu1 %v16901_v6 }
 0x470   :  { %11748 = vmatmul.mubr.msk.f32.vlgmr.msra.gmra.mrb[10].mxu1 %vm105_vm2, %v10283_v8 }
 0x471   :  { %12557 = vmatpush3.bf16.msra.mxu1 %v14111_v28  ;;  %11782 = vmatprep.mubr.msk.f32.mxu1 %vm13869_vm1, %v16903_v2 }
 0x472   :  { %12558 = vmatprep.subr.bf16.mxu1 %v16901_v6 }
 0x475   :  { %12560 = vmatpush3.bf16.msra.mxu1 %v14121_v32 }
 0x476   :  { %12561 = vmatprep.subr.bf16.mxu1 %v16901_v6 }
 0x479   :  { %12563 = vmatpush3.bf16.msra.mxu1 %v14133_v35 }
 0x47a   :  { %12564 = vmatprep.subr.bf16.mxu1 %v16901_v6 }
 0x47d   :  { %12566 = vmatpush3.bf16.msra.mxu1 %v14143_v38 }
 0x47e   :  { %12567 = vmatprep.subr.bf16.mxu1 %v16901_v6 }
 0x481   :  { %12569 = vmatpush3.bf16.msra.mxu1 %v14154_v41 }
 0x482   :  { %12570 = vmatprep.subr.bf16.mxu1 %v16901_v6 }
 0x485   :  { %12572 = vmatpush3.bf16.msra.mxu1 %v14164_v44 }
 0x486   :  { %12573 = vmatprep.subr.bf16.mxu1 %v16901_v6 }
 0x489   :  { %12575 = vmatpush3.bf16.msra.mxu1 %v14173_v49 }
 0x48a   :  { %12576 = vmatprep.subr.bf16.mxu1 %v16901_v6 }
 0x48d   :  { %12578 = vmatpush3.bf16.msra.mxu1 %v14184_v52 }
 0x48e   :  { %12615 = vmatprep.subr.bf16.mxu1 %v16901_v6 }
 0x53f   :  { %v671_v11 = vpop.f32.mrb[8].mxu1 }
 0x540   :  { %v672_v13 = vadd.f32 %v14200_v56, %v671_v11  ;;  %v11744_v14 = vpop.f32.mrb[9].mxu1 }
 0x542   :  { %13705 = vtanh.f32 %v672_v13 }
 0x543   :  { %v747_v16 = vpop.f32.mrb[10].mxu1 }
 0x544   :  { %v11749_v17 = vpop.f32.mrb[11].mxu1 }
 0x545   :  { %v1730_v17 = vsel %vm1729_vm8, 1, %v13871_v54 }
 0x546   :  { %1732 = vperm.xlu0 %13701, %v1730_v17  }
 0x54c   :  { %v13706_v18 = vpop.eup %13705 }
 0x54d   :  { %v751_v21 = vmul.f32 %v13706_v18, %v747_v16  ;;  %v10298_v16 = vld [vmem:[%s17069_s30 + $0x20] sm:$0xff] }
 0x54f   :  { %11783 = vmatmul.mubr.f32.vlgmr.msra.gmra.mrb[12].mxu1 %v751_v21 }
 0x550   :  { %12617 = vmatpush3.bf16.msra.mxu1 %v14031_v5  ;;  %11855 = vmatprep.mubr.msk.f32.mxu1 %vm13869_vm1, %v16903_v2 }
 0x551   :  { %12618 = vmatprep.subr.bf16.mxu1 %v16901_v6 }
 0x554   :  { %12620 = vmatpush3.bf16.msra.mxu1 %v14048_v9 }
 0x555   :  { %12621 = vmatprep.subr.bf16.mxu1 %v16901_v6 }
 0x622   :  { %v818_v23 = vpop.f32.mrb[12].mxu1 }
 0x623   :  { %v14259_v24 = vadd.f32 %v818_v23, %v14210_v63  ;;  %v11784_v25 = vpop.f32.mrb[13].mxu1 }
 0x625   :  { %11794 = vmatmul.mubr.msk.f32.vlgmr.msra.gmra.mrb[4].mxu0 %vm217_vm3, %v14259_v24 }
 0x626   :  { %12587 = vmatpush3.bf16.msra.mxu0 %v14058_v12  ;;  %11804 = vmatprep.mubr.msk.f32.mxu0 %vm13869_vm1, %v16903_v2 }
 0x627   :  { %12588 = vmatprep.subr.bf16.mxu0 %v16901_v6 }
 0x62a   :  { %12590 = vmatpush3.bf16.msra.mxu0 %v14077_v19 }
 0x62b   :  { %11807 = vmatprep.subr.mxu0 %v16903_v2 }
 0x6f8   :  { %v899_v26 = vpop.f32.mrb[4].mxu0 }
 0x6f9   :  { %v900_v27 = vadd.f32 %v14102_v22, %v899_v26  ;;  %v11795_v29 = vpop.f32.mrb[5].mxu0 }
 0x6fb   :  { %v903_v30 = vmax.f32 %v900_v27, 0.0 }
 0x6fd   :  { %11805 = vmatmul.mubr.msk.f32.vlgmr.msra.gmra.mrb[6].mxu0 %vm217_vm3, %v903_v30 }
 0x6fe   :  { %11808 = vmatpush3.msk.msra.mxu0 %vm109_vm0, %v14084_v20  ;;  %11809 = vmatprep.mubr.msk.f32.mxu0 %vm13869_vm1, %v16903_v2 }
 0x6ff   :  { %12591 = vmatprep.subr.bf16.mxu0 %v16901_v6 }
 0x701   :  { %11810 = vmatmul.mubr.msk.f32.vlgmr.msra.gmra.mrb[8].mxu0 %vm105_vm2, %v10288_v31 }
 0x702   :  { %12593 = vmatpush3.bf16.msra.mxu0 %v14111_v28  ;;  %11844 = vmatprep.mubr.msk.f32.mxu0 %vm13869_vm1, %v16903_v2 }
 0x703   :  { %12594 = vmatprep.subr.bf16.mxu0 %v16901_v6 }
 0x706   :  { %12596 = vmatpush3.bf16.msra.mxu0 %v14121_v32 }
 0x707   :  { %12597 = vmatprep.subr.bf16.mxu0 %v16901_v6 }
 0x70a   :  { %12599 = vmatpush3.bf16.msra.mxu0 %v14133_v35 }
 0x70b   :  { %12600 = vmatprep.subr.bf16.mxu0 %v16901_v6 }
 0x70e   :  { %12602 = vmatpush3.bf16.msra.mxu0 %v14143_v38 }
 0x70f   :  { %12603 = vmatprep.subr.bf16.mxu0 %v16901_v6 }
 0x712   :  { %12605 = vmatpush3.bf16.msra.mxu0 %v14154_v41 }
 0x713   :  { %12606 = vmatprep.subr.bf16.mxu0 %v16901_v6 }
 0x716   :  { %12608 = vmatpush3.bf16.msra.mxu0 %v14164_v44 }
 0x717   :  { %12609 = vmatprep.subr.bf16.mxu0 %v16901_v6 }
 0x71a   :  { %12611 = vmatpush3.bf16.msra.mxu0 %v14173_v49 }
 0x71b   :  { %12612 = vmatprep.subr.bf16.mxu0 %v16901_v6 }
 0x71e   :  { %12614 = vmatpush3.bf16.msra.mxu0 %v14184_v52 }
 0x71f   :  { %12651 = vmatprep.subr.bf16.mxu0 %v16901_v6 }
 0x7d0   :  { %v973_v34 = vpop.f32.mrb[6].mxu0 }
 0x7d1   :  { %v974_v36 = vadd.f32 %v14200_v56, %v973_v34  ;;  %v11806_v37 = vpop.f32.mrb[7].mxu0 }
 0x7d2   :  { %v10303_v37 = vld [vmem:[%s17069_s30 + $0x28] sm:$0xff] }
 0x7d3   :  { %13707 = vtanh.f32 %v974_v36 }
 0x7d4   :  { %v1049_v39 = vpop.f32.mrb[8].mxu0 }
 0x7d5   :  { %v11811_v40 = vpop.f32.mrb[9].mxu0 }
 0x7dd   :  { %v13708_v42 = vpop.eup %13707 }
 0x7de   :  { %v1053_v43 = vmul.f32 %v13708_v42, %v1049_v39  ;;  %v2032_v39 = vsel %vm2031_vm9, 1, %v13871_v54 }
 0x7df   :  { %2034 = vperm.xlu1 %13702, %v2032_v39   ;;  %v2432_v39 = vld [vmem:[%s16887_s16 + $0x18] sm:$0xff] }
 0x7e0   :  { %11845 = vmatmul.mubr.f32.vlgmr.msra.gmra.mrb[10].mxu0 %v1053_v43 }
 0x7e1   :  { %12653 = vmatpush3.bf16.msra.mxu0 %v14031_v5  ;;  %11917 = vmatprep.mubr.msk.f32.mxu0 %vm13869_vm1, %v16903_v2 }
 0x7e2   :  { %12654 = vmatprep.subr.bf16.mxu0 %v16901_v6 }
 0x7e5   :  { %12656 = vmatpush3.bf16.msra.mxu0 %v14048_v9 }
 0x7e6   :  { %12657 = vmatprep.subr.bf16.mxu0 %v16901_v6 }
 0x8b3   :  { %v1120_v45 = vpop.f32.mrb[10].mxu0 }
 0x8b4   :  { %v14308_v46 = vadd.f32 %v1120_v45, %v14259_v24  ;;  %v11846_v47 = vpop.f32.mrb[11].mxu0 }
 0x8b6   :  { %11856 = vmatmul.mubr.msk.f32.vlgmr.msra.gmra.mrb[14].mxu1 %vm217_vm3, %v14308_v46 }
 0x8b7   :  { %12623 = vmatpush3.bf16.msra.mxu1 %v14058_v12  ;;  %11866 = vmatprep.mubr.msk.f32.mxu1 %vm13869_vm1, %v16903_v2 }
 0x8b8   :  { %12624 = vmatprep.subr.bf16.mxu1 %v16901_v6 }
 0x8bb   :  { %12626 = vmatpush3.bf16.msra.mxu1 %v14077_v19 }
 0x8bc   :  { %11869 = vmatprep.subr.mxu1 %v16903_v2 }
 0x989   :  { %v1201_v48 = vpop.f32.mrb[14].mxu1 }
 0x98a   :  { %v1202_v50 = vadd.f32 %v14102_v22, %v1201_v48  ;;  %v11857_v51 = vpop.f32.mrb[15].mxu1 }
 0x98c   :  { %v1205_v55 = vmax.f32 %v1202_v50, 0.0 }
 0x98e   :  { %11867 = vmatmul.mubr.msk.f32.vlgmr.msra.gmra.mrb[16].mxu1 %vm217_vm3, %v1205_v55 }
 0x98f   :  { %11870 = vmatpush3.msk.msra.mxu1 %vm109_vm0, %v14084_v20  ;;  %11871 = vmatprep.mubr.msk.f32.mxu1 %vm13869_vm1, %v16903_v2 }
 0x990   :  { %12627 = vmatprep.subr.bf16.mxu1 %v16901_v6 }
 0x992   :  { %11872 = vmatmul.mubr.msk.f32.vlgmr.msra.gmra.mrb[18].mxu1 %vm105_vm2, %v10293_v57 }
 0x993   :  { %12629 = vmatpush3.bf16.msra.mxu1 %v14111_v28  ;;  %11906 = vmatprep.mubr.msk.f32.mxu1 %vm13869_vm1, %v16903_v2 }
 0x994   :  { %12630 = vmatprep.subr.bf16.mxu1 %v16901_v6 }
 0x997   :  { %12632 = vmatpush3.bf16.msra.mxu1 %v14121_v32 }
 0x998   :  { %12633 = vmatprep.subr.bf16.mxu1 %v16901_v6 }
 0x99b   :  { %12635 = vmatpush3.bf16.msra.mxu1 %v14133_v35 }
 0x99c   :  { %12636 = vmatprep.subr.bf16.mxu1 %v16901_v6 }
 0x99f   :  { %12638 = vmatpush3.bf16.msra.mxu1 %v14143_v38 }
 0x9a0   :  { %12639 = vmatprep.subr.bf16.mxu1 %v16901_v6 }
 0x9a3   :  { %12641 = vmatpush3.bf16.msra.mxu1 %v14154_v41 }
 0x9a4   :  { %12642 = vmatprep.subr.bf16.mxu1 %v16901_v6 }
 0x9a7   :  { %12644 = vmatpush3.bf16.msra.mxu1 %v14164_v44 }
 0x9a8   :  { %12645 = vmatprep.subr.bf16.mxu1 %v16901_v6 }
 0x9ab   :  { %12647 = vmatpush3.bf16.msra.mxu1 %v14173_v49 }
 0x9ac   :  { %12648 = vmatprep.subr.bf16.mxu1 %v16901_v6 }
 0x9af   :  { %12650 = vmatpush3.bf16.msra.mxu1 %v14184_v52 }
 0x9b0   :  { %12687 = vmatprep.subr.bf16.mxu1 %v16901_v6 }
 0xa61   :  { %v1275_v59 = vpop.f32.mrb[16].mxu1 }
 0xa62   :  { %v1276_v60 = vadd.f32 %v14200_v56, %v1275_v59  ;;  %v11868_v61 = vpop.f32.mrb[17].mxu1 }
 0xa64   :  { %13709 = vtanh.f32 %v1276_v60 }
 0xa65   :  { %v1351_v62 = vpop.f32.mrb[18].mxu1 }
 0xa66   :  { %v11873_v0 = vpop.f32.mrb[19].mxu1 }
 0xa67   :  { %v2425_v0 = vld [vmem:[%s16885_s14 + $0x8] sm:$0xff] }
 0xa6e   :  { %v13710_v1 = vpop.eup %13709 }
 0xa6f   :  { %v1355_v3 = vmul.f32 %v13710_v1, %v1351_v62 }
 0xa71   :  { %11907 = vmatmul.mubr.f32.vlgmr.msra.gmra.mrb[20].mxu1 %v1355_v3  ;;  %v525_v3 = vpop.permute.xlu0 %524 }
 0xa72   :  { %12689 = vmatpush3.bf16.msra.mxu1 %v14031_v5  ;;  %11979 = vmatprep.mubr.msk.f32.mxu1 %vm13869_vm1, %v16903_v2  ;;  %vm526_vm11 = vcmp.eq.s32.totalorder %v525_v3, 1 }
 0xa73   :  { %12690 = vmatprep.subr.bf16.mxu1 %v16901_v6 }
 0xa76   :  { %12692 = vmatpush3.bf16.msra.mxu1 %v14048_v9 }
 0xa77   :  { %12693 = vmatprep.subr.bf16.mxu1 %v16901_v6 }
 0xb44   :  { %v1422_v4 = vpop.f32.mrb[20].mxu1 }
 0xb45   :  { %v14357_v7 = vadd.f32 %v1422_v4, %v14308_v46  ;;  %v11908_v8 = vpop.f32.mrb[21].mxu1  ;;  %v1129_v4 = vpop.permute.xlu1 %1128 }
 0xb46   :  { %v827_v8 = vpop.permute.xlu0 %826  ;;  %vm1130_vm13 = vcmp.eq.s32.totalorder %v1129_v4, 1 }
 0xb47   :  { %11918 = vmatmul.mubr.msk.f32.vlgmr.msra.gmra.mrb[12].mxu0 %vm217_vm3, %v14357_v7  ;;  %vm828_vm12 = vcmp.eq.s32.totalorder %v827_v8, 1 }
 0xb48   :  { %12659 = vmatpush3.bf16.msra.mxu0 %v14058_v12  ;;  %11928 = vmatprep.mubr.msk.f32.mxu0 %vm13869_vm1, %v16903_v2 }
 0xb49   :  { %12660 = vmatprep.subr.bf16.mxu0 %v16901_v6 }
 0xb4c   :  { %12662 = vmatpush3.bf16.msra.mxu0 %v14077_v19 }
 0xb4d   :  { %11931 = vmatprep.subr.mxu0 %v16903_v2 }
 0xc1a   :  { %v1503_v10 = vpop.f32.mrb[12].mxu0 }
 0xc1b   :  { %v1504_v11 = vadd.f32 %v14102_v22, %v1503_v10  ;;  %v11919_v13 = vpop.f32.mrb[13].mxu0  ;;  %v1431_v10 = vpop.permute.xlu1 %1430 }
 0xc1c   :  { %vm1432_vm14 = vcmp.eq.s32.totalorder %v1431_v10, 1 }
 0xc1d   :  { %v1507_v14 = vmax.f32 %v1504_v11, 0.0  ;;  %v1733_v11 = vpop.permute.xlu0 %1732 }
 0xc1e   :  { %vm1734_vm15 = vcmp.eq.s32.totalorder %v1733_v11, 1 }
 0xc1f   :  { %11929 = vmatmul.mubr.msk.f32.vlgmr.msra.gmra.mrb[14].mxu0 %vm217_vm3, %v1507_v14  ;;  %v2035_v13 = vpop.permute.xlu1 %2034  ;;  %v527_v14 = vsel %vm526_vm11, %v14210_v63, %v14065_v15 }
 0xc20   :  { %11932 = vmatpush3.msk.msra.mxu0 %vm109_vm0, %v14084_v20  ;;  %11933 = vmatprep.mubr.msk.f32.mxu0 %vm13869_vm1, %v16903_v2 }
 0xc21   :  { %12663 = vmatprep.subr.bf16.mxu0 %v16901_v6 }
 0xc23   :  { %11934 = vmatmul.mubr.msk.f32.vlgmr.msra.gmra.mrb[16].mxu0 %vm105_vm2, %v10298_v16  ;;  %v829_v16 = vsel %vm828_vm12, %v14259_v24, %v527_v14  ;;  %v2426_v24 = vld [vmem:[%s16885_s14 + $0x10] sm:$0xff] }
 0xc24   :  { %12665 = vmatpush3.bf16.msra.mxu0 %v14111_v28  ;;  %11968 = vmatprep.mubr.msk.f32.mxu0 %vm13869_vm1, %v16903_v2  ;;  %v1131_v17 = vsel %vm1130_vm13, %v14308_v46, %v829_v16  ;;  %v2427_v46 = vld [vmem:[%s16885_s14 + $0x18] sm:$0xff] }
 0xc25   :  { %12666 = vmatprep.subr.bf16.mxu0 %v16901_v6 }
 0xc28   :  { %12668 = vmatpush3.bf16.msra.mxu0 %v14121_v32 }
 0xc29   :  { %12669 = vmatprep.subr.bf16.mxu0 %v16901_v6 }
 0xc2c   :  { %12671 = vmatpush3.bf16.msra.mxu0 %v14133_v35 }
 0xc2d   :  { %12672 = vmatprep.subr.bf16.mxu0 %v16901_v6 }
 0xc30   :  { %12674 = vmatpush3.bf16.msra.mxu0 %v14143_v38 }
 0xc31   :  { %12675 = vmatprep.subr.bf16.mxu0 %v16901_v6 }
 0xc34   :  { %12677 = vmatpush3.bf16.msra.mxu0 %v14154_v41 }
 0xc35   :  { %12678 = vmatprep.subr.bf16.mxu0 %v16901_v6 }
 0xc38   :  { %12680 = vmatpush3.bf16.msra.mxu0 %v14164_v44 }
 0xc39   :  { %12681 = vmatprep.subr.bf16.mxu0 %v16901_v6 }
 0xc3c   :  { %12683 = vmatpush3.bf16.msra.mxu0 %v14173_v49 }
 0xc3d   :  { %12684 = vmatprep.subr.bf16.mxu0 %v16901_v6 }
 0xc40   :  { %12686 = vmatpush3.bf16.msra.mxu0 %v14184_v52 }
 0xc41   :  { %12723 = vmatprep.subr.bf16.mxu0 %v16901_v6 }
 0xcf2   :  { %v1577_v18 = vpop.f32.mrb[14].mxu0 }
 0xcf3   :  { %v1578_v21 = vadd.f32 %v14200_v56, %v1577_v18  ;;  %v11930_v23 = vpop.f32.mrb[15].mxu0 }
 0xcf5   :  { %13711 = vtanh.f32 %v1578_v21  ;;  %v1433_v21 = vsel %vm1432_vm14, %v14357_v7, %v1131_v17 }
 0xcf6   :  { %v1653_v25 = vpop.f32.mrb[16].mxu0 }
 0xcf7   :  { %v11935_v26 = vpop.f32.mrb[17].mxu0 }
 0xcff   :  { %v13712_v27 = vpop.eup %13711 }
 0xd00   :  { %v1657_v29 = vmul.f32 %v13712_v27, %v1653_v25 }
 0xd02   :  { %11969 = vmatmul.mubr.f32.vlgmr.msra.gmra.mrb[18].mxu0 %v1657_v29 }
 0xd03   :  { %12725 = vmatpush3.bf16.msra.mxu0 %v14031_v5  ;;  %12041 = vmatprep.mubr.msk.f32.mxu0 %vm13869_vm1, %v16903_v2 }
 0xd04   :  { %12726 = vmatprep.subr.bf16.mxu0 %v16901_v6 }
 0xd07   :  { %12728 = vmatpush3.bf16.msra.mxu0 %v14048_v9 }
 0xd08   :  { %12729 = vmatprep.subr.bf16.mxu0 %v16901_v6 }
 0xdd5   :  { %v1724_v30 = vpop.f32.mrb[18].mxu0 }
 0xdd6   :  { %v14406_v31 = vadd.f32 %v1724_v30, %v14357_v7  ;;  %v11970_v33 = vpop.f32.mrb[19].mxu0  ;;  %v14538_v7 = vpack.c.bf16 %v2427_v46, %v2426_v24  ;;  %v10311_v30 = vld [vmem:[%s16884_s13] ss:$0 sm:$0xff] }
 0xdd8   :  { %11980 = vmatmul.mubr.msk.f32.vlgmr.msra.gmra.mrb[22].mxu1 %vm217_vm3, %v14406_v31  ;;  %v1735_v25 = vsel %vm1734_vm15, %v14406_v31, %v1433_v21 }
 0xdd9   :  { %12695 = vmatpush3.bf16.msra.mxu1 %v14058_v12  ;;  %11990 = vmatprep.mubr.msk.f32.mxu1 %vm13869_vm1, %v16903_v2 }
 0xdda   :  { %12696 = vmatprep.subr.bf16.mxu1 %v16901_v6 }
 0xddd   :  { %12698 = vmatpush3.bf16.msra.mxu1 %v14077_v19 }
 0xdde   :  { %11993 = vmatprep.subr.mxu1 %v16903_v2 }
 0xeab   :  { %v1805_v5 = vpop.f32.mrb[22].mxu1 }
 0xeac   :  { %v1806_v9 = vadd.f32 %v14102_v22, %v1805_v5  ;;  %v11981_v34 = vpop.f32.mrb[23].mxu1 }
 0xead   :  { %v2430_v34 = vld [vmem:[%s16887_s16 + $0x8] sm:$0xff] }
 0xeae   :  { %v1809_v36 = vmax.f32 %v1806_v9, 0.0  ;;  %v2429_v9 = vld [vmem:[%s16887_s16] sm:$0xff] }
 0xeb0   :  { %11991 = vmatmul.mubr.msk.f32.vlgmr.msra.gmra.mrb[24].mxu1 %vm217_vm3, %v1809_v36  ;;  %v14556_v36 = vpack.c.bf16 %v2430_v34, %v2429_v9 }
 0xeb1   :  { %11994 = vmatpush3.msk.msra.mxu1 %vm109_vm0, %v14084_v20  ;;  %11995 = vmatprep.mubr.msk.f32.mxu1 %vm13869_vm1, %v16903_v2 }
 0xeb2   :  { %12699 = vmatprep.subr.bf16.mxu1 %v16901_v6 }
 0xeb4   :  { %11996 = vmatmul.mubr.msk.f32.vlgmr.msra.gmra.mrb[26].mxu1 %vm105_vm2, %v10303_v37  ;;  %v2431_v37 = vld [vmem:[%s16887_s16 + $0x10] sm:$0xff] }
 0xeb5   :  { %12701 = vmatpush3.bf16.msra.mxu1 %v14111_v28  ;;  %12030 = vmatprep.mubr.msk.f32.mxu1 %vm13869_vm1, %v16903_v2 }
 0xeb6   :  { %12702 = vmatprep.subr.bf16.mxu1 %v16901_v6 }
 0xeb9   :  { %12704 = vmatpush3.bf16.msra.mxu1 %v14121_v32 }
 0xeba   :  { %12705 = vmatprep.subr.bf16.mxu1 %v16901_v6 }
 0xebd   :  { %12707 = vmatpush3.bf16.msra.mxu1 %v14133_v35 }
 0xebe   :  { %12708 = vmatprep.subr.bf16.mxu1 %v16901_v6 }
 0xec1   :  { %12710 = vmatpush3.bf16.msra.mxu1 %v14143_v38 }
 0xec2   :  { %12711 = vmatprep.subr.bf16.mxu1 %v16901_v6 }
 0xec5   :  { %12713 = vmatpush3.bf16.msra.mxu1 %v14154_v41 }
 0xec6   :  { %12714 = vmatprep.subr.bf16.mxu1 %v16901_v6 }
 0xec9   :  { %12716 = vmatpush3.bf16.msra.mxu1 %v14164_v44 }
 0xeca   :  { %12717 = vmatprep.subr.bf16.mxu1 %v16901_v6 }
 0xecd   :  { %12719 = vmatpush3.bf16.msra.mxu1 %v14173_v49 }
 0xece   :  { %12720 = vmatprep.subr.bf16.mxu1 %v16901_v6 }
 0xed1   :  { %12722 = vmatpush3.bf16.msra.mxu1 %v14184_v52 }
 0xed2   :  { %12759 = vmatprep.subr.bf16.mxu1 %v16901_v6 }
 0xf83   :  { %v1879_v40 = vpop.f32.mrb[24].mxu1 }
 0xf84   :  { %v1880_v42 = vadd.f32 %v14200_v56, %v1879_v40  ;;  %v11992_v43 = vpop.f32.mrb[25].mxu1  ;;  %v14566_v40 = vpack.c.bf16 %v2432_v39, %v2431_v37  ;;  %v14686_v39 = vld [vmem:[%s16890_s19 + $0x18] sm:$0xff] }
 0xf86   :  { %13713 = vtanh.f32 %v1880_v42  ;;  %v14572_v42 = vld [vmem:[%s16886_s15] ss:$0 sm:$0xff] }
 0xf87   :  { %v1955_v45 = vpop.f32.mrb[26].mxu1 }
 0xf88   :  { %v11997_v47 = vpop.f32.mrb[27].mxu1 }
 0xf90   :  { %v13714_v48 = vpop.eup %13713 }
 0xf91   :  { %v1959_v50 = vmul.f32 %v13714_v48, %v1955_v45 }
 0xf93   :  { %12031 = vmatmul.mubr.f32.vlgmr.msra.gmra.mrb[28].mxu1 %v1959_v50  ;;  %v2434_v50 = vld [vmem:[%s16889_s18] sm:$0xff] }
 0xf94   :  { %12103 = vmatprep.mubr.msk.f32.mxu1 %vm13869_vm1, %v16903_v2 }
0x1066   :  { %v2026_v51 = vpop.f32.mrb[28].mxu1 }
0x1067   :  { %v14451_v55 = vadd.f32 %v2026_v51, %v14406_v31  ;;  %v12032_v57 = vpop.f32.mrb[29].mxu1  ;;  %v2435_v51 = vld [vmem:[%s16889_s18 + $0x8] sm:$0xff] }
0x1068   :  { %v14588_v57 = vpack.c.bf16 %v2435_v51, %v2434_v50 }
0x1069   :  { %12042 = vmatmul.mubr.msk.f32.vlgmr.msra.gmra.mrb[20].mxu0 %vm217_vm3, %v14451_v55 }
0x106a   :  { %12731 = vmatpush3.bf16.msra.mxu0 %v14058_v12  ;;  %12052 = vmatprep.mubr.msk.f32.mxu0 %vm13869_vm1, %v16903_v2  ;;  %v10308_v12 = vld [vmem:[%s17069_s30 + $0x30] sm:$0xff] }
0x106b   :  { %12732 = vmatprep.subr.bf16.mxu0 %v16901_v6 }
0x106e   :  { %12734 = vmatpush3.bf16.msra.mxu0 %v14077_v19  ;;  %v2334_v19 = vsel %vm2333_vm10, 1, %v13871_v54  ;;  %v2343_v54 = vld [vmem:[%s16883_s12 + $0x18] sm:$0xff] }
0x106f   :  { %12055 = vmatprep.subr.mxu0 %v16903_v2  ;;  %2336 = vperm.xlu0 %13701, %v2334_v19   ;;  %v12763_v62 = vpack.c.bf16 %v2343_v54, %v2342_v53 }
0x10ee   :  { %v2337_v18 = vpop.permute.xlu0 %2336 }
0x113c   :  { %v2107_v58 = vpop.f32.mrb[20].mxu0 }
0x113d   :  { %v2108_v59 = vadd.f32 %v14102_v22, %v2107_v58  ;;  %v12043_v60 = vpop.f32.mrb[21].mxu0  ;;  %v2341_v22 = vld [vmem:[%s16883_s12 + $0x8] sm:$0xff]  ;;  %v2437_v58 = vld [vmem:[%s16889_s18 + $0x18] sm:$0xff] }
0x113e   :  { %v14603_v60 = vld [vmem:[%s16888_s17] ss:$0 sm:$0xff] }
0x113f   :  { %v2111_v61 = vmax.f32 %v2108_v59, 0.0 }
0x1141   :  { %12053 = vmatmul.mubr.msk.f32.vlgmr.msra.gmra.mrb[22].mxu0 %vm217_vm3, %v2111_v61 }
0x1142   :  { %12056 = vmatpush3.msk.msra.mxu0 %vm109_vm0, %v14084_v20  ;;  %12057 = vmatprep.mubr.msk.f32.mxu0 %vm13869_vm1, %v16903_v2  ;;  %v2340_v20 = vld [vmem:[%s16883_s12] sm:$0xff]  ;;  %vm2036_vm0 = vcmp.eq.s32.totalorder %v2035_v13, 1  ;;  %s15688_s12 = sld [smem:[#allocation2 + $0x4]] }
0x1143   :  { %12735 = vmatprep.subr.bf16.mxu0 %v16901_v6  ;;  %v2037_v29 = vsel %vm2036_vm0, %v14451_v55, %v1735_v25 }
0x1145   :  { %12058 = vmatmul.mubr.msk.f32.vlgmr.msra.gmra.mrb[24].mxu0 %vm105_vm2, %v10308_v12  ;;  %vm2338_vm2 = vcmp.eq.s32.totalorder %v2337_v18, 1  ;;  %v13872_v18 = vmov 1966171168  }
0x1146   :  { %12737 = vmatpush3.bf16.msra.mxu0 %v14111_v28  ;;  %12092 = vmatprep.mubr.msk.f32.mxu0 %vm13869_vm1, %v16903_v2  ;;  %v12760_v28 = vpack.c.bf16 %v2341_v22, %v2340_v20  ;;  %v2612_v20 = vlaneseq  ;;  %v2610_v21 = vunpack.c.l.s4 %v13872_v18 }
0x1147   :  { %12738 = vmatprep.subr.bf16.mxu0 %v16901_v6 }
0x1148   :  { %12761 = vmatpush3.bf16.msra.mxu1 %v12760_v28  ;;  %v2611_v25 = vunpack.c.0.s8 %v2610_v21 }
0x1149   :  { %12762 = vmatprep.subr.bf16.mxu1 %v16901_v6 }
0x114a   :  { %12740 = vmatpush3.bf16.msra.mxu0 %v14121_v32 }
0x114b   :  { %12741 = vmatprep.subr.bf16.mxu0 %v16901_v6 }
0x114c   :  { %12764 = vmatpush3.bf16.msra.mxu1 %v12763_v62 }
0x114d   :  { %12765 = vmatprep.subr.bf16.mxu1 %v16901_v6 }
0x114e   :  { %12743 = vmatpush3.bf16.msra.mxu0 %v14133_v35 }
0x114f   :  { %12744 = vmatprep.subr.bf16.mxu0 %v16901_v6 }
0x1152   :  { %12746 = vmatpush3.bf16.msra.mxu0 %v14143_v38 }
0x1153   :  { %12747 = vmatprep.subr.bf16.mxu0 %v16901_v6 }
0x1156   :  { %12749 = vmatpush3.bf16.msra.mxu0 %v14154_v41 }
0x1157   :  { %12750 = vmatprep.subr.bf16.mxu0 %v16901_v6 }
0x115a   :  { %12752 = vmatpush3.bf16.msra.mxu0 %v14164_v44 }
0x115b   :  { %12753 = vmatprep.subr.bf16.mxu0 %v16901_v6 }
0x115e   :  { %12755 = vmatpush3.bf16.msra.mxu0 %v14173_v49 }
0x115f   :  { %12756 = vmatprep.subr.bf16.mxu0 %v16901_v6 }
0x1162   :  { %12758 = vmatpush3.bf16.msra.mxu0 %v14184_v52 }
0x1163   :  { %12785 = vmatprep.subr.bf16.mxu0 %v16901_v6 }
0x1214   :  { %v2181_v32 = vpop.f32.mrb[22].mxu0 }
0x1215   :  { %v2182_v35 = vadd.f32 %v14200_v56, %v2181_v32  ;;  %v12054_v38 = vpop.f32.mrb[23].mxu0  ;;  %v2424_v56 = vld [vmem:[%s16885_s14] sm:$0xff]  ;;  %v14609_v32 = vshrl.u32 %v2612_v20, 7 }
0x1216   :  { %v14515_v1 = vpack.c.bf16 %v2425_v0, %v2424_v56 }
0x1217   :  { %13715 = vtanh.f32 %v2182_v35  ;;  %v14630_v53 = vsub.s32 1, %v14609_v32  ;;  %v14636_v62 = vsub.s32 2, %v14609_v32  ;;  %v14640_v0 = vsub.s32 3, %v14609_v32 }
0x1218   :  { %v2257_v41 = vpop.f32.mrb[24].mxu0  ;;  %v14644_v4 = vsub.s32 4, %v14609_v32  ;;  %v14648_v10 = vsub.s32 5, %v14609_v32  ;;  %v14652_v13 = vsub.s32 6, %v14609_v32  ;;  %v14656_v16 = vsub.s32 7, %v14609_v32 }
0x1219   :  { %v12059_v44 = vpop.f32.mrb[25].mxu0 }
0x1221   :  { %v13716_v49 = vpop.eup %13715 }
0x1222   :  { %v2261_v52 = vmul.f32 %v13716_v49, %v2257_v41  ;;  %v14620_v49 = vsub.s32 0, %v14609_v32 }
0x1224   :  { %12093 = vmatmul.mubr.f32.vlgmr.msra.gmra.mrb[26].mxu0 %v2261_v52 }
0x1225   :  { %12192 = vmatprep.mubr.msk.f32.mxu0 %vm13869_vm1, %v16903_v2  ;;  %12787 = vmatpush3.bf16.msra.mxu0 %v14515_v1 }
0x1226   :  { %12788 = vmatprep.subr.bf16.mxu0 %v16901_v6 }
0x1229   :  { %12790 = vmatpush3.bf16.msra.mxu0 %v14538_v7 }
0x122a   :  { %12791 = vmatprep.subr.bf16.mxu0 %v16901_v6 }
0x12f7   :  { %v2328_v23 = vpop.f32.mrb[26].mxu0 }
0x12f8   :  { %v2332_v26 = vadd.f32 %v2328_v23, %v14451_v55  ;;  %v12094_v27 = vpop.f32.mrb[27].mxu0  ;;  %v2436_v55 = vld [vmem:[%s16889_s18 + $0x10] sm:$0xff]  ;;  %s14606_s18 = sld [smem:[#allocation2]] }
0x12f9   :  { %v14593_v59 = vpack.c.bf16 %v2437_v58, %v2436_v55  ;;  %v14664_v27 = vsub.s32 %v2611_v25, %v14609_v32 }
0x12fa   :  { %v2339_v63 = vsel %vm2338_vm2, %v2332_v26, %v2037_v29 }
0x12fb   :  { %12104 = vmatmul.mubr.msk.f32.vlgmr.msra.gmra.mrb[30].mxu1 %vm217_vm3, %v2339_v63 }
0x12fc   :  { %12767 = vmatpush3.bf16.msra.mxu1 %v14515_v1  ;;  %12114 = vmatprep.mubr.msk.f32.mxu1 %vm13869_vm1, %v16903_v2 }
0x12fd   :  { %12768 = vmatprep.subr.bf16.mxu1 %v16901_v6 }
0x12fe   :  { %v3356_v22 = vstv %s14606_s18 }
0x1300   :  { %12770 = vmatpush3.bf16.msra.mxu1 %v14538_v7 }
0x1301   :  { %12771 = vmatprep.subr.bf16.mxu1 %v16901_v6 }
0x13ce   :  { %v2420_v31 = vpop.f32.mrb[30].mxu1 }
0x13cf   :  { %v2421_v33 = vadd.f32 %v10311_v30, %v2420_v31  ;;  %v12105_v5 = vpop.f32.mrb[31].mxu1  ;;  %v14673_v30 = vld [vmem:[%s16890_s19 + $0x8] sm:$0xff]  ;;  %v14678_v31 = vld [vmem:[%s16890_s19] sm:$0xff] }
0x13d1   :  { %12115 = vmatmul.mubr.msk.f32.vlgmr.msra.gmra.mrb[32].mxu1 %vm217_vm3, %v2421_v33 }
0x13d2   :  { %12125 = vmatprep.mubr.msk.f32.mxu1 %vm13869_vm1, %v16903_v2  ;;  %12773 = vmatpush3.bf16.msra.mxu1 %v14556_v36 }
0x13d3   :  { %12774 = vmatprep.subr.bf16.mxu1 %v16901_v6 }
0x13d6   :  { %12776 = vmatpush3.bf16.msra.mxu1 %v14566_v40 }
0x13d7   :  { %12778 = vmatprep.subr.bf16.mxu1 %v14588_v57 }
0x14a4   :  { %v2518_v43 = vpop.f32.mrb[32].mxu1 }
0x14a5   :  { %v2519_v45 = vadd.f32 %v14572_v42, %v2518_v43  ;;  %v12116_v47 = vpop.f32.mrb[33].mxu1  ;;  %v14691_v43 = vld [vmem:[%s16890_s19 + $0x10] sm:$0xff] }
0x14a7   :  { %13717 = vtanh.f32 %v2519_v45 }
0x14b1   :  { %v14575_v48 = vpop.eup %13717 }
0x14b2   :  { %12126 = vmatmul.mubr.msk.f32.vlgmr.msra.gmra.mrb[34].mxu1 %vm217_vm3, %v14575_v48  ;;  %v2603_v23 = vmul.f32 %v14575_v48, %v14575_v48 }
0x14b3   :  { %12780 = vmatpush3.bf16.msra.mxu1 %v14588_v57 }
0x14b4   :  { %12782 = vmatprep.subr.bf16.mxu1 %v14593_v59  ;;  %v14661_v26 = vsub.f32 1.0, %v2603_v23 }
0x14b6   :  { %v2615_v29 = vrot.slane %v14661_v26, %v14664_v27  ;;  %v2608_v18 = vcombine.high %v14661_v26, %v14661_v26 }
0x14b7   :  { %12784 = vmatpush3.bf16.msra.mxu1 %v14593_v59 }
0x14b8   :  { %12805 = vmatprep.subr.bf16.mxu1 %v16901_v6  ;;  %v2631_v63 = vrot.slane %v2615_v29, %v14664_v27  ;;  %v2623_v46 = vcombine.high %v2615_v29, %v2615_v29 }
0x14ba   :  { %v2660_v24 = vrot.slane %v2631_v63, %v14620_v49  ;;  %v2645_v9 = vrot.slane %v2623_v46, %v14664_v27 }
0x14bc   :  { %v2697_v5 = vmul.f32 %v2660_v24, %v14678_v31  ;;  %v2700_v48 = vmul.f32 %v2660_v24, %v14686_v39  ;;  %v2699_v50 = vmul.f32 %v2660_v24, %v14691_v43  ;;  %v2664_v51 = vrot.slane %v2645_v9, %v14620_v49 }
0x14bd   :  { %v2655_v25 = vcombine.high %v2645_v9, %v2645_v9 }
0x14be   :  { %v2701_v20 = vmul.f32 %v2664_v51, %v14678_v31 }
0x14bf   :  { %v2672_v26 = vrot.slane %v2655_v25, %v14620_v49 }
0x1585   :  { %v2598_v61 = vpop.f32.mrb[34].mxu1 }
0x1586   :  { %v2599_v12 = vadd.f32 %v14603_v60, %v2598_v61  ;;  %v12127_v19 = vpop.f32.mrb[35].mxu1 }
0x1587   :  { %v2702_v19 = vmul.f32 %v2664_v51, %v14673_v30 }
0x1588   :  { %13719 = vtanh.f32 %v2599_v12 }
0x1592   :  { %v13720_v28 = vpop.eup %13719 }
0x1593   :  { %v14611_v35 = vmul.f32 %v13720_v28, %v13720_v28  ;;  %v14613_v38 = vmul.f32 %v13720_v28, %v3356_v22  ;;  %v2653_v22 = vcombine.high %v2631_v63, %v2631_v63 }
0x1595   :  { %v2606_v41 = vsub.f32 1.0, %v14611_v35  ;;  %v14617_v44 = vadd.f32 %v14613_v38, %v2421_v33  ;;  %v2698_v33 = vmul.f32 %v2660_v24, %v14673_v30 }
0x1597   :  { %12193 = vmatmul.mubr.msk.f32.vlgmr.msra.gmra.mrb[28].mxu0 %vm217_vm3, %v14617_v44  ;;  %v2732_v52 = vrot.slane %v2606_v41, %v14620_v49  ;;  %v2751_v54 = vrot.slane %v2606_v41, %v14630_v53  ;;  %v2770_v56 = vrot.slane %v2606_v41, %v14636_v62  ;;  %v2789_v3 = vrot.slane %v2606_v41, %v14640_v0 }
0x1598   :  { %12793 = vmatpush3.bf16.msra.mxu0 %v14556_v36  ;;  %12203 = vmatprep.mubr.msk.f32.mxu0 %vm13869_vm1, %v16903_v2  ;;  %v2808_v8 = vrot.slane %v2606_v41, %v14644_v4  ;;  %v2827_v11 = vrot.slane %v2606_v41, %v14648_v10  ;;  %v2846_v14 = vrot.slane %v2606_v41, %v14652_v13 }
0x1599   :  { %2738 = vbcast.lane.b32.xlu0 %v2732_v52, 264  ;;  %2734 = vbcast.lane.b32.xlu1 %v2732_v52, 256  ;;  %v2865_v17 = vrot.slane %v2606_v41, %v14656_v16 }
0x159a   :  { %12794 = vmatprep.subr.bf16.mxu0 %v16901_v6 }
0x159c   :  { %12796 = vmatpush3.bf16.msra.mxu0 %v14566_v40 }
0x159d   :  { %2746 = vbcast.lane.b32.xlu0 %v2732_v52, 280  ;;  %2742 = vbcast.lane.b32.xlu1 %v2732_v52, 272 }
0x159e   :  { %12798 = vmatprep.subr.bf16.mxu0 %v14588_v57 }
0x15a1   :  { %2757 = vbcast.lane.b32.xlu0 %v2751_v54, 264  ;;  %2753 = vbcast.lane.b32.xlu1 %v2751_v54, 256 }
0x15a5   :  { %2765 = vbcast.lane.b32.xlu0 %v2751_v54, 280  ;;  %2761 = vbcast.lane.b32.xlu1 %v2751_v54, 272  ;;  %v2704_v54 = vmul.f32 %v2664_v51, %v14686_v39 }
0x15a9   :  { %2776 = vbcast.lane.b32.xlu0 %v2770_v56, 264  ;;  %2772 = vbcast.lane.b32.xlu1 %v2770_v56, 256 }
0x15ad   :  { %2784 = vbcast.lane.b32.xlu0 %v2770_v56, 280  ;;  %2780 = vbcast.lane.b32.xlu1 %v2770_v56, 272  ;;  %v2703_v56 = vmul.f32 %v2664_v51, %v14691_v43 }
0x15b1   :  { %2795 = vbcast.lane.b32.xlu0 %v2789_v3, 264  ;;  %2791 = vbcast.lane.b32.xlu1 %v2789_v3, 256 }
0x15b5   :  { %2803 = vbcast.lane.b32.xlu0 %v2789_v3, 280  ;;  %2799 = vbcast.lane.b32.xlu1 %v2789_v3, 272  ;;  %v2668_v3 = vrot.slane %v2653_v22, %v14620_v49 }
0x15b7   :  { %v2706_v21 = vmul.f32 %v2668_v3, %v14673_v30  ;;  %v2705_v23 = vmul.f32 %v2668_v3, %v14678_v31 }
0x15b9   :  { %2814 = vbcast.lane.b32.xlu0 %v2808_v8, 264  ;;  %2810 = vbcast.lane.b32.xlu1 %v2808_v8, 256 }
0x15bd   :  { %2822 = vbcast.lane.b32.xlu0 %v2808_v8, 280  ;;  %2818 = vbcast.lane.b32.xlu1 %v2808_v8, 272 }
0x15c1   :  { %2833 = vbcast.lane.b32.xlu0 %v2827_v11, 264  ;;  %2829 = vbcast.lane.b32.xlu1 %v2827_v11, 256 }
0x15c5   :  { %2841 = vbcast.lane.b32.xlu0 %v2827_v11, 280  ;;  %2837 = vbcast.lane.b32.xlu1 %v2827_v11, 272 }
0x15c9   :  { %2852 = vbcast.lane.b32.xlu0 %v2846_v14, 264  ;;  %2848 = vbcast.lane.b32.xlu1 %v2846_v14, 256 }
0x15cd   :  { %2860 = vbcast.lane.b32.xlu0 %v2846_v14, 280  ;;  %2856 = vbcast.lane.b32.xlu1 %v2846_v14, 272 }
0x15d1   :  { %2871 = vbcast.lane.b32.xlu0 %v2865_v17, 264  ;;  %2867 = vbcast.lane.b32.xlu1 %v2865_v17, 256 }
0x15d5   :  { %2879 = vbcast.lane.b32.xlu0 %v2865_v17, 280  ;;  %2875 = vbcast.lane.b32.xlu1 %v2865_v17, 272 }
0x160b   :  { %v2739_v34 = vpop.permute.xlu0 %2738  ;;  %v2735_v37 = vpop.permute.xlu1 %2734 }
0x160c   :  { %v2882_v45 = vmul.f32 %v2739_v34, %v2698_v33  ;;  %v2881_v47 = vmul.f32 %v2735_v37, %v2697_v5  ;;  %v2708_v33 = vmul.f32 %v2668_v3, %v14686_v39  ;;  %v2707_v5 = vmul.f32 %v2668_v3, %v14691_v43 }
0x160d   :  { %v2622_v34 = vrot.slane %v2608_v18, %v14664_v27 }
0x160e   :  { %12136 = vmatprep.mubr.msk.f32.mxu1 %vm217_vm3, %v2881_v47 }
0x160f   :  { %v2747_v55 = vpop.permute.xlu0 %2746  ;;  %12137 = vmatmul.mubr.msk.f32.vlgmr.msra.gmra.mrb[36].mxu1 %vm217_vm3, %v2882_v45  ;;  %v2743_v58 = vpop.permute.xlu1 %2742  ;;  %v2638_v51 = vrot.slane %v2622_v34, %v14664_v27 }
0x1610   :  { %v2884_v61 = vmul.f32 %v2747_v55, %v2700_v48  ;;  %v2883_v12 = vmul.f32 %v2743_v58, %v2699_v50  ;;  %12807 = vmatpush3.bf16.msra.mxu1 %v14515_v1  ;;  %v2710_v48 = vmul.f32 %v2672_v26, %v14673_v30  ;;  %v2709_v50 = vmul.f32 %v2672_v26, %v14678_v31 }
0x1611   :  { %12808 = vmatprep.subr.bf16.mxu1 %v16901_v6  ;;  %v2676_v22 = vrot.slane %v2638_v51, %v14620_v49 }
0x1612   :  { %12139 = vmatprep.mubr.msk.f32.mxu1 %vm217_vm3, %v2883_v12 }
0x1613   :  { %v2758_v28 = vpop.permute.xlu0 %2757  ;;  %12140 = vmatmul.mubr.msk.f32.gmra.mrb[38].mxu1 %vm217_vm3, %v2884_v61  ;;  %v2754_v32 = vpop.permute.xlu1 %2753  ;;  %v2713_v3 = vmul.f32 %v2676_v22, %v14678_v31 }
0x1614   :  { %v2886_v41 = vmul.f32 %v2758_v28, %v2702_v19  ;;  %v2885_v52 = vmul.f32 %v2754_v32, %v2701_v20  ;;  %12810 = vmatpush3.bf16.msra.mxu1 %v14538_v7  ;;  %v2712_v19 = vmul.f32 %v2672_v26, %v14686_v39  ;;  %v2711_v20 = vmul.f32 %v2672_v26, %v14691_v43 }
0x1615   :  { %12811 = vmatprep.subr.bf16.mxu1 %v16901_v6  ;;  %v2624_v28 = vcombine.high %v2622_v34, %v2622_v34  ;;  %v2654_v26 = vcombine.high %v2638_v51, %v2638_v51 }
0x1616   :  { %12142 = vmatprep.mubr.msk.f32.mxu1 %vm217_vm3, %v2885_v52 }
0x1617   :  { %v2766_v8 = vpop.permute.xlu0 %2765  ;;  %12143 = vmatmul.mubr.msk.f32.gmra.mrb[40].mxu1 %vm217_vm3, %v2886_v41  ;;  %v2762_v11 = vpop.permute.xlu1 %2761 }
0x1618   :  { %v2888_v14 = vmul.f32 %v2766_v8, %v2704_v54  ;;  %v2887_v17 = vmul.f32 %v2762_v11, %v2703_v56  ;;  %v2714_v56 = vmul.f32 %v2676_v22, %v14673_v30  ;;  %v2652_v8 = vrot.slane %v2624_v28, %v14664_v27 }
0x161a   :  { %12145 = vmatprep.mubr.msk.f32.mxu1 %vm217_vm3, %v2887_v17  ;;  %v2680_v25 = vrot.slane %v2652_v8, %v14620_v49 }
0x161b   :  { %v2777_v29 = vpop.permute.xlu0 %2776  ;;  %12146 = vmatmul.mubr.msk.f32.gmra.mrb[42].mxu1 %vm217_vm3, %v2888_v14  ;;  %v2773_v63 = vpop.permute.xlu1 %2772 }
0x161c   :  { %v2890_v24 = vmul.f32 %v2777_v29, %v2706_v21  ;;  %v2889_v46 = vmul.f32 %v2773_v63, %v2705_v23  ;;  %v2716_v21 = vmul.f32 %v2676_v22, %v14686_v39  ;;  %v2715_v23 = vmul.f32 %v2676_v22, %v14691_v43 }
0x161e   :  { %12148 = vmatprep.mubr.msk.f32.mxu1 %vm217_vm3, %v2889_v46 }
0x161f   :  { %v2785_v37 = vpop.permute.xlu0 %2784  ;;  %12149 = vmatmul.mubr.msk.f32.gmra.mrb[44].mxu1 %vm217_vm3, %v2890_v24  ;;  %v2781_v9 = vpop.permute.xlu1 %2780 }
0x1620   :  { %v2892_v45 = vmul.f32 %v2785_v37, %v2708_v33  ;;  %v2891_v47 = vmul.f32 %v2781_v9, %v2707_v5  ;;  %v2718_v33 = vmul.f32 %v2680_v25, %v14673_v30  ;;  %v2717_v5 = vmul.f32 %v2680_v25, %v14678_v31 }
0x1622   :  { %12151 = vmatprep.mubr.msk.f32.mxu1 %vm217_vm3, %v2891_v47  ;;  %v2720_v47 = vmul.f32 %v2680_v25, %v14686_v39 }
0x1623   :  { %v2796_v55 = vpop.permute.xlu0 %2795  ;;  %12152 = vmatmul.mubr.msk.f32.gmra.mrb[46].mxu1 %vm217_vm3, %v2892_v45  ;;  %v2792_v58 = vpop.permute.xlu1 %2791 }
0x1624   :  { %v2894_v61 = vmul.f32 %v2796_v55, %v2710_v48  ;;  %v2893_v12 = vmul.f32 %v2792_v58, %v2709_v50  ;;  %v2719_v48 = vmul.f32 %v2680_v25, %v14691_v43  ;;  %v2684_v50 = vrot.slane %v2654_v26, %v14620_v49 }
0x1626   :  { %12154 = vmatprep.mubr.msk.f32.mxu1 %vm217_vm3, %v2893_v12  ;;  %v2722_v12 = vmul.f32 %v2684_v50, %v14673_v30 }
0x1627   :  { %v2804_v32 = vpop.permute.xlu0 %2803  ;;  %12155 = vmatmul.mubr.msk.f32.gmra.mrb[48].mxu1 %vm217_vm3, %v2894_v61  ;;  %v2800_v41 = vpop.permute.xlu1 %2799 }
0x1628   :  { %v2896_v52 = vmul.f32 %v2804_v32, %v2712_v19  ;;  %v2895_v54 = vmul.f32 %v2800_v41, %v2711_v20  ;;  %v2721_v19 = vmul.f32 %v2684_v50, %v14678_v31  ;;  %v2656_v20 = vcombine.high %v2652_v8, %v2652_v8 }
0x162a   :  { %12157 = vmatprep.mubr.msk.f32.mxu1 %vm217_vm3, %v2895_v54  ;;  %v2723_v54 = vmul.f32 %v2684_v50, %v14691_v43 }
0x162b   :  { %v2815_v11 = vpop.permute.xlu0 %2814  ;;  %12158 = vmatmul.mubr.msk.f32.gmra.mrb[50].mxu1 %vm217_vm3, %v2896_v52  ;;  %v2811_v14 = vpop.permute.xlu1 %2810  ;;  %v2724_v52 = vmul.f32 %v2684_v50, %v14686_v39 }
0x162c   :  { %v2898_v17 = vmul.f32 %v2815_v11, %v2714_v56  ;;  %v2897_v18 = vmul.f32 %v2811_v14, %v2713_v3  ;;  %v2688_v56 = vrot.slane %v2656_v20, %v14620_v49 }
0x162e   :  { %12160 = vmatprep.mubr.msk.f32.mxu1 %vm217_vm3, %v2897_v18  ;;  %v2725_v18 = vmul.f32 %v2688_v56, %v14678_v31 }
0x162f   :  { %v2823_v29 = vpop.permute.xlu0 %2822  ;;  %12161 = vmatmul.mubr.msk.f32.gmra.mrb[52].mxu1 %vm217_vm3, %v2898_v17  ;;  %v2819_v63 = vpop.permute.xlu1 %2818  ;;  %v2726_v17 = vmul.f32 %v2688_v56, %v14673_v30 }
0x1630   :  { %v2900_v24 = vmul.f32 %v2823_v29, %v2716_v21  ;;  %v2899_v46 = vmul.f32 %v2819_v63, %v2715_v23  ;;  %v2728_v63 = vmul.f32 %v2688_v56, %v14686_v39 }
0x1632   :  { %12163 = vmatprep.mubr.msk.f32.mxu1 %vm217_vm3, %v2899_v46 }
0x1633   :  { %v2834_v34 = vpop.permute.xlu0 %2833  ;;  %12164 = vmatmul.mubr.msk.f32.gmra.mrb[54].mxu1 %vm217_vm3, %v2900_v24  ;;  %v2830_v37 = vpop.permute.xlu1 %2829  ;;  %v2727_v24 = vmul.f32 %v2688_v56, %v14691_v43 }
0x1634   :  { %v2902_v9 = vmul.f32 %v2834_v34, %v2718_v33  ;;  %v2901_v45 = vmul.f32 %v2830_v37, %v2717_v5 }
0x1636   :  { %12166 = vmatprep.mubr.msk.f32.mxu1 %vm217_vm3, %v2901_v45 }
0x1637   :  { %v2842_v55 = vpop.permute.xlu0 %2841  ;;  %12167 = vmatmul.mubr.msk.f32.gmra.mrb[56].mxu1 %vm217_vm3, %v2902_v9  ;;  %v2838_v58 = vpop.permute.xlu1 %2837 }
0x1638   :  { %v2904_v61 = vmul.f32 %v2842_v55, %v2720_v47  ;;  %v2903_v51 = vmul.f32 %v2838_v58, %v2719_v48 }
0x163a   :  { %12169 = vmatprep.mubr.msk.f32.mxu1 %vm217_vm3, %v2903_v51 }
0x163b   :  { %v2853_v22 = vpop.permute.xlu0 %2852  ;;  %12170 = vmatmul.mubr.msk.f32.gmra.mrb[58].mxu1 %vm217_vm3, %v2904_v61  ;;  %v2849_v28 = vpop.permute.xlu1 %2848 }
0x163c   :  { %v2906_v32 = vmul.f32 %v2853_v22, %v2722_v12  ;;  %v2905_v41 = vmul.f32 %v2849_v28, %v2721_v19 }
0x163e   :  { %12172 = vmatprep.mubr.msk.f32.mxu1 %vm217_vm3, %v2905_v41 }
0x163f   :  { %v2861_v3 = vpop.permute.xlu0 %2860  ;;  %12173 = vmatmul.mubr.msk.f32.gmra.mrb[60].mxu1 %vm217_vm3, %v2906_v32  ;;  %v2857_v11 = vpop.permute.xlu1 %2856 }
0x1640   :  { %v2908_v14 = vmul.f32 %v2861_v3, %v2724_v52  ;;  %v2907_v8 = vmul.f32 %v2857_v11, %v2723_v54 }
0x1642   :  { %12175 = vmatprep.mubr.msk.f32.mxu1 %vm217_vm3, %v2907_v8 }
0x1643   :  { %v2872_v21 = vpop.permute.xlu0 %2871  ;;  %12176 = vmatmul.mubr.msk.f32.gmra.mrb[62].mxu1 %vm217_vm3, %v2908_v14  ;;  %v2868_v23 = vpop.permute.xlu1 %2867 }
0x1644   :  { %v2910_v25 = vmul.f32 %v2872_v21, %v2726_v17  ;;  %v2909_v29 = vmul.f32 %v2868_v23, %v2725_v18 }
0x1646   :  { %12178 = vmatprep.mubr.msk.f32.mxu1 %vm217_vm3, %v2909_v29 }
0x1647   :  { %v2880_v46 = vpop.permute.xlu0 %2879  ;;  %12179 = vmatmul.mubr.msk.f32.gmra.mrb[64].mxu1 %vm217_vm3, %v2910_v25  ;;  %v2876_v33 = vpop.permute.xlu1 %2875 }
0x1648   :  { %v2912_v5 = vmul.f32 %v2880_v46, %v2728_v63  ;;  %v2911_v26 = vmul.f32 %v2876_v33, %v2727_v24 }
0x164a   :  { %12181 = vmatprep.mubr.msk.f32.mxu1 %vm217_vm3, %v2911_v26 }
0x164b   :  { %12182 = vmatmul.mubr.msk.f32.gmra.mrb[66].mxu1 %vm217_vm3, %v2912_v5 }
0x164c   :  { %12270 = vmatprep.mubr.msk.f32.mxu1 %vm13869_vm1, %v16903_v2 }
0x166a   :  { %v3444_v34 = vpop.f32.mrb[28].mxu0 }
0x166b   :  { %v3445_v37 = vadd.f32 %v14572_v42, %v3444_v34  ;;  %v12194_v9 = vpop.f32.mrb[29].mxu0 }
0x166d   :  { %13721 = vtanh.f32 %v3445_v37 }
0x1677   :  { %v14774_v45 = vpop.eup %13721 }
0x1678   :  { %12204 = vmatmul.mubr.msk.f32.vlgmr.msra.gmra.mrb[30].mxu0 %vm217_vm3, %v14774_v45 }
0x1679   :  { %12800 = vmatpush3.bf16.msra.mxu0 %v14588_v57 }
0x167a   :  { %12802 = vmatprep.subr.bf16.mxu0 %v14593_v59 }
0x167d   :  { %12804 = vmatpush3.bf16.msra.mxu0 %v14593_v59 }
0x167e   :  { %12825 = vmatprep.subr.bf16.mxu0 %v16901_v6 }
0x16e2   :  { %v12138_v47 = vpop.f32.mrb[36].mxu1 }
0x16e3   :  { %v3246_v48 = vmul.f32 %v12138_v47, %v12138_v47  ;;  %v3075_v50 = vpop.f32.mrb[37].mxu1 }
0x16e4   :  { %v3245_v55 = vmul.f32 %v3075_v50, %v3075_v50 }
0x16e5   :  { %v3278_v42 = vsel %vm217_vm3, %v3246_v48, 0.0 }
0x16e6   :  { %v3277_v58 = vsel %vm217_vm3, %v3245_v55, 0.0  ;;  %v12141_v61 = vpop.f32.mrb[38].mxu1 }
0x16e7   :  { %v3279_v51 = vadd.f32 %v3278_v42, %v3277_v58  ;;  %v3085_v12 = vpop.f32.mrb[39].mxu1  ;;  %v3248_v19 = vmul.f32 %v12141_v61, %v12141_v61 }
0x16e8   :  { %v3247_v20 = vmul.f32 %v3085_v12, %v3085_v12 }
0x16e9   :  { %v3282_v52 = vsel %vm217_vm3, %v3248_v19, 0.0 }
0x16ea   :  { %v3280_v22 = vsel %vm217_vm3, %v3247_v20, 0.0  ;;  %v12144_v28 = vpop.f32.mrb[40].mxu1 }
0x16eb   :  { %v3281_v32 = vadd.f32 %v3280_v22, %v3279_v51  ;;  %v3095_v41 = vpop.f32.mrb[41].mxu1  ;;  %v3250_v54 = vmul.f32 %v12144_v28, %v12144_v28 }
0x16ec   :  { %v3249_v56 = vmul.f32 %v3095_v41, %v3095_v41 }
0x16ed   :  { %v3283_v3 = vadd.f32 %v3282_v52, %v3281_v32  ;;  %v3286_v18 = vsel %vm217_vm3, %v3250_v54, 0.0 }
0x16ee   :  { %v3284_v11 = vsel %vm217_vm3, %v3249_v56, 0.0  ;;  %v12147_v14 = vpop.f32.mrb[42].mxu1 }
0x16ef   :  { %v3285_v8 = vadd.f32 %v3284_v11, %v3283_v3  ;;  %v3105_v17 = vpop.f32.mrb[43].mxu1  ;;  %v3252_v21 = vmul.f32 %v12147_v14, %v12147_v14 }
0x16f0   :  { %v3251_v23 = vmul.f32 %v3105_v17, %v3105_v17 }
0x16f1   :  { %v3287_v25 = vadd.f32 %v3286_v18, %v3285_v8  ;;  %v3290_v33 = vsel %vm217_vm3, %v3252_v21, 0.0 }
0x16f2   :  { %v3288_v29 = vsel %vm217_vm3, %v3251_v23, 0.0  ;;  %v12150_v63 = vpop.f32.mrb[44].mxu1 }
0x16f3   :  { %v3289_v24 = vadd.f32 %v3288_v29, %v3287_v25  ;;  %v3115_v46 = vpop.f32.mrb[45].mxu1  ;;  %v3254_v5 = vmul.f32 %v12150_v63, %v12150_v63 }
0x16f4   :  { %v3253_v26 = vmul.f32 %v3115_v46, %v3115_v46 }
0x16f5   :  { %v3291_v34 = vadd.f32 %v3290_v33, %v3289_v24  ;;  %v3294_v50 = vsel %vm217_vm3, %v3254_v5, 0.0 }
0x16f6   :  { %v3292_v37 = vsel %vm217_vm3, %v3253_v26, 0.0  ;;  %v12153_v9 = vpop.f32.mrb[46].mxu1 }
0x16f7   :  { %v3293_v47 = vadd.f32 %v3292_v37, %v3291_v34  ;;  %v3125_v48 = vpop.f32.mrb[47].mxu1  ;;  %v3256_v55 = vmul.f32 %v12153_v9, %v12153_v9 }
0x16f8   :  { %v3255_v42 = vmul.f32 %v3125_v48, %v3125_v48 }
0x16f9   :  { %v3295_v58 = vadd.f32 %v3294_v50, %v3293_v47  ;;  %v3298_v20 = vsel %vm217_vm3, %v3256_v55, 0.0 }
0x16fa   :  { %v3296_v61 = vsel %vm217_vm3, %v3255_v42, 0.0  ;;  %v12156_v51 = vpop.f32.mrb[48].mxu1 }
0x16fb   :  { %v3297_v12 = vadd.f32 %v3296_v61, %v3295_v58  ;;  %v3135_v19 = vpop.f32.mrb[49].mxu1  ;;  %v3258_v22 = vmul.f32 %v12156_v51, %v12156_v51 }
0x16fc   :  { %v3257_v28 = vmul.f32 %v3135_v19, %v3135_v19 }
0x16fd   :  { %v3299_v32 = vadd.f32 %v3298_v20, %v3297_v12  ;;  %v3302_v3 = vsel %vm217_vm3, %v3258_v22, 0.0 }
0x16fe   :  { %v3300_v41 = vsel %vm217_vm3, %v3257_v28, 0.0  ;;  %v12159_v52 = vpop.f32.mrb[50].mxu1 }
0x16ff   :  { %v3301_v54 = vadd.f32 %v3300_v41, %v3299_v32  ;;  %v3145_v56 = vpop.f32.mrb[51].mxu1  ;;  %v3260_v11 = vmul.f32 %v12159_v52, %v12159_v52 }
0x1700   :  { %v3259_v14 = vmul.f32 %v3145_v56, %v3145_v56 }
0x1701   :  { %v3303_v8 = vadd.f32 %v3302_v3, %v3301_v54  ;;  %v3306_v25 = vsel %vm217_vm3, %v3260_v11, 0.0 }
0x1702   :  { %v3304_v17 = vsel %vm217_vm3, %v3259_v14, 0.0  ;;  %v12162_v18 = vpop.f32.mrb[52].mxu1 }
0x1703   :  { %v3305_v21 = vadd.f32 %v3304_v17, %v3303_v8  ;;  %v3155_v23 = vpop.f32.mrb[53].mxu1  ;;  %v3262_v29 = vmul.f32 %v12162_v18, %v12162_v18 }
0x1704   :  { %v3261_v63 = vmul.f32 %v3155_v23, %v3155_v23 }
0x1705   :  { %v3307_v24 = vadd.f32 %v3306_v25, %v3305_v21  ;;  %v3310_v34 = vsel %vm217_vm3, %v3262_v29, 0.0 }
0x1706   :  { %v3308_v46 = vsel %vm217_vm3, %v3261_v63, 0.0  ;;  %v12165_v33 = vpop.f32.mrb[54].mxu1 }
0x1707   :  { %v3309_v5 = vadd.f32 %v3308_v46, %v3307_v24  ;;  %v3165_v26 = vpop.f32.mrb[55].mxu1  ;;  %v3264_v37 = vmul.f32 %v12165_v33, %v12165_v33 }
0x1708   :  { %v3263_v9 = vmul.f32 %v3165_v26, %v3165_v26 }
0x1709   :  { %v3311_v47 = vadd.f32 %v3310_v34, %v3309_v5  ;;  %v3314_v58 = vsel %vm217_vm3, %v3264_v37, 0.0 }
0x170a   :  { %v3312_v48 = vsel %vm217_vm3, %v3263_v9, 0.0  ;;  %v12168_v50 = vpop.f32.mrb[56].mxu1 }
0x170b   :  { %v3313_v55 = vadd.f32 %v3312_v48, %v3311_v47  ;;  %v3175_v42 = vpop.f32.mrb[57].mxu1  ;;  %v3266_v61 = vmul.f32 %v12168_v50, %v12168_v50 }
0x170c   :  { %v3265_v51 = vmul.f32 %v3175_v42, %v3175_v42 }
0x170d   :  { %v3315_v12 = vadd.f32 %v3314_v58, %v3313_v55  ;;  %v3318_v32 = vsel %vm217_vm3, %v3266_v61, 0.0 }
0x170e   :  { %v3316_v19 = vsel %vm217_vm3, %v3265_v51, 0.0  ;;  %v12171_v20 = vpop.f32.mrb[58].mxu1 }
0x170f   :  { %v3317_v22 = vadd.f32 %v3316_v19, %v3315_v12  ;;  %v3185_v28 = vpop.f32.mrb[59].mxu1  ;;  %v3268_v41 = vmul.f32 %v12171_v20, %v12171_v20 }
0x1710   :  { %v3267_v52 = vmul.f32 %v3185_v28, %v3185_v28 }
0x1711   :  { %v3319_v54 = vadd.f32 %v3318_v32, %v3317_v22  ;;  %v3322_v8 = vsel %vm217_vm3, %v3268_v41, 0.0 }
0x1712   :  { %v3320_v56 = vsel %vm217_vm3, %v3267_v52, 0.0  ;;  %v12174_v3 = vpop.f32.mrb[60].mxu1 }
0x1713   :  { %v3321_v11 = vadd.f32 %v3320_v56, %v3319_v54  ;;  %v3195_v14 = vpop.f32.mrb[61].mxu1  ;;  %v3270_v17 = vmul.f32 %v12174_v3, %v12174_v3 }
0x1714   :  { %v3269_v18 = vmul.f32 %v3195_v14, %v3195_v14 }
0x1715   :  { %v3323_v21 = vadd.f32 %v3322_v8, %v3321_v11  ;;  %v3326_v24 = vsel %vm217_vm3, %v3270_v17, 0.0  ;;  %v4276_v11 = vstv %s14817_s2 }
0x1716   :  { %v3324_v23 = vsel %vm217_vm3, %v3269_v18, 0.0  ;;  %v12177_v25 = vpop.f32.mrb[62].mxu1 }
0x1717   :  { %v3325_v29 = vadd.f32 %v3324_v23, %v3323_v21  ;;  %v3205_v63 = vpop.f32.mrb[63].mxu1  ;;  %v3272_v46 = vmul.f32 %v12177_v25, %v12177_v25 }
0x1718   :  { %v3271_v33 = vmul.f32 %v3205_v63, %v3205_v63 }
0x1719   :  { %v3327_v5 = vadd.f32 %v3326_v24, %v3325_v29  ;;  %v3330_v47 = vsel %vm217_vm3, %v3272_v46, 0.0 }
0x171a   :  { %v3328_v26 = vsel %vm217_vm3, %v3271_v33, 0.0  ;;  %v12180_v34 = vpop.f32.mrb[64].mxu1  ;;  %v3523_v33 = vmul.f32 %v14774_v45, %v14774_v45 }
0x171b   :  { %v3329_v37 = vadd.f32 %v3328_v26, %v3327_v5  ;;  %v3215_v9 = vpop.f32.mrb[65].mxu1  ;;  %v3274_v48 = vmul.f32 %v12180_v34, %v12180_v34 }
0x171c   :  { %v3273_v50 = vmul.f32 %v3215_v9, %v3215_v9  ;;  %v3524_v5 = vsub.f32 1.0, %v3523_v33 }
0x171d   :  { %v3331_v55 = vadd.f32 %v3330_v47, %v3329_v37  ;;  %v3334_v12 = vsel %vm217_vm3, %v3274_v48, 0.0 }
0x171e   :  { %v3332_v42 = vsel %vm217_vm3, %v3273_v50, 0.0  ;;  %v12183_v58 = vpop.f32.mrb[66].mxu1  ;;  %v3535_v26 = vrot.slane %v3524_v5, %v14664_v27 }
0x171f   :  { %v3333_v61 = vadd.f32 %v3332_v42, %v3331_v55  ;;  %v3225_v51 = vpop.f32.mrb[67].mxu1  ;;  %v3276_v19 = vmul.f32 %v12183_v58, %v12183_v58 }
0x1720   :  { %v3275_v20 = vmul.f32 %v3225_v51, %v3225_v51  ;;  %v3551_v34 = vrot.slane %v3535_v26, %v14664_v27  ;;  %v3543_v9 = vcombine.high %v3535_v26, %v3535_v26 }
0x1721   :  { %v3335_v22 = vadd.f32 %v3334_v12, %v3333_v61  ;;  %v3338_v41 = vsel %vm217_vm3, %v3276_v19, 0.0 }
0x1722   :  { %v3336_v28 = vsel %vm217_vm3, %v3275_v20, 0.0  ;;  %v3580_v37 = vrot.slane %v3551_v34, %v14620_v49  ;;  %v3565_v50 = vrot.slane %v3543_v9, %v14664_v27 }
0x1723   :  { %v3337_v32 = vadd.f32 %v3336_v28, %v3335_v22 }
0x1724   :  { %v3618_v47 = vmul.f32 %v3580_v37, %v14673_v30  ;;  %v3617_v48 = vmul.f32 %v3580_v37, %v14678_v31  ;;  %v3620_v45 = vmul.f32 %v3580_v37, %v14686_v39  ;;  %v3619_v51 = vmul.f32 %v3580_v37, %v14691_v43 }
0x1725   :  { %v14814_v52 = vadd.f32 %v3338_v41, %v3337_v32  ;;  %v3584_v12 = vrot.slane %v3565_v50, %v14620_v49  ;;  %v3575_v26 = vcombine.high %v3565_v50, %v3565_v50 }
0x1727   :  { %v3622_v32 = vmul.f32 %v3584_v12, %v14673_v30  ;;  %v3621_v41 = vmul.f32 %v3584_v12, %v14678_v31 }
0x174b   :  { %v3518_v54 = vpop.f32.mrb[30].mxu0 }
0x174c   :  { %v3519_v56 = vadd.f32 %v14603_v60, %v3518_v54  ;;  %v12205_v3 = vpop.f32.mrb[31].mxu0  ;;  %v3573_v54 = vcombine.high %v3551_v34, %v3551_v34 }
0x174e   :  { %13723 = vtanh.f32 %v3519_v56 }
0x1758   :  { %v13724_v14 = vpop.eup %13723 }
0x1759   :  { %v14820_v8 = vmul.f32 %v13724_v14, %v13724_v14  ;;  %v14822_v17 = vmul.f32 %v13724_v14, %v4276_v11 }
0x175b   :  { %v3526_v18 = vsub.f32 1.0, %v14820_v8  ;;  %v14827_v21 = vadd.f32 %v14822_v17, %v14617_v44 }
0x175d   :  { %12271 = vmatmul.mubr.msk.f32.vlgmr.msra.gmra.mrb[68].mxu1 %vm217_vm3, %v14827_v21  ;;  %v3652_v60 = vrot.slane %v3526_v18, %v14620_v49  ;;  %v3671_v44 = vrot.slane %v3526_v18, %v14630_v53  ;;  %v3690_v23 = vrot.slane %v3526_v18, %v14636_v62  ;;  %v3709_v25 = vrot.slane %v3526_v18, %v14640_v0 }
0x175e   :  { %12813 = vmatpush3.bf16.msra.mxu1 %v14556_v36  ;;  %12281 = vmatprep.mubr.msk.f32.mxu1 %vm13869_vm1, %v16903_v2  ;;  %v3728_v29 = vrot.slane %v3526_v18, %v14644_v4  ;;  %v3747_v63 = vrot.slane %v3526_v18, %v14648_v10  ;;  %v3766_v24 = vrot.slane %v3526_v18, %v14652_v13 }
0x175f   :  { %3658 = vbcast.lane.b32.xlu0 %v3652_v60, 264  ;;  %3654 = vbcast.lane.b32.xlu1 %v3652_v60, 256  ;;  %v3785_v46 = vrot.slane %v3526_v18, %v14656_v16  ;;  %v3624_v18 = vmul.f32 %v3584_v12, %v14686_v39 }
0x1760   :  { %12814 = vmatprep.subr.bf16.mxu1 %v16901_v6 }
0x1762   :  { %12816 = vmatpush3.bf16.msra.mxu1 %v14566_v40 }
0x1763   :  { %3666 = vbcast.lane.b32.xlu0 %v3652_v60, 280  ;;  %3662 = vbcast.lane.b32.xlu1 %v3652_v60, 272  ;;  %v3623_v60 = vmul.f32 %v3584_v12, %v14691_v43 }
0x1764   :  { %12818 = vmatprep.subr.bf16.mxu1 %v14588_v57 }
0x1767   :  { %3677 = vbcast.lane.b32.xlu0 %v3671_v44, 264  ;;  %3673 = vbcast.lane.b32.xlu1 %v3671_v44, 256 }
0x176b   :  { %3685 = vbcast.lane.b32.xlu0 %v3671_v44, 280  ;;  %3681 = vbcast.lane.b32.xlu1 %v3671_v44, 272  ;;  %v3588_v44 = vrot.slane %v3573_v54, %v14620_v49 }
0x176d   :  { %v3625_v33 = vmul.f32 %v3588_v44, %v14678_v31 }
0x176f   :  { %3696 = vbcast.lane.b32.xlu0 %v3690_v23, 264  ;;  %3692 = vbcast.lane.b32.xlu1 %v3690_v23, 256 }
0x1773   :  { %3704 = vbcast.lane.b32.xlu0 %v3690_v23, 280  ;;  %3700 = vbcast.lane.b32.xlu1 %v3690_v23, 272 }
0x1777   :  { %3715 = vbcast.lane.b32.xlu0 %v3709_v25, 264  ;;  %3711 = vbcast.lane.b32.xlu1 %v3709_v25, 256 }
0x177b   :  { %3723 = vbcast.lane.b32.xlu0 %v3709_v25, 280  ;;  %3719 = vbcast.lane.b32.xlu1 %v3709_v25, 272 }
0x177f   :  { %3734 = vbcast.lane.b32.xlu0 %v3728_v29, 264  ;;  %3730 = vbcast.lane.b32.xlu1 %v3728_v29, 256 }
0x1783   :  { %3742 = vbcast.lane.b32.xlu0 %v3728_v29, 280  ;;  %3738 = vbcast.lane.b32.xlu1 %v3728_v29, 272 }
0x1787   :  { %3753 = vbcast.lane.b32.xlu0 %v3747_v63, 264  ;;  %3749 = vbcast.lane.b32.xlu1 %v3747_v63, 256 }
0x178b   :  { %3761 = vbcast.lane.b32.xlu0 %v3747_v63, 280  ;;  %3757 = vbcast.lane.b32.xlu1 %v3747_v63, 272 }
0x178f   :  { %3772 = vbcast.lane.b32.xlu0 %v3766_v24, 264  ;;  %3768 = vbcast.lane.b32.xlu1 %v3766_v24, 256 }
0x1793   :  { %3780 = vbcast.lane.b32.xlu0 %v3766_v24, 280  ;;  %3776 = vbcast.lane.b32.xlu1 %v3766_v24, 272  ;;  %v3528_v24 = vcombine.high %v3524_v5, %v3524_v5  ;;  %v3592_v5 = vrot.slane %v3575_v26, %v14620_v49 }
0x1795   :  { %v3629_v12 = vmul.f32 %v3592_v5, %v14678_v31  ;;  %v3631_v54 = vmul.f32 %v3592_v5, %v14691_v43 }
0x1797   :  { %3791 = vbcast.lane.b32.xlu0 %v3785_v46, 264  ;;  %3787 = vbcast.lane.b32.xlu1 %v3785_v46, 256 }
0x179b   :  { %3799 = vbcast.lane.b32.xlu0 %v3785_v46, 280  ;;  %3795 = vbcast.lane.b32.xlu1 %v3785_v46, 272  ;;  %v3626_v46 = vmul.f32 %v3588_v44, %v14673_v30 }
0x17d1   :  { %v3659_v55 = vpop.permute.xlu0 %3658  ;;  %v3655_v42 = vpop.permute.xlu1 %3654 }
0x17d2   :  { %v3802_v58 = vmul.f32 %v3659_v55, %v3618_v47  ;;  %v3801_v61 = vmul.f32 %v3655_v42, %v3617_v48  ;;  %v3628_v48 = vmul.f32 %v3588_v44, %v14686_v39  ;;  %v3627_v55 = vmul.f32 %v3588_v44, %v14691_v43 }
0x17d3   :  { %v3542_v42 = vrot.slane %v3528_v24, %v14664_v27 }
0x17d4   :  { %12214 = vmatprep.mubr.msk.f32.mxu0 %vm217_vm3, %v3801_v61 }
0x17d5   :  { %v3667_v19 = vpop.permute.xlu0 %3666  ;;  %12215 = vmatmul.mubr.msk.f32.vlgmr.msra.gmra.mrb[32].mxu0 %vm217_vm3, %v3802_v58  ;;  %v3663_v20 = vpop.permute.xlu1 %3662 }
0x17d6   :  { %v3804_v22 = vmul.f32 %v3667_v19, %v3620_v45  ;;  %v3803_v28 = vmul.f32 %v3663_v20, %v3619_v51  ;;  %12827 = vmatpush3.bf16.msra.mxu0 %v14515_v1  ;;  %v3630_v51 = vmul.f32 %v3592_v5, %v14673_v30  ;;  %v3558_v19 = vrot.slane %v3542_v42, %v14664_v27 }
0x17d7   :  { %12828 = vmatprep.subr.bf16.mxu0 %v16901_v6 }
0x17d8   :  { %12217 = vmatprep.mubr.msk.f32.mxu0 %vm217_vm3, %v3803_v28 }
0x17d9   :  { %v3678_v56 = vpop.permute.xlu0 %3677  ;;  %12218 = vmatmul.mubr.msk.f32.gmra.mrb[34].mxu0 %vm217_vm3, %v3804_v22  ;;  %v3674_v3 = vpop.permute.xlu1 %3673 }
0x17da   :  { %v3806_v11 = vmul.f32 %v3678_v56, %v3622_v32  ;;  %v3805_v14 = vmul.f32 %v3674_v3, %v3621_v41  ;;  %12830 = vmatpush3.bf16.msra.mxu0 %v14538_v7  ;;  %v3632_v41 = vmul.f32 %v3592_v5, %v14686_v39  ;;  %v3596_v56 = vrot.slane %v3558_v19, %v14620_v49 }
0x17db   :  { %12831 = vmatprep.subr.bf16.mxu0 %v16901_v6  ;;  %v3544_v3 = vcombine.high %v3542_v42, %v3542_v42  ;;  %v3574_v42 = vcombine.high %v3558_v19, %v3558_v19 }
0x17dc   :  { %12220 = vmatprep.mubr.msk.f32.mxu0 %vm217_vm3, %v3805_v14  ;;  %v3634_v44 = vmul.f32 %v3596_v56, %v14673_v30  ;;  %v3635_v26 = vmul.f32 %v3596_v56, %v14691_v43 }
0x17dd   :  { %v3686_v23 = vpop.permute.xlu0 %3685  ;;  %12221 = vmatmul.mubr.msk.f32.gmra.mrb[36].mxu0 %vm217_vm3, %v3806_v11  ;;  %v3682_v25 = vpop.permute.xlu1 %3681 }
0x17de   :  { %v3808_v29 = vmul.f32 %v3686_v23, %v3624_v18  ;;  %v3807_v63 = vmul.f32 %v3682_v25, %v3623_v60  ;;  %v3633_v23 = vmul.f32 %v3596_v56, %v14678_v31  ;;  %v3572_v25 = vrot.slane %v3544_v3, %v14664_v27 }
0x17e0   :  { %12223 = vmatprep.mubr.msk.f32.mxu0 %vm217_vm3, %v3807_v63 }
0x17e1   :  { %v3697_v34 = vpop.permute.xlu0 %3696  ;;  %12224 = vmatmul.mubr.msk.f32.gmra.mrb[38].mxu0 %vm217_vm3, %v3808_v29  ;;  %v3693_v37 = vpop.permute.xlu1 %3692 }
0x17e2   :  { %v3810_v9 = vmul.f32 %v3697_v34, %v3626_v46  ;;  %v3809_v47 = vmul.f32 %v3693_v37, %v3625_v33  ;;  %v3636_v33 = vmul.f32 %v3596_v56, %v14686_v39  ;;  %v3600_v34 = vrot.slane %v3572_v25, %v14620_v49 }
0x17e3   :  { %v3576_v56 = vcombine.high %v3572_v25, %v3572_v25 }
0x17e4   :  { %12226 = vmatprep.mubr.msk.f32.mxu0 %vm217_vm3, %v3809_v47  ;;  %v3637_v5 = vmul.f32 %v3600_v34, %v14678_v31 }
0x17e5   :  { %v3705_v58 = vpop.permute.xlu0 %3704  ;;  %12227 = vmatmul.mubr.msk.f32.gmra.mrb[40].mxu0 %vm217_vm3, %v3810_v9  ;;  %v3701_v50 = vpop.permute.xlu1 %3700 }
0x17e6   :  { %v3812_v61 = vmul.f32 %v3705_v58, %v3628_v48  ;;  %v3811_v45 = vmul.f32 %v3701_v50, %v3627_v55  ;;  %v3638_v55 = vmul.f32 %v3600_v34, %v14673_v30 }
0x17e8   :  { %12229 = vmatprep.mubr.msk.f32.mxu0 %vm217_vm3, %v3811_v45 }
0x17e9   :  { %v3716_v20 = vpop.permute.xlu0 %3715  ;;  %12230 = vmatmul.mubr.msk.f32.gmra.mrb[42].mxu0 %vm217_vm3, %v3812_v61  ;;  %v3712_v22 = vpop.permute.xlu1 %3711 }
0x17ea   :  { %v3814_v28 = vmul.f32 %v3716_v20, %v3630_v51  ;;  %v3813_v32 = vmul.f32 %v3712_v22, %v3629_v12  ;;  %v3640_v51 = vmul.f32 %v3600_v34, %v14686_v39  ;;  %v3639_v12 = vmul.f32 %v3600_v34, %v14691_v43 }
0x17eb   :  { %v3604_v20 = vrot.slane %v3574_v42, %v14620_v49 }
0x17ec   :  { %12232 = vmatprep.mubr.msk.f32.mxu0 %vm217_vm3, %v3813_v32 }
0x17ed   :  { %v3724_v11 = vpop.permute.xlu0 %3723  ;;  %12233 = vmatmul.mubr.msk.f32.gmra.mrb[44].mxu0 %vm217_vm3, %v3814_v28  ;;  %v3720_v14 = vpop.permute.xlu1 %3719 }
0x17ee   :  { %v3816_v18 = vmul.f32 %v3724_v11, %v3632_v41  ;;  %v3815_v60 = vmul.f32 %v3720_v14, %v3631_v54  ;;  %v3642_v41 = vmul.f32 %v3604_v20, %v14673_v30  ;;  %v3641_v54 = vmul.f32 %v3604_v20, %v14678_v31 }
0x17f0   :  { %12235 = vmatprep.mubr.msk.f32.mxu0 %vm217_vm3, %v3815_v60  ;;  %v3644_v60 = vmul.f32 %v3604_v20, %v14686_v39 }
0x17f1   :  { %v3735_v29 = vpop.permute.xlu0 %3734  ;;  %12236 = vmatmul.mubr.msk.f32.gmra.mrb[46].mxu0 %vm217_vm3, %v3816_v18  ;;  %v3731_v63 = vpop.permute.xlu1 %3730 }
0x17f2   :  { %v3818_v24 = vmul.f32 %v3735_v29, %v3634_v44  ;;  %v3817_v46 = vmul.f32 %v3731_v63, %v3633_v23  ;;  %v3643_v44 = vmul.f32 %v3604_v20, %v14691_v43  ;;  %v3608_v23 = vrot.slane %v3576_v56, %v14620_v49 }
0x17f4   :  { %12238 = vmatprep.mubr.msk.f32.mxu0 %vm217_vm3, %v3817_v46  ;;  %v3646_v46 = vmul.f32 %v3608_v23, %v14673_v30 }
0x17f5   :  { %v3743_v37 = vpop.permute.xlu0 %3742  ;;  %12239 = vmatmul.mubr.msk.f32.gmra.mrb[48].mxu0 %vm217_vm3, %v3818_v24  ;;  %v3739_v9 = vpop.permute.xlu1 %3738 }
0x17f6   :  { %v3820_v47 = vmul.f32 %v3743_v37, %v3636_v33  ;;  %v3819_v48 = vmul.f32 %v3739_v9, %v3635_v26  ;;  %v3645_v33 = vmul.f32 %v3608_v23, %v14678_v31 }
0x17f8   :  { %12241 = vmatprep.mubr.msk.f32.mxu0 %vm217_vm3, %v3819_v48  ;;  %v3647_v48 = vmul.f32 %v3608_v23, %v14691_v43 }
0x17f9   :  { %v3754_v58 = vpop.permute.xlu0 %3753  ;;  %12242 = vmatmul.mubr.msk.f32.gmra.mrb[50].mxu0 %vm217_vm3, %v3820_v47  ;;  %v3750_v50 = vpop.permute.xlu1 %3749  ;;  %v3648_v47 = vmul.f32 %v3608_v23, %v14686_v39  ;;  %v14934_v39 = vld [vmem:[%s16886_s15] ss:$0 sm:$0xff] }
0x17fa   :  { %v3822_v61 = vmul.f32 %v3754_v58, %v3638_v55  ;;  %v3821_v45 = vmul.f32 %v3750_v50, %v3637_v5 }
0x17fc   :  { %12244 = vmatprep.mubr.msk.f32.mxu0 %vm217_vm3, %v3821_v45 }
0x17fd   :  { %v3762_v22 = vpop.permute.xlu0 %3761  ;;  %12245 = vmatmul.mubr.msk.f32.gmra.mrb[52].mxu0 %vm217_vm3, %v3822_v61  ;;  %v3758_v28 = vpop.permute.xlu1 %3757 }
0x17fe   :  { %v3824_v32 = vmul.f32 %v3762_v22, %v3640_v51  ;;  %v3823_v19 = vmul.f32 %v3758_v28, %v3639_v12 }
0x1800   :  { %12247 = vmatprep.mubr.msk.f32.mxu0 %vm217_vm3, %v3823_v19 }
0x1801   :  { %v3773_v3 = vpop.permute.xlu0 %3772  ;;  %12248 = vmatmul.mubr.msk.f32.gmra.mrb[54].mxu0 %vm217_vm3, %v3824_v32  ;;  %v3769_v11 = vpop.permute.xlu1 %3768 }
0x1802   :  { %v3826_v14 = vmul.f32 %v3773_v3, %v3642_v41  ;;  %v3825_v18 = vmul.f32 %v3769_v11, %v3641_v54 }
0x1804   :  { %12250 = vmatprep.mubr.msk.f32.mxu0 %vm217_vm3, %v3825_v18 }
0x1805   :  { %v3781_v29 = vpop.permute.xlu0 %3780  ;;  %12251 = vmatmul.mubr.msk.f32.gmra.mrb[56].mxu0 %vm217_vm3, %v3826_v14  ;;  %v3777_v63 = vpop.permute.xlu1 %3776 }
0x1806   :  { %v3828_v24 = vmul.f32 %v3781_v29, %v3644_v60  ;;  %v3827_v25 = vmul.f32 %v3777_v63, %v3643_v44 }
0x1808   :  { %12253 = vmatprep.mubr.msk.f32.mxu0 %vm217_vm3, %v3827_v25 }
0x1809   :  { %v3792_v26 = vpop.permute.xlu0 %3791  ;;  %12254 = vmatmul.mubr.msk.f32.gmra.mrb[58].mxu0 %vm217_vm3, %v3828_v24  ;;  %v3788_v34 = vpop.permute.xlu1 %3787 }
0x180a   :  { %v3830_v37 = vmul.f32 %v3792_v26, %v3646_v46  ;;  %v3829_v9 = vmul.f32 %v3788_v34, %v3645_v33 }
0x180c   :  { %12256 = vmatprep.mubr.msk.f32.mxu0 %vm217_vm3, %v3829_v9 }
0x180d   :  { %v3800_v55 = vpop.permute.xlu0 %3799  ;;  %12257 = vmatmul.mubr.msk.f32.gmra.mrb[60].mxu0 %vm217_vm3, %v3830_v37  ;;  %v3796_v5 = vpop.permute.xlu1 %3795 }
0x180e   :  { %v3832_v42 = vmul.f32 %v3800_v55, %v3648_v47  ;;  %v3831_v30 = vmul.f32 %v3796_v5, %v3647_v48 }
0x1810   :  { %12259 = vmatprep.mubr.msk.f32.mxu0 %vm217_vm3, %v3831_v30 }
0x1811   :  { %12260 = vmatmul.mubr.msk.f32.gmra.mrb[62].mxu0 %vm217_vm3, %v3832_v42 }
0x1812   :  { %12348 = vmatprep.mubr.msk.f32.mxu0 %vm13869_vm1, %v16903_v2 }
0x1830   :  { %v4362_v31 = vpop.f32.mrb[68].mxu1 }
0x1831   :  { %v4363_v43 = vadd.f32 %v14934_v39, %v4362_v31  ;;  %v12272_v58 = vpop.f32.mrb[69].mxu1 }
0x1833   :  { %13725 = vtanh.f32 %v4363_v43 }
0x183d   :  { %v14937_v50 = vpop.eup %13725 }
0x183e   :  { %12282 = vmatmul.mubr.msk.f32.vlgmr.msra.gmra.mrb[70].mxu1 %vm217_vm3, %v14937_v50 }
0x183f   :  { %12820 = vmatpush3.bf16.msra.mxu1 %v14588_v57 }
0x1840   :  { %12822 = vmatprep.subr.bf16.mxu1 %v14593_v59 }
0x1843   :  { %12824 = vmatpush3.bf16.msra.mxu1 %v14593_v59 }
0x1844   :  { %12845 = vmatprep.subr.bf16.mxu1 %v16901_v6 }
0x18a8   :  { %v12216_v61 = vpop.f32.mrb[32].mxu0 }
0x18a9   :  { %v4166_v45 = vmul.f32 %v12216_v61, %v12216_v61  ;;  %v3995_v51 = vpop.f32.mrb[33].mxu0 }
0x18aa   :  { %v4165_v12 = vmul.f32 %v3995_v51, %v3995_v51 }
0x18ab   :  { %v4198_v20 = vsel %vm217_vm3, %v4166_v45, 0.0 }
0x18ac   :  { %v4197_v22 = vsel %vm217_vm3, %v4165_v12, 0.0  ;;  %v12219_v28 = vpop.f32.mrb[34].mxu0 }
0x18ad   :  { %v4199_v32 = vadd.f32 %v4198_v20, %v4197_v22  ;;  %v4005_v19 = vpop.f32.mrb[35].mxu0  ;;  %v4168_v41 = vmul.f32 %v12219_v28, %v12219_v28 }
0x18ae   :  { %v4167_v54 = vmul.f32 %v4005_v19, %v4005_v19 }
0x18af   :  { %v4202_v18 = vsel %vm217_vm3, %v4168_v41, 0.0 }
0x18b0   :  { %v4200_v56 = vsel %vm217_vm3, %v4167_v54, 0.0  ;;  %v12222_v3 = vpop.f32.mrb[36].mxu0 }
0x18b1   :  { %v4201_v11 = vadd.f32 %v4200_v56, %v4199_v32  ;;  %v4015_v14 = vpop.f32.mrb[37].mxu0  ;;  %v4170_v60 = vmul.f32 %v12222_v3, %v12222_v3 }
0x18b2   :  { %v4169_v44 = vmul.f32 %v4015_v14, %v4015_v14 }
0x18b3   :  { %v4203_v23 = vadd.f32 %v4202_v18, %v4201_v11  ;;  %v4206_v46 = vsel %vm217_vm3, %v4170_v60, 0.0 }
0x18b4   :  { %v4204_v29 = vsel %vm217_vm3, %v4169_v44, 0.0  ;;  %v12225_v63 = vpop.f32.mrb[38].mxu0 }
0x18b5   :  { %v4205_v24 = vadd.f32 %v4204_v29, %v4203_v23  ;;  %v4025_v25 = vpop.f32.mrb[39].mxu0  ;;  %v4172_v33 = vmul.f32 %v12225_v63, %v12225_v63 }
0x18b6   :  { %v4171_v26 = vmul.f32 %v4025_v25, %v4025_v25 }
0x18b7   :  { %v4207_v34 = vadd.f32 %v4206_v46, %v4205_v24  ;;  %v4210_v55 = vsel %vm217_vm3, %v4172_v33, 0.0 }
0x18b8   :  { %v4208_v37 = vsel %vm217_vm3, %v4171_v26, 0.0  ;;  %v12228_v9 = vpop.f32.mrb[40].mxu0 }
0x18b9   :  { %v4209_v47 = vadd.f32 %v4208_v37, %v4207_v34  ;;  %v4035_v48 = vpop.f32.mrb[41].mxu0  ;;  %v4174_v5 = vmul.f32 %v12228_v9, %v12228_v9 }
0x18ba   :  { %v4173_v42 = vmul.f32 %v4035_v48, %v4035_v48 }
0x18bb   :  { %v4211_v30 = vadd.f32 %v4210_v55, %v4209_v47  ;;  %v4214_v45 = vsel %vm217_vm3, %v4174_v5, 0.0 }
0x18bc   :  { %v4212_v31 = vsel %vm217_vm3, %v4173_v42, 0.0  ;;  %v12231_v43 = vpop.f32.mrb[42].mxu0 }
0x18bd   :  { %v4213_v58 = vadd.f32 %v4212_v31, %v4211_v30  ;;  %v4045_v61 = vpop.f32.mrb[43].mxu0  ;;  %v4176_v51 = vmul.f32 %v12231_v43, %v12231_v43 }
0x18be   :  { %v4175_v12 = vmul.f32 %v4045_v61, %v4045_v61 }
0x18bf   :  { %v4215_v20 = vadd.f32 %v4214_v45, %v4213_v58  ;;  %v4218_v41 = vsel %vm217_vm3, %v4176_v51, 0.0 }
0x18c0   :  { %v4216_v22 = vsel %vm217_vm3, %v4175_v12, 0.0  ;;  %v12234_v28 = vpop.f32.mrb[44].mxu0 }
0x18c1   :  { %v4217_v32 = vadd.f32 %v4216_v22, %v4215_v20  ;;  %v4055_v19 = vpop.f32.mrb[45].mxu0  ;;  %v4178_v54 = vmul.f32 %v12234_v28, %v12234_v28 }
0x18c2   :  { %v4177_v56 = vmul.f32 %v4055_v19, %v4055_v19 }
0x18c3   :  { %v4219_v3 = vadd.f32 %v4218_v41, %v4217_v32  ;;  %v4222_v44 = vsel %vm217_vm3, %v4178_v54, 0.0 }
0x18c4   :  { %v4220_v11 = vsel %vm217_vm3, %v4177_v56, 0.0  ;;  %v12237_v14 = vpop.f32.mrb[46].mxu0 }
0x18c5   :  { %v4221_v18 = vadd.f32 %v4220_v11, %v4219_v3  ;;  %v4065_v60 = vpop.f32.mrb[47].mxu0  ;;  %v4180_v23 = vmul.f32 %v12237_v14, %v12237_v14 }
0x18c6   :  { %v4179_v29 = vmul.f32 %v4065_v60, %v4065_v60 }
0x18c7   :  { %v4223_v63 = vadd.f32 %v4222_v44, %v4221_v18  ;;  %v4226_v26 = vsel %vm217_vm3, %v4180_v23, 0.0 }
0x18c8   :  { %v4224_v24 = vsel %vm217_vm3, %v4179_v29, 0.0  ;;  %v12240_v25 = vpop.f32.mrb[48].mxu0 }
0x18c9   :  { %v4225_v46 = vadd.f32 %v4224_v24, %v4223_v63  ;;  %v4075_v33 = vpop.f32.mrb[49].mxu0  ;;  %v4182_v34 = vmul.f32 %v12240_v25, %v12240_v25 }
0x18ca   :  { %v4181_v37 = vmul.f32 %v4075_v33, %v4075_v33 }
0x18cb   :  { %v4227_v9 = vadd.f32 %v4226_v26, %v4225_v46  ;;  %v4230_v42 = vsel %vm217_vm3, %v4182_v34, 0.0 }
0x18cc   :  { %v4228_v47 = vsel %vm217_vm3, %v4181_v37, 0.0  ;;  %v12243_v48 = vpop.f32.mrb[50].mxu0 }
0x18cd   :  { %v4229_v55 = vadd.f32 %v4228_v47, %v4227_v9  ;;  %v4085_v5 = vpop.f32.mrb[51].mxu0  ;;  %v4184_v30 = vmul.f32 %v12243_v48, %v12243_v48 }
0x18ce   :  { %v4183_v31 = vmul.f32 %v4085_v5, %v4085_v5 }
0x18cf   :  { %v4231_v43 = vadd.f32 %v4230_v42, %v4229_v55  ;;  %v4234_v12 = vsel %vm217_vm3, %v4184_v30, 0.0 }
0x18d0   :  { %v4232_v58 = vsel %vm217_vm3, %v4183_v31, 0.0  ;;  %v12246_v61 = vpop.f32.mrb[52].mxu0 }
0x18d1   :  { %v4233_v45 = vadd.f32 %v4232_v58, %v4231_v43  ;;  %v4095_v51 = vpop.f32.mrb[53].mxu0  ;;  %v4186_v20 = vmul.f32 %v12246_v61, %v12246_v61 }
0x18d2   :  { %v4185_v22 = vmul.f32 %v4095_v51, %v4095_v51 }
0x18d3   :  { %v4235_v28 = vadd.f32 %v4234_v12, %v4233_v45  ;;  %v4238_v56 = vsel %vm217_vm3, %v4186_v20, 0.0 }
0x18d4   :  { %v4236_v32 = vsel %vm217_vm3, %v4185_v22, 0.0  ;;  %v12249_v19 = vpop.f32.mrb[54].mxu0 }
0x18d5   :  { %v4237_v41 = vadd.f32 %v4236_v32, %v4235_v28  ;;  %v4105_v54 = vpop.f32.mrb[55].mxu0  ;;  %v4188_v3 = vmul.f32 %v12249_v19, %v12249_v19 }
0x18d6   :  { %v4187_v11 = vmul.f32 %v4105_v54, %v4105_v54 }
0x18d7   :  { %v4239_v14 = vadd.f32 %v4238_v56, %v4237_v41  ;;  %v4242_v29 = vsel %vm217_vm3, %v4188_v3, 0.0 }
0x18d8   :  { %v4240_v18 = vsel %vm217_vm3, %v4187_v11, 0.0  ;;  %v12252_v60 = vpop.f32.mrb[56].mxu0 }
0x18d9   :  { %v4241_v44 = vadd.f32 %v4240_v18, %v4239_v14  ;;  %v4115_v23 = vpop.f32.mrb[57].mxu0  ;;  %v4190_v63 = vmul.f32 %v12252_v60, %v12252_v60  ;;  %v14982_v14 = vld [vmem:[%s16888_s17] ss:$0 sm:$0xff] }
0x18da   :  { %v4189_v24 = vmul.f32 %v4115_v23, %v4115_v23 }
0x18db   :  { %v4243_v25 = vadd.f32 %v4242_v29, %v4241_v44  ;;  %v4246_v37 = vsel %vm217_vm3, %v4190_v63, 0.0  ;;  %v5194_v44 = vstv %s14985_s1 }
0x18dc   :  { %v4244_v46 = vsel %vm217_vm3, %v4189_v24, 0.0  ;;  %v12255_v33 = vpop.f32.mrb[58].mxu0 }
0x18dd   :  { %v4245_v26 = vadd.f32 %v4244_v46, %v4243_v25  ;;  %v4125_v34 = vpop.f32.mrb[59].mxu0  ;;  %v4192_v9 = vmul.f32 %v12255_v33, %v12255_v33 }
0x18de   :  { %v4191_v47 = vmul.f32 %v4125_v34, %v4125_v34 }
0x18df   :  { %v4247_v48 = vadd.f32 %v4246_v37, %v4245_v26  ;;  %v4250_v31 = vsel %vm217_vm3, %v4192_v9, 0.0 }
0x18e0   :  { %v4248_v55 = vsel %vm217_vm3, %v4191_v47, 0.0  ;;  %v12258_v5 = vpop.f32.mrb[60].mxu0 }
0x18e1   :  { %v4249_v42 = vadd.f32 %v4248_v55, %v4247_v48  ;;  %v4135_v30 = vpop.f32.mrb[61].mxu0  ;;  %v4194_v43 = vmul.f32 %v12258_v5, %v12258_v5  ;;  %v4441_v48 = vmul.f32 %v14937_v50, %v14937_v50 }
0x18e2   :  { %v4193_v58 = vmul.f32 %v4135_v30, %v4135_v30 }
0x18e3   :  { %v4251_v61 = vadd.f32 %v4250_v31, %v4249_v42  ;;  %v4254_v22 = vsel %vm217_vm3, %v4194_v43, 0.0  ;;  %v4442_v55 = vsub.f32 1.0, %v4441_v48  ;;  %v15021_v43 = vld [vmem:[%s16890_s19 + $0x8] sm:$0xff] }
0x18e4   :  { %v4252_v45 = vsel %vm217_vm3, %v4193_v58, 0.0  ;;  %v12261_v51 = vpop.f32.mrb[62].mxu0 }
0x18e5   :  { %v4253_v12 = vadd.f32 %v4252_v45, %v4251_v61  ;;  %v4145_v20 = vpop.f32.mrb[63].mxu0  ;;  %v4196_v28 = vmul.f32 %v12261_v51, %v12261_v51  ;;  %v4453_v5 = vrot.slane %v4442_v55, %v14664_v27  ;;  %v15027_v61 = vld [vmem:[%s16890_s19] sm:$0xff] }
0x18e6   :  { %v4195_v32 = vmul.f32 %v4145_v20, %v4145_v20 }
0x18e7   :  { %v4255_v19 = vadd.f32 %v4254_v22, %v4253_v12  ;;  %v4258_v56 = vsel %vm217_vm3, %v4196_v28, 0.0  ;;  %v4469_v42 = vrot.slane %v4453_v5, %v14664_v27  ;;  %v4461_v31 = vcombine.high %v4453_v5, %v4453_v5  ;;  %v15035_v28 = vld [vmem:[%s16890_s19 + $0x18] sm:$0xff] }
0x18e8   :  { %v4256_v41 = vsel %vm217_vm3, %v4195_v32, 0.0 }
0x18e9   :  { %v4257_v54 = vadd.f32 %v4256_v41, %v4255_v19  ;;  %v4498_v30 = vrot.slane %v4469_v42, %v14620_v49  ;;  %v4483_v45 = vrot.slane %v4461_v31, %v14664_v27  ;;  %v15041_v19 = vld [vmem:[%s16890_s19 + $0x10] sm:$0xff] }
0x18eb   :  { %v14977_v3 = vadd.f32 %v4258_v56, %v4257_v54  ;;  %v4536_v58 = vmul.f32 %v15021_v43, %v4498_v30  ;;  %v4535_v50 = vmul.f32 %v15027_v61, %v4498_v30  ;;  %v4538_v32 = vmul.f32 %v15035_v28, %v4498_v30 }
0x18ec   :  { %v4537_v41 = vmul.f32 %v15041_v19, %v4498_v30  ;;  %v4502_v54 = vrot.slane %v4483_v45, %v14620_v49  ;;  %v4493_v31 = vcombine.high %v4483_v45, %v4483_v45 }
0x1911   :  { %v4436_v11 = vpop.f32.mrb[70].mxu1 }
0x1912   :  { %v4437_v18 = vadd.f32 %v14982_v14, %v4436_v11  ;;  %v12283_v60 = vpop.f32.mrb[71].mxu1 }
0x1914   :  { %13727 = vtanh.f32 %v4437_v18 }
0x191e   :  { %v13728_v23 = vpop.eup %13727 }
0x191f   :  { %v14988_v29 = vmul.f32 %v13728_v23, %v13728_v23  ;;  %v14990_v63 = vmul.f32 %v13728_v23, %v5194_v44  ;;  %v4540_v44 = vmul.f32 %v15021_v43, %v4502_v54  ;;  %v4539_v23 = vmul.f32 %v15027_v61, %v4502_v54 }
0x1921   :  { %v4444_v24 = vsub.f32 1.0, %v14988_v29  ;;  %v14995_v25 = vadd.f32 %v14990_v63, %v14827_v21 }
0x1923   :  { %12349 = vmatmul.mubr.msk.f32.vlgmr.msra.gmra.mrb[64].mxu0 %vm217_vm3, %v14995_v25  ;;  %v4570_v46 = vrot.slane %v4444_v24, %v14620_v49  ;;  %v4589_v21 = vrot.slane %v4444_v24, %v14630_v53  ;;  %v4608_v33 = vrot.slane %v4444_v24, %v14636_v62  ;;  %v4627_v26 = vrot.slane %v4444_v24, %v14640_v0 }
0x1924   :  { %12833 = vmatpush3.bf16.msra.mxu0 %v14556_v36  ;;  %12359 = vmatprep.mubr.msk.f32.mxu0 %vm13869_vm1, %v16903_v2  ;;  %v4646_v34 = vrot.slane %v4444_v24, %v14644_v4  ;;  %v4665_v37 = vrot.slane %v4444_v24, %v14648_v10  ;;  %v4684_v9 = vrot.slane %v4444_v24, %v14652_v13 }
0x1925   :  { %4576 = vbcast.lane.b32.xlu0 %v4570_v46, 264  ;;  %4572 = vbcast.lane.b32.xlu1 %v4570_v46, 256  ;;  %v4703_v47 = vrot.slane %v4444_v24, %v14656_v16  ;;  %v4491_v24 = vcombine.high %v4469_v42, %v4469_v42  ;;  %v4446_v42 = vcombine.high %v4442_v55, %v4442_v55 }
0x1926   :  { %12834 = vmatprep.subr.bf16.mxu0 %v16901_v6  ;;  %v4510_v55 = vrot.slane %v4493_v31, %v14620_v49 }
0x1928   :  { %12836 = vmatpush3.bf16.msra.mxu0 %v14566_v40 }
0x1929   :  { %4584 = vbcast.lane.b32.xlu0 %v4570_v46, 280  ;;  %4580 = vbcast.lane.b32.xlu1 %v4570_v46, 272 }
0x192a   :  { %12838 = vmatprep.subr.bf16.mxu0 %v14588_v57 }
0x192d   :  { %4595 = vbcast.lane.b32.xlu0 %v4589_v21, 264  ;;  %4591 = vbcast.lane.b32.xlu1 %v4589_v21, 256 }
0x1931   :  { %4603 = vbcast.lane.b32.xlu0 %v4589_v21, 280  ;;  %4599 = vbcast.lane.b32.xlu1 %v4589_v21, 272 }
0x1935   :  { %4614 = vbcast.lane.b32.xlu0 %v4608_v33, 264  ;;  %4610 = vbcast.lane.b32.xlu1 %v4608_v33, 256 }
0x1939   :  { %4622 = vbcast.lane.b32.xlu0 %v4608_v33, 280  ;;  %4618 = vbcast.lane.b32.xlu1 %v4608_v33, 272 }
0x193d   :  { %4633 = vbcast.lane.b32.xlu0 %v4627_v26, 264  ;;  %4629 = vbcast.lane.b32.xlu1 %v4627_v26, 256 }
0x1941   :  { %4641 = vbcast.lane.b32.xlu0 %v4627_v26, 280  ;;  %4637 = vbcast.lane.b32.xlu1 %v4627_v26, 272 }
0x1945   :  { %4652 = vbcast.lane.b32.xlu0 %v4646_v34, 264  ;;  %4648 = vbcast.lane.b32.xlu1 %v4646_v34, 256 }
0x1949   :  { %4660 = vbcast.lane.b32.xlu0 %v4646_v34, 280  ;;  %4656 = vbcast.lane.b32.xlu1 %v4646_v34, 272  ;;  %v4541_v34 = vmul.f32 %v15041_v19, %v4502_v54 }
0x194d   :  { %4671 = vbcast.lane.b32.xlu0 %v4665_v37, 264  ;;  %4667 = vbcast.lane.b32.xlu1 %v4665_v37, 256 }
0x1951   :  { %4679 = vbcast.lane.b32.xlu0 %v4665_v37, 280  ;;  %4675 = vbcast.lane.b32.xlu1 %v4665_v37, 272  ;;  %v4506_v37 = vrot.slane %v4491_v24, %v14620_v49 }
0x1953   :  { %v4543_v30 = vmul.f32 %v15027_v61, %v4506_v37 }
0x1955   :  { %4690 = vbcast.lane.b32.xlu0 %v4684_v9, 264  ;;  %4686 = vbcast.lane.b32.xlu1 %v4684_v9, 256 }
0x1959   :  { %4698 = vbcast.lane.b32.xlu0 %v4684_v9, 280  ;;  %4694 = vbcast.lane.b32.xlu1 %v4684_v9, 272 }
0x195d   :  { %4709 = vbcast.lane.b32.xlu0 %v4703_v47, 264  ;;  %4705 = vbcast.lane.b32.xlu1 %v4703_v47, 256 }
0x1961   :  { %4717 = vbcast.lane.b32.xlu0 %v4703_v47, 280  ;;  %4713 = vbcast.lane.b32.xlu1 %v4703_v47, 272 }
0x1997   :  { %v4577_v51 = vpop.permute.xlu0 %4576  ;;  %v4573_v12 = vpop.permute.xlu1 %4572 }
0x1998   :  { %v4720_v20 = vmul.f32 %v4577_v51, %v4536_v58  ;;  %v4719_v22 = vmul.f32 %v4573_v12, %v4535_v50 }
0x199a   :  { %12292 = vmatprep.mubr.msk.f32.mxu1 %vm217_vm3, %v4719_v22  ;;  %v4545_v22 = vmul.f32 %v15041_v19, %v4506_v37 }
0x199b   :  { %v4585_v56 = vpop.permute.xlu0 %4584  ;;  %12293 = vmatmul.mubr.msk.f32.vlgmr.msra.gmra.mrb[72].mxu1 %vm217_vm3, %v4720_v20  ;;  %v4581_v11 = vpop.permute.xlu1 %4580  ;;  %v4546_v20 = vmul.f32 %v15035_v28, %v4506_v37 }
0x199c   :  { %v4722_v18 = vmul.f32 %v4585_v56, %v4538_v32  ;;  %v4721_v60 = vmul.f32 %v4581_v11, %v4537_v41  ;;  %12847 = vmatpush3.bf16.msra.mxu1 %v14515_v1  ;;  %v4542_v1 = vmul.f32 %v15035_v28, %v4502_v54  ;;  %v4460_v32 = vrot.slane %v4446_v42, %v14664_v27 }
0x199d   :  { %12848 = vmatprep.subr.bf16.mxu1 %v16901_v6  ;;  %v4548_v11 = vmul.f32 %v15021_v43, %v4510_v55 }
0x199e   :  { %12295 = vmatprep.mubr.msk.f32.mxu1 %vm217_vm3, %v4721_v60  ;;  %v4476_v60 = vrot.slane %v4460_v32, %v14664_v27 }
0x199f   :  { %v4596_v46 = vpop.permute.xlu0 %4595  ;;  %12296 = vmatmul.mubr.msk.f32.gmra.mrb[74].mxu1 %vm217_vm3, %v4722_v18  ;;  %v4592_v21 = vpop.permute.xlu1 %4591  ;;  %v4547_v18 = vmul.f32 %v15027_v61, %v4510_v55 }
0x19a0   :  { %v4724_v33 = vmul.f32 %v4596_v46, %v4540_v44  ;;  %v4723_v26 = vmul.f32 %v4592_v21, %v4539_v23  ;;  %12850 = vmatpush3.bf16.msra.mxu1 %v14538_v7  ;;  %v4544_v7 = vmul.f32 %v15021_v43, %v4506_v37  ;;  %v4550_v21 = vmul.f32 %v15035_v28, %v4510_v55 }
0x19a1   :  { %12851 = vmatprep.subr.bf16.mxu1 %v16901_v6 }
0x19a2   :  { %12298 = vmatprep.mubr.msk.f32.mxu1 %vm217_vm3, %v4723_v26  ;;  %v4514_v26 = vrot.slane %v4476_v60, %v14620_v49 }
0x19a3   :  { %v4604_v9 = vpop.permute.xlu0 %4603  ;;  %12299 = vmatmul.mubr.msk.f32.gmra.mrb[76].mxu1 %vm217_vm3, %v4724_v33  ;;  %v4600_v47 = vpop.permute.xlu1 %4599  ;;  %v4549_v33 = vmul.f32 %v15041_v19, %v4510_v55 }
0x19a4   :  { %v4726_v48 = vmul.f32 %v4604_v9, %v4542_v1  ;;  %v4725_v5 = vmul.f32 %v4600_v47, %v4541_v34  ;;  %v4462_v1 = vcombine.high %v4460_v32, %v4460_v32 }
0x19a6   :  { %12301 = vmatprep.mubr.msk.f32.mxu1 %vm217_vm3, %v4725_v5  ;;  %v4551_v5 = vmul.f32 %v15027_v61, %v4514_v26  ;;  %v4490_v42 = vrot.slane %v4462_v1, %v14664_v27 }
0x19a7   :  { %v4615_v58 = vpop.permute.xlu0 %4614  ;;  %12302 = vmatmul.mubr.msk.f32.gmra.mrb[78].mxu1 %vm217_vm3, %v4726_v48  ;;  %v4611_v50 = vpop.permute.xlu1 %4610  ;;  %v4552_v48 = vmul.f32 %v15021_v43, %v4514_v26 }
0x19a8   :  { %v4728_v51 = vmul.f32 %v4615_v58, %v4544_v7  ;;  %v4727_v12 = vmul.f32 %v4611_v50, %v4543_v30  ;;  %v4554_v50 = vmul.f32 %v15035_v28, %v4514_v26 }
0x19aa   :  { %12304 = vmatprep.mubr.msk.f32.mxu1 %vm217_vm3, %v4727_v12  ;;  %v4518_v12 = vrot.slane %v4490_v42, %v14620_v49 }
0x19ab   :  { %v4623_v41 = vpop.permute.xlu0 %4622  ;;  %12305 = vmatmul.mubr.msk.f32.gmra.mrb[80].mxu1 %vm217_vm3, %v4728_v51  ;;  %v4619_v45 = vpop.permute.xlu1 %4618  ;;  %v4553_v51 = vmul.f32 %v15041_v19, %v4514_v26 }
0x19ac   :  { %v4730_v54 = vmul.f32 %v4623_v41, %v4546_v20  ;;  %v4729_v56 = vmul.f32 %v4619_v45, %v4545_v22  ;;  %v4556_v41 = vmul.f32 %v15021_v43, %v4518_v12  ;;  %v4555_v45 = vmul.f32 %v15027_v61, %v4518_v12 }
0x19ae   :  { %12307 = vmatprep.mubr.msk.f32.mxu1 %vm217_vm3, %v4729_v56 }
0x19af   :  { %v4634_v44 = vpop.permute.xlu0 %4633  ;;  %12308 = vmatmul.mubr.msk.f32.gmra.mrb[82].mxu1 %vm217_vm3, %v4730_v54  ;;  %v4630_v23 = vpop.permute.xlu1 %4629  ;;  %v4492_v54 = vcombine.high %v4476_v60, %v4476_v60 }
0x19b0   :  { %v4732_v24 = vmul.f32 %v4634_v44, %v4548_v11  ;;  %v4731_v46 = vmul.f32 %v4630_v23, %v4547_v18  ;;  %v4558_v23 = vmul.f32 %v15035_v28, %v4518_v12 }
0x19b2   :  { %12310 = vmatprep.mubr.msk.f32.mxu1 %vm217_vm3, %v4731_v46  ;;  %v4522_v46 = vrot.slane %v4492_v54, %v14620_v49 }
0x19b3   :  { %v4642_v34 = vpop.permute.xlu0 %4641  ;;  %12311 = vmatmul.mubr.msk.f32.gmra.mrb[84].mxu1 %vm217_vm3, %v4732_v24  ;;  %v4638_v37 = vpop.permute.xlu1 %4637  ;;  %v4557_v24 = vmul.f32 %v15041_v19, %v4518_v12 }
0x19b4   :  { %v4734_v9 = vmul.f32 %v4642_v34, %v4550_v21  ;;  %v4733_v47 = vmul.f32 %v4638_v37, %v4549_v33  ;;  %v4560_v1 = vmul.f32 %v15021_v43, %v4522_v46  ;;  %v4559_v34 = vmul.f32 %v15027_v61, %v4522_v46 }
0x19b5   :  { %v4494_v37 = vcombine.high %v4490_v42, %v4490_v42 }
0x19b6   :  { %12313 = vmatprep.mubr.msk.f32.mxu1 %vm217_vm3, %v4733_v47 }
0x19b7   :  { %v4653_v7 = vpop.permute.xlu0 %4652  ;;  %12314 = vmatmul.mubr.msk.f32.gmra.mrb[86].mxu1 %vm217_vm3, %v4734_v9  ;;  %v4649_v30 = vpop.permute.xlu1 %4648 }
0x19b8   :  { %v4736_v31 = vmul.f32 %v4653_v7, %v4552_v48  ;;  %v4735_v58 = vmul.f32 %v4649_v30, %v4551_v5  ;;  %v4562_v7 = vmul.f32 %v15035_v28, %v4522_v46  ;;  %v4561_v30 = vmul.f32 %v15041_v19, %v4522_v46 }
0x19ba   :  { %12316 = vmatprep.mubr.msk.f32.mxu1 %vm217_vm3, %v4735_v58 }
0x19bb   :  { %v4661_v20 = vpop.permute.xlu0 %4660  ;;  %12317 = vmatmul.mubr.msk.f32.gmra.mrb[88].mxu1 %vm217_vm3, %v4736_v31  ;;  %v4657_v22 = vpop.permute.xlu1 %4656  ;;  %v4526_v31 = vrot.slane %v4494_v37, %v14620_v49 }
0x19bc   :  { %v4738_v55 = vmul.f32 %v4661_v20, %v4554_v50  ;;  %v4737_v32 = vmul.f32 %v4657_v22, %v4553_v51 }
0x19bd   :  { %v4564_v12 = vmul.f32 %v15021_v43, %v4526_v31  ;;  %v4563_v20 = vmul.f32 %v15027_v61, %v4526_v31  ;;  %v4565_v54 = vmul.f32 %v15041_v19, %v4526_v31 }
0x19be   :  { %12319 = vmatprep.mubr.msk.f32.mxu1 %vm217_vm3, %v4737_v32 }
0x19bf   :  { %v4672_v56 = vpop.permute.xlu0 %4671  ;;  %12320 = vmatmul.mubr.msk.f32.gmra.mrb[90].mxu1 %vm217_vm3, %v4738_v55  ;;  %v4668_v11 = vpop.permute.xlu1 %4667 }
0x19c0   :  { %v4740_v18 = vmul.f32 %v4672_v56, %v4556_v41  ;;  %v4739_v44 = vmul.f32 %v4668_v11, %v4555_v45  ;;  %v4566_v45 = vmul.f32 %v15035_v28, %v4526_v31 }
0x19c2   :  { %12322 = vmatprep.mubr.msk.f32.mxu1 %vm217_vm3, %v4739_v44 }
0x19c3   :  { %v4680_v21 = vpop.permute.xlu0 %4679  ;;  %12323 = vmatmul.mubr.msk.f32.gmra.mrb[92].mxu1 %vm217_vm3, %v4740_v18  ;;  %v4676_v33 = vpop.permute.xlu1 %4675 }
0x19c4   :  { %v4742_v26 = vmul.f32 %v4680_v21, %v4558_v23  ;;  %v4741_v60 = vmul.f32 %v4676_v33, %v4557_v24 }
0x19c6   :  { %12325 = vmatprep.mubr.msk.f32.mxu1 %vm217_vm3, %v4741_v60 }
0x19c7   :  { %v4691_v9 = vpop.permute.xlu0 %4690  ;;  %12326 = vmatmul.mubr.msk.f32.gmra.mrb[94].mxu1 %vm217_vm3, %v4742_v26  ;;  %v4687_v47 = vpop.permute.xlu1 %4686 }
0x19c8   :  { %v4744_v48 = vmul.f32 %v4691_v9, %v4560_v1  ;;  %v4743_v5 = vmul.f32 %v4687_v47, %v4559_v34 }
0x19ca   :  { %12328 = vmatprep.mubr.msk.f32.mxu1 %vm217_vm3, %v4743_v5 }
0x19cb   :  { %v4699_v58 = vpop.permute.xlu0 %4698  ;;  %12329 = vmatmul.mubr.msk.f32.gmra.mrb[96].mxu1 %vm217_vm3, %v4744_v48  ;;  %v4695_v50 = vpop.permute.xlu1 %4694 }
0x19cc   :  { %v4746_v51 = vmul.f32 %v4699_v58, %v4562_v7  ;;  %v4745_v42 = vmul.f32 %v4695_v50, %v4561_v30 }
0x19ce   :  { %12331 = vmatprep.mubr.msk.f32.mxu1 %vm217_vm3, %v4745_v42 }
0x19cf   :  { %v4710_v22 = vpop.permute.xlu0 %4709  ;;  %12332 = vmatmul.mubr.msk.f32.gmra.mrb[98].mxu1 %vm217_vm3, %v4746_v51  ;;  %v4706_v55 = vpop.permute.xlu1 %4705 }
0x19d0   :  { %v4748_v32 = vmul.f32 %v4710_v22, %v4564_v12  ;;  %v4747_v41 = vmul.f32 %v4706_v55, %v4563_v20 }
0x19d2   :  { %12334 = vmatprep.mubr.msk.f32.mxu1 %vm217_vm3, %v4747_v41 }
0x19d3   :  { %v4718_v56 = vpop.permute.xlu0 %4717  ;;  %12335 = vmatmul.mubr.msk.f32.gmra.mrb[100].mxu1 %vm217_vm3, %v4748_v32  ;;  %v4714_v11 = vpop.permute.xlu1 %4713 }
0x19d4   :  { %v4750_v18 = vmul.f32 %v4718_v56, %v4566_v45  ;;  %v4749_v44 = vmul.f32 %v4714_v11, %v4565_v54 }
0x19d6   :  { %12337 = vmatprep.mubr.msk.f32.mxu1 %vm217_vm3, %v4749_v44 }
0x19d7   :  { %12338 = vmatmul.mubr.msk.f32.gmra.mrb[102].mxu1 %vm217_vm3, %v4750_v18 }
0x19d8   :  { %12426 = vmatprep.mubr.msk.f32.mxu1 %vm13869_vm1, %v16903_v2 }
0x19f6   :  { %v5280_v23 = vpop.f32.mrb[64].mxu0 }
0x19f7   :  { %v5281_v24 = vadd.f32 %v14934_v39, %v5280_v23  ;;  %v12350_v46 = vpop.f32.mrb[65].mxu0 }
0x19f9   :  { %13729 = vtanh.f32 %v5281_v24 }
0x1a03   :  { %v15120_v21 = vpop.eup %13729 }
0x1a04   :  { %12360 = vmatmul.mubr.msk.f32.vlgmr.msra.gmra.mrb[66].mxu0 %vm217_vm3, %v15120_v21 }
0x1a05   :  { %12840 = vmatpush3.bf16.msra.mxu0 %v14588_v57 }
0x1a06   :  { %12842 = vmatprep.subr.bf16.mxu0 %v14593_v59 }
0x1a09   :  { %12844 = vmatpush3.bf16.msra.mxu0 %v14593_v59 }
0x1a6e   :  { %v12294_v33 = vpop.f32.mrb[72].mxu1 }
0x1a6f   :  { %v5084_v26 = vmul.f32 %v12294_v33, %v12294_v33  ;;  %v4913_v60 = vpop.f32.mrb[73].mxu1 }
0x1a70   :  { %v5083_v1 = vmul.f32 %v4913_v60, %v4913_v60 }
0x1a71   :  { %v5116_v34 = vsel %vm217_vm3, %v5084_v26, 0.0 }
0x1a72   :  { %v5115_v39 = vsel %vm217_vm3, %v5083_v1, 0.0  ;;  %v12297_v37 = vpop.f32.mrb[74].mxu1 }
0x1a73   :  { %v5117_v9 = vadd.f32 %v5116_v34, %v5115_v39  ;;  %v4923_v47 = vpop.f32.mrb[75].mxu1  ;;  %v5086_v48 = vmul.f32 %v12297_v37, %v12297_v37 }
0x1a74   :  { %v5085_v5 = vmul.f32 %v4923_v47, %v4923_v47 }
0x1a75   :  { %v5120_v50 = vsel %vm217_vm3, %v5086_v48, 0.0 }
0x1a76   :  { %v5118_v7 = vsel %vm217_vm3, %v5085_v5, 0.0  ;;  %v12300_v30 = vpop.f32.mrb[76].mxu1 }
0x1a77   :  { %v5119_v31 = vadd.f32 %v5118_v7, %v5117_v9  ;;  %v4933_v58 = vpop.f32.mrb[77].mxu1  ;;  %v5088_v51 = vmul.f32 %v12300_v30, %v12300_v30 }
0x1a78   :  { %v5087_v42 = vmul.f32 %v4933_v58, %v4933_v58 }
0x1a79   :  { %v5121_v12 = vadd.f32 %v5120_v50, %v5119_v31  ;;  %v5124_v41 = vsel %vm217_vm3, %v5088_v51, 0.0 }
0x1a7a   :  { %v5122_v20 = vsel %vm217_vm3, %v5087_v42, 0.0  ;;  %v12303_v22 = vpop.f32.mrb[78].mxu1 }
0x1a7b   :  { %v5123_v55 = vadd.f32 %v5122_v20, %v5121_v12  ;;  %v4943_v32 = vpop.f32.mrb[79].mxu1  ;;  %v5090_v45 = vmul.f32 %v12303_v22, %v12303_v22 }
0x1a7c   :  { %v5089_v54 = vmul.f32 %v4943_v32, %v4943_v32 }
0x1a7d   :  { %v5125_v56 = vadd.f32 %v5124_v41, %v5123_v55  ;;  %v5128_v24 = vsel %vm217_vm3, %v5090_v45, 0.0 }
0x1a7e   :  { %v5126_v11 = vsel %vm217_vm3, %v5089_v54, 0.0  ;;  %v12306_v18 = vpop.f32.mrb[80].mxu1 }
0x1a7f   :  { %v5127_v44 = vadd.f32 %v5126_v11, %v5125_v56  ;;  %v4953_v23 = vpop.f32.mrb[81].mxu1  ;;  %v5092_v46 = vmul.f32 %v12306_v18, %v12306_v18 }
0x1a80   :  { %v5091_v33 = vmul.f32 %v4953_v23, %v4953_v23 }
0x1a81   :  { %v5129_v26 = vadd.f32 %v5128_v24, %v5127_v44  ;;  %v5132_v37 = vsel %vm217_vm3, %v5092_v46, 0.0 }
0x1a82   :  { %v5130_v60 = vsel %vm217_vm3, %v5091_v33, 0.0  ;;  %v12309_v1 = vpop.f32.mrb[82].mxu1 }
0x1a83   :  { %v5131_v34 = vadd.f32 %v5130_v60, %v5129_v26  ;;  %v4963_v39 = vpop.f32.mrb[83].mxu1  ;;  %v5094_v9 = vmul.f32 %v12309_v1, %v12309_v1 }
0x1a84   :  { %v5093_v47 = vmul.f32 %v4963_v39, %v4963_v39 }
0x1a85   :  { %v5133_v48 = vadd.f32 %v5132_v37, %v5131_v34  ;;  %v5136_v58 = vsel %vm217_vm3, %v5094_v9, 0.0 }
0x1a86   :  { %v5134_v5 = vsel %vm217_vm3, %v5093_v47, 0.0  ;;  %v12312_v7 = vpop.f32.mrb[84].mxu1 }
0x1a87   :  { %v5135_v30 = vadd.f32 %v5134_v5, %v5133_v48  ;;  %v4973_v31 = vpop.f32.mrb[85].mxu1  ;;  %v5096_v50 = vmul.f32 %v12312_v7, %v12312_v7 }
0x1a88   :  { %v5095_v51 = vmul.f32 %v4973_v31, %v4973_v31 }
0x1a89   :  { %v5137_v42 = vadd.f32 %v5136_v58, %v5135_v30  ;;  %v5140_v32 = vsel %vm217_vm3, %v5096_v50, 0.0 }
0x1a8a   :  { %v5138_v12 = vsel %vm217_vm3, %v5095_v51, 0.0  ;;  %v12315_v20 = vpop.f32.mrb[86].mxu1 }
0x1a8b   :  { %v5139_v22 = vadd.f32 %v5138_v12, %v5137_v42  ;;  %v4983_v55 = vpop.f32.mrb[87].mxu1  ;;  %v5098_v41 = vmul.f32 %v12315_v20, %v12315_v20 }
0x1a8c   :  { %v5097_v45 = vmul.f32 %v4983_v55, %v4983_v55 }
0x1a8d   :  { %v5141_v54 = vadd.f32 %v5140_v32, %v5139_v22  ;;  %v5144_v23 = vsel %vm217_vm3, %v5098_v41, 0.0 }
0x1a8e   :  { %v5142_v56 = vsel %vm217_vm3, %v5097_v45, 0.0  ;;  %v12318_v11 = vpop.f32.mrb[88].mxu1 }
0x1a8f   :  { %v5143_v18 = vadd.f32 %v5142_v56, %v5141_v54  ;;  %v4993_v44 = vpop.f32.mrb[89].mxu1  ;;  %v5100_v24 = vmul.f32 %v12318_v11, %v12318_v11 }
0x1a90   :  { %v5099_v46 = vmul.f32 %v4993_v44, %v4993_v44 }
0x1a91   :  { %v5145_v33 = vadd.f32 %v5144_v23, %v5143_v18  ;;  %v5148_v39 = vsel %vm217_vm3, %v5100_v24, 0.0 }
0x1a92   :  { %v5146_v26 = vsel %vm217_vm3, %v5099_v46, 0.0  ;;  %v12321_v60 = vpop.f32.mrb[90].mxu1 }
0x1a93   :  { %v5147_v1 = vadd.f32 %v5146_v26, %v5145_v33  ;;  %v5003_v34 = vpop.f32.mrb[91].mxu1  ;;  %v5102_v37 = vmul.f32 %v12321_v60, %v12321_v60 }
0x1a94   :  { %v5101_v9 = vmul.f32 %v5003_v34, %v5003_v34 }
0x1a95   :  { %v5149_v47 = vadd.f32 %v5148_v39, %v5147_v1  ;;  %v5152_v31 = vsel %vm217_vm3, %v5102_v37, 0.0 }
0x1a96   :  { %v5150_v48 = vsel %vm217_vm3, %v5101_v9, 0.0  ;;  %v12324_v5 = vpop.f32.mrb[92].mxu1 }
0x1a97   :  { %v5151_v7 = vadd.f32 %v5150_v48, %v5149_v47  ;;  %v5013_v30 = vpop.f32.mrb[93].mxu1  ;;  %v5104_v58 = vmul.f32 %v12324_v5, %v12324_v5 }
0x1a98   :  { %v5103_v50 = vmul.f32 %v5013_v30, %v5013_v30 }
0x1a99   :  { %v5153_v51 = vadd.f32 %v5152_v31, %v5151_v7  ;;  %v5156_v55 = vsel %vm217_vm3, %v5104_v58, 0.0 }
0x1a9a   :  { %v5154_v42 = vsel %vm217_vm3, %v5103_v50, 0.0  ;;  %v12327_v12 = vpop.f32.mrb[94].mxu1 }
0x1a9b   :  { %v5155_v20 = vadd.f32 %v5154_v42, %v5153_v51  ;;  %v5023_v22 = vpop.f32.mrb[95].mxu1  ;;  %v5106_v32 = vmul.f32 %v12327_v12, %v12327_v12 }
0x1a9c   :  { %v5105_v41 = vmul.f32 %v5023_v22, %v5023_v22 }
0x1a9d   :  { %v5157_v45 = vadd.f32 %v5156_v55, %v5155_v20  ;;  %v5160_v44 = vsel %vm217_vm3, %v5106_v32, 0.0 }
0x1a9e   :  { %v5158_v54 = vsel %vm217_vm3, %v5105_v41, 0.0  ;;  %v12330_v56 = vpop.f32.mrb[96].mxu1 }
0x1a9f   :  { %v5159_v11 = vadd.f32 %v5158_v54, %v5157_v45  ;;  %v5033_v18 = vpop.f32.mrb[97].mxu1  ;;  %v5108_v23 = vmul.f32 %v12330_v56, %v12330_v56 }
0x1aa0   :  { %v5107_v24 = vmul.f32 %v5033_v18, %v5033_v18 }
0x1aa1   :  { %v5161_v46 = vadd.f32 %v5160_v44, %v5159_v11  ;;  %v5164_v34 = vsel %vm217_vm3, %v5108_v23, 0.0 }
0x1aa2   :  { %v5162_v33 = vsel %vm217_vm3, %v5107_v24, 0.0  ;;  %v12333_v26 = vpop.f32.mrb[98].mxu1  ;;  %v6112_v24 = vstv %s15162_s8 }
0x1aa3   :  { %v5163_v60 = vadd.f32 %v5162_v33, %v5161_v46  ;;  %v5043_v1 = vpop.f32.mrb[99].mxu1  ;;  %v5110_v39 = vmul.f32 %v12333_v26, %v12333_v26 }
0x1aa4   :  { %v5109_v37 = vmul.f32 %v5043_v1, %v5043_v1 }
0x1aa5   :  { %v5165_v9 = vadd.f32 %v5164_v34, %v5163_v60  ;;  %v5168_v30 = vsel %vm217_vm3, %v5110_v39, 0.0 }
0x1aa6   :  { %v5166_v47 = vsel %vm217_vm3, %v5109_v37, 0.0  ;;  %v12336_v48 = vpop.f32.mrb[100].mxu1  ;;  %v7046_v37 = vld [vmem:[%s16891_s20 + $0x8] sm:$0xff] }
0x1aa7   :  { %v5167_v5 = vadd.f32 %v5166_v47, %v5165_v9  ;;  %v5053_v7 = vpop.f32.mrb[101].mxu1  ;;  %v5112_v31 = vmul.f32 %v12336_v48, %v12336_v48  ;;  %v7054_v9 = vld [vmem:[%s16891_s20 + $0x48] sm:$0xff] }
0x1aa8   :  { %v5111_v58 = vmul.f32 %v5053_v7, %v5053_v7  ;;  %v15192_v48 = vpack.c.bf16 %v7054_v9, %v7046_v37  ;;  %v5359_v7 = vmul.f32 %v15120_v21, %v15120_v21 }
0x1aa9   :  { %v5169_v50 = vadd.f32 %v5168_v30, %v5167_v5  ;;  %v5172_v22 = vsel %vm217_vm3, %v5112_v31, 0.0 }
0x1aaa   :  { %v5170_v51 = vsel %vm217_vm3, %v5111_v58, 0.0  ;;  %v12339_v42 = vpop.f32.mrb[102].mxu1  ;;  %17073 = vst [vmem:[#allocation9_spill] sm:$0xff] %v15192_v48  ;;  %12866 = vmatprep.subr.bf16.mxu0 %v15192_v48  ;;  %v15202_v30 = vsub.f32 1.0, %v5359_v7 }
0x1aab   :  { %v5171_v12 = vadd.f32 %v5170_v51, %v5169_v50  ;;  %v5063_v20 = vpop.f32.mrb[103].mxu1  ;;  %v5114_v55 = vmul.f32 %v12339_v42, %v12339_v42  ;;  %v7045_v42 = vld [vmem:[%s16891_s20] sm:$0xff] }
0x1aac   :  { %v5113_v32 = vmul.f32 %v5063_v20, %v5063_v20  ;;  %v5371_v31 = vrot.slane %v15202_v30, %v14664_v27 }
0x1aad   :  { %v5173_v41 = vadd.f32 %v5172_v22, %v5171_v12  ;;  %v5176_v56 = vsel %vm217_vm3, %v5114_v55, 0.0  ;;  %v7053_v12 = vld [vmem:[%s16891_s20 + $0x40] sm:$0xff]  ;;  %v7062_v55 = vld [vmem:[%s16891_s20 + $0x88] sm:$0xff] }
0x1aae   :  { %v5174_v45 = vsel %vm217_vm3, %v5113_v32, 0.0  ;;  %v5387_v58 = vrot.slane %v5371_v31, %v14664_v27  ;;  %v5379_v51 = vcombine.high %v5371_v31, %v5371_v31  ;;  %v7070_v32 = vld [vmem:[%s16891_s20 + $0xc8] sm:$0xff] }
0x1aaf   :  { %v5175_v54 = vadd.f32 %v5174_v45, %v5173_v41 }
0x1ab0   :  { %v5416_v50 = vrot.slane %v5387_v58, %v14620_v49  ;;  %v5401_v22 = vrot.slane %v5379_v51, %v14664_v27  ;;  %v5409_v7 = vcombine.high %v5387_v58, %v5387_v58 }
0x1ab1   :  { %v15159_v11 = vadd.f32 %v5176_v56, %v5175_v54 }
0x1ab2   :  { %v5454_v21 = vmul.f32 %v15021_v43, %v5416_v50  ;;  %v5453_v20 = vmul.f32 %v15027_v61, %v5416_v50 }
0x1ad7   :  { %v5354_v18 = vpop.f32.mrb[66].mxu0 }
0x1ad8   :  { %v5355_v44 = vadd.f32 %v14982_v14, %v5354_v18  ;;  %v12361_v23 = vpop.f32.mrb[67].mxu0  ;;  %v15223_v18 = vpack.c.bf16 %v7053_v12, %v7045_v42 }
0x1ad9   :  { %v7061_v23 = vld [vmem:[%s16891_s20 + $0x80] sm:$0xff] }
0x1ada   :  { %13731 = vtanh.f32 %v5355_v44  ;;  %17074 = vst [vmem:[#allocation10_spill] sm:$0xff] %v15223_v18  ;;  %v15225_v44 = vpack.c.bf16 %v7070_v32, %v7062_v55 }
0x1adc   :  { %17075 = vst [vmem:[#allocation11_spill] sm:$0xff] %v15225_v44 }
0x1ae4   :  { %v13732_v46 = vpop.eup %13731 }
0x1ae5   :  { %v15165_v33 = vmul.f32 %v13732_v46, %v13732_v46  ;;  %v15167_v26 = vmul.f32 %v13732_v46, %v6112_v24  ;;  %v7069_v24 = vld [vmem:[%s16891_s20 + $0xc0] sm:$0xff]  ;;  %v5456_v46 = vmul.f32 %v15035_v28, %v5416_v50 }
0x1ae6   :  { %v15245_v37 = vpack.c.bf16 %v7069_v24, %v7061_v23  ;;  %v5411_v23 = vcombine.high %v5401_v22, %v5401_v22 }
0x1ae7   :  { %v5362_v60 = vsub.f32 1.0, %v15165_v33  ;;  %v6127_v1 = vadd.f32 %v15167_v26, %v14995_v25 }
0x1ae8   :  { %17076 = vst [vmem:[#allocation12_spill] sm:$0xff] %v15245_v37 }
0x1ae9   :  { %12427 = vmatmul.mubr.msk.f32.vlgmr.msra.gmra.mrb[104].mxu1 %vm217_vm3, %v6127_v1  ;;  %v5488_v14 = vrot.slane %v5362_v60, %v14620_v49  ;;  %v5507_v25 = vrot.slane %v5362_v60, %v14630_v53  ;;  %v5545_v34 = vrot.slane %v5362_v60, %v14640_v0  ;;  %v5583_v39 = vrot.slane %v5362_v60, %v14648_v10 }
0x1aea   :  { %12853 = vmatpush3.bf16.msra.mxu1 %v14556_v36  ;;  %12437 = vmatprep.mubr.msk.f32.mxu1 %vm13869_vm1, %v16903_v2  ;;  %v5526_v36 = vrot.slane %v5362_v60, %v14636_v62  ;;  %v5602_v47 = vrot.slane %v5362_v60, %v14652_v13  ;;  %v5621_v5 = vrot.slane %v5362_v60, %v14656_v16 }
0x1aeb   :  { %5494 = vbcast.lane.b32.xlu0 %v5488_v14, 264  ;;  %5490 = vbcast.lane.b32.xlu1 %v5488_v14, 256  ;;  %v5420_v1 = vrot.slane %v5401_v22, %v14620_v49 }
0x1aec   :  { %12854 = vmatprep.subr.bf16.mxu1 %v16901_v6  ;;  %v7100_v6 = vld [vmem:[%s16893_s22 + $0xb0] sm:$0xff] }
0x1aed   :  { %v5460_v12 = vmul.f32 %v15035_v28, %v5420_v1 }
0x1aee   :  { %12856 = vmatpush3.bf16.msra.mxu1 %v14566_v40  ;;  %v5564_v40 = vrot.slane %v5362_v60, %v14644_v4  ;;  %v5455_v60 = vmul.f32 %v15041_v19, %v5416_v50 }
0x1aef   :  { %5502 = vbcast.lane.b32.xlu0 %v5488_v14, 280  ;;  %5498 = vbcast.lane.b32.xlu1 %v5488_v14, 272  ;;  %v7048_v14 = vld [vmem:[%s16891_s20 + $0x18] sm:$0xff] }
0x1af0   :  { %12858 = vmatprep.subr.bf16.mxu1 %v14588_v57 }
0x1af3   :  { %5513 = vbcast.lane.b32.xlu0 %v5507_v25, 264  ;;  %5509 = vbcast.lane.b32.xlu1 %v5507_v25, 256 }
0x1af7   :  { %5521 = vbcast.lane.b32.xlu0 %v5507_v25, 280  ;;  %5517 = vbcast.lane.b32.xlu1 %v5507_v25, 272  ;;  %v7056_v25 = vld [vmem:[%s16891_s20 + $0x58] sm:$0xff] }
0x1af8   :  { %v15248_v9 = vpack.c.bf16 %v7056_v25, %v7048_v14 }
0x1afa   :  { %17077 = vst [vmem:[#allocation13_spill] sm:$0xff] %v15248_v9 }
0x1afb   :  { %5532 = vbcast.lane.b32.xlu0 %v5526_v36, 264  ;;  %5528 = vbcast.lane.b32.xlu1 %v5526_v36, 256 }
0x1aff   :  { %5540 = vbcast.lane.b32.xlu0 %v5526_v36, 280  ;;  %5536 = vbcast.lane.b32.xlu1 %v5526_v36, 272 }
0x1b03   :  { %5551 = vbcast.lane.b32.xlu0 %v5545_v34, 264  ;;  %5547 = vbcast.lane.b32.xlu1 %v5545_v34, 256 }
0x1b07   :  { %5559 = vbcast.lane.b32.xlu0 %v5545_v34, 280  ;;  %5555 = vbcast.lane.b32.xlu1 %v5545_v34, 272 }
0x1b0b   :  { %5570 = vbcast.lane.b32.xlu0 %v5564_v40, 264  ;;  %5566 = vbcast.lane.b32.xlu1 %v5564_v40, 256 }
0x1b0f   :  { %5578 = vbcast.lane.b32.xlu0 %v5564_v40, 280  ;;  %5574 = vbcast.lane.b32.xlu1 %v5564_v40, 272 }
0x1b13   :  { %5589 = vbcast.lane.b32.xlu0 %v5583_v39, 264  ;;  %5585 = vbcast.lane.b32.xlu1 %v5583_v39, 256 }
0x1b17   :  { %5597 = vbcast.lane.b32.xlu0 %v5583_v39, 280  ;;  %5593 = vbcast.lane.b32.xlu1 %v5583_v39, 272 }
0x1b1b   :  { %5608 = vbcast.lane.b32.xlu0 %v5602_v47, 264  ;;  %5604 = vbcast.lane.b32.xlu1 %v5602_v47, 256 }
0x1b1f   :  { %5616 = vbcast.lane.b32.xlu0 %v5602_v47, 280  ;;  %5612 = vbcast.lane.b32.xlu1 %v5602_v47, 272  ;;  %v5458_v47 = vmul.f32 %v15021_v43, %v5420_v1 }
0x1b23   :  { %5627 = vbcast.lane.b32.xlu0 %v5621_v5, 264  ;;  %5623 = vbcast.lane.b32.xlu1 %v5621_v5, 256 }
0x1b27   :  { %5635 = vbcast.lane.b32.xlu0 %v5621_v5, 280  ;;  %5631 = vbcast.lane.b32.xlu1 %v5621_v5, 272  ;;  %v5457_v5 = vmul.f32 %v15027_v61, %v5420_v1 }
0x1b2b   :  { %3362 = vrot.lane.b32.xlu0 %v14613_v38, %s13873_s9  ;;  %3359 = vrot.lane.b32.xlu1 %v14613_v38, %s13874_s5 }
0x1b5d   :  { %v5495_v41 = vpop.permute.xlu0 %5494  ;;  %v5491_v45 = vpop.permute.xlu1 %5490 }
0x1b5e   :  { %v5638_v54 = vmul.f32 %v5495_v41, %v5454_v21  ;;  %v5637_v56 = vmul.f32 %v5491_v45, %v5453_v20  ;;  %v5459_v21 = vmul.f32 %v15041_v19, %v5420_v1  ;;  %v5424_v20 = vrot.slane %v5409_v7, %v14620_v49 }
0x1b5f   :  { %v5364_v45 = vcombine.high %v15202_v30, %v15202_v30  ;;  %v5428_v30 = vrot.slane %v5411_v23, %v14620_v49 }
0x1b60   :  { %12370 = vmatprep.mubr.msk.f32.mxu0 %vm217_vm3, %v5637_v56  ;;  %v5461_v56 = vmul.f32 %v15027_v61, %v5424_v20  ;;  %v5464_v14 = vmul.f32 %v15035_v28, %v5424_v20  ;;  %v5463_v25 = vmul.f32 %v15041_v19, %v5424_v20 }
0x1b61   :  { %v5503_v36 = vpop.permute.xlu0 %5502  ;;  %12371 = vmatmul.mubr.msk.f32.vlgmr.msra.gmra.mrb[68].mxu0 %vm217_vm3, %v5638_v54  ;;  %v5499_v34 = vpop.permute.xlu1 %5498  ;;  %v5462_v54 = vmul.f32 %v15021_v43, %v5424_v20 }
0x1b62   :  { %v5640_v40 = vmul.f32 %v5503_v36, %v5456_v46  ;;  %v5639_v39 = vmul.f32 %v5499_v34, %v5455_v60  ;;  %12868 = vmatpush1.bf16.msra.mxu0 %v15223_v18  ;;  %v5378_v36 = vrot.slane %v5364_v45, %v14664_v27 }
0x1b63   :  { %12870 = vmatprep.subr.bf16.mxu0 %v15225_v44 }
0x1b64   :  { %12373 = vmatprep.mubr.msk.f32.mxu0 %vm217_vm3, %v5639_v39  ;;  %v5394_v7 = vrot.slane %v5378_v36, %v14664_v27 }
0x1b65   :  { %v5514_v31 = vpop.permute.xlu0 %5513  ;;  %12374 = vmatmul.mubr.msk.f32.gmra.mrb[70].mxu0 %vm217_vm3, %v5640_v40  ;;  %v5510_v50 = vpop.permute.xlu1 %5509 }
0x1b66   :  { %v5642_v51 = vmul.f32 %v5514_v31, %v5458_v47  ;;  %v5641_v42 = vmul.f32 %v5510_v50, %v5457_v5  ;;  %12872 = vmatpush1.bf16.msra.mxu0 %v15245_v37  ;;  %v5466_v47 = vmul.f32 %v15021_v43, %v5428_v30  ;;  %v5465_v5 = vmul.f32 %v15027_v61, %v5428_v30 }
0x1b67   :  { %12874 = vmatprep.subr.bf16.mxu0 %v15248_v9  ;;  %v5432_v20 = vrot.slane %v5394_v7, %v14620_v49 }
0x1b68   :  { %12376 = vmatprep.mubr.msk.f32.mxu0 %vm217_vm3, %v5641_v42 }
0x1b69   :  { %v5522_v55 = vpop.permute.xlu0 %5521  ;;  %12377 = vmatmul.mubr.msk.f32.gmra.mrb[72].mxu0 %vm217_vm3, %v5642_v51  ;;  %v5518_v58 = vpop.permute.xlu1 %5517 }
0x1b6a   :  { %v5644_v32 = vmul.f32 %v5522_v55, %v5460_v12  ;;  %v5643_v41 = vmul.f32 %v5518_v58, %v5459_v21  ;;  %v5468_v12 = vmul.f32 %v15035_v28, %v5428_v30  ;;  %v5467_v21 = vmul.f32 %v15041_v19, %v5428_v30 }
0x1b6b   :  { %v5380_v55 = vcombine.high %v5378_v36, %v5378_v36 }
0x1b6c   :  { %12379 = vmatprep.mubr.msk.f32.mxu0 %vm217_vm3, %v5643_v41 }
0x1b6d   :  { %v5533_v24 = vpop.permute.xlu0 %5532  ;;  %12380 = vmatmul.mubr.msk.f32.gmra.mrb[74].mxu0 %vm217_vm3, %v5644_v32  ;;  %v5529_v46 = vpop.permute.xlu1 %5528  ;;  %v5408_v23 = vrot.slane %v5380_v55, %v14664_v27 }
0x1b6e   :  { %v5646_v60 = vmul.f32 %v5533_v24, %v5462_v54  ;;  %v5645_v1 = vmul.f32 %v5529_v46, %v5461_v56  ;;  %v5470_v54 = vmul.f32 %v15021_v43, %v5432_v20  ;;  %v5469_v56 = vmul.f32 %v15027_v61, %v5432_v20 }
0x1b6f   :  { %v5436_v30 = vrot.slane %v5408_v23, %v14620_v49 }
0x1b70   :  { %12382 = vmatprep.mubr.msk.f32.mxu0 %vm217_vm3, %v5645_v1 }
0x1b71   :  { %v5541_v34 = vpop.permute.xlu0 %5540  ;;  %12383 = vmatmul.mubr.msk.f32.gmra.mrb[76].mxu0 %vm217_vm3, %v5646_v60  ;;  %v5537_v22 = vpop.permute.xlu1 %5536 }
0x1b72   :  { %v5648_v40 = vmul.f32 %v5541_v34, %v5464_v14  ;;  %v5647_v39 = vmul.f32 %v5537_v22, %v5463_v25  ;;  %v5472_v14 = vmul.f32 %v15035_v28, %v5432_v20  ;;  %v5471_v25 = vmul.f32 %v15041_v19, %v5432_v20 }
0x1b74   :  { %12385 = vmatprep.mubr.msk.f32.mxu0 %vm217_vm3, %v5647_v39  ;;  %v5474_v39 = vmul.f32 %v15021_v43, %v5436_v30 }
0x1b75   :  { %v5552_v31 = vpop.permute.xlu0 %5551  ;;  %12386 = vmatmul.mubr.msk.f32.gmra.mrb[78].mxu0 %vm217_vm3, %v5648_v40  ;;  %v5548_v50 = vpop.permute.xlu1 %5547 }
0x1b76   :  { %v5650_v51 = vmul.f32 %v5552_v31, %v5466_v47  ;;  %v5649_v42 = vmul.f32 %v5548_v50, %v5465_v5  ;;  %v5473_v47 = vmul.f32 %v15027_v61, %v5436_v30  ;;  %v5410_v5 = vcombine.high %v5394_v7, %v5394_v7 }
0x1b78   :  { %12388 = vmatprep.mubr.msk.f32.mxu0 %vm217_vm3, %v5649_v42  ;;  %v5440_v20 = vrot.slane %v5410_v5, %v14620_v49 }
0x1b79   :  { %v5560_v58 = vpop.permute.xlu0 %5559  ;;  %12389 = vmatmul.mubr.msk.f32.gmra.mrb[80].mxu0 %vm217_vm3, %v5650_v51  ;;  %v5556_v32 = vpop.permute.xlu1 %5555 }
0x1b7a   :  { %v5652_v41 = vmul.f32 %v5560_v58, %v5468_v12  ;;  %v5651_v45 = vmul.f32 %v5556_v32, %v5467_v21  ;;  %v5476_v12 = vmul.f32 %v15035_v28, %v5436_v30  ;;  %v5475_v21 = vmul.f32 %v15041_v19, %v5436_v30 }
0x1b7c   :  { %12391 = vmatprep.mubr.msk.f32.mxu0 %vm217_vm3, %v5651_v45  ;;  %v5477_v45 = vmul.f32 %v15027_v61, %v5440_v20 }
0x1b7d   :  { %v5571_v24 = vpop.permute.xlu0 %5570  ;;  %12392 = vmatmul.mubr.msk.f32.gmra.mrb[82].mxu0 %vm217_vm3, %v5652_v41  ;;  %v5567_v46 = vpop.permute.xlu1 %5566  ;;  %v5478_v41 = vmul.f32 %v15021_v43, %v5440_v20 }
0x1b7e   :  { %v5654_v60 = vmul.f32 %v5571_v24, %v5470_v54  ;;  %v5653_v1 = vmul.f32 %v5567_v46, %v5469_v56  ;;  %v5412_v54 = vcombine.high %v5408_v23, %v5408_v23 }
0x1b80   :  { %12394 = vmatprep.mubr.msk.f32.mxu0 %vm217_vm3, %v5653_v1  ;;  %v5480_v1 = vmul.f32 %v15035_v28, %v5440_v20 }
0x1b81   :  { %v5579_v36 = vpop.permute.xlu0 %5578  ;;  %12395 = vmatmul.mubr.msk.f32.gmra.mrb[84].mxu0 %vm217_vm3, %v5654_v60  ;;  %v5575_v34 = vpop.permute.xlu1 %5574 }
0x1b82   :  { %v5656_v22 = vmul.f32 %v5579_v36, %v5472_v14  ;;  %v5655_v40 = vmul.f32 %v5575_v34, %v5471_v25  ;;  %v5479_v14 = vmul.f32 %v15041_v19, %v5440_v20  ;;  %v5444_v25 = vrot.slane %v5412_v54, %v14620_v49  ;;  %v7055_v20 = vld [vmem:[%s16891_s20 + $0x50] sm:$0xff] }
0x1b84   :  { %12397 = vmatprep.mubr.msk.f32.mxu0 %vm217_vm3, %v5655_v40  ;;  %v5481_v40 = vmul.f32 %v15027_v61, %v5444_v25  ;;  %v7047_v61 = vld [vmem:[%s16891_s20 + $0x10] sm:$0xff] }
0x1b85   :  { %v5590_v31 = vpop.permute.xlu0 %5589  ;;  %12398 = vmatmul.mubr.msk.f32.gmra.mrb[86].mxu0 %vm217_vm3, %v5656_v22  ;;  %v5586_v50 = vpop.permute.xlu1 %5585  ;;  %v5482_v22 = vmul.f32 %v15021_v43, %v5444_v25 }
0x1b86   :  { %v5658_v51 = vmul.f32 %v5590_v31, %v5474_v39  ;;  %v5657_v42 = vmul.f32 %v5586_v50, %v5473_v47  ;;  %v5484_v50 = vmul.f32 %v15035_v28, %v5444_v25  ;;  %v7064_v28 = vld [vmem:[%s16891_s20 + $0x98] sm:$0xff] }
0x1b88   :  { %12400 = vmatprep.mubr.msk.f32.mxu0 %vm217_vm3, %v5657_v42 }
0x1b89   :  { %v5598_v55 = vpop.permute.xlu0 %5597  ;;  %12401 = vmatmul.mubr.msk.f32.gmra.mrb[88].mxu0 %vm217_vm3, %v5658_v51  ;;  %v5594_v58 = vpop.permute.xlu1 %5593  ;;  %v5483_v51 = vmul.f32 %v15041_v19, %v5444_v25  ;;  %v7072_v19 = vld [vmem:[%s16891_s20 + $0xd8] sm:$0xff] }
0x1b8a   :  { %v5660_v32 = vmul.f32 %v5598_v55, %v5476_v12  ;;  %v5659_v7 = vmul.f32 %v5594_v58, %v5475_v21  ;;  %v15334_v55 = vpack.c.bf16 %v7055_v20, %v7047_v61  ;;  %v15336_v58 = vpack.c.bf16 %v7072_v19, %v7064_v28  ;;  %v13823_v61 = vld [vmem:[%s16886_s15] ss:$0 sm:$0xff] }
0x1b8c   :  { %12403 = vmatprep.mubr.msk.f32.mxu0 %vm217_vm3, %v5659_v7  ;;  %17078 = vst [vmem:[#allocation14_spill] sm:$0xff] %v15334_v55  ;;  %17079 = vst [vmem:[#allocation15_spill] sm:$0xff] %v15336_v58  ;;  %v7071_v7 = vld [vmem:[%s16891_s20 + $0xd0] sm:$0xff] }
0x1b8d   :  { %v5609_v56 = vpop.permute.xlu0 %5608  ;;  %12404 = vmatmul.mubr.msk.f32.gmra.mrb[90].mxu0 %vm217_vm3, %v5660_v32  ;;  %v5605_v24 = vpop.permute.xlu1 %5604  ;;  %v7063_v32 = vld [vmem:[%s16891_s20 + $0x90] sm:$0xff] }
0x1b8e   :  { %v5662_v46 = vmul.f32 %v5609_v56, %v5478_v41  ;;  %v5661_v60 = vmul.f32 %v5605_v24, %v5477_v45  ;;  %v7050_v41 = vld [vmem:[%s16891_s20 + $0x28] sm:$0xff]  ;;  %v15353_v54 = vpack.c.bf16 %v7071_v7, %v7063_v32  ;;  %v7049_v24 = vld [vmem:[%s16891_s20 + $0x20] sm:$0xff] }
0x1b8f   :  { %v7058_v45 = vld [vmem:[%s16891_s20 + $0x68] sm:$0xff] }
0x1b90   :  { %12406 = vmatprep.mubr.msk.f32.mxu0 %vm217_vm3, %v5661_v60  ;;  %17080 = vst [vmem:[#allocation16_spill] sm:$0xff] %v15353_v54  ;;  %v15357_v56 = vpack.c.bf16 %v7058_v45, %v7050_v41  ;;  %v7066_v60 = vld [vmem:[%s16891_s20 + $0xa8] sm:$0xff] }
0x1b91   :  { %v5617_v30 = vpop.permute.xlu0 %5616  ;;  %12407 = vmatmul.mubr.msk.f32.gmra.mrb[92].mxu0 %vm217_vm3, %v5662_v46  ;;  %v5613_v36 = vpop.permute.xlu1 %5612  ;;  %v7057_v46 = vld [vmem:[%s16891_s20 + $0x60] sm:$0xff] }
0x1b92   :  { %v5664_v34 = vmul.f32 %v5617_v30, %v5480_v1  ;;  %v5663_v23 = vmul.f32 %v5613_v36, %v5479_v14  ;;  %17081 = vst [vmem:[#allocation17_spill] sm:$0xff] %v15357_v56  ;;  %v7074_v1 = vld [vmem:[%s16891_s20 + $0xe8] sm:$0xff]  ;;  %v15372_v14 = vpack.c.bf16 %v7057_v46, %v7049_v24  ;;  %v7065_v30 = vld [vmem:[%s16891_s20 + $0xa0] sm:$0xff] }
0x1b93   :  { %v15375_v25 = vpack.c.bf16 %v7074_v1, %v7066_v60  ;;  %v7073_v36 = vld [vmem:[%s16891_s20 + $0xe0] sm:$0xff] }
0x1b94   :  { %12409 = vmatprep.mubr.msk.f32.mxu0 %vm217_vm3, %v5663_v23  ;;  %17082 = vst [vmem:[#allocation18_spill] sm:$0xff] %v15372_v14  ;;  %v7060_v23 = vld [vmem:[%s16891_s20 + $0x78] sm:$0xff] }
0x1b95   :  { %v5628_v39 = vpop.permute.xlu0 %5627  ;;  %12410 = vmatmul.mubr.msk.f32.gmra.mrb[94].mxu0 %vm217_vm3, %v5664_v34  ;;  %v5624_v47 = vpop.permute.xlu1 %5623  ;;  %17083 = vst [vmem:[#allocation19_spill] sm:$0xff] %v15375_v25  ;;  %v7052_v34 = vld [vmem:[%s16891_s20 + $0x38] sm:$0xff] }
0x1b96   :  { %v5666_v5 = vmul.f32 %v5628_v39, %v5482_v22  ;;  %v5665_v31 = vmul.f32 %v5624_v47, %v5481_v40  ;;  %v15392_v22 = vpack.c.bf16 %v7073_v36, %v7065_v30  ;;  %v15396_v40 = vpack.c.bf16 %v7060_v23, %v7052_v34  ;;  %v7051_v39 = vld [vmem:[%s16891_s20 + $0x30] sm:$0xff] }
0x1b97   :  { %v7059_v47 = vld [vmem:[%s16891_s20 + $0x70] sm:$0xff] }
0x1b98   :  { %12412 = vmatprep.mubr.msk.f32.mxu0 %vm217_vm3, %v5665_v31  ;;  %17084 = vst [vmem:[#allocation20_spill] sm:$0xff] %v15392_v22  ;;  %17085 = vst [vmem:[#allocation21_spill] sm:$0xff] %v15396_v40  ;;  %v7076_v31 = vld [vmem:[%s16891_s20 + $0xf8] sm:$0xff] }
0x1b99   :  { %v5636_v42 = vpop.permute.xlu0 %5635  ;;  %12413 = vmatmul.mubr.msk.f32.gmra.mrb[96].mxu0 %vm217_vm3, %v5666_v5  ;;  %v5632_v12 = vpop.permute.xlu1 %5631  ;;  %v7068_v5 = vld [vmem:[%s16891_s20 + $0xb8] sm:$0xff] }
0x1b9a   :  { %v5668_v21 = vmul.f32 %v5636_v42, %v5484_v50  ;;  %v5667_v43 = vmul.f32 %v5632_v12, %v5483_v51  ;;  %v15411_v50 = vpack.c.bf16 %v7059_v47, %v7051_v39  ;;  %v15414_v51 = vpack.c.bf16 %v7076_v31, %v7068_v5  ;;  %v7067_v42 = vld [vmem:[%s16891_s20 + $0xb0] sm:$0xff] }
0x1b9b   :  { %v7075_v12 = vld [vmem:[%s16891_s20 + $0xf0] sm:$0xff] }
0x1b9c   :  { %12415 = vmatprep.mubr.msk.f32.mxu0 %vm217_vm3, %v5667_v43  ;;  %17086 = vst [vmem:[#allocation22_spill] sm:$0xff] %v15411_v50  ;;  %17087 = vst [vmem:[#allocation23_spill] sm:$0xff] %v15414_v51 }
0x1b9d   :  { %12416 = vmatmul.mubr.msk.f32.gmra.mrb[98].mxu0 %vm217_vm3, %v5668_v21  ;;  %v15425_v21 = vpack.c.bf16 %v7075_v12, %v7067_v42 }
0x1b9e   :  { %7311 = vmatprep.mubr.f32.mxu0 %v16903_v2 }
0x1b9f   :  { %17088 = vst [vmem:[#allocation24_spill] sm:$0xff] %v15425_v21 }
0x1ba1   :  { %10489 = vmatmul.mubr.msk.f32.vlgmr.msra.gmra.mrb[100].mxu0 %vm217_vm3, %v14065_v15 }
0x1ba2   :  { %12876 = vmatpush1.bf16.msra.mxu0 %v15334_v55  ;;  %7382 = vmatprep.mubr.f32.mxu0 %v16903_v2 }
0x1ba3   :  { %12878 = vmatprep.subr.bf16.mxu0 %v15336_v58  ;;  %v7114_v58 = vld [vmem:[%s16893_s22 + $0x120] sm:$0xff] }
0x1ba6   :  { %12880 = vmatpush1.bf16.msra.mxu0 %v15353_v54 }
0x1ba7   :  { %12882 = vmatprep.subr.bf16.mxu0 %v15357_v56 }
0x1ba9   :  { %10490 = vmatmul.mubr.msk.f32.vlgmr.msra.gmra.mrb[102].mxu0 %vm217_vm3, %v14065_v15 }
0x1baa   :  { %12884 = vmatpush1.bf16.msra.mxu0 %v15372_v14  ;;  %7453 = vmatprep.mubr.f32.mxu0 %v16903_v2  ;;  %v7112_v14 = vld [vmem:[%s16893_s22 + $0x110] sm:$0xff] }
0x1bab   :  { %12886 = vmatprep.subr.bf16.mxu0 %v15375_v25 }
0x1bae   :  { %12888 = vmatpush1.bf16.msra.mxu0 %v15392_v22  ;;  %v3234_v22 = vsel %vm217_vm3, %v14611_v35, 0.0  ;;  %v15767_v35 = vld [vmem:[%s16890_s19 + $0x18] sm:$0xff] }
0x1baf   :  { %12890 = vmatprep.subr.bf16.mxu0 %v15396_v40 }
0x1bb1   :  { %10491 = vmatmul.mubr.msk.f32.vlgmr.msra.gmra.mrb[104].mxu0 %vm217_vm3, %v14065_v15 }
0x1bb2   :  { %12892 = vmatpush1.bf16.msra.mxu0 %v15411_v50  ;;  %7524 = vmatprep.mubr.f32.mxu0 %v16903_v2 }
0x1bb3   :  { %12894 = vmatprep.subr.bf16.mxu0 %v15414_v51 }
0x1bb6   :  { %12896 = vmatpush1.bf16.msra.mxu0 %v15425_v21 }
0x1bb9   :  { %10492 = vmatmul.mubr.msk.f32.vlgmr.msra.gmra.mrb[106].mxu0 %vm217_vm3, %v14065_v15  ;;  %v7113_v15 = vld [vmem:[%s16893_s22 + $0x118] sm:$0xff] }
0x1bba   :  { %v15788_v40 = vpack.c.bf16 %v7113_v15, %v7112_v14  ;;  %v7132_v14 = vld [vmem:[%s16893_s22 + $0x1b0] sm:$0xff] }
0x1bbc   :  { %v6198_v43 = vpop.f32.mrb[104].mxu1 }
0x1bbd   :  { %v6199_v20 = vadd.f32 %v13823_v61, %v6198_v43  ;;  %v12428_v28 = vpop.f32.mrb[105].mxu1 }
0x1bbf   :  { %13733 = vtanh.f32 %v6199_v20 }
0x1bc9   :  { %v15435_v19 = vpop.eup %13733 }
0x1bca   :  { %12438 = vmatmul.mubr.msk.f32.vlgmr.msra.gmra.mrb[106].mxu1 %vm217_vm3, %v15435_v19 }
0x1bcb   :  { %12860 = vmatpush3.bf16.msra.mxu1 %v14588_v57 }
0x1bcc   :  { %12862 = vmatprep.subr.bf16.mxu1 %v14593_v59 }
0x1bcf   :  { %12864 = vmatpush3.bf16.msra.mxu1 %v14593_v59 }
0x1c34   :  { %v12372_v32 = vpop.f32.mrb[68].mxu0 }
0x1c35   :  { %v6002_v7 = vmul.f32 %v12372_v32, %v12372_v32  ;;  %v5831_v41 = vpop.f32.mrb[69].mxu0 }
0x1c36   :  { %v6001_v45 = vmul.f32 %v5831_v41, %v5831_v41 }
0x1c37   :  { %v6034_v24 = vsel %vm217_vm3, %v6002_v7, 0.0 }
0x1c38   :  { %v6033_v46 = vsel %vm217_vm3, %v6001_v45, 0.0  ;;  %v12375_v60 = vpop.f32.mrb[70].mxu0 }
0x1c39   :  { %v6035_v1 = vadd.f32 %v6034_v24, %v6033_v46  ;;  %v5841_v30 = vpop.f32.mrb[71].mxu0  ;;  %v6004_v36 = vmul.f32 %v12375_v60, %v12375_v60 }
0x1c3a   :  { %v6003_v34 = vmul.f32 %v5841_v30, %v5841_v30 }
0x1c3b   :  { %v6038_v59 = vsel %vm217_vm3, %v6004_v36, 0.0 }
0x1c3c   :  { %v6036_v23 = vsel %vm217_vm3, %v6003_v34, 0.0  ;;  %v12378_v57 = vpop.f32.mrb[72].mxu0 }
0x1c3d   :  { %v6037_v39 = vadd.f32 %v6036_v23, %v6035_v1  ;;  %v5851_v47 = vpop.f32.mrb[73].mxu0  ;;  %v6006_v5 = vmul.f32 %v12378_v57, %v12378_v57 }
0x1c3e   :  { %v6005_v31 = vmul.f32 %v5851_v47, %v5851_v47 }
0x1c3f   :  { %v6039_v42 = vadd.f32 %v6038_v59, %v6037_v39  ;;  %v6042_v28 = vsel %vm217_vm3, %v6006_v5, 0.0 }
0x1c40   :  { %v6040_v12 = vsel %vm217_vm3, %v6005_v31, 0.0  ;;  %v12381_v43 = vpop.f32.mrb[74].mxu0 }
0x1c41   :  { %v6041_v61 = vadd.f32 %v6040_v12, %v6039_v42  ;;  %v5861_v20 = vpop.f32.mrb[75].mxu0  ;;  %v6008_v32 = vmul.f32 %v12381_v43, %v12381_v43 }
0x1c42   :  { %v6007_v7 = vmul.f32 %v5861_v20, %v5861_v20 }
0x1c43   :  { %v6043_v41 = vadd.f32 %v6042_v28, %v6041_v61  ;;  %v6046_v1 = vsel %vm217_vm3, %v6008_v32, 0.0 }
0x1c44   :  { %v6044_v45 = vsel %vm217_vm3, %v6007_v7, 0.0  ;;  %v12384_v24 = vpop.f32.mrb[76].mxu0 }
0x1c45   :  { %v6045_v46 = vadd.f32 %v6044_v45, %v6043_v41  ;;  %v5871_v60 = vpop.f32.mrb[77].mxu0  ;;  %v6010_v30 = vmul.f32 %v12384_v24, %v12384_v24 }
0x1c46   :  { %v6009_v36 = vmul.f32 %v5871_v60, %v5871_v60 }
0x1c47   :  { %v6047_v34 = vadd.f32 %v6046_v1, %v6045_v46  ;;  %v6050_v59 = vsel %vm217_vm3, %v6010_v30, 0.0 }
0x1c48   :  { %v6048_v23 = vsel %vm217_vm3, %v6009_v36, 0.0  ;;  %v12387_v57 = vpop.f32.mrb[78].mxu0 }
0x1c49   :  { %v6049_v39 = vadd.f32 %v6048_v23, %v6047_v34  ;;  %v5881_v47 = vpop.f32.mrb[79].mxu0  ;;  %v6012_v5 = vmul.f32 %v12387_v57, %v12387_v57 }
0x1c4a   :  { %v6011_v31 = vmul.f32 %v5881_v47, %v5881_v47 }
0x1c4b   :  { %v6051_v42 = vadd.f32 %v6050_v59, %v6049_v39  ;;  %v6054_v28 = vsel %vm217_vm3, %v6012_v5, 0.0 }
0x1c4c   :  { %v6052_v12 = vsel %vm217_vm3, %v6011_v31, 0.0  ;;  %v12390_v43 = vpop.f32.mrb[80].mxu0 }
0x1c4d   :  { %v6053_v61 = vadd.f32 %v6052_v12, %v6051_v42  ;;  %v5891_v20 = vpop.f32.mrb[81].mxu0  ;;  %v6014_v32 = vmul.f32 %v12390_v43, %v12390_v43 }
0x1c4e   :  { %v6013_v7 = vmul.f32 %v5891_v20, %v5891_v20 }
0x1c4f   :  { %v6055_v41 = vadd.f32 %v6054_v28, %v6053_v61  ;;  %v6058_v1 = vsel %vm217_vm3, %v6014_v32, 0.0 }
0x1c50   :  { %v6056_v45 = vsel %vm217_vm3, %v6013_v7, 0.0  ;;  %v12393_v24 = vpop.f32.mrb[82].mxu0 }
0x1c51   :  { %v6057_v46 = vadd.f32 %v6056_v45, %v6055_v41  ;;  %v5901_v60 = vpop.f32.mrb[83].mxu0  ;;  %v6016_v30 = vmul.f32 %v12393_v24, %v12393_v24 }
0x1c52   :  { %v6015_v36 = vmul.f32 %v5901_v60, %v5901_v60 }
0x1c53   :  { %v6059_v34 = vadd.f32 %v6058_v1, %v6057_v46  ;;  %v6062_v59 = vsel %vm217_vm3, %v6016_v30, 0.0 }
0x1c54   :  { %v6060_v23 = vsel %vm217_vm3, %v6015_v36, 0.0  ;;  %v12396_v57 = vpop.f32.mrb[84].mxu0 }
0x1c55   :  { %v6061_v39 = vadd.f32 %v6060_v23, %v6059_v34  ;;  %v5911_v47 = vpop.f32.mrb[85].mxu0  ;;  %v6018_v5 = vmul.f32 %v12396_v57, %v12396_v57 }
0x1c56   :  { %v6017_v31 = vmul.f32 %v5911_v47, %v5911_v47 }
0x1c57   :  { %v6063_v42 = vadd.f32 %v6062_v59, %v6061_v39  ;;  %v6066_v28 = vsel %vm217_vm3, %v6018_v5, 0.0 }
0x1c58   :  { %v6064_v12 = vsel %vm217_vm3, %v6017_v31, 0.0  ;;  %v12399_v43 = vpop.f32.mrb[86].mxu0 }
0x1c59   :  { %v6065_v61 = vadd.f32 %v6064_v12, %v6063_v42  ;;  %v5921_v20 = vpop.f32.mrb[87].mxu0  ;;  %v6020_v32 = vmul.f32 %v12399_v43, %v12399_v43 }
0x1c5a   :  { %v6019_v7 = vmul.f32 %v5921_v20, %v5921_v20 }
0x1c5b   :  { %v6067_v41 = vadd.f32 %v6066_v28, %v6065_v61  ;;  %v6070_v1 = vsel %vm217_vm3, %v6020_v32, 0.0 }
0x1c5c   :  { %v6068_v45 = vsel %vm217_vm3, %v6019_v7, 0.0  ;;  %v12402_v24 = vpop.f32.mrb[88].mxu0 }
0x1c5d   :  { %v6069_v46 = vadd.f32 %v6068_v45, %v6067_v41  ;;  %v5931_v60 = vpop.f32.mrb[89].mxu0  ;;  %v6022_v30 = vmul.f32 %v12402_v24, %v12402_v24 }
0x1c5e   :  { %v6021_v36 = vmul.f32 %v5931_v60, %v5931_v60 }
0x1c5f   :  { %v6071_v34 = vadd.f32 %v6070_v1, %v6069_v46  ;;  %v6074_v59 = vsel %vm217_vm3, %v6022_v30, 0.0 }
0x1c60   :  { %v6072_v23 = vsel %vm217_vm3, %v6021_v36, 0.0  ;;  %v12405_v57 = vpop.f32.mrb[90].mxu0 }
0x1c61   :  { %v6073_v39 = vadd.f32 %v6072_v23, %v6071_v34  ;;  %v5941_v47 = vpop.f32.mrb[91].mxu0  ;;  %v6024_v5 = vmul.f32 %v12405_v57, %v12405_v57 }
0x1c62   :  { %v6023_v31 = vmul.f32 %v5941_v47, %v5941_v47 }
0x1c63   :  { %v6075_v42 = vadd.f32 %v6074_v59, %v6073_v39  ;;  %v6078_v28 = vsel %vm217_vm3, %v6024_v5, 0.0 }
0x1c64   :  { %v6076_v12 = vsel %vm217_vm3, %v6023_v31, 0.0  ;;  %v12408_v43 = vpop.f32.mrb[92].mxu0 }
0x1c65   :  { %v6077_v61 = vadd.f32 %v6076_v12, %v6075_v42  ;;  %v5951_v20 = vpop.f32.mrb[93].mxu0  ;;  %v6026_v32 = vmul.f32 %v12408_v43, %v12408_v43 }
0x1c66   :  { %v6025_v7 = vmul.f32 %v5951_v20, %v5951_v20 }
0x1c67   :  { %v6079_v41 = vadd.f32 %v6078_v28, %v6077_v61  ;;  %v6082_v1 = vsel %vm217_vm3, %v6026_v32, 0.0 }
0x1c68   :  { %v6080_v45 = vsel %vm217_vm3, %v6025_v7, 0.0  ;;  %v12411_v24 = vpop.f32.mrb[94].mxu0 }
0x1c69   :  { %v6081_v46 = vadd.f32 %v6080_v45, %v6079_v41  ;;  %v5961_v60 = vpop.f32.mrb[95].mxu0  ;;  %v6028_v30 = vmul.f32 %v12411_v24, %v12411_v24 }
0x1c6a   :  { %v6027_v36 = vmul.f32 %v5961_v60, %v5961_v60 }
0x1c6b   :  { %v6083_v34 = vadd.f32 %v6082_v1, %v6081_v46  ;;  %v6086_v59 = vsel %vm217_vm3, %v6028_v30, 0.0 }
0x1c6c   :  { %v6084_v23 = vsel %vm217_vm3, %v6027_v36, 0.0  ;;  %v12414_v57 = vpop.f32.mrb[96].mxu0 }
0x1c6d   :  { %v6085_v39 = vadd.f32 %v6084_v23, %v6083_v34  ;;  %v5971_v47 = vpop.f32.mrb[97].mxu0  ;;  %v6030_v5 = vmul.f32 %v12414_v57, %v12414_v57 }
0x1c6e   :  { %v6029_v31 = vmul.f32 %v5971_v47, %v5971_v47 }
0x1c6f   :  { %v6087_v42 = vadd.f32 %v6086_v59, %v6085_v39  ;;  %v6090_v28 = vsel %vm217_vm3, %v6030_v5, 0.0  ;;  %v13824_v5 = vld [vmem:[%s16888_s17] ss:$0 sm:$0xff] }
0x1c70   :  { %v6088_v12 = vsel %vm217_vm3, %v6029_v31, 0.0  ;;  %v12417_v43 = vpop.f32.mrb[98].mxu0 }
0x1c71   :  { %v6089_v61 = vadd.f32 %v6088_v12, %v6087_v42  ;;  %v5981_v20 = vpop.f32.mrb[99].mxu0  ;;  %v6032_v32 = vmul.f32 %v12417_v43, %v12417_v43  ;;  %v7126_v12 = vld [vmem:[%s16893_s22 + $0x180] sm:$0xff]  ;;  %v7127_v43 = vld [vmem:[%s16893_s22 + $0x188] sm:$0xff] }
0x1c72   :  { %v6031_v7 = vmul.f32 %v5981_v20, %v5981_v20 }
0x1c73   :  { %v6091_v41 = vadd.f32 %v6090_v28, %v6089_v61  ;;  %v6094_v1 = vsel %vm217_vm3, %v6032_v32, 0.0  ;;  %v15501_v61 = vpack.c.bf16 %v7127_v43, %v7126_v12  ;;  %v7096_v12 = vld [vmem:[%s16893_s22 + $0x90] sm:$0xff]  ;;  %v7097_v43 = vld [vmem:[%s16893_s22 + $0x98] sm:$0xff] }
0x1c74   :  { %v6092_v45 = vsel %vm217_vm3, %v6031_v7, 0.0  ;;  %v15473_v24 = vpop.f32.mrb[100].mxu0 }
0x1c75   :  { %v6093_v46 = vadd.f32 %v6092_v45, %v6091_v41  ;;  %v15475_v60 = vpop.f32.mrb[101].mxu0  ;;  %17089 = vst [vmem:[#allocation25_spill] sm:$0xff] %v15501_v61  ;;  %12930 = vmatprep.subr.bf16.mxu1 %v15501_v61  ;;  %v7129_v61 = vld [vmem:[%s16893_s22 + $0x198] sm:$0xff] }
0x1c77   :  { %v15478_v30 = vadd.f32 %v6094_v1, %v6093_v46  ;;  %v7094_v46 = vld [vmem:[%s16893_s22 + $0x80] sm:$0xff]  ;;  %v7095_v1 = vld [vmem:[%s16893_s22 + $0x88] sm:$0xff] }
0x1c7c   :  { %v15480_v36 = vpop.f32.mrb[102].mxu0 }
0x1c7d   :  { %v15482_v34 = vpop.f32.mrb[103].mxu0 }
0x1c84   :  { %v15484_v23 = vpop.f32.mrb[104].mxu0 }
0x1c85   :  { %v15486_v57 = vpop.f32.mrb[105].mxu0 }
0x1c8c   :  { %v15488_v39 = vpop.f32.mrb[106].mxu0 }
0x1c8d   :  { %v15490_v47 = vpop.f32.mrb[107].mxu0 }
0x1c9d   :  { %v6272_v59 = vpop.f32.mrb[106].mxu1 }
0x1c9e   :  { %v6273_v31 = vadd.f32 %v13824_v5, %v6272_v59  ;;  %v12439_v42 = vpop.f32.mrb[107].mxu1  ;;  %v15525_v59 = vpack.c.bf16 %v7095_v1, %v7094_v46  ;;  %v7078_v5 = vld [vmem:[%s16893_s22] sm:$0xff]  ;;  %v7081_v46 = vld [vmem:[%s16893_s22 + $0x18] sm:$0xff] }
0x1ca0   :  { %13735 = vtanh.f32 %v6273_v31  ;;  %17090 = vst [vmem:[#allocation26_spill] sm:$0xff] %v15525_v59  ;;  %v7079_v31 = vld [vmem:[%s16893_s22 + $0x8] sm:$0xff]  ;;  %12898 = vmatprep.subr.bf16.mxu0 %v15525_v59 }
0x1ca1   :  { %v15533_v42 = vpack.c.bf16 %v7079_v31, %v7078_v5  ;;  %v7098_v5 = vld [vmem:[%s16893_s22 + $0xa0] sm:$0xff]  ;;  %v7099_v31 = vld [vmem:[%s16893_s22 + $0xa8] sm:$0xff] }
0x1ca3   :  { %17091 = vst [vmem:[#allocation27_spill] sm:$0xff] %v15533_v42  ;;  %12900 = vmatpush3.bf16.msra.mxu0 %v15533_v42  ;;  %v7128_v42 = vld [vmem:[%s16893_s22 + $0x190] sm:$0xff] }
0x1caa   :  { %v15503_v20 = vpop.eup %13735 }
0x1cab   :  { %v15507_v28 = vmul.f32 %v15503_v20, %v15503_v20 }
0x1cad   :  { %v15511_v32 = vsub.f32 1.0, %v15507_v28 }
0x1caf   :  { %v6406_v7 = vrot.slane %v15511_v32, %v14620_v49  ;;  %v6425_v41 = vrot.slane %v15511_v32, %v14630_v53  ;;  %v6444_v45 = vrot.slane %v15511_v32, %v14636_v62 }
0x1cb1   :  { %6412 = vbcast.lane.b32.xlu0 %v6406_v7, 264  ;;  %6408 = vbcast.lane.b32.xlu1 %v6406_v7, 256 }
0x1cb5   :  { %6420 = vbcast.lane.b32.xlu0 %v6406_v7, 280  ;;  %6416 = vbcast.lane.b32.xlu1 %v6406_v7, 272  ;;  %v6463_v7 = vrot.slane %v15511_v32, %v14640_v0 }
0x1cb9   :  { %6431 = vbcast.lane.b32.xlu0 %v6425_v41, 264  ;;  %6427 = vbcast.lane.b32.xlu1 %v6425_v41, 256 }
0x1cbd   :  { %6439 = vbcast.lane.b32.xlu0 %v6425_v41, 280  ;;  %6435 = vbcast.lane.b32.xlu1 %v6425_v41, 272  ;;  %v15545_v41 = vpack.c.bf16 %v7097_v43, %v7096_v12  ;;  %v15563_v12 = vpack.c.bf16 %v7099_v31, %v7098_v5  ;;  %v7082_v43 = vld [vmem:[%s16893_s22 + $0x20] sm:$0xff]  ;;  %v7101_v5 = vld [vmem:[%s16893_s22 + $0xb8] sm:$0xff]  ;;  %v6482_v31 = vrot.slane %v15511_v32, %v14644_v4 }
0x1cbe   :  { %v15583_v2 = vpack.c.bf16 %v7101_v5, %v7100_v6  ;;  %v7103_v6 = vld [vmem:[%s16893_s22 + $0xc8] sm:$0xff] }
0x1cbf   :  { %17092 = vst [vmem:[#allocation28_spill] sm:$0xff] %v15545_v41  ;;  %12902 = vmatprep.subr.bf16.mxu0 %v15545_v41  ;;  %17094 = vst [vmem:[#allocation30_spill] sm:$0xff] %v15563_v12 }
0x1cc0   :  { %17096 = vst [vmem:[#allocation32_spill] sm:$0xff] %v15583_v2 }
0x1cc1   :  { %6450 = vbcast.lane.b32.xlu0 %v6444_v45, 264  ;;  %6446 = vbcast.lane.b32.xlu1 %v6444_v45, 256 }
0x1cc5   :  { %6458 = vbcast.lane.b32.xlu0 %v6444_v45, 280  ;;  %6454 = vbcast.lane.b32.xlu1 %v6444_v45, 272  ;;  %v7080_v45 = vld [vmem:[%s16893_s22 + $0x10] sm:$0xff] }
0x1cc6   :  { %v15553_v1 = vpack.c.bf16 %v7081_v46, %v7080_v45  ;;  %v7083_v45 = vld [vmem:[%s16893_s22 + $0x28] sm:$0xff] }
0x1cc7   :  { %v15571_v46 = vpack.c.bf16 %v7083_v45, %v7082_v43  ;;  %v7085_v43 = vld [vmem:[%s16893_s22 + $0x38] sm:$0xff] }
0x1cc8   :  { %17093 = vst [vmem:[#allocation29_spill] sm:$0xff] %v15553_v1  ;;  %12904 = vmatpush3.bf16.msra.mxu0 %v15553_v1 }
0x1cc9   :  { %6469 = vbcast.lane.b32.xlu0 %v6463_v7, 264  ;;  %6465 = vbcast.lane.b32.xlu1 %v6463_v7, 256  ;;  %17095 = vst [vmem:[#allocation31_spill] sm:$0xff] %v15571_v46 }
0x1cca   :  { %12906 = vmatprep.subr.bf16.mxu0 %v15563_v12  ;;  %v7086_v12 = vld [vmem:[%s16893_s22 + $0x40] sm:$0xff] }
0x1ccc   :  { %12908 = vmatpush3.bf16.msra.mxu0 %v15571_v46  ;;  %v7102_v46 = vld [vmem:[%s16893_s22 + $0xc0] sm:$0xff] }
0x1ccd   :  { %6477 = vbcast.lane.b32.xlu0 %v6463_v7, 280  ;;  %6473 = vbcast.lane.b32.xlu1 %v6463_v7, 272  ;;  %v7084_v7 = vld [vmem:[%s16893_s22 + $0x30] sm:$0xff]  ;;  %v15601_v5 = vpack.c.bf16 %v7103_v6, %v7102_v46  ;;  %v7105_v46 = vld [vmem:[%s16893_s22 + $0xd8] sm:$0xff]  ;;  %v6501_v6 = vrot.slane %v15511_v32, %v14648_v10 }
0x1cce   :  { %v15591_v45 = vpack.c.bf16 %v7085_v43, %v7084_v7  ;;  %12910 = vmatprep.subr.bf16.mxu0 %v15583_v2  ;;  %v7087_v7 = vld [vmem:[%s16893_s22 + $0x48] sm:$0xff] }
0x1ccf   :  { %17098 = vst [vmem:[#allocation34_spill] sm:$0xff] %v15601_v5  ;;  %v15609_v43 = vpack.c.bf16 %v7087_v7, %v7086_v12  ;;  %v7088_v12 = vld [vmem:[%s16893_s22 + $0x50] sm:$0xff] }
0x1cd0   :  { %17097 = vst [vmem:[#allocation33_spill] sm:$0xff] %v15591_v45  ;;  %12912 = vmatpush3.bf16.msra.mxu0 %v15591_v45  ;;  %v7104_v45 = vld [vmem:[%s16893_s22 + $0xd0] sm:$0xff] }
0x1cd1   :  { %6488 = vbcast.lane.b32.xlu0 %v6482_v31, 264  ;;  %6484 = vbcast.lane.b32.xlu1 %v6482_v31, 256  ;;  %17099 = vst [vmem:[#allocation35_spill] sm:$0xff] %v15609_v43  ;;  %v15621_v2 = vpack.c.bf16 %v7105_v46, %v7104_v45  ;;  %v7107_v45 = vld [vmem:[%s16893_s22 + $0xe8] sm:$0xff] }
0x1cd2   :  { %12914 = vmatprep.subr.bf16.mxu0 %v15601_v5  ;;  %v7090_v5 = vld [vmem:[%s16893_s22 + $0x60] sm:$0xff] }
0x1cd3   :  { %17100 = vst [vmem:[#allocation36_spill] sm:$0xff] %v15621_v2 }
0x1cd4   :  { %12916 = vmatpush3.bf16.msra.mxu0 %v15609_v43  ;;  %v7106_v43 = vld [vmem:[%s16893_s22 + $0xe0] sm:$0xff] }
0x1cd5   :  { %6496 = vbcast.lane.b32.xlu0 %v6482_v31, 280  ;;  %6492 = vbcast.lane.b32.xlu1 %v6482_v31, 272  ;;  %v7089_v31 = vld [vmem:[%s16893_s22 + $0x58] sm:$0xff]  ;;  %v15639_v46 = vpack.c.bf16 %v7107_v45, %v7106_v43  ;;  %v6520_v45 = vrot.slane %v15511_v32, %v14652_v13 }
0x1cd6   :  { %v15629_v7 = vpack.c.bf16 %v7089_v31, %v7088_v12  ;;  %12918 = vmatprep.subr.bf16.mxu0 %v15621_v2  ;;  %v7091_v12 = vld [vmem:[%s16893_s22 + $0x68] sm:$0xff]  ;;  %v7109_v43 = vld [vmem:[%s16893_s22 + $0xf8] sm:$0xff] }
0x1cd7   :  { %17102 = vst [vmem:[#allocation38_spill] sm:$0xff] %v15639_v46  ;;  %v15647_v31 = vpack.c.bf16 %v7091_v12, %v7090_v5  ;;  %v7092_v5 = vld [vmem:[%s16893_s22 + $0x70] sm:$0xff] }
0x1cd8   :  { %17101 = vst [vmem:[#allocation37_spill] sm:$0xff] %v15629_v7  ;;  %12920 = vmatpush3.bf16.msra.mxu0 %v15629_v7  ;;  %v7108_v7 = vld [vmem:[%s16893_s22 + $0xf0] sm:$0xff] }
0x1cd9   :  { %6507 = vbcast.lane.b32.xlu0 %v6501_v6, 264  ;;  %6503 = vbcast.lane.b32.xlu1 %v6501_v6, 256  ;;  %17103 = vst [vmem:[#allocation39_spill] sm:$0xff] %v15647_v31  ;;  %v15659_v2 = vpack.c.bf16 %v7109_v43, %v7108_v7  ;;  %v7158_v7 = vld [vmem:[%s16893_s22 + $0x280] sm:$0xff]  ;;  %v7159_v43 = vld [vmem:[%s16893_s22 + $0x288] sm:$0xff] }
0x1cda   :  { %12922 = vmatprep.subr.bf16.mxu0 %v15639_v46 }
0x1cdb   :  { %17104 = vst [vmem:[#allocation40_spill] sm:$0xff] %v15659_v2 }
0x1cdc   :  { %12924 = vmatpush3.bf16.msra.mxu0 %v15647_v31  ;;  %v15677_v31 = vpack.c.bf16 %v7159_v43, %v7158_v7 }
0x1cdd   :  { %6515 = vbcast.lane.b32.xlu0 %v6501_v6, 280  ;;  %6511 = vbcast.lane.b32.xlu1 %v6501_v6, 272  ;;  %v7093_v6 = vld [vmem:[%s16893_s22 + $0x78] sm:$0xff] }
0x1cde   :  { %v15667_v12 = vpack.c.bf16 %v7093_v6, %v7092_v5  ;;  %12926 = vmatprep.subr.bf16.mxu0 %v15659_v2  ;;  %17106 = vst [vmem:[#allocation42_spill] sm:$0xff] %v15677_v31  ;;  %v6539_v5 = vrot.slane %v15511_v32, %v14656_v16  ;;  %v7030_v32 = vstv %s15688_s12  ;;  %v6277_v6 = vmul.f32 %v15435_v19, %v15435_v19  ;;  %v7110_v19 = vld [vmem:[%s16893_s22 + $0x100] sm:$0xff]  ;;  %v15733_v2 = vld [vmem:[%s16890_s19 + $0x8] sm:$0xff] }
0x1ce0   :  { %17105 = vst [vmem:[#allocation41_spill] sm:$0xff] %v15667_v12  ;;  %12928 = vmatpush3.bf16.msra.mxu0 %v15667_v12  ;;  %v15711_v7 = vsub.f32 1.0, %v6277_v6  ;;  %v15722_v12 = vpop.permute.xlu1 %3359  ;;  %v7111_v6 = vld [vmem:[%s16893_s22 + $0x108] sm:$0xff] }
0x1ce1   :  { %6526 = vbcast.lane.b32.xlu0 %v6520_v45, 264  ;;  %6522 = vbcast.lane.b32.xlu1 %v6520_v45, 256  ;;  %v15753_v50 = vpack.c.bf16 %v7111_v6, %v7110_v19  ;;  %v4154_v19 = vsel %vm217_vm3, %v14820_v8, 0.0 }
0x1ce2   :  { %12962 = vmatprep.subr.bf16.mxu0 %v15677_v31  ;;  %v6289_v43 = vrot.slane %v15711_v7, %v14664_v27  ;;  %v15720_v31 = vpop.permute.xlu0 %3362 }
0x1ce5   :  { %6534 = vbcast.lane.b32.xlu0 %v6520_v45, 280  ;;  %6530 = vbcast.lane.b32.xlu1 %v6520_v45, 272  ;;  %v15702_v45 = vmul.f32 %v15503_v20, %v7030_v32  ;;  %v6297_v32 = vcombine.high %v6289_v43, %v6289_v43 }
0x1ce7   :  { %v15743_v41 = vrot.slane %v6297_v32, %v14664_v27  ;;  %v15755_v32 = vpack.c.bf16 %v7129_v61, %v7128_v42  ;;  %v7131_v42 = vld [vmem:[%s16893_s22 + $0x1a8] sm:$0xff] }
0x1ce9   :  { %6545 = vbcast.lane.b32.xlu0 %v6539_v5, 264  ;;  %6541 = vbcast.lane.b32.xlu1 %v6539_v5, 256 }
0x1ced   :  { %3365 = vrot.lane.b32.xlu0 %v14613_v38, %s13875_s6  ;;  %6549 = vbcast.lane.b32.xlu1 %v6539_v5, 272 }
0x1cf1   :  { %4279 = vrot.lane.b32.xlu0 %v14822_v17, %s13874_s5  ;;  %6553 = vbcast.lane.b32.xlu1 %v6539_v5, 280  ;;  %v15716_v5 = vrot.slane %v6289_v43, %v14664_v27  ;;  %v15739_v43 = vld [vmem:[%s16890_s19] sm:$0xff] }
0x1cf3   :  { %v6334_v20 = vrot.slane %v15716_v5, %v14620_v49  ;;  %v6327_v15 = vcombine.high %v15716_v5, %v15716_v5 }
0x1cf5   :  { %4285 = vrot.lane.b32.xlu0 %v14822_v17, %s13875_s6  ;;  %4282 = vrot.lane.b32.xlu1 %v14822_v17, %s13873_s9  ;;  %v6372_v46 = vmul.f32 %v15733_v2, %v6334_v20  ;;  %v6371_v1 = vmul.f32 %v15739_v43, %v6334_v20 }
0x1cf9   :  { %5200 = vrot.lane.b32.xlu0 %v14990_v63, %s13873_s9  ;;  %5197 = vrot.lane.b32.xlu1 %v14990_v63, %s13874_s5 }
0x1cfd   :  { %6115 = vrot.lane.b32.xlu0 %v15167_v26, %s13874_s5  ;;  %5203 = vrot.lane.b32.xlu1 %v14990_v63, %s13875_s6 }
0x1d01   :  { %6121 = vrot.lane.b32.xlu0 %v15167_v26, %s13875_s6  ;;  %6118 = vrot.lane.b32.xlu1 %v15167_v26, %s13873_s9 }
0x1d05   :  { %7036 = vrot.lane.b32.xlu0 %v15702_v45, %s13873_s9  ;;  %7033 = vrot.lane.b32.xlu1 %v15702_v45, %s13874_s5 }
0x1d09   :  { %7039 = vrot.lane.b32.xlu1 %v15702_v45, %s13875_s6 }
0x1d23   :  { %v6413_v59 = vpop.permute.xlu0 %6412  ;;  %v6409_v21 = vpop.permute.xlu1 %6408 }
0x1d24   :  { %v6556_v51 = vmul.f32 %v6413_v59, %v6372_v46  ;;  %v6555_v25 = vmul.f32 %v6409_v21, %v6371_v1  ;;  %3235 = vadd.xlane.f32.xlu0 %v3234_v22  ;;  %v6374_v22 = vmul.f32 %v15767_v35, %v6334_v20  ;;  %v15773_v21 = vld [vmem:[%s16890_s19 + $0x10] sm:$0xff]  ;;  %v6338_v59 = vrot.slane %v15743_v41, %v14620_v49 }
0x1d25   :  { %v6373_v61 = vmul.f32 %v15773_v21, %v6334_v20 }
0x1d26   :  { %12448 = vmatprep.mubr.msk.f32.mxu1 %vm217_vm3, %v6555_v25  ;;  %v7130_v25 = vld [vmem:[%s16893_s22 + $0x1a0] sm:$0xff]  ;;  %v6376_v8 = vmul.f32 %v15733_v2, %v6338_v59 }
0x1d27   :  { %v6421_v1 = vpop.permute.xlu0 %6420  ;;  %12449 = vmatmul.mubr.msk.f32.vlgmr.msra.gmra.mrb[108].mxu1 %vm217_vm3, %v6556_v51  ;;  %v6417_v46 = vpop.permute.xlu1 %6416  ;;  %v15791_v54 = vpack.c.bf16 %v7131_v42, %v7130_v25  ;;  %v7115_v51 = vld [vmem:[%s16893_s22 + $0x128] sm:$0xff] }
0x1d28   :  { %v6558_v6 = vmul.f32 %v6421_v1, %v6374_v22  ;;  %v6557_v20 = vmul.f32 %v6417_v46, %v6373_v61  ;;  %4155 = vadd.xlane.f32.xlu0 %v4154_v19  ;;  %12932 = vmatpush3.bf16.msra.mxu1 %v15753_v50  ;;  %v6375_v22 = vmul.f32 %v15739_v43, %v6338_v59  ;;  %v7133_v61 = vld [vmem:[%s16893_s22 + $0x1b8] sm:$0xff] }
0x1d29   :  { %12934 = vmatprep.subr.bf16.mxu1 %v15755_v32  ;;  %v15813_v19 = vpack.c.bf16 %v7115_v51, %v7114_v58  ;;  %v15817_v5 = vpack.c.bf16 %v7133_v61, %v7132_v14  ;;  %v6377_v58 = vmul.f32 %v15773_v21, %v6338_v59  ;;  %v7134_v51 = vld [vmem:[%s16893_s22 + $0x1c0] sm:$0xff] }
0x1d2a   :  { %12451 = vmatprep.mubr.msk.f32.mxu1 %vm217_vm3, %v6557_v20  ;;  %v7116_v20 = vld [vmem:[%s16893_s22 + $0x130] sm:$0xff] }
0x1d2b   :  { %v6432_v25 = vpop.permute.xlu0 %6431  ;;  %12452 = vmatmul.mubr.msk.f32.gmra.mrb[110].mxu1 %vm217_vm3, %v6558_v6  ;;  %v6428_v42 = vpop.permute.xlu1 %6427  ;;  %v7117_v6 = vld [vmem:[%s16893_s22 + $0x138] sm:$0xff] }
0x1d2c   :  { %v6560_v1 = vmul.f32 %v6432_v25, %v6376_v8  ;;  %v6559_v46 = vmul.f32 %v6428_v42, %v6375_v22  ;;  %4260 = vadd.xlane.f32.xlu0 %v14977_v3  ;;  %12936 = vmatpush3.bf16.msra.mxu1 %v15788_v40  ;;  %v6378_v3 = vmul.f32 %v15767_v35, %v6338_v59  ;;  %v7135_v8 = vld [vmem:[%s16893_s22 + $0x1c8] sm:$0xff]  ;;  %v5072_v59 = vsel %vm217_vm3, %v14988_v29, 0.0 }
0x1d2d   :  { %3340 = vadd.xlane.f32.xlu1 %v14814_v52  ;;  %12938 = vmatprep.subr.bf16.mxu1 %v15791_v54  ;;  %v6342_v52 = vrot.slane %v6327_v15, %v14620_v49  ;;  %v15840_v15 = vpack.c.bf16 %v7117_v6, %v7116_v20  ;;  %v15843_v42 = vpack.c.bf16 %v7135_v8, %v7134_v51 }
0x1d2e   :  { %12454 = vmatprep.mubr.msk.f32.mxu1 %vm217_vm3, %v6559_v46  ;;  %v6282_v29 = vcombine.high %v15711_v7, %v15711_v7  ;;  %v6329_v6 = vcombine.high %v15743_v41, %v15743_v41 }
0x1d2f   :  { %v6440_v22 = vpop.permute.xlu0 %6439  ;;  %12455 = vmatmul.mubr.msk.f32.gmra.mrb[112].mxu1 %vm217_vm3, %v6560_v1  ;;  %v6436_v14 = vpop.permute.xlu1 %6435  ;;  %v7118_v1 = vld [vmem:[%s16893_s22 + $0x140] sm:$0xff]  ;;  %v6380_v46 = vmul.f32 %v15733_v2, %v6342_v52  ;;  %v6379_v20 = vmul.f32 %v15739_v43, %v6342_v52 }
0x1d30   :  { %v6562_v61 = vmul.f32 %v6440_v22, %v6378_v3  ;;  %v6561_v25 = vmul.f32 %v6436_v14, %v6377_v58  ;;  %5178 = vadd.xlane.f32.xlu0 %v15159_v11  ;;  %12940 = vmatpush3.bf16.msra.mxu1 %v15813_v19  ;;  %v7119_v11 = vld [vmem:[%s16893_s22 + $0x148] sm:$0xff]  ;;  %v7136_v3 = vld [vmem:[%s16893_s22 + $0x1d0] sm:$0xff]  ;;  %v7137_v58 = vld [vmem:[%s16893_s22 + $0x1d8] sm:$0xff]  ;;  %v5990_v14 = vsel %vm217_vm3, %v15165_v33, 0.0  ;;  %v6382_v33 = vmul.f32 %v15767_v35, %v6342_v52 }
0x1d31   :  { %5073 = vadd.xlane.f32.xlu1 %v5072_v59  ;;  %12942 = vmatprep.subr.bf16.mxu1 %v15817_v5  ;;  %v15869_v41 = vpack.c.bf16 %v7119_v11, %v7118_v1  ;;  %v6381_v59 = vmul.f32 %v15773_v21, %v6342_v52  ;;  %v6346_v1 = vrot.slane %v6329_v6, %v14620_v49  ;;  %v6908_v52 = vsel %vm217_vm3, %v15507_v28, 0.0 }
0x1d32   :  { %12457 = vmatprep.mubr.msk.f32.mxu1 %vm217_vm3, %v6561_v25  ;;  %v15872_v25 = vpack.c.bf16 %v7137_v58, %v7136_v3  ;;  %v6296_v11 = vrot.slane %v6282_v29, %v14664_v27 }
0x1d33   :  { %v6451_v51 = vpop.permute.xlu0 %6450  ;;  %12458 = vmatmul.mubr.msk.f32.gmra.mrb[114].mxu1 %vm217_vm3, %v6562_v61  ;;  %v6447_v7 = vpop.permute.xlu1 %6446  ;;  %17107 = vst [vmem:[#allocation43_spill] sm:$0xff] %v15869_v41  ;;  %v7120_v61 = vld [vmem:[%s16893_s22 + $0x150] sm:$0xff]  ;;  %v6384_v28 = vmul.f32 %v15733_v2, %v6346_v1 }
0x1d34   :  { %v6564_v8 = vmul.f32 %v6451_v51, %v6380_v46  ;;  %v6563_v22 = vmul.f32 %v6447_v7, %v6379_v20  ;;  %6096 = vadd.xlane.f32.xlu0 %v15478_v30  ;;  %12944 = vmatpush3.bf16.msra.mxu1 %v15840_v15  ;;  %17108 = vst [vmem:[#allocation44_spill] sm:$0xff] %v15872_v25  ;;  %v7121_v30 = vld [vmem:[%s16893_s22 + $0x158] sm:$0xff]  ;;  %v7138_v46 = vld [vmem:[%s16893_s22 + $0x1e0] sm:$0xff]  ;;  %v7139_v20 = vld [vmem:[%s16893_s22 + $0x1e8] sm:$0xff] }
0x1d35   :  { %5991 = vadd.xlane.f32.xlu1 %v5990_v14  ;;  %12946 = vmatprep.subr.bf16.mxu1 %v15843_v42  ;;  %v15895_v29 = vpack.c.bf16 %v7121_v30, %v7120_v61  ;;  %v15898_v6 = vpack.c.bf16 %v7139_v20, %v7138_v46  ;;  %v6383_v14 = vmul.f32 %v15739_v43, %v6346_v1  ;;  %v7140_v30 = vld [vmem:[%s16893_s22 + $0x1f0] sm:$0xff] }
0x1d36   :  { %12460 = vmatprep.mubr.msk.f32.mxu1 %vm217_vm3, %v6563_v22  ;;  %v7122_v22 = vld [vmem:[%s16893_s22 + $0x160] sm:$0xff]  ;;  %v15910_v61 = vrot.slane %v6296_v11, %v14664_v27 }
0x1d37   :  { %v6459_v3 = vpop.permute.xlu0 %6458  ;;  %12461 = vmatmul.mubr.msk.f32.gmra.mrb[116].mxu1 %vm217_vm3, %v6564_v8  ;;  %v6455_v58 = vpop.permute.xlu1 %6454  ;;  %17109 = vst [vmem:[#allocation45_spill] sm:$0xff] %v15895_v29  ;;  %17110 = vst [vmem:[#allocation46_spill] sm:$0xff] %v15898_v6  ;;  %v7123_v8 = vld [vmem:[%s16893_s22 + $0x168] sm:$0xff] }
0x1d38   :  { %v6566_v51 = vmul.f32 %v6459_v3, %v6382_v33  ;;  %v6565_v7 = vmul.f32 %v6455_v58, %v6381_v59  ;;  %12948 = vmatpush3.bf16.msra.mxu1 %v15869_v41  ;;  %v7141_v33 = vld [vmem:[%s16893_s22 + $0x1f8] sm:$0xff]  ;;  %v15920_v58 = vpack.c.bf16 %v7123_v8, %v7122_v22  ;;  %v6350_v22 = vrot.slane %v15910_v61, %v14620_v49 }
0x1d39   :  { %6909 = vadd.xlane.f32.xlu1 %v6908_v52  ;;  %12950 = vmatprep.subr.bf16.mxu1 %v15872_v25  ;;  %v7124_v52 = vld [vmem:[%s16893_s22 + $0x170] sm:$0xff]  ;;  %v7125_v25 = vld [vmem:[%s16893_s22 + $0x178] sm:$0xff]  ;;  %v6298_v8 = vcombine.high %v6296_v11, %v6296_v11 }
0x1d3a   :  { %12463 = vmatprep.mubr.msk.f32.mxu1 %vm217_vm3, %v6565_v7  ;;  %17111 = vst [vmem:[#allocation47_spill] sm:$0xff] %v15920_v58  ;;  %v15923_v7 = vpack.c.bf16 %v7141_v33, %v7140_v30  ;;  %v7191_v30 = vld [vmem:[%s16893_s22 + $0x388] sm:$0xff] }
0x1d3b   :  { %v6470_v59 = vpop.permute.xlu0 %6469  ;;  %12464 = vmatmul.mubr.msk.f32.gmra.mrb[118].mxu1 %vm217_vm3, %v6566_v51  ;;  %v6466_v46 = vpop.permute.xlu1 %6465  ;;  %v6386_v51 = vmul.f32 %v15767_v35, %v6346_v1  ;;  %v6326_v41 = vrot.slane %v6298_v8, %v14664_v27 }
0x1d3c   :  { %v6568_v20 = vmul.f32 %v6470_v59, %v6384_v28  ;;  %v6567_v3 = vmul.f32 %v6466_v46, %v6383_v14  ;;  %12952 = vmatpush3.bf16.msra.mxu1 %v15895_v29  ;;  %17112 = vst [vmem:[#allocation48_spill] sm:$0xff] %v15923_v7  ;;  %v6385_v28 = vmul.f32 %v15773_v21, %v6346_v1  ;;  %v7190_v14 = vld [vmem:[%s16893_s22 + $0x380] sm:$0xff] }
0x1d3d   :  { %12954 = vmatprep.subr.bf16.mxu1 %v15898_v6  ;;  %v15944_v1 = vpack.c.bf16 %v7125_v25, %v7124_v52  ;;  %v15947_v11 = vpack.c.bf16 %v7191_v30, %v7190_v14  ;;  %v6388_v6 = vmul.f32 %v15733_v2, %v6350_v22  ;;  %v6387_v29 = vmul.f32 %v15739_v43, %v6350_v22 }
0x1d3e   :  { %12466 = vmatprep.mubr.msk.f32.mxu1 %vm217_vm3, %v6567_v3  ;;  %v6390_v25 = vmul.f32 %v15767_v35, %v6350_v22  ;;  %v6389_v52 = vmul.f32 %v15773_v21, %v6350_v22  ;;  %v6354_v14 = vrot.slane %v6326_v41, %v14620_v49  ;;  %v6328_v22 = vcombine.high %v15910_v61, %v15910_v61 }
0x1d3f   :  { %v6478_v33 = vpop.permute.xlu0 %6477  ;;  %12467 = vmatmul.mubr.msk.f32.gmra.mrb[120].mxu1 %vm217_vm3, %v6568_v20  ;;  %v6474_v59 = vpop.permute.xlu1 %6473  ;;  %17113 = vst [vmem:[#allocation49_spill] sm:$0xff] %v15944_v1  ;;  %17114 = vst [vmem:[#allocation50_spill] sm:$0xff] %v15947_v11 }
0x1d40   :  { %v6570_v46 = vmul.f32 %v6478_v33, %v6386_v51  ;;  %v6569_v3 = vmul.f32 %v6474_v59, %v6385_v28  ;;  %12956 = vmatpush3.bf16.msra.mxu1 %v15920_v58  ;;  %v6393_v61 = vmul.f32 %v15773_v21, %v6354_v14 }
0x1d41   :  { %12958 = vmatprep.subr.bf16.mxu1 %v15923_v7 }
0x1d42   :  { %12469 = vmatprep.mubr.msk.f32.mxu1 %vm217_vm3, %v6569_v3 }
0x1d43   :  { %v6489_v20 = vpop.permute.xlu0 %6488  ;;  %12470 = vmatmul.mubr.msk.f32.gmra.mrb[122].mxu1 %vm217_vm3, %v6570_v46  ;;  %v6485_v51 = vpop.permute.xlu1 %6484  ;;  %v6391_v46 = vmul.f32 %v15739_v43, %v6354_v14 }
0x1d44   :  { %v6572_v28 = vmul.f32 %v6489_v20, %v6388_v6  ;;  %v6571_v33 = vmul.f32 %v6485_v51, %v6387_v29  ;;  %12960 = vmatpush3.bf16.msra.mxu1 %v15944_v1  ;;  %v15964_v29 = vld [vmem:[%s16892_s21] sm:$0xff]  ;;  %v6392_v6 = vmul.f32 %v15733_v2, %v6354_v14 }
0x1d45   :  { %12994 = vmatprep.subr.bf16.mxu1 %v15947_v11 }
0x1d46   :  { %12472 = vmatprep.mubr.msk.f32.mxu1 %vm217_vm3, %v6571_v33  ;;  %v15974_v33 = vrot.slane %v15964_v29, %v14620_v49 }
0x1d47   :  { %v6497_v30 = vpop.permute.xlu0 %6496  ;;  %12473 = vmatmul.mubr.msk.f32.gmra.mrb[124].mxu1 %vm217_vm3, %v6572_v28  ;;  %v6493_v27 = vpop.permute.xlu1 %6492 }
0x1d48   :  { %v6574_v8 = vmul.f32 %v6497_v30, %v6390_v25  ;;  %v6573_v59 = vmul.f32 %v6493_v27, %v6389_v52  ;;  %v15978_v25 = vrot.slane %v15964_v29, %v14630_v53  ;;  %v6394_v52 = vmul.f32 %v15767_v35, %v6354_v14 }
0x1d49   :  { %v6358_v30 = vrot.slane %v6328_v22, %v14620_v49  ;;  %v7314_v53 = vadd.f32 %v15473_v24, %v15974_v33  ;;  %v15995_v14 = vrot.slane %v15964_v29, %v14640_v0  ;;  %v16005_v0 = vrot.slane %v15964_v29, %v14636_v62 }
0x1d4a   :  { %12475 = vmatprep.mubr.msk.f32.mxu1 %vm217_vm3, %v6573_v59  ;;  %v15987_v59 = vrot.slane %v15964_v29, %v14648_v10 }
0x1d4b   :  { %v6508_v3 = vpop.permute.xlu0 %6507  ;;  %12476 = vmatmul.mubr.msk.f32.gmra.mrb[126].mxu1 %vm217_vm3, %v6574_v8  ;;  %v6504_v20 = vpop.permute.xlu1 %6503  ;;  %v6396_v22 = vmul.f32 %v15733_v2, %v6358_v30  ;;  %v6395_v10 = vmul.f32 %v15739_v43, %v6358_v30  ;;  %13737 = vtanh.f32 %v7314_v53  ;;  %17115 = vst [vmem:[#allocation51_spill] sm:$0xff] %v16005_v0 }
0x1d4c   :  { %v6576_v51 = vmul.f32 %v6508_v3, %v6392_v6  ;;  %v6575_v28 = vmul.f32 %v6504_v20, %v6391_v46  ;;  %v6330_v3 = vcombine.high %v6326_v41, %v6326_v41  ;;  %v7316_v20 = vadd.f32 %v15475_v60, %v15978_v25 }
0x1d4d   :  { %v7458_v24 = vadd.f32 %v15486_v57, %v15987_v59  ;;  %v6398_v60 = vmul.f32 %v15767_v35, %v6358_v30 }
0x1d4e   :  { %12478 = vmatprep.mubr.msk.f32.mxu1 %vm217_vm3, %v6575_v28  ;;  %13739 = vtanh.f32 %v7316_v20  ;;  %v6362_v57 = vrot.slane %v6330_v3, %v14620_v49 }
0x1d4f   :  { %v6516_v27 = vpop.permute.xlu0 %6515  ;;  %12479 = vmatmul.mubr.msk.f32.gmra.mrb[128].mxu1 %vm217_vm3, %v6576_v51  ;;  %v6512_v8 = vpop.permute.xlu1 %6511  ;;  %13741 = vtanh.f32 %v7458_v24  ;;  %v7161_v24 = vld [vmem:[%s16893_s22 + $0x298] sm:$0xff] }
0x1d50   :  { %v6578_v6 = vmul.f32 %v6516_v27, %v6394_v52  ;;  %v6577_v46 = vmul.f32 %v6512_v8, %v6393_v61  ;;  %v6397_v61 = vmul.f32 %v15773_v21, %v6358_v30  ;;  %v7387_v27 = vadd.f32 %v15482_v34, %v15995_v14 }
0x1d51   :  { %v16013_v8 = vrot.slane %v15964_v29, %v14656_v16  ;;  %v7385_v30 = vadd.f32 %v15480_v36, %v16005_v0  ;;  %v6400_v16 = vmul.f32 %v15733_v2, %v6362_v57  ;;  %v6399_v49 = vmul.f32 %v15739_v43, %v6362_v57  ;;  %v7143_v43 = vld [vmem:[%s16893_s22 + $0x208] sm:$0xff] }
0x1d52   :  { %12481 = vmatprep.mubr.msk.f32.mxu1 %vm217_vm3, %v6577_v46  ;;  %13743 = vtanh.f32 %v7387_v27  ;;  %v6401_v2 = vmul.f32 %v15773_v21, %v6362_v57  ;;  %v7160_v21 = vld [vmem:[%s16893_s22 + $0x290] sm:$0xff] }
0x1d53   :  { %v6527_v51 = vpop.permute.xlu0 %6526  ;;  %12482 = vmatmul.mubr.msk.f32.gmra.mrb[130].mxu1 %vm217_vm3, %v6578_v6  ;;  %v6523_v28 = vpop.permute.xlu1 %6522  ;;  %v7529_v34 = vadd.f32 %v15490_v47, %v16013_v8  ;;  %13745 = vtanh.f32 %v7385_v30  ;;  %v7142_v47 = vld [vmem:[%s16893_s22 + $0x200] sm:$0xff]  ;;  %v7145_v30 = vld [vmem:[%s16893_s22 + $0x218] sm:$0xff] }
0x1d54   :  { %v6580_v41 = vmul.f32 %v6527_v51, %v6396_v22  ;;  %v6579_v52 = vmul.f32 %v6523_v28, %v6395_v10  ;;  %v3368_v22 = vsel %vm217_vm3, %v14613_v38, %v15722_v12  ;;  %v16051_v27 = vpack.c.bf16 %v7143_v43, %v7142_v47  ;;  %v7192_v47 = vld [vmem:[%s16893_s22 + $0x390] sm:$0xff]  ;;  %v7193_v43 = vld [vmem:[%s16893_s22 + $0x398] sm:$0xff] }
0x1d55   :  { %13747 = vtanh.f32 %v7529_v34  ;;  %v13738_v51 = vpop.eup %13737  ;;  %v3370_v38 = vsel %vm3369_vm4, %v3368_v22, %v15720_v31  ;;  %v7174_v22 = vld [vmem:[%s16893_s22 + $0x300] sm:$0xff] }
0x1d56   :  { %12484 = vmatprep.mubr.msk.f32.mxu1 %vm217_vm3, %v6579_v52 }
0x1d57   :  { %v6535_v6 = vpop.permute.xlu0 %6534  ;;  %12485 = vmatmul.mubr.msk.f32.gmra.mrb[132].mxu1 %vm217_vm3, %v6580_v41  ;;  %v6531_v62 = vpop.permute.xlu1 %6530 }
0x1d58   :  { %v6582_v46 = vmul.f32 %v6535_v6, %v6398_v60  ;;  %v6581_v53 = vmul.f32 %v6531_v62, %v6397_v61  ;;  %v13740_v41 = vpop.eup %13739  ;;  %v6402_v62 = vmul.f32 %v15767_v35, %v6362_v57  ;;  %v7163_v35 = vld [vmem:[%s16893_s22 + $0x2a8] sm:$0xff] }
0x1d59   :  { %v13742_v6 = vpop.eup %13741 }
0x1d5a   :  { %12487 = vmatprep.mubr.msk.f32.mxu1 %vm217_vm3, %v6581_v53  ;;  %v7144_v53 = vld [vmem:[%s16893_s22 + $0x210] sm:$0xff] }
0x1d5b   :  { %v6546_v3 = vpop.permute.xlu0 %6545  ;;  %12488 = vmatmul.mubr.msk.f32.gmra.mrb[134].mxu1 %vm217_vm3, %v6582_v46  ;;  %v6542_v20 = vpop.permute.xlu1 %6541  ;;  %v16055_v46 = vpack.c.bf16 %v7161_v24, %v7160_v21 }
0x1d5c   :  { %v6584_v10 = vmul.f32 %v6546_v3, %v6400_v16  ;;  %v6583_v36 = vmul.f32 %v6542_v20, %v6399_v49  ;;  %v7162_v3 = vld [vmem:[%s16893_s22 + $0x2a0] sm:$0xff]  ;;  %v13744_v57 = vpop.eup %13743 }
0x1d5e   :  { %12490 = vmatprep.mubr.msk.f32.mxu1 %vm217_vm3, %v6583_v36 }
0x1d5f   :  { %v3366_v12 = vpop.permute.xlu0 %3365  ;;  %12491 = vmatmul.mubr.msk.f32.gmra.mrb[136].mxu1 %vm217_vm3, %v6584_v10  ;;  %v6550_v28 = vpop.permute.xlu1 %6549  ;;  %v7175_v10 = vld [vmem:[%s16893_s22 + $0x308] sm:$0xff] }
0x1d60   :  { %v16047_v52 = vsel %vm3371_vm5, %v3370_v38, %v3366_v12  ;;  %v6585_v60 = vmul.f32 %v6550_v28, %v6401_v2  ;;  %v16078_v2 = vpack.c.bf16 %v7145_v30, %v7144_v53  ;;  %v7146_v38 = vld [vmem:[%s16893_s22 + $0x220] sm:$0xff]  ;;  %v7147_v12 = vld [vmem:[%s16893_s22 + $0x228] sm:$0xff]  ;;  %v13746_v28 = vpop.eup %13745  ;;  %v16108_v30 = vpack.c.bf16 %v7193_v43, %v7192_v47 }
0x1d61   :  { %v7540_v61 = vmul.f32 %v13740_v41, %v16047_v52  ;;  %v7539_v31 = vmul.f32 %v13738_v51, %v16047_v52  ;;  %v7544_v49 = vmul.f32 %v13742_v6, %v16047_v52  ;;  %v7542_v36 = vmul.f32 %v13744_v57, %v16047_v52  ;;  %v13748_v6 = vpop.eup %13747  ;;  %v7195_v57 = vld [vmem:[%s16893_s22 + $0x3a8] sm:$0xff] }
0x1d62   :  { %12493 = vmatprep.mubr.msk.f32.mxu1 %vm217_vm3, %v6585_v60  ;;  %v16088_v51 = vpack.c.bf16 %v7163_v35, %v7162_v3  ;;  %v16098_v60 = vpack.c.bf16 %v7175_v10, %v7174_v22  ;;  %v7541_v53 = vmul.f32 %v13746_v28, %v16047_v52  ;;  %v16121_v3 = vpack.c.bf16 %v7147_v12, %v7146_v38  ;;  %v7194_v35 = vld [vmem:[%s16893_s22 + $0x3a0] sm:$0xff]  ;;  %v7148_v22 = vld [vmem:[%s16893_s22 + $0x230] sm:$0xff]  ;;  %v7149_v10 = vld [vmem:[%s16893_s22 + $0x238] sm:$0xff] }
0x1d63   :  { %7611 = vmatprep.mubr.f32.mxu0 %v7540_v61  ;;  %v4280_v34 = vpop.permute.xlu0 %4279  ;;  %v6554_v16 = vpop.permute.xlu1 %6553  ;;  %v7164_v61 = vld [vmem:[%s16893_s22 + $0x2b0] sm:$0xff]  ;;  %v7166_v38 = vld [vmem:[%s16893_s22 + $0x2c0] sm:$0xff]  ;;  %v7167_v12 = vld [vmem:[%s16893_s22 + $0x2c8] sm:$0xff] }
0x1d64   :  { %v6586_v20 = vmul.f32 %v6554_v16, %v6402_v62  ;;  %7612 = vmatmul.mubr.f32.vlgmr.msra.gmra.mrb[108].mxu0 %v7539_v31  ;;  %17116 = vst [vmem:[#allocation52_spill] sm:$0xff] %v16088_v51  ;;  %v4288_v21 = vsel %vm217_vm3, %v14822_v17, %v4280_v34  ;;  %v7165_v31 = vld [vmem:[%s16893_s22 + $0x2b8] sm:$0xff]  ;;  %v7176_v17 = vld [vmem:[%s16893_s22 + $0x310] sm:$0xff]  ;;  %17117 = vst [vmem:[#allocation53_spill] sm:$0xff] %v16121_v3 }
0x1d65   :  { %12964 = vmatpush3.bf16.msra.mxu0 %v16051_v27  ;;  %7751 = vmatprep.mubr.f32.mxu0 %v7544_v49  ;;  %v7177_v34 = vld [vmem:[%s16893_s22 + $0x318] sm:$0xff]  ;;  %v7546_v49 = vmul.f32 %v13748_v6, %v16047_v52 }
0x1d66   :  { %12494 = vmatmul.mubr.msk.f32.gmra.mrb[138].mxu1 %vm217_vm3, %v6586_v20  ;;  %12966 = vmatprep.subr.bf16.mxu0 %v16055_v46  ;;  %v16130_v20 = vpack.c.bf16 %v7165_v31, %v7164_v61  ;;  %v16139_v43 = vpack.c.bf16 %v7177_v34, %v7176_v17  ;;  %v16160_v31 = vpack.c.bf16 %v7149_v10, %v7148_v22  ;;  %v7197_v6 = vld [vmem:[%s16893_s22 + $0x3b8] sm:$0xff]  ;;  %v7151_v17 = vld [vmem:[%s16893_s22 + $0x248] sm:$0xff]  ;;  %v7168_v22 = vld [vmem:[%s16893_s22 + $0x2d0] sm:$0xff] }
0x1d67   :  { %v4286_v24 = vpop.permute.xlu0 %4285  ;;  %7681 = vmatprep.mubr.f32.mxu1 %v7542_v36  ;;  %v4283_v41 = vpop.permute.xlu1 %4282  ;;  %v16179_v34 = vrot.slane %v15964_v29, %v14644_v4  ;;  %v7169_v10 = vld [vmem:[%s16893_s22 + $0x2d8] sm:$0xff] }
0x1d68   :  { %v4289_v62 = vsel %vm3369_vm4, %v4288_v21, %v4283_v41  ;;  %17118 = vst [vmem:[#allocation54_spill] sm:$0xff] %v16130_v20  ;;  %v16150_v21 = vpack.c.bf16 %v7195_v57, %v7194_v35  ;;  %v7179_v41 = vld [vmem:[%s16893_s22 + $0x328] sm:$0xff]  ;;  %17120 = vst [vmem:[#allocation56_spill] sm:$0xff] %v16160_v31 }
0x1d69   :  { %v16117_v16 = vsel %vm3371_vm5, %v4289_v62, %v4286_v24  ;;  %12968 = vmatpush3.bf16.msra.mxu0 %v16078_v2  ;;  %v7178_v24 = vld [vmem:[%s16893_s22 + $0x320] sm:$0xff]  ;;  %v16169_v62 = vpack.c.bf16 %v7167_v12, %v7166_v38  ;;  %v7181_v38 = vld [vmem:[%s16893_s22 + $0x338] sm:$0xff] }
0x1d6a   :  { %7682 = vmatmul.mubr.f32.vlgmr.msra.gmra.mrb[140].mxu1 %v7541_v53  ;;  %12970 = vmatprep.subr.bf16.mxu0 %v16088_v51  ;;  %17119 = vst [vmem:[#allocation55_spill] sm:$0xff] %v16150_v21  ;;  %v7150_v53 = vld [vmem:[%s16893_s22 + $0x240] sm:$0xff]  ;;  %v16182_v57 = vpack.c.bf16 %v7179_v41, %v7178_v24  ;;  %v7199_v24 = vld [vmem:[%s16893_s22 + $0x3c8] sm:$0xff]  ;;  %v16212_v41 = vpack.c.bf16 %v7169_v10, %v7168_v22 }
0x1d6b   :  { %12996 = vmatpush3.bf16.msra.mxu1 %v16098_v60  ;;  %v5201_v36 = vpop.permute.xlu0 %5200  ;;  %7821 = vmatprep.mubr.f32.mxu1 %v7546_v49  ;;  %v5198_v47 = vpop.permute.xlu1 %5197  ;;  %17121 = vst [vmem:[#allocation57_spill] sm:$0xff] %v16169_v62  ;;  %v16203_v12 = vpack.c.bf16 %v7151_v17, %v7150_v53  ;;  %v7170_v10 = vld [vmem:[%s16893_s22 + $0x2e0] sm:$0xff] }
0x1d6c   :  { %v5206_v28 = vsel %vm217_vm3, %v14990_v63, %v5198_v47  ;;  %12998 = vmatprep.subr.bf16.mxu1 %v16108_v30  ;;  %v7196_v63 = vld [vmem:[%s16893_s22 + $0x3b0] sm:$0xff]  ;;  %17122 = vst [vmem:[#allocation58_spill] sm:$0xff] %v16182_v57  ;;  %17126 = vst [vmem:[#allocation62_spill] sm:$0xff] %v16212_v41 }
0x1d6d   :  { %12972 = vmatpush3.bf16.msra.mxu0 %v16121_v3  ;;  %v5207_v61 = vsel %vm3369_vm4, %v5206_v28, %v5201_v36  ;;  %v16194_v4 = vpack.c.bf16 %v7197_v6, %v7196_v63  ;;  %v7180_v47 = vld [vmem:[%s16893_s22 + $0x330] sm:$0xff]  ;;  %17125 = vst [vmem:[#allocation61_spill] sm:$0xff] %v16203_v12  ;;  %v7198_v28 = vld [vmem:[%s16893_s22 + $0x3c0] sm:$0xff]  ;;  %v7153_v63 = vld [vmem:[%s16893_s22 + $0x258] sm:$0xff]  ;;  %v7456_v6 = vadd.f32 %v15484_v23, %v16179_v34 }
0x1d6e   :  { %12974 = vmatprep.subr.bf16.mxu0 %v16130_v20  ;;  %v16225_v22 = vpack.c.bf16 %v7181_v38, %v7180_v47  ;;  %v16235_v23 = vpack.c.bf16 %v7199_v24, %v7198_v28  ;;  %v16245_v47 = vrot.slane %v15964_v29, %v14652_v13  ;;  %v7200_v28 = vld [vmem:[%s16893_s22 + $0x3d0] sm:$0xff]  ;;  %v7201_v24 = vld [vmem:[%s16893_s22 + $0x3d8] sm:$0xff]  ;;  %v7154_v13 = vld [vmem:[%s16893_s22 + $0x260] sm:$0xff] }
0x1d6f   :  { %13000 = vmatpush3.bf16.msra.mxu1 %v16139_v43  ;;  %v6116_v49 = vpop.permute.xlu0 %6115  ;;  %v5204_v35 = vpop.permute.xlu1 %5203  ;;  %17124 = vst [vmem:[#allocation60_spill] sm:$0xff] %v16194_v4  ;;  %v7155_v29 = vld [vmem:[%s16893_s22 + $0x268] sm:$0xff]  ;;  %13749 = vtanh.f32 %v7456_v6  ;;  %v16280_v6 = vpack.c.bf16 %v7201_v24, %v7200_v28  ;;  %v7202_v28 = vld [vmem:[%s16893_s22 + $0x3e0] sm:$0xff] }
0x1d70   :  { %v16191_v36 = vsel %vm3371_vm5, %v5207_v61, %v5204_v35  ;;  %13002 = vmatprep.subr.bf16.mxu1 %v16150_v21  ;;  %v7152_v61 = vld [vmem:[%s16893_s22 + $0x250] sm:$0xff]  ;;  %v6124_v53 = vsel %vm217_vm3, %v15167_v26, %v6116_v49  ;;  %17127 = vst [vmem:[#allocation63_spill] sm:$0xff] %v16225_v22  ;;  %17128 = vst [vmem:[#allocation64_spill] sm:$0xff] %v16235_v23  ;;  %v7182_v26 = vld [vmem:[%s16893_s22 + $0x340] sm:$0xff] }
0x1d71   :  { %17123 = vst [vmem:[#allocation59_spill] sm:$0xff] %v16191_v36  ;;  %12976 = vmatpush3.bf16.msra.mxu0 %v16160_v31  ;;  %v7171_v36 = vld [vmem:[%s16893_s22 + $0x2e8] sm:$0xff]  ;;  %17129 = vst [vmem:[#allocation65_spill] sm:$0xff] %v16245_v47 }
0x1d72   :  { %12978 = vmatprep.subr.bf16.mxu0 %v16169_v62  ;;  %v7183_v49 = vld [vmem:[%s16893_s22 + $0x348] sm:$0xff]  ;;  %17134 = vst [vmem:[#allocation70_spill] sm:$0xff] %v16280_v6 }
0x1d73   :  { %13004 = vmatpush3.bf16.msra.mxu1 %v16182_v57  ;;  %v6122_v17 = vpop.permute.xlu0 %6121  ;;  %v6119_v35 = vpop.permute.xlu1 %6118  ;;  %v7203_v24 = vld [vmem:[%s16893_s22 + $0x3e8] sm:$0xff] }
0x1d74   :  { %v6125_v62 = vsel %vm3369_vm4, %v6124_v53, %v6119_v35  ;;  %13006 = vmatprep.subr.bf16.mxu1 %v16194_v4  ;;  %v16251_v53 = vpack.c.bf16 %v7153_v63, %v7152_v61  ;;  %v16260_v35 = vpack.c.bf16 %v7171_v36, %v7170_v10  ;;  %v16269_v63 = vpack.c.bf16 %v7183_v49, %v7182_v26  ;;  %v7172_v36 = vld [vmem:[%s16893_s22 + $0x2f0] sm:$0xff]  ;;  %v7185_v49 = vld [vmem:[%s16893_s22 + $0x358] sm:$0xff] }
0x1d75   :  { %v16248_v38 = vsel %vm3371_vm5, %v6125_v62, %v6122_v17  ;;  %12980 = vmatpush3.bf16.msra.mxu0 %v16203_v12  ;;  %v7173_v17 = vld [vmem:[%s16893_s22 + $0x2f8] sm:$0xff]  ;;  %v7184_v26 = vld [vmem:[%s16893_s22 + $0x350] sm:$0xff] }
0x1d76   :  { %17130 = vst [vmem:[#allocation66_spill] sm:$0xff] %v16248_v38  ;;  %17131 = vst [vmem:[#allocation67_spill] sm:$0xff] %v16251_v53  ;;  %12982 = vmatprep.subr.bf16.mxu0 %v16212_v41  ;;  %v7527_v38 = vadd.f32 %v15488_v39, %v16245_v47  ;;  %v7156_v39 = vld [vmem:[%s16893_s22 + $0x270] sm:$0xff] }
0x1d77   :  { %17132 = vst [vmem:[#allocation68_spill] sm:$0xff] %v16260_v35  ;;  %13008 = vmatpush3.bf16.msra.mxu1 %v16225_v22  ;;  %v7037_v62 = vpop.permute.xlu0 %7036  ;;  %v7034_v61 = vpop.permute.xlu1 %7033  ;;  %17133 = vst [vmem:[#allocation69_spill] sm:$0xff] %v16269_v63 }
0x1d78   :  { %v7042_v10 = vsel %vm217_vm3, %v15702_v45, %v7034_v61  ;;  %13010 = vmatprep.subr.bf16.mxu1 %v16235_v23  ;;  %v16292_v45 = vpack.c.bf16 %v7155_v29, %v7154_v13  ;;  %v16301_v61 = vpack.c.bf16 %v7173_v17, %v7172_v36  ;;  %v7157_v13 = vld [vmem:[%s16893_s22 + $0x278] sm:$0xff]  ;;  %v16316_v36 = vpack.c.bf16 %v7203_v24, %v7202_v28  ;;  %v7186_v17 = vld [vmem:[%s16893_s22 + $0x360] sm:$0xff]  ;;  %v7188_v24 = vld [vmem:[%s16893_s22 + $0x370] sm:$0xff] }
0x1d79   :  { %12984 = vmatpush3.bf16.msra.mxu0 %v16251_v53  ;;  %v7043_v41 = vsel %vm3369_vm4, %v7042_v10, %v7037_v62  ;;  %v16310_v62 = vpack.c.bf16 %v7185_v49, %v7184_v26  ;;  %13751 = vtanh.f32 %v7527_v38  ;;  %v16325_v26 = vpack.c.bf16 %v7157_v13, %v7156_v39  ;;  %v7205_v49 = vld [vmem:[%s16893_s22 + $0x3f8] sm:$0xff]  ;;  %v13750_v13 = vpop.eup %13749 }
0x1d7a   :  { %17135 = vst [vmem:[#allocation71_spill] sm:$0xff] %v16292_v45  ;;  %12986 = vmatprep.subr.bf16.mxu0 %v16260_v35  ;;  %17136 = vst [vmem:[#allocation72_spill] sm:$0xff] %v16301_v61  ;;  %v7187_v35 = vld [vmem:[%s16893_s22 + $0x368] sm:$0xff]  ;;  %v7189_v39 = vld [vmem:[%s16893_s22 + $0x378] sm:$0xff] }
0x1d7b   :  { %13012 = vmatpush3.bf16.msra.mxu1 %v16269_v63  ;;  %v7040_v29 = vpop.permute.xlu1 %7039  ;;  %17137 = vst [vmem:[#allocation73_spill] sm:$0xff] %v16310_v62  ;;  %17139 = vst [vmem:[#allocation75_spill] sm:$0xff] %v16316_v36  ;;  %v16335_v28 = vpack.c.bf16 %v7187_v35, %v7186_v17  ;;  %v16350_v35 = vpack.c.bf16 %v7189_v39, %v7188_v24  ;;  %v17144_v17 = vmov 0.0   ;;  %v17145_v24 = vld [vmem:[#allocation15_spill] sm:$0xff]  ;;  %v17146_v39 = vld [vmem:[#allocation16_spill] sm:$0xff] }
0x1d7c   :  { %v16313_v10 = vsel %vm3371_vm5, %v7043_v41, %v7040_v29  ;;  %13014 = vmatprep.subr.bf16.mxu1 %v16280_v6  ;;  %17140 = vst [vmem:[#allocation76_spill] sm:$0xff] %v16325_v26  ;;  %v7204_v41 = vld [vmem:[%s16893_s22 + $0x3f0] sm:$0xff]  ;;  %v7543_v29 = vmul.f32 %v13750_v13, %v16047_v52 }
0x1d7d   :  { %17138 = vst [vmem:[#allocation74_spill] sm:$0xff] %v16313_v10  ;;  %12988 = vmatpush3.bf16.msra.mxu0 %v16292_v45  ;;  %17141 = vst [vmem:[#allocation77_spill] sm:$0xff] %v16335_v28  ;;  %v16338_v38 = vpack.c.bf16 %v7205_v49, %v7204_v41  ;;  %v17147_v13 = vld [vmem:[#allocation21_spill] sm:$0xff] }
0x1d7e   :  { %12990 = vmatprep.subr.bf16.mxu0 %v16301_v61  ;;  %17143 = vst [vmem:[#allocation79_spill] sm:$0xff] %v16350_v35 }
0x1d7f   :  { %13016 = vmatpush3.bf16.msra.mxu1 %v16310_v62  ;;  %17142 = vst [vmem:[#allocation78_spill] sm:$0xff] %v16338_v38 }
0x1d80   :  { %13018 = vmatprep.subr.bf16.mxu1 %v16316_v36 }
0x1d81   :  { %12992 = vmatpush3.bf16.msra.mxu0 %v16325_v26 }
0x1d82   :  { %13026 = vmatprep.subr.bf16.mxu0 %v15192_v48 }
0x1d83   :  { %13020 = vmatpush3.bf16.msra.mxu1 %v16335_v28  ;;  %v13752_v41 = vpop.eup %13751 }
0x1d84   :  { %7752 = vmatmul.mubr.f32.vlgmr.msra.gmra.mrb[110].mxu0 %v7543_v29  ;;  %13022 = vmatprep.subr.bf16.mxu1 %v16338_v38  ;;  %v7545_v49 = vmul.f32 %v13752_v41, %v16047_v52 }
0x1d85   :  { %13028 = vmatpush1.bf16.msra.mxu0 %v15223_v18  ;;  %7895 = vmatprep.mubr.f32.mxu0 %v17144_v17 }
0x1d86   :  { %13030 = vmatprep.subr.bf16.mxu0 %v15225_v44 }
0x1d87   :  { %13024 = vmatpush3.bf16.msra.mxu1 %v16350_v35 }
0x1d88   :  { %13034 = vmatprep.subr.bf16.mxu1 %v15248_v9 }
0x1d89   :  { %13032 = vmatpush1.bf16.msra.mxu0 %v15245_v37 }
0x1d8a   :  { %7822 = vmatmul.mubr.f32.vlgmr.msra.gmra.mrb[142].mxu1 %v7545_v49  ;;  %13042 = vmatprep.subr.bf16.mxu0 %v15357_v56 }
0x1d8b   :  { %13036 = vmatpush1.bf16.msra.mxu1 %v15334_v55  ;;  %7966 = vmatprep.mubr.f32.mxu1 %v17144_v17 }
0x1d8c   :  { %13038 = vmatprep.subr.bf16.mxu1 %v17145_v24 }
0x1d8f   :  { %13040 = vmatpush1.bf16.msra.mxu1 %v17146_v39 }
0x1d90   :  { %13050 = vmatprep.subr.bf16.mxu1 %v17147_v13 }
0x1db1   :  { %v3236_v29 = vpop.xlane.xlu0 %3235 }
0x1db2   :  { %v3237_v10 = vrot.slane %v3236_v29, 4 }
0x1db4   :  { %v3238_v52 = vadd.f32 %v3237_v10, %v3236_v29 }
0x1db5   :  { %v4156_v41 = vpop.xlane.xlu0 %4155 }
0x1db6   :  { %v3239_v44 = vrot.slane %v3238_v52, 2  ;;  %v4157_v18 = vrot.slane %v4156_v41, 4 }
0x1db8   :  { %v4158_v37 = vadd.f32 %v4157_v18, %v4156_v41  ;;  %v3240_v49 = vadd.f32 %v3239_v44, %v3238_v52 }
0x1db9   :  { %v4261_v9 = vpop.xlane.xlu0 %4260 }
0x1dba   :  { %v4159_v56 = vrot.slane %v4158_v37, 2  ;;  %v4262_v48 = vrot.slane %v4261_v9, 4  ;;  %v3341_v55 = vpop.xlane.xlu1 %3340  ;;  %v3241_v35 = vrot.slane %v3240_v49, 1 }
0x1dbb   :  { %v3342_v26 = vrot.slane %v3341_v55, 4 }
0x1dbc   :  { %v4263_v38 = vadd.f32 %v4262_v48, %v4261_v9  ;;  %v3242_v24 = vadd.f32 %v3241_v35, %v3240_v49  ;;  %v4160_v10 = vadd.f32 %v4159_v56, %v4158_v37 }
0x1dbd   :  { %v3343_v61 = vadd.f32 %v3342_v26, %v3341_v55  ;;  %v5179_v39 = vpop.xlane.xlu0 %5178 }
0x1dbe   :  { %v4264_v28 = vrot.slane %v4263_v38, 2  ;;  %v5180_v13 = vrot.slane %v5179_v39, 4  ;;  %13671 = vpush %v3242_v24  ;;  %v5074_v45 = vpop.xlane.xlu1 %5073  ;;  %v4161_v12 = vrot.slane %v4160_v10, 1 }
0x1dbf   :  { %v3344_v29 = vrot.slane %v3343_v61, 2  ;;  %v5075_v36 = vrot.slane %v5074_v45, 4 }
0x1dc0   :  { %v5181_v62 = vadd.f32 %v5180_v13, %v5179_v39  ;;  %v4265_v18 = vadd.f32 %v4264_v28, %v4263_v38  ;;  %v4162_v28 = vadd.f32 %v4161_v12, %v4160_v10 }
0x1dc1   :  { %v5076_v44 = vadd.f32 %v5075_v36, %v5074_v45  ;;  %v6097_v52 = vpop.xlane.xlu0 %6096  ;;  %v3345_v41 = vadd.f32 %v3344_v29, %v3343_v61 }
0x1dc2   :  { %v5182_v53 = vrot.slane %v5181_v62, 2  ;;  %v6098_v6 = vrot.slane %v6097_v52, 4  ;;  %v5992_v63 = vpop.xlane.xlu1 %5991  ;;  %v4266_v48 = vrot.slane %v4265_v18, 1 }
0x1dc3   :  { %v5077_v9 = vrot.slane %v5076_v44, 2  ;;  %v5993_v55 = vrot.slane %v5992_v63, 4  ;;  %v3346_v26 = vrot.slane %v3345_v41, 1 }
0x1dc4   :  { %v6099_v35 = vadd.f32 %v6098_v6, %v6097_v52  ;;  %v5183_v49 = vadd.f32 %v5182_v53, %v5181_v62  ;;  %v4267_v37 = vadd.f32 %v4266_v48, %v4265_v18 }
0x1dc5   :  { %v5994_v24 = vadd.f32 %v5993_v55, %v5992_v63  ;;  %v3347_v23 = vadd.f32 %v3346_v26, %v3345_v41  ;;  %v5078_v56 = vadd.f32 %v5077_v9, %v5076_v44 }
0x1dc6   :  { %v6100_v22 = vrot.slane %v6099_v35, 2  ;;  %v6910_v39 = vpop.xlane.xlu1 %6909  ;;  %v5184_v45 = vrot.slane %v5183_v49, 1 }
0x1dc7   :  { %v5995_v36 = vrot.slane %v5994_v24, 2  ;;  %v6911_v61 = vrot.slane %v6910_v39, 4  ;;  %13673 = vpush %v3347_v23  ;;  %v5079_v38 = vrot.slane %v5078_v56, 1 }
0x1dc8   :  { %13675 = vpush %v4162_v28  ;;  %v5185_v13 = vadd.f32 %v5184_v45, %v5183_v49  ;;  %v6101_v29 = vadd.f32 %v6100_v22, %v6099_v35 }
0x1dc9   :  { %v6912_v31 = vadd.f32 %v6911_v61, %v6910_v39  ;;  %13677 = vpush %v4267_v37  ;;  %v5080_v4 = vadd.f32 %v5079_v38, %v5078_v56  ;;  %v5996_v6 = vadd.f32 %v5995_v36, %v5994_v24 }
0x1dca   :  { %v6102_v53 = vrot.slane %v6101_v29, 1 }
0x1dcb   :  { %v6913_v63 = vrot.slane %v6912_v31, 2  ;;  %13679 = vpush %v5080_v4  ;;  %v5997_v62 = vrot.slane %v5996_v6, 1 }
0x1dcc   :  { %13681 = vpush %v5185_v13  ;;  %v6103_v18 = vadd.f32 %v6102_v53, %v6101_v29 }
0x1dcd   :  { %v6914_v44 = vadd.f32 %v6913_v63, %v6912_v31  ;;  %v5998_v12 = vadd.f32 %v5997_v62, %v5996_v6 }
0x1dcf   :  { %13683 = vpush %v5998_v12  ;;  %v6915_v10 = vrot.slane %v6914_v44, 1 }
0x1dd0   :  { %13685 = vpush %v6103_v18 }
0x1dd1   :  { %v6916_v23 = vadd.f32 %v6915_v10, %v6914_v44 }
0x1dd3   :  { %13687 = vpush %v6916_v23 }
0x1def   :  { %s13672_s22 = spop %13671 }
0x1df0   :  { %s3244_s13 = smul.f32 0.01, %s13672_s22 }
0x1df8   :  { %s13674_s14 = spop %13673 }
0x1df9   :  { %s3349_s11 = smul.f32 0.01, %s13674_s14  ;;  %s13676_s4 = spop %13675 }
0x1dfa   :  { %v12450_v52 = vpop.f32.mrb[108].mxu1  ;;  %s13678_s29 = spop %13677  ;;  %s4164_s16 = smul.f32 0.01, %s13676_s4 }
0x1dfb   :  { %v6920_v41 = vmul.f32 %v12450_v52, %v12450_v52  ;;  %v6749_v22 = vpop.f32.mrb[109].mxu1  ;;  %s3350_s21 = sadd.f32 %s3349_s11, %s3244_s13  ;;  %s4269_s10 = smul.f32 0.01, %s13678_s29 }
0x1dfc   :  { %v6919_v48 = vmul.f32 %v6749_v22, %v6749_v22  ;;  %s13680_s0 = spop %13679 }
0x1dfd   :  { %v6952_v9 = vsel %vm217_vm3, %v6920_v41, 0.0  ;;  %s13682_s15 = spop %13681  ;;  %s5082_s6 = smul.f32 0.01, %s13680_s0 }
0x1dfe   :  { %v6951_v55 = vsel %vm217_vm3, %v6919_v48, 0.0  ;;  %v12453_v26 = vpop.f32.mrb[110].mxu1  ;;  %s5187_s9 = smul.f32 0.01, %s13682_s15  ;;  %s4270_s3 = sadd.f32 %s4269_s10, %s4164_s16 }
0x1dff   :  { %v6953_v4 = vadd.f32 %v6952_v9, %v6951_v55  ;;  %v6759_v35 = vpop.f32.mrb[111].mxu1  ;;  %v6922_v49 = vmul.f32 %v12453_v26, %v12453_v26  ;;  %s3351_s27 = smul.f32 %s3350_s21, %s14606_s18 }
0x1e00   :  { %v6921_v24 = vmul.f32 %v6759_v35, %v6759_v35  ;;  %s13684_s20 = spop %13683  ;;  %s5188_s7 = sadd.f32 %s5187_s9, %s5082_s6 }
0x1e01   :  { %v6956_v28 = vsel %vm217_vm3, %v6922_v49, 0.0  ;;  %s13686_s5 = spop %13685  ;;  %s6000_s17 = smul.f32 0.01, %s13684_s20 }
0x1e02   :  { %v6954_v31 = vsel %vm217_vm3, %v6921_v24, 0.0  ;;  %v12456_v37 = vpop.f32.mrb[112].mxu1  ;;  %s6105_s19 = smul.f32 0.01, %s13686_s5  ;;  %s13876_s9 = smov [#allocation5]  }
0x1e03   :  { %v6955_v56 = vadd.f32 %v6954_v31, %v6953_v4  ;;  %v6769_v39 = vpop.f32.mrb[113].mxu1  ;;  %v6924_v45 = vmul.f32 %v12456_v37, %v12456_v37  ;;  %s4271_s28 = smul.f32 %s14817_s2, %s4270_s3  ;;  %s10261_s5 = sshll.u32 %s13876_s9, 4  ;;  %s10262_s5 = int_to_ptr.vmem [resolvable:$true] %s10261_s5 }
0x1e04   :  { %v6923_v36 = vmul.f32 %v6769_v39, %v6769_v39  ;;  %s3354_s30 = smul.f32 0.125, %s3351_s27  ;;  %s6106_s22 = sadd.f32 %s6105_s19, %s6000_s17 }
0x1e05   :  { %v6957_v61 = vadd.f32 %v6956_v28, %v6955_v56  ;;  %v6960_v53 = vsel %vm217_vm3, %v6924_v45, 0.0  ;;  %s13688_s14 = spop %13687  ;;  %s5189_s11 = smul.f32 %s14985_s1, %s5188_s7 }
0x1e06   :  { %v6958_v38 = vsel %vm217_vm3, %v6923_v36, 0.0  ;;  %v12459_v13 = vpop.f32.mrb[114].mxu1  ;;  %s4274_s4 = smul.f32 0.125, %s4271_s28  ;;  %s13841_s27 = scalar_lea.vmem %s10262_s5, 16 }
0x1e07   :  { %v6959_v29 = vadd.f32 %v6958_v38, %v6957_v61  ;;  %v6779_v6 = vpop.f32.mrb[115].mxu1  ;;  %v6926_v63 = vmul.f32 %v12459_v13, %v12459_v13  ;;  %s6918_s13 = smul.f32 0.01, %s13688_s14  ;;  %p13842_p5 = scmp.ne.s32.totalorder %s10262_s5, %s13841_s27 }
0x1e08   :  { %v6925_v62 = vmul.f32 %v6779_v6, %v6779_v6  ;;  %s6107_s29 = smul.f32 %s15162_s8, %s6106_s22  ;;  %s4275_s0 = sadd.f32 %s4274_s4, %s3354_s30 }
0x1e09   :  { %v6961_v18 = vadd.f32 %v6960_v53, %v6959_v29  ;;  %v6964_v52 = vsel %vm217_vm3, %v6926_v63, 0.0  ;;  %s5192_s25 = smul.f32 0.125, %s5189_s11  ;;  %s13845_s3 = scalar_lea.vmem %s10262_s5, 32 }
0x1e0a   :  { %v6962_v44 = vsel %vm217_vm3, %v6925_v62, 0.0  ;;  %v12462_v12 = vpop.f32.mrb[116].mxu1  ;;  %s6110_s15 = smul.f32 0.125, %s6107_s29  ;;  %p13846_p6 = scmp.lt.s32.totalorder %s10262_s5, %s10262_s5 }
0x1e0b   :  { %v6963_v10 = vadd.f32 %v6962_v44, %v6961_v18  ;;  %v6789_v23 = vpop.f32.mrb[117].mxu1  ;;  %v6928_v41 = vmul.f32 %v12462_v12, %v12462_v12  ;;  %s5193_s21 = sadd.f32 %s5192_s25, %s4275_s0  ;;  %s17328_s25 = sld [smem:[#allocation91_spill]] }
0x1e0c   :  { %v6927_v22 = vmul.f32 %v6789_v23, %v6789_v23  ;;  %p13847_p7 = scmp.lt.s32.totalorder %s13845_s3, %s13841_s27 }
0x1e0d   :  { %v6965_v48 = vadd.f32 %v6964_v52, %v6963_v10  ;;  %v6968_v35 = vsel %vm217_vm3, %v6928_v41, 0.0  ;;  %s6111_s16 = sadd.f32 %s6110_s15, %s5193_s21 }
0x1e0e   :  { %v6966_v9 = vsel %vm217_vm3, %v6927_v22, 0.0  ;;  %v12465_v55 = vpop.f32.mrb[118].mxu1  ;;  %p13848_p8 = por %p13847_p7, %p13846_p6 }
0x1e0f   :  { %v6967_v26 = vadd.f32 %v6966_v9, %v6965_v48  ;;  %v6799_v4 = vpop.f32.mrb[119].mxu1  ;;  %v6930_v49 = vmul.f32 %v12465_v55, %v12465_v55 }
0x1e10   :  { %v6929_v24 = vmul.f32 %v6799_v4, %v6799_v4  ;;  %p13849_p9 = pnand %p13848_p8, %p13842_p5 }
0x1e11   :  { %v6969_v31 = vadd.f32 %v6968_v35, %v6967_v26  ;;  %v6972_v45 = vsel %vm217_vm3, %v6930_v49, 0.0 }
0x1e12   :  { %v6970_v37 = vsel %vm217_vm3, %v6929_v24, 0.0  ;;  %v12468_v56 = vpop.f32.mrb[120].mxu1 }
0x1e13   :  { %v6971_v39 = vadd.f32 %v6970_v37, %v6969_v31  ;;  %v6809_v28 = vpop.f32.mrb[121].mxu1  ;;  %v6932_v36 = vmul.f32 %v12468_v56, %v12468_v56 }
0x1e14   :  { %v6931_v61 = vmul.f32 %v6809_v28, %v6809_v28 }
0x1e15   :  { %v6973_v38 = vadd.f32 %v6972_v45, %v6971_v39  ;;  %v6976_v63 = vsel %vm217_vm3, %v6932_v36, 0.0 }
0x1e16   :  { %v6974_v13 = vsel %vm217_vm3, %v6931_v61, 0.0  ;;  %v12471_v29 = vpop.f32.mrb[122].mxu1 }
0x1e17   :  { %v6975_v6 = vadd.f32 %v6974_v13, %v6973_v38  ;;  %v6819_v53 = vpop.f32.mrb[123].mxu1  ;;  %v6934_v62 = vmul.f32 %v12471_v29, %v12471_v29 }
0x1e18   :  { %v6933_v18 = vmul.f32 %v6819_v53, %v6819_v53 }
0x1e19   :  { %v6977_v44 = vadd.f32 %v6976_v63, %v6975_v6  ;;  %v6980_v41 = vsel %vm217_vm3, %v6934_v62, 0.0 }
0x1e1a   :  { %v6978_v12 = vsel %vm217_vm3, %v6933_v18, 0.0  ;;  %v12474_v10 = vpop.f32.mrb[124].mxu1 }
0x1e1b   :  { %v6979_v23 = vadd.f32 %v6978_v12, %v6977_v44  ;;  %v6829_v52 = vpop.f32.mrb[125].mxu1  ;;  %v6936_v22 = vmul.f32 %v12474_v10, %v12474_v10 }
0x1e1c   :  { %v6935_v48 = vmul.f32 %v6829_v52, %v6829_v52 }
0x1e1d   :  { %v6981_v9 = vadd.f32 %v6980_v41, %v6979_v23  ;;  %v6984_v49 = vsel %vm217_vm3, %v6936_v22, 0.0 }
0x1e1e   :  { %v6982_v55 = vsel %vm217_vm3, %v6935_v48, 0.0  ;;  %v12477_v26 = vpop.f32.mrb[126].mxu1 }
0x1e1f   :  { %v6983_v4 = vadd.f32 %v6982_v55, %v6981_v9  ;;  %v6839_v35 = vpop.f32.mrb[127].mxu1  ;;  %v6938_v24 = vmul.f32 %v12477_v26, %v12477_v26 }
0x1e20   :  { %v6937_v31 = vmul.f32 %v6839_v35, %v6839_v35 }
0x1e21   :  { %v6985_v37 = vadd.f32 %v6984_v49, %v6983_v4  ;;  %v6988_v36 = vsel %vm217_vm3, %v6938_v24, 0.0 }
0x1e22   :  { %v6986_v56 = vsel %vm217_vm3, %v6937_v31, 0.0  ;;  %v12480_v39 = vpop.f32.mrb[128].mxu1 }
0x1e23   :  { %v6987_v28 = vadd.f32 %v6986_v56, %v6985_v37  ;;  %v6849_v45 = vpop.f32.mrb[129].mxu1  ;;  %v6940_v61 = vmul.f32 %v12480_v39, %v12480_v39 }
0x1e24   :  { %v6939_v38 = vmul.f32 %v6849_v45, %v6849_v45 }
0x1e25   :  { %v6989_v13 = vadd.f32 %v6988_v36, %v6987_v28  ;;  %v6992_v62 = vsel %vm217_vm3, %v6940_v61, 0.0 }
0x1e26   :  { %v6990_v29 = vsel %vm217_vm3, %v6939_v38, 0.0  ;;  %v12483_v6 = vpop.f32.mrb[130].mxu1 }
0x1e27   :  { %v6991_v53 = vadd.f32 %v6990_v29, %v6989_v13  ;;  %v6859_v63 = vpop.f32.mrb[131].mxu1  ;;  %v6942_v18 = vmul.f32 %v12483_v6, %v12483_v6 }
0x1e28   :  { %v6941_v44 = vmul.f32 %v6859_v63, %v6859_v63 }
0x1e29   :  { %v6993_v12 = vadd.f32 %v6992_v62, %v6991_v53  ;;  %v6996_v22 = vsel %vm217_vm3, %v6942_v18, 0.0 }
0x1e2a   :  { %v6994_v10 = vsel %vm217_vm3, %v6941_v44, 0.0  ;;  %v12486_v23 = vpop.f32.mrb[132].mxu1 }
0x1e2b   :  { %v6995_v52 = vadd.f32 %v6994_v10, %v6993_v12  ;;  %v6869_v41 = vpop.f32.mrb[133].mxu1  ;;  %v6944_v48 = vmul.f32 %v12486_v23, %v12486_v23 }
0x1e2c   :  { %v6943_v9 = vmul.f32 %v6869_v41, %v6869_v41 }
0x1e2d   :  { %v6997_v55 = vadd.f32 %v6996_v22, %v6995_v52  ;;  %v7000_v24 = vsel %vm217_vm3, %v6944_v48, 0.0 }
0x1e2e   :  { %v6998_v26 = vsel %vm217_vm3, %v6943_v9, 0.0  ;;  %v12489_v4 = vpop.f32.mrb[134].mxu1 }
0x1e2f   :  { %v6999_v35 = vadd.f32 %v6998_v26, %v6997_v55  ;;  %v6879_v49 = vpop.f32.mrb[135].mxu1  ;;  %v6946_v31 = vmul.f32 %v12489_v4, %v12489_v4 }
0x1e30   :  { %v6945_v37 = vmul.f32 %v6879_v49, %v6879_v49 }
0x1e31   :  { %v7001_v56 = vadd.f32 %v7000_v24, %v6999_v35  ;;  %v7004_v61 = vsel %vm217_vm3, %v6946_v31, 0.0 }
0x1e32   :  { %v7002_v39 = vsel %vm217_vm3, %v6945_v37, 0.0  ;;  %v12492_v28 = vpop.f32.mrb[136].mxu1 }
0x1e33   :  { %v7003_v45 = vadd.f32 %v7002_v39, %v7001_v56  ;;  %v6889_v36 = vpop.f32.mrb[137].mxu1  ;;  %v6948_v38 = vmul.f32 %v12492_v28, %v12492_v28 }
0x1e34   :  { %v6947_v13 = vmul.f32 %v6889_v36, %v6889_v36 }
0x1e35   :  { %v7005_v29 = vadd.f32 %v7004_v61, %v7003_v45  ;;  %v7008_v62 = vsel %vm217_vm3, %v6948_v38, 0.0  ;;  %v17148_v61 = vld [vmem:[#allocation8_spill] sm:$0xff] }
0x1e36   :  { %v7006_v6 = vsel %vm217_vm3, %v6947_v13, 0.0  ;;  %v17149_v13 = vld [vmem:[#allocation18_spill] sm:$0xff] }
0x1e37   :  { %v7007_v53 = vadd.f32 %v7006_v6, %v7005_v29  ;;  %v10983_v63 = vpop.f32.mrb[108].mxu0  ;;  %v17150_v29 = vld [vmem:[#allocation22_spill] sm:$0xff]  ;;  %v17151_v6 = vld [vmem:[#allocation19_spill] sm:$0xff] }
0x1e38   :  { %v10984_v18 = vpop.f32.mrb[109].mxu0 }
0x1e39   :  { %v10985_v44 = vadd.f32 %v10984_v18, %v10983_v63  ;;  %v12495_v12 = vpop.f32.mrb[138].mxu1  ;;  %v7009_v10 = vadd.f32 %v7008_v62, %v7007_v53  ;;  %v17152_v53 = vld [vmem:[#allocation23_spill] sm:$0xff]  ;;  %v17153_v63 = vld [vmem:[#allocation20_spill] sm:$0xff]  ;;  %v17155_v18 = vld [vmem:[#allocation26_spill] sm:$0xff] }
0x1e3a   :  { %v6899_v23 = vpop.f32.mrb[139].mxu1  ;;  %v6950_v52 = vmul.f32 %v12495_v12, %v12495_v12  ;;  %v17154_v62 = vld [vmem:[#allocation24_spill] sm:$0xff]  ;;  %v17157_v12 = vld [vmem:[#allocation27_spill] sm:$0xff] }
0x1e3b   :  { %v6949_v41 = vmul.f32 %v6899_v23, %v6899_v23  ;;  %v17159_v23 = vld [vmem:[#allocation29_spill] sm:$0xff] }
0x1e3c   :  { %v7012_v26 = vsel %vm217_vm3, %v6950_v52, 0.0  ;;  %v17160_v52 = vld [vmem:[#allocation30_spill] sm:$0xff] }
0x1e3d   :  { %v7010_v22 = vsel %vm217_vm3, %v6949_v41, 0.0  ;;  %v11018_v48 = vpop.f32.mrb[140].mxu1  ;;  %v17161_v41 = vld [vmem:[#allocation31_spill] sm:$0xff] }
0x1e3e   :  { %v7011_v9 = vadd.f32 %v7010_v22, %v7009_v10  ;;  %v11019_v55 = vpop.f32.mrb[141].mxu1  ;;  %v17158_v10 = vld [vmem:[#allocation28_spill] sm:$0xff] }
0x1e3f   :  { %v11020_v4 = vadd.f32 %v11019_v55, %v11018_v48  ;;  %v17162_v22 = vld [vmem:[#allocation32_spill] sm:$0xff]  ;;  %v17163_v48 = vld [vmem:[#allocation33_spill] sm:$0xff]  ;;  %v17165_v55 = vld [vmem:[#allocation35_spill] sm:$0xff] }
0x1e40   :  { %v7013_v35 = vadd.f32 %v7012_v26, %v7011_v9  ;;  %v17164_v9 = vld [vmem:[#allocation34_spill] sm:$0xff]  ;;  %v17166_v26 = vld [vmem:[#allocation43_spill] sm:$0xff] }
0x1e41   :  { %v7684_v49 = vadd.f32 %v11020_v4, %v10985_v44  ;;  %v17156_v44 = vld [vmem:[#allocation25_spill] sm:$0xff]  ;;  %v17167_v4 = vld [vmem:[#allocation36_spill] sm:$0xff] }
0x1e42   :  { %7014 = vadd.xlane.f32.xlu0 %v7013_v35  ;;  %v17168_v35 = vld [vmem:[#allocation44_spill] sm:$0xff] }
0x1e57   :  { %v11053_v24 = vpop.f32.mrb[110].mxu0 }
0x1e58   :  { %v11054_v31 = vpop.f32.mrb[111].mxu0 }
0x1e59   :  { %v11055_v37 = vadd.f32 %v11054_v31, %v11053_v24  ;;  %v17170_v24 = vld [vmem:[#allocation45_spill] sm:$0xff]  ;;  %v17171_v31 = vld [vmem:[#allocation38_spill] sm:$0xff] }
0x1e5b   :  { %v7754_v56 = vadd.f32 %v11055_v37, %v7684_v49  ;;  %v17169_v49 = vld [vmem:[#allocation37_spill] sm:$0xff]  ;;  %v17172_v37 = vld [vmem:[#allocation46_spill] sm:$0xff] }
0x1e5d   :  { %v11088_v39 = vpop.f32.mrb[142].mxu1 }
0x1e5e   :  { %v11089_v28 = vpop.f32.mrb[143].mxu1 }
0x1e5f   :  { %v11090_v45 = vadd.f32 %v11089_v28, %v11088_v39  ;;  %v17174_v39 = vld [vmem:[#allocation40_spill] sm:$0xff]  ;;  %v17175_v28 = vld [vmem:[#allocation41_spill] sm:$0xff] }
0x1e61   :  { %v7824_v36 = vadd.f32 %v11090_v45, %v7754_v56  ;;  %v17173_v56 = vld [vmem:[#allocation39_spill] sm:$0xff]  ;;  %v17176_v45 = vld [vmem:[#allocation42_spill] sm:$0xff] }
0x1e63   :  { %v16399_v38 = vadd.f32 %v7824_v36, %v17148_v61 }
0x1e65   :  { %10493 = vmatmul.mubr.msk.f32.vlgmr.msra.gmra.mrb[112].mxu0 %vm217_vm3, %v16399_v38  ;;  %10494 = vmatmul.mubr.msk.f32.vlgmr.msra.gmra.mrb[144].mxu1 %vm217_vm3, %v16399_v38 }
0x1e66   :  { %13044 = vmatpush1.bf16.msra.mxu0 %v17149_v13  ;;  %13052 = vmatpush1.bf16.msra.mxu1 %v17150_v29 }
0x1e67   :  { %13046 = vmatprep.subr.bf16.mxu0 %v17151_v6  ;;  %13054 = vmatprep.subr.bf16.mxu1 %v17152_v53 }
0x1e68   :  { %8037 = vmatprep.mubr.f32.mxu0 %v17144_v17  ;;  %8108 = vmatprep.mubr.f32.mxu1 %v17144_v17 }
0x1e6a   :  { %13048 = vmatpush1.bf16.msra.mxu0 %v17153_v63  ;;  %13056 = vmatpush1.bf16.msra.mxu1 %v17154_v62 }
0x1e6b   :  { %13058 = vmatprep.subr.bf16.mxu0 %v17155_v18  ;;  %13090 = vmatprep.subr.bf16.mxu1 %v17156_v44 }
0x1e6d   :  { %10495 = vmatmul.mubr.msk.f32.vlgmr.msra.gmra.mrb[114].mxu0 %vm217_vm3, %v16399_v38  ;;  %10496 = vmatmul.mubr.msk.f32.vlgmr.msra.gmra.mrb[146].mxu1 %vm217_vm3, %v16399_v38 }
0x1e6e   :  { %13060 = vmatpush3.bf16.msra.mxu0 %v17157_v12  ;;  %13092 = vmatpush3.bf16.msra.mxu1 %v15753_v50 }
0x1e6f   :  { %13062 = vmatprep.subr.bf16.mxu0 %v17158_v10  ;;  %13094 = vmatprep.subr.bf16.mxu1 %v15755_v32 }
0x1e72   :  { %13064 = vmatpush3.bf16.msra.mxu0 %v17159_v23  ;;  %13096 = vmatpush3.bf16.msra.mxu1 %v15788_v40 }
0x1e73   :  { %13066 = vmatprep.subr.bf16.mxu0 %v17160_v52  ;;  %13098 = vmatprep.subr.bf16.mxu1 %v15791_v54 }
0x1e76   :  { %13068 = vmatpush3.bf16.msra.mxu0 %v17161_v41  ;;  %13100 = vmatpush3.bf16.msra.mxu1 %v15813_v19 }
0x1e77   :  { %13070 = vmatprep.subr.bf16.mxu0 %v17162_v22  ;;  %13102 = vmatprep.subr.bf16.mxu1 %v15817_v5 }
0x1e7a   :  { %13072 = vmatpush3.bf16.msra.mxu0 %v17163_v48  ;;  %13104 = vmatpush3.bf16.msra.mxu1 %v15840_v15 }
0x1e7b   :  { %13074 = vmatprep.subr.bf16.mxu0 %v17164_v9  ;;  %13106 = vmatprep.subr.bf16.mxu1 %v15843_v42 }
0x1e7e   :  { %13076 = vmatpush3.bf16.msra.mxu0 %v17165_v55  ;;  %13108 = vmatpush3.bf16.msra.mxu1 %v17166_v26 }
0x1e7f   :  { %13078 = vmatprep.subr.bf16.mxu0 %v17167_v4  ;;  %13110 = vmatprep.subr.bf16.mxu1 %v17168_v35 }
0x1e82   :  { %13080 = vmatpush3.bf16.msra.mxu0 %v17169_v49  ;;  %13112 = vmatpush3.bf16.msra.mxu1 %v17170_v24 }
0x1e83   :  { %13082 = vmatprep.subr.bf16.mxu0 %v17171_v31  ;;  %13114 = vmatprep.subr.bf16.mxu1 %v17172_v37 }
0x1e86   :  { %13084 = vmatpush3.bf16.msra.mxu0 %v17173_v56  ;;  %13116 = vmatpush3.bf16.msra.mxu1 %v15920_v58 }
0x1e87   :  { %13086 = vmatprep.subr.bf16.mxu0 %v17174_v39  ;;  %13118 = vmatprep.subr.bf16.mxu1 %v15923_v7 }
0x1e8a   :  { %13088 = vmatpush3.bf16.msra.mxu0 %v17175_v28  ;;  %13120 = vmatpush3.bf16.msra.mxu1 %v15944_v1 }
0x1e8b   :  { %13122 = vmatprep.subr.bf16.mxu0 %v17176_v45  ;;  %13154 = vmatprep.subr.bf16.mxu1 %v15947_v11 }
0x1ecf   :  { %v7015_v36 = vpop.xlane.xlu0 %7014 }
0x1ed0   :  { %v7016_v61 = vrot.slane %v7015_v36, 4 }
0x1ed2   :  { %v7017_v31 = vadd.f32 %v7016_v61, %v7015_v36 }
0x1ed4   :  { %v7018_v37 = vrot.slane %v7017_v31, 2 }
0x1ed6   :  { %v7019_v24 = vadd.f32 %v7018_v37, %v7017_v31 }
0x1ed8   :  { %v7020_v56 = vrot.slane %v7019_v24, 1 }
0x1eda   :  { %v7021_v49 = vadd.f32 %v7020_v56, %v7019_v24 }
0x1edc   :  { %13689 = vpush %v7021_v49 }
0x1f0d   :  { %s13690_s24 = spop %13689 }
0x1f0e   :  { %s7023_s26 = smul.f32 0.01, %s13690_s24 }
0x1f10   :  { %s7024_s23 = sadd.f32 %s7023_s26, %s6918_s13 }
0x1f12   :  { %s7025_s18 = smul.f32 %s15688_s12, %s7024_s23 }
0x1f14   :  { %s7028_s10 = smul.f32 0.125, %s7025_s18 }
0x1f16   :  { %s7029_s20 = sadd.f32 %s7028_s10, %s6111_s16 }
0x1f18   :  { %v10250_v49 = vstv %s7029_s20 }
0x1f19   :  { %10252 = vst.msk [vmem:[#allocation5] sm:$0x1] %vm10251_vm6, %v10250_v49 }
0x1f38   :  { %v7897_v24 = vpop.f32.mrb[112].mxu0  ;;  %v7968_v31 = vpop.f32.mrb[144].mxu1 }
0x1f39   :  { %v7898_v37 = vadd.f32 %v7897_v24, %v15974_v33  ;;  %v7969_v56 = vadd.f32 %v7968_v31, %v16005_v0  ;;  %v7899_v36 = vpop.f32.mrb[113].mxu0  ;;  %v7970_v61 = vpop.f32.mrb[145].mxu1 }
0x1f3a   :  { %v7900_v11 = vadd.f32 %v7899_v36, %v15978_v25  ;;  %v7971_v45 = vadd.f32 %v7970_v61, %v15995_v14 }
0x1f3b   :  { %13753 = vtanh.f32 %v7898_v37 }
0x1f3c   :  { %13755 = vtanh.f32 %v7969_v56 }
0x1f3d   :  { %13757 = vtanh.f32 %v7900_v11 }
0x1f3e   :  { %13759 = vtanh.f32 %v7971_v45 }
0x1f40   :  { %v8039_v1 = vpop.f32.mrb[114].mxu0  ;;  %v8110_v28 = vpop.f32.mrb[146].mxu1 }
0x1f41   :  { %v8040_v49 = vadd.f32 %v8039_v1, %v16179_v34  ;;  %v8111_v7 = vadd.f32 %v8110_v28, %v16245_v47  ;;  %v8041_v39 = vpop.f32.mrb[115].mxu0  ;;  %v8112_v24 = vpop.f32.mrb[147].mxu1 }
0x1f42   :  { %v8042_v31 = vadd.f32 %v8041_v39, %v15987_v59  ;;  %v8113_v0 = vadd.f32 %v8112_v24, %v16013_v8 }
0x1f43   :  { %13761 = vtanh.f32 %v8040_v49 }
0x1f44   :  { %13763 = vtanh.f32 %v8111_v7 }
0x1f45   :  { %v13754_v36 = vpop.eup %13753  ;;  %13765 = vtanh.f32 %v8042_v31 }
0x1f46   :  { %v13756_v37 = vpop.eup %13755  ;;  %13767 = vtanh.f32 %v8113_v0  ;;  %v8123_v11 = vmul.f32 %v13754_v36, %v16117_v16 }
0x1f47   :  { %v13758_v45 = vpop.eup %13757  ;;  %v8125_v56 = vmul.f32 %v13756_v37, %v16117_v16 }
0x1f48   :  { %v13760_v1 = vpop.eup %13759  ;;  %v8124_v28 = vmul.f32 %v13758_v45, %v16117_v16  ;;  %v17178_v45 = vld [vmem:[#allocation56_spill] sm:$0xff] }
0x1f49   :  { %v8126_v61 = vmul.f32 %v13760_v1, %v16117_v16  ;;  %v17180_v1 = vld [vmem:[#allocation57_spill] sm:$0xff] }
0x1f4a   :  { %8195 = vmatprep.mubr.f32.mxu0 %v8124_v28  ;;  %v17182_v28 = vld [vmem:[#allocation61_spill] sm:$0xff] }
0x1f4b   :  { %8265 = vmatprep.mubr.f32.mxu1 %v8126_v61  ;;  %8196 = vmatmul.mubr.f32.vlgmr.msra.gmra.mrb[116].mxu0 %v8123_v11  ;;  %v17177_v11 = vld [vmem:[#allocation60_spill] sm:$0xff]  ;;  %v17183_v61 = vld [vmem:[#allocation69_spill] sm:$0xff] }
0x1f4c   :  { %8266 = vmatmul.mubr.f32.vlgmr.msra.gmra.mrb[148].mxu1 %v8125_v56  ;;  %13124 = vmatpush3.bf16.msra.mxu0 %v16051_v27  ;;  %v17179_v56 = vld [vmem:[#allocation63_spill] sm:$0xff] }
0x1f4d   :  { %v13762_v7 = vpop.eup %13761  ;;  %13156 = vmatpush3.bf16.msra.mxu1 %v16098_v60  ;;  %13126 = vmatprep.subr.bf16.mxu0 %v16055_v46 }
0x1f4e   :  { %v13764_v0 = vpop.eup %13763  ;;  %13158 = vmatprep.subr.bf16.mxu1 %v16108_v30  ;;  %v8127_v39 = vmul.f32 %v13762_v7, %v16117_v16  ;;  %v17184_v7 = vld [vmem:[#allocation62_spill] sm:$0xff] }
0x1f4f   :  { %v13766_v49 = vpop.eup %13765  ;;  %v8129_v24 = vmul.f32 %v13764_v0, %v16117_v16  ;;  %v17185_v0 = vld [vmem:[#allocation70_spill] sm:$0xff] }
0x1f50   :  { %v13768_v31 = vpop.eup %13767  ;;  %13128 = vmatpush3.bf16.msra.mxu0 %v16078_v2  ;;  %v8128_v36 = vmul.f32 %v13766_v49, %v16117_v16  ;;  %v17186_v49 = vld [vmem:[#allocation67_spill] sm:$0xff] }
0x1f51   :  { %13160 = vmatpush3.bf16.msra.mxu1 %v16139_v43  ;;  %v8130_v37 = vmul.f32 %v13768_v31, %v16117_v16  ;;  %13130 = vmatprep.subr.bf16.mxu0 %v16088_v51  ;;  %v17181_v16 = vld [vmem:[#allocation64_spill] sm:$0xff]  ;;  %v17187_v31 = vld [vmem:[#allocation73_spill] sm:$0xff] }
0x1f52   :  { %8335 = vmatprep.mubr.f32.mxu0 %v8128_v36  ;;  %13162 = vmatprep.subr.bf16.mxu1 %v16150_v21  ;;  %v17188_v36 = vld [vmem:[#allocation68_spill] sm:$0xff] }
0x1f53   :  { %8405 = vmatprep.mubr.f32.mxu1 %v8130_v37  ;;  %v17189_v37 = vld [vmem:[#allocation75_spill] sm:$0xff] }
0x1f54   :  { %13132 = vmatpush3.bf16.msra.mxu0 %v16121_v3 }
0x1f55   :  { %13164 = vmatpush3.bf16.msra.mxu1 %v16182_v57  ;;  %13134 = vmatprep.subr.bf16.mxu0 %v16130_v20 }
0x1f56   :  { %13166 = vmatprep.subr.bf16.mxu1 %v17177_v11 }
0x1f58   :  { %13136 = vmatpush3.bf16.msra.mxu0 %v17178_v45 }
0x1f59   :  { %13168 = vmatpush3.bf16.msra.mxu1 %v17179_v56  ;;  %13138 = vmatprep.subr.bf16.mxu0 %v17180_v1  ;;  %v17190_v56 = vld [vmem:[#allocation71_spill] sm:$0xff]  ;;  %v17191_v1 = vld [vmem:[#allocation77_spill] sm:$0xff] }
0x1f5a   :  { %13170 = vmatprep.subr.bf16.mxu1 %v17181_v16  ;;  %v17192_v16 = vld [vmem:[#allocation72_spill] sm:$0xff] }
0x1f5c   :  { %13140 = vmatpush3.bf16.msra.mxu0 %v17182_v28  ;;  %v17193_v28 = vld [vmem:[#allocation78_spill] sm:$0xff] }
0x1f5d   :  { %13172 = vmatpush3.bf16.msra.mxu1 %v17183_v61  ;;  %13142 = vmatprep.subr.bf16.mxu0 %v17184_v7  ;;  %v17194_v61 = vld [vmem:[#allocation76_spill] sm:$0xff]  ;;  %v17195_v7 = vld [vmem:[#allocation79_spill] sm:$0xff] }
0x1f5e   :  { %13174 = vmatprep.subr.bf16.mxu1 %v17185_v0  ;;  %v17196_v0 = vld [vmem:[#allocation9_spill] sm:$0xff] }
0x1f60   :  { %13144 = vmatpush3.bf16.msra.mxu0 %v17186_v49  ;;  %v17197_v49 = vld [vmem:[#allocation13_spill] sm:$0xff] }
0x1f61   :  { %13176 = vmatpush3.bf16.msra.mxu1 %v17187_v31  ;;  %13146 = vmatprep.subr.bf16.mxu0 %v17188_v36  ;;  %v17198_v36 = vld [vmem:[#allocation10_spill] sm:$0xff] }
0x1f62   :  { %13178 = vmatprep.subr.bf16.mxu1 %v17189_v37  ;;  %v17199_v37 = vld [vmem:[#allocation14_spill] sm:$0xff] }
0x1f64   :  { %13148 = vmatpush3.bf16.msra.mxu0 %v17190_v56  ;;  %v17200_v56 = vld [vmem:[#allocation11_spill] sm:$0xff] }
0x1f65   :  { %13180 = vmatpush3.bf16.msra.mxu1 %v17191_v1  ;;  %13150 = vmatprep.subr.bf16.mxu0 %v17192_v16  ;;  %v17201_v1 = vld [vmem:[#allocation15_spill] sm:$0xff] }
0x1f66   :  { %13182 = vmatprep.subr.bf16.mxu1 %v17193_v28 }
0x1f68   :  { %13152 = vmatpush3.bf16.msra.mxu0 %v17194_v61  ;;  %v17202_v61 = vld [vmem:[#allocation12_spill] sm:$0xff] }
0x1f69   :  { %13184 = vmatpush3.bf16.msra.mxu1 %v17195_v7  ;;  %13186 = vmatprep.subr.bf16.mxu0 %v17196_v0  ;;  %v17203_v7 = vld [vmem:[#allocation16_spill] sm:$0xff]  ;;  %v17204_v0 = vld [vmem:[#allocation17_spill] sm:$0xff] }
0x1f6a   :  { %13194 = vmatprep.subr.bf16.mxu1 %v17197_v49 }
0x1f6b   :  { %8336 = vmatmul.mubr.f32.vlgmr.msra.gmra.mrb[118].mxu0 %v8127_v39  ;;  %v17205_v39 = vld [vmem:[#allocation21_spill] sm:$0xff] }
0x1f6c   :  { %8406 = vmatmul.mubr.f32.vlgmr.msra.gmra.mrb[150].mxu1 %v8129_v24  ;;  %13188 = vmatpush1.bf16.msra.mxu0 %v17198_v36 }
0x1f6d   :  { %13196 = vmatpush1.bf16.msra.mxu1 %v17199_v37  ;;  %13190 = vmatprep.subr.bf16.mxu0 %v17200_v56 }
0x1f6e   :  { %13198 = vmatprep.subr.bf16.mxu1 %v17201_v1  ;;  %8479 = vmatprep.mubr.f32.mxu0 %v17144_v17 }
0x1f6f   :  { %8550 = vmatprep.mubr.f32.mxu1 %v17144_v17 }
0x1f70   :  { %13192 = vmatpush1.bf16.msra.mxu0 %v17202_v61 }
0x1f71   :  { %13200 = vmatpush1.bf16.msra.mxu1 %v17203_v7  ;;  %13202 = vmatprep.subr.bf16.mxu0 %v17204_v0 }
0x1f72   :  { %13210 = vmatprep.subr.bf16.mxu1 %v17205_v39 }
0x201e   :  { %v11123_v24 = vpop.f32.mrb[116].mxu0 }
0x201f   :  { %v11158_v36 = vpop.f32.mrb[148].mxu1  ;;  %v11124_v49 = vpop.f32.mrb[117].mxu0 }
0x2020   :  { %v11125_v37 = vadd.f32 %v11124_v49, %v11123_v24  ;;  %v11159_v28 = vpop.f32.mrb[149].mxu1 }
0x2021   :  { %v11160_v56 = vadd.f32 %v11159_v28, %v11158_v36  ;;  %v17215_v28 = vld [vmem:[#allocation42_spill] sm:$0xff] }
0x2023   :  { %v8268_v16 = vadd.f32 %v11160_v56, %v11125_v37  ;;  %v17212_v56 = vld [vmem:[#allocation48_spill] sm:$0xff]  ;;  %v17217_v37 = vld [vmem:[#allocation51_spill] sm:$0xff] }
0x203e   :  { %v11193_v1 = vpop.f32.mrb[118].mxu0 }
0x203f   :  { %v11228_v31 = vpop.f32.mrb[150].mxu1  ;;  %v11194_v45 = vpop.f32.mrb[119].mxu0 }
0x2040   :  { %v11195_v11 = vadd.f32 %v11194_v45, %v11193_v1  ;;  %v11229_v20 = vpop.f32.mrb[151].mxu1  ;;  %v17211_v45 = vld [vmem:[#allocation40_spill] sm:$0xff]  ;;  %v17213_v1 = vld [vmem:[#allocation41_spill] sm:$0xff] }
0x2041   :  { %v11230_v57 = vadd.f32 %v11229_v20, %v11228_v31  ;;  %v17207_v20 = vld [vmem:[#allocation45_spill] sm:$0xff] }
0x2042   :  { %v8338_v61 = vadd.f32 %v11195_v11, %v8268_v16  ;;  %v17210_v11 = vld [vmem:[#allocation39_spill] sm:$0xff]  ;;  %v17214_v16 = vld [vmem:[#allocation49_spill] sm:$0xff] }
0x2044   :  { %v8408_v3 = vadd.f32 %v11230_v57, %v8338_v61  ;;  %v17208_v57 = vld [vmem:[#allocation38_spill] sm:$0xff] }
0x2045   :  { %v17216_v61 = vld [vmem:[#allocation50_spill] sm:$0xff] }
0x2046   :  { %v16515_v7 = vadd.f32 %v8408_v3, %v16399_v38  ;;  %v17206_v3 = vld [vmem:[#allocation37_spill] sm:$0xff]  ;;  %v17209_v38 = vld [vmem:[#allocation46_spill] sm:$0xff] }
0x2048   :  { %10497 = vmatmul.mubr.msk.f32.vlgmr.msra.gmra.mrb[120].mxu0 %vm217_vm3, %v16515_v7  ;;  %10498 = vmatmul.mubr.msk.f32.vlgmr.msra.gmra.mrb[152].mxu1 %vm217_vm3, %v16515_v7 }
0x2049   :  { %13204 = vmatpush1.bf16.msra.mxu0 %v17149_v13  ;;  %13212 = vmatpush1.bf16.msra.mxu1 %v17150_v29 }
0x204a   :  { %13206 = vmatprep.subr.bf16.mxu0 %v17151_v6  ;;  %13214 = vmatprep.subr.bf16.mxu1 %v17152_v53 }
0x204b   :  { %8621 = vmatprep.mubr.f32.mxu0 %v17144_v17  ;;  %8692 = vmatprep.mubr.f32.mxu1 %v17144_v17 }
0x204d   :  { %13208 = vmatpush1.bf16.msra.mxu0 %v17153_v63  ;;  %13216 = vmatpush1.bf16.msra.mxu1 %v17154_v62 }
0x204e   :  { %13218 = vmatprep.subr.bf16.mxu0 %v17155_v18  ;;  %13250 = vmatprep.subr.bf16.mxu1 %v17156_v44 }
0x2050   :  { %10499 = vmatmul.mubr.msk.f32.vlgmr.msra.gmra.mrb[122].mxu0 %vm217_vm3, %v16515_v7  ;;  %10500 = vmatmul.mubr.msk.f32.vlgmr.msra.gmra.mrb[154].mxu1 %vm217_vm3, %v16515_v7 }
0x2051   :  { %13220 = vmatpush3.bf16.msra.mxu0 %v17157_v12  ;;  %13252 = vmatpush3.bf16.msra.mxu1 %v15753_v50 }
0x2052   :  { %13222 = vmatprep.subr.bf16.mxu0 %v17158_v10  ;;  %13254 = vmatprep.subr.bf16.mxu1 %v15755_v32 }
0x2055   :  { %13224 = vmatpush3.bf16.msra.mxu0 %v17159_v23  ;;  %13256 = vmatpush3.bf16.msra.mxu1 %v15788_v40 }
0x2056   :  { %13226 = vmatprep.subr.bf16.mxu0 %v17160_v52  ;;  %13258 = vmatprep.subr.bf16.mxu1 %v15791_v54 }
0x2059   :  { %13228 = vmatpush3.bf16.msra.mxu0 %v17161_v41  ;;  %13260 = vmatpush3.bf16.msra.mxu1 %v15813_v19 }
0x205a   :  { %13230 = vmatprep.subr.bf16.mxu0 %v17162_v22  ;;  %13262 = vmatprep.subr.bf16.mxu1 %v15817_v5 }
0x205d   :  { %13232 = vmatpush3.bf16.msra.mxu0 %v17163_v48  ;;  %13264 = vmatpush3.bf16.msra.mxu1 %v15840_v15 }
0x205e   :  { %13234 = vmatprep.subr.bf16.mxu0 %v17164_v9  ;;  %13266 = vmatprep.subr.bf16.mxu1 %v15843_v42 }
0x2061   :  { %13236 = vmatpush3.bf16.msra.mxu0 %v17165_v55  ;;  %13268 = vmatpush3.bf16.msra.mxu1 %v17166_v26 }
0x2062   :  { %13238 = vmatprep.subr.bf16.mxu0 %v17167_v4  ;;  %13270 = vmatprep.subr.bf16.mxu1 %v17168_v35 }
0x2065   :  { %13240 = vmatpush3.bf16.msra.mxu0 %v17206_v3  ;;  %13272 = vmatpush3.bf16.msra.mxu1 %v17207_v20 }
0x2066   :  { %13242 = vmatprep.subr.bf16.mxu0 %v17208_v57  ;;  %13274 = vmatprep.subr.bf16.mxu1 %v17209_v38 }
0x2069   :  { %13244 = vmatpush3.bf16.msra.mxu0 %v17210_v11  ;;  %13276 = vmatpush3.bf16.msra.mxu1 %v15920_v58 }
0x206a   :  { %13246 = vmatprep.subr.bf16.mxu0 %v17211_v45  ;;  %13278 = vmatprep.subr.bf16.mxu1 %v17212_v56 }
0x206d   :  { %13248 = vmatpush3.bf16.msra.mxu0 %v17213_v1  ;;  %13280 = vmatpush3.bf16.msra.mxu1 %v17214_v16 }
0x206e   :  { %13282 = vmatprep.subr.bf16.mxu0 %v17215_v28  ;;  %13314 = vmatprep.subr.bf16.mxu1 %v17216_v61 }
0x211b   :  { %v8481_v49 = vpop.f32.mrb[120].mxu0  ;;  %v8552_v31 = vpop.f32.mrb[152].mxu1 }
0x211c   :  { %v8482_v36 = vadd.f32 %v8481_v49, %v15974_v33  ;;  %v8553_v24 = vadd.f32 %v8552_v31, %v17217_v37  ;;  %v8483_v11 = vpop.f32.mrb[121].mxu0  ;;  %v8554_v58 = vpop.f32.mrb[153].mxu1 }
0x211d   :  { %v8484_v45 = vadd.f32 %v8483_v11, %v15978_v25  ;;  %v8555_v56 = vadd.f32 %v8554_v58, %v15995_v14 }
0x211e   :  { %13769 = vtanh.f32 %v8482_v36 }
0x211f   :  { %13771 = vtanh.f32 %v8553_v24 }
0x2120   :  { %13773 = vtanh.f32 %v8484_v45  ;;  %v17218_v45 = vld [vmem:[#allocation59_spill] sm:$0xff] }
0x2121   :  { %13775 = vtanh.f32 %v8555_v56 }
0x2123   :  { %v8623_v16 = vpop.f32.mrb[122].mxu0  ;;  %v8694_v28 = vpop.f32.mrb[154].mxu1 }
0x2124   :  { %v8624_v61 = vadd.f32 %v8623_v16, %v16179_v34  ;;  %v8695_v1 = vadd.f32 %v8694_v28, %v16245_v47  ;;  %v8625_v38 = vpop.f32.mrb[123].mxu0  ;;  %v8696_v49 = vpop.f32.mrb[155].mxu1 }
0x2125   :  { %v8626_v31 = vadd.f32 %v8625_v38, %v15987_v59  ;;  %v8697_v37 = vadd.f32 %v8696_v49, %v16013_v8 }
0x2126   :  { %13777 = vtanh.f32 %v8624_v61 }
0x2127   :  { %13779 = vtanh.f32 %v8695_v1 }
0x2128   :  { %v13770_v11 = vpop.eup %13769  ;;  %13781 = vtanh.f32 %v8626_v31 }
0x2129   :  { %v13772_v58 = vpop.eup %13771  ;;  %13783 = vtanh.f32 %v8697_v37  ;;  %v8707_v56 = vmul.f32 %v13770_v11, %v17218_v45 }
0x212a   :  { %v13774_v36 = vpop.eup %13773  ;;  %v8709_v24 = vmul.f32 %v13772_v58, %v17218_v45  ;;  %v17219_v58 = vld [vmem:[#allocation53_spill] sm:$0xff] }
0x212b   :  { %v13776_v16 = vpop.eup %13775  ;;  %v8708_v28 = vmul.f32 %v13774_v36, %v17218_v45  ;;  %v17221_v36 = vld [vmem:[#allocation54_spill] sm:$0xff] }
0x212c   :  { %v8710_v47 = vmul.f32 %v13776_v16, %v17218_v45  ;;  %v17223_v16 = vld [vmem:[#allocation56_spill] sm:$0xff] }
0x212d   :  { %8779 = vmatprep.mubr.f32.mxu0 %v8708_v28  ;;  %v17224_v28 = vld [vmem:[#allocation63_spill] sm:$0xff] }
0x212e   :  { %8849 = vmatprep.mubr.f32.mxu1 %v8710_v47  ;;  %8780 = vmatmul.mubr.f32.vlgmr.msra.gmra.mrb[124].mxu0 %v8707_v56  ;;  %v17220_v56 = vld [vmem:[#allocation58_spill] sm:$0xff] }
0x212f   :  { %8850 = vmatmul.mubr.f32.vlgmr.msra.gmra.mrb[156].mxu1 %v8709_v24  ;;  %13284 = vmatpush3.bf16.msra.mxu0 %v16051_v27  ;;  %v17222_v24 = vld [vmem:[#allocation60_spill] sm:$0xff] }
0x2130   :  { %v13778_v38 = vpop.eup %13777  ;;  %13316 = vmatpush3.bf16.msra.mxu1 %v16098_v60  ;;  %13286 = vmatprep.subr.bf16.mxu0 %v16055_v46 }
0x2131   :  { %v13780_v1 = vpop.eup %13779  ;;  %13318 = vmatprep.subr.bf16.mxu1 %v16108_v30  ;;  %v8711_v61 = vmul.f32 %v13778_v38, %v17218_v45  ;;  %v17225_v38 = vld [vmem:[#allocation57_spill] sm:$0xff] }
0x2132   :  { %v13782_v37 = vpop.eup %13781  ;;  %v8713_v49 = vmul.f32 %v13780_v1, %v17218_v45  ;;  %v17227_v1 = vld [vmem:[#allocation61_spill] sm:$0xff] }
0x2133   :  { %v13784_v31 = vpop.eup %13783  ;;  %13288 = vmatpush3.bf16.msra.mxu0 %v16078_v2  ;;  %v8712_v47 = vmul.f32 %v13782_v37, %v17218_v45  ;;  %v17228_v37 = vld [vmem:[#allocation69_spill] sm:$0xff] }
0x2134   :  { %13320 = vmatpush3.bf16.msra.mxu1 %v16139_v43  ;;  %v8714_v11 = vmul.f32 %v13784_v31, %v17218_v45  ;;  %13290 = vmatprep.subr.bf16.mxu0 %v16088_v51  ;;  %v17226_v45 = vld [vmem:[#allocation64_spill] sm:$0xff]  ;;  %v17229_v31 = vld [vmem:[#allocation62_spill] sm:$0xff] }
0x2135   :  { %8919 = vmatprep.mubr.f32.mxu0 %v8712_v47  ;;  %13322 = vmatprep.subr.bf16.mxu1 %v16150_v21  ;;  %v17230_v47 = vld [vmem:[#allocation70_spill] sm:$0xff] }
0x2136   :  { %8989 = vmatprep.mubr.f32.mxu1 %v8714_v11  ;;  %v17231_v11 = vld [vmem:[#allocation67_spill] sm:$0xff] }
0x2137   :  { %13292 = vmatpush3.bf16.msra.mxu0 %v17219_v58 }
0x2138   :  { %13324 = vmatpush3.bf16.msra.mxu1 %v17220_v56  ;;  %13294 = vmatprep.subr.bf16.mxu0 %v17221_v36  ;;  %v17232_v36 = vld [vmem:[#allocation73_spill] sm:$0xff] }
0x2139   :  { %13326 = vmatprep.subr.bf16.mxu1 %v17222_v24  ;;  %v17233_v24 = vld [vmem:[#allocation68_spill] sm:$0xff] }
0x213b   :  { %13296 = vmatpush3.bf16.msra.mxu0 %v17223_v16  ;;  %v17234_v16 = vld [vmem:[#allocation75_spill] sm:$0xff] }
0x213c   :  { %13328 = vmatpush3.bf16.msra.mxu1 %v17224_v28  ;;  %13298 = vmatprep.subr.bf16.mxu0 %v17225_v38  ;;  %v17235_v28 = vld [vmem:[#allocation71_spill] sm:$0xff]  ;;  %v17236_v38 = vld [vmem:[#allocation77_spill] sm:$0xff] }
0x213d   :  { %13330 = vmatprep.subr.bf16.mxu1 %v17226_v45  ;;  %v17237_v45 = vld [vmem:[#allocation72_spill] sm:$0xff] }
0x213f   :  { %13300 = vmatpush3.bf16.msra.mxu0 %v17227_v1  ;;  %v17238_v1 = vld [vmem:[#allocation78_spill] sm:$0xff] }
0x2140   :  { %13332 = vmatpush3.bf16.msra.mxu1 %v17228_v37  ;;  %13302 = vmatprep.subr.bf16.mxu0 %v17229_v31  ;;  %v17239_v37 = vld [vmem:[#allocation76_spill] sm:$0xff]  ;;  %v17240_v31 = vld [vmem:[#allocation79_spill] sm:$0xff] }
0x2141   :  { %13334 = vmatprep.subr.bf16.mxu1 %v17230_v47  ;;  %v17241_v47 = vld [vmem:[#allocation9_spill] sm:$0xff] }
0x2143   :  { %13304 = vmatpush3.bf16.msra.mxu0 %v17231_v11  ;;  %v17242_v11 = vld [vmem:[#allocation13_spill] sm:$0xff] }
0x2144   :  { %13336 = vmatpush3.bf16.msra.mxu1 %v17232_v36  ;;  %13306 = vmatprep.subr.bf16.mxu0 %v17233_v24  ;;  %v17243_v24 = vld [vmem:[#allocation10_spill] sm:$0xff] }
0x2145   :  { %13338 = vmatprep.subr.bf16.mxu1 %v17234_v16  ;;  %v17244_v16 = vld [vmem:[#allocation14_spill] sm:$0xff] }
0x2147   :  { %13308 = vmatpush3.bf16.msra.mxu0 %v17235_v28  ;;  %v17245_v28 = vld [vmem:[#allocation11_spill] sm:$0xff] }
0x2148   :  { %13340 = vmatpush3.bf16.msra.mxu1 %v17236_v38  ;;  %13310 = vmatprep.subr.bf16.mxu0 %v17237_v45  ;;  %v17246_v38 = vld [vmem:[#allocation15_spill] sm:$0xff] }
0x2149   :  { %13342 = vmatprep.subr.bf16.mxu1 %v17238_v1 }
0x214b   :  { %13312 = vmatpush3.bf16.msra.mxu0 %v17239_v37  ;;  %v17247_v37 = vld [vmem:[#allocation12_spill] sm:$0xff] }
0x214c   :  { %13344 = vmatpush3.bf16.msra.mxu1 %v17240_v31  ;;  %13346 = vmatprep.subr.bf16.mxu0 %v17241_v47  ;;  %v17248_v31 = vld [vmem:[#allocation16_spill] sm:$0xff] }
0x214d   :  { %13354 = vmatprep.subr.bf16.mxu1 %v17242_v11 }
0x214e   :  { %8920 = vmatmul.mubr.f32.vlgmr.msra.gmra.mrb[126].mxu0 %v8711_v61 }
0x214f   :  { %8990 = vmatmul.mubr.f32.vlgmr.msra.gmra.mrb[158].mxu1 %v8713_v49  ;;  %13348 = vmatpush1.bf16.msra.mxu0 %v17243_v24 }
0x2150   :  { %13356 = vmatpush1.bf16.msra.mxu1 %v17244_v16  ;;  %13350 = vmatprep.subr.bf16.mxu0 %v17245_v28 }
0x2151   :  { %13358 = vmatprep.subr.bf16.mxu1 %v17246_v38  ;;  %9063 = vmatprep.mubr.f32.mxu0 %v17144_v17 }
0x2152   :  { %9134 = vmatprep.mubr.f32.mxu1 %v17144_v17 }
0x2153   :  { %13352 = vmatpush1.bf16.msra.mxu0 %v17247_v37 }
0x2154   :  { %13360 = vmatpush1.bf16.msra.mxu1 %v17248_v31  ;;  %13362 = vmatprep.subr.bf16.mxu0 %v17204_v0 }
0x2155   :  { %13370 = vmatprep.subr.bf16.mxu1 %v17205_v39 }
0x2201   :  { %v11263_v61 = vpop.f32.mrb[124].mxu0 }
0x2202   :  { %v11298_v49 = vpop.f32.mrb[156].mxu1  ;;  %v11264_v24 = vpop.f32.mrb[125].mxu0 }
0x2203   :  { %v11265_v16 = vadd.f32 %v11264_v24, %v11263_v61  ;;  %v11299_v11 = vpop.f32.mrb[157].mxu1  ;;  %v17254_v24 = vld [vmem:[#allocation41_spill] sm:$0xff] }
0x2204   :  { %v11300_v28 = vadd.f32 %v11299_v11, %v11298_v49 }
0x2206   :  { %v8852_v47 = vadd.f32 %v11300_v28, %v11265_v16  ;;  %v17255_v16 = vld [vmem:[#allocation49_spill] sm:$0xff]  ;;  %v17256_v28 = vld [vmem:[#allocation42_spill] sm:$0xff] }
0x2221   :  { %v11333_v38 = vpop.f32.mrb[126].mxu0 }
0x2222   :  { %v11368_v1 = vpop.f32.mrb[158].mxu1  ;;  %v11334_v45 = vpop.f32.mrb[127].mxu0 }
0x2223   :  { %v11335_v36 = vadd.f32 %v11334_v45, %v11333_v38  ;;  %v11369_v56 = vpop.f32.mrb[159].mxu1  ;;  %v17257_v38 = vld [vmem:[#allocation50_spill] sm:$0xff] }
0x2224   :  { %v11370_v58 = vadd.f32 %v11369_v56, %v11368_v1  ;;  %v17252_v56 = vld [vmem:[#allocation40_spill] sm:$0xff] }
0x2225   :  { %v8922_v37 = vadd.f32 %v11335_v36, %v8852_v47  ;;  %v17253_v36 = vld [vmem:[#allocation48_spill] sm:$0xff]  ;;  %v17258_v47 = vld [vmem:[#allocation51_spill] sm:$0xff] }
0x2227   :  { %v8992_v21 = vadd.f32 %v11370_v58, %v8922_v37  ;;  %v17251_v58 = vld [vmem:[#allocation47_spill] sm:$0xff] }
0x2229   :  { %v16626_v31 = vadd.f32 %v8992_v21, %v16515_v7  ;;  %v17249_v21 = vld [vmem:[#allocation46_spill] sm:$0xff]  ;;  %v17250_v7 = vld [vmem:[#allocation39_spill] sm:$0xff] }
0x222b   :  { %10501 = vmatmul.mubr.msk.f32.vlgmr.msra.gmra.mrb[128].mxu0 %vm217_vm3, %v16626_v31  ;;  %10502 = vmatmul.mubr.msk.f32.vlgmr.msra.gmra.mrb[160].mxu1 %vm217_vm3, %v16626_v31 }
0x222c   :  { %13364 = vmatpush1.bf16.msra.mxu0 %v17149_v13  ;;  %13372 = vmatpush1.bf16.msra.mxu1 %v17150_v29 }
0x222d   :  { %13366 = vmatprep.subr.bf16.mxu0 %v17151_v6  ;;  %13374 = vmatprep.subr.bf16.mxu1 %v17152_v53 }
0x222e   :  { %9205 = vmatprep.mubr.f32.mxu0 %v17144_v17  ;;  %9276 = vmatprep.mubr.f32.mxu1 %v17144_v17 }
0x2230   :  { %13368 = vmatpush1.bf16.msra.mxu0 %v17153_v63  ;;  %13376 = vmatpush1.bf16.msra.mxu1 %v17154_v62 }
0x2231   :  { %13378 = vmatprep.subr.bf16.mxu0 %v17155_v18  ;;  %13410 = vmatprep.subr.bf16.mxu1 %v17156_v44 }
0x2233   :  { %10503 = vmatmul.mubr.msk.f32.vlgmr.msra.gmra.mrb[130].mxu0 %vm217_vm3, %v16626_v31  ;;  %10504 = vmatmul.mubr.msk.f32.vlgmr.msra.gmra.mrb[162].mxu1 %vm217_vm3, %v16626_v31 }
0x2234   :  { %13380 = vmatpush3.bf16.msra.mxu0 %v17157_v12  ;;  %13412 = vmatpush3.bf16.msra.mxu1 %v15753_v50 }
0x2235   :  { %13382 = vmatprep.subr.bf16.mxu0 %v17158_v10  ;;  %13414 = vmatprep.subr.bf16.mxu1 %v15755_v32 }
0x2238   :  { %13384 = vmatpush3.bf16.msra.mxu0 %v17159_v23  ;;  %13416 = vmatpush3.bf16.msra.mxu1 %v15788_v40 }
0x2239   :  { %13386 = vmatprep.subr.bf16.mxu0 %v17160_v52  ;;  %13418 = vmatprep.subr.bf16.mxu1 %v15791_v54 }
0x223c   :  { %13388 = vmatpush3.bf16.msra.mxu0 %v17161_v41  ;;  %13420 = vmatpush3.bf16.msra.mxu1 %v15813_v19 }
0x223d   :  { %13390 = vmatprep.subr.bf16.mxu0 %v17162_v22  ;;  %13422 = vmatprep.subr.bf16.mxu1 %v15817_v5 }
0x2240   :  { %13392 = vmatpush3.bf16.msra.mxu0 %v17163_v48  ;;  %13424 = vmatpush3.bf16.msra.mxu1 %v15840_v15 }
0x2241   :  { %13394 = vmatprep.subr.bf16.mxu0 %v17164_v9  ;;  %13426 = vmatprep.subr.bf16.mxu1 %v15843_v42 }
0x2244   :  { %13396 = vmatpush3.bf16.msra.mxu0 %v17165_v55  ;;  %13428 = vmatpush3.bf16.msra.mxu1 %v17166_v26 }
0x2245   :  { %13398 = vmatprep.subr.bf16.mxu0 %v17167_v4  ;;  %13430 = vmatprep.subr.bf16.mxu1 %v17168_v35 }
0x2248   :  { %13400 = vmatpush3.bf16.msra.mxu0 %v17206_v3  ;;  %13432 = vmatpush3.bf16.msra.mxu1 %v17207_v20 }
0x2249   :  { %13402 = vmatprep.subr.bf16.mxu0 %v17208_v57  ;;  %13434 = vmatprep.subr.bf16.mxu1 %v17249_v21 }
0x224c   :  { %13404 = vmatpush3.bf16.msra.mxu0 %v17250_v7  ;;  %13436 = vmatpush3.bf16.msra.mxu1 %v17251_v58 }
0x224d   :  { %13406 = vmatprep.subr.bf16.mxu0 %v17252_v56  ;;  %13438 = vmatprep.subr.bf16.mxu1 %v17253_v36 }
0x2250   :  { %13408 = vmatpush3.bf16.msra.mxu0 %v17254_v24  ;;  %13440 = vmatpush3.bf16.msra.mxu1 %v17255_v16  ;;  %v17259_v24 = vld [vmem:[#allocation65_spill] sm:$0xff] }
0x2251   :  { %13442 = vmatprep.subr.bf16.mxu0 %v17256_v28  ;;  %13474 = vmatprep.subr.bf16.mxu1 %v17257_v38 }
0x22fe   :  { %v9065_v45 = vpop.f32.mrb[128].mxu0  ;;  %v9136_v1 = vpop.f32.mrb[160].mxu1 }
0x22ff   :  { %v9066_v37 = vadd.f32 %v9065_v45, %v15974_v33  ;;  %v9137_v11 = vadd.f32 %v9136_v1, %v17258_v47  ;;  %v9067_v61 = vpop.f32.mrb[129].mxu0  ;;  %v9138_v49 = vpop.f32.mrb[161].mxu1 }
0x2300   :  { %v9068_v56 = vadd.f32 %v9067_v61, %v15978_v25  ;;  %v9139_v36 = vadd.f32 %v9138_v49, %v15995_v14 }
0x2301   :  { %13785 = vtanh.f32 %v9066_v37 }
0x2302   :  { %13787 = vtanh.f32 %v9137_v11 }
0x2303   :  { %13789 = vtanh.f32 %v9068_v56  ;;  %v17260_v56 = vld [vmem:[#allocation66_spill] sm:$0xff] }
0x2304   :  { %13791 = vtanh.f32 %v9139_v36 }
0x2306   :  { %v9207_v16 = vpop.f32.mrb[130].mxu0  ;;  %v9278_v28 = vpop.f32.mrb[162].mxu1 }
0x2307   :  { %v9208_v38 = vadd.f32 %v9207_v16, %v16179_v34  ;;  %v9279_v58 = vadd.f32 %v9278_v28, %v17259_v24  ;;  %v9209_v7 = vpop.f32.mrb[131].mxu0  ;;  %v9280_v45 = vpop.f32.mrb[163].mxu1 }
0x2308   :  { %v9210_v1 = vadd.f32 %v9209_v7, %v15987_v59  ;;  %v9281_v47 = vadd.f32 %v9280_v45, %v16013_v8 }
0x2309   :  { %13793 = vtanh.f32 %v9208_v38 }
0x230a   :  { %13795 = vtanh.f32 %v9279_v58 }
0x230b   :  { %v13786_v61 = vpop.eup %13785  ;;  %13797 = vtanh.f32 %v9210_v1 }
0x230c   :  { %v13788_v37 = vpop.eup %13787  ;;  %13799 = vtanh.f32 %v9281_v47  ;;  %v9291_v36 = vmul.f32 %v13786_v61, %v17260_v56 }
0x230d   :  { %v13790_v11 = vpop.eup %13789  ;;  %v9293_v49 = vmul.f32 %v13788_v37, %v17260_v56  ;;  %v17261_v37 = vld [vmem:[#allocation55_spill] sm:$0xff] }
0x230e   :  { %v13792_v16 = vpop.eup %13791  ;;  %v9292_v28 = vmul.f32 %v13790_v11, %v17260_v56  ;;  %v17263_v11 = vld [vmem:[#allocation58_spill] sm:$0xff] }
0x230f   :  { %v9294_v24 = vmul.f32 %v13792_v16, %v17260_v56  ;;  %v17265_v16 = vld [vmem:[#allocation60_spill] sm:$0xff] }
0x2310   :  { %9363 = vmatprep.mubr.f32.mxu0 %v9292_v28  ;;  %v17266_v28 = vld [vmem:[#allocation56_spill] sm:$0xff] }
0x2311   :  { %9433 = vmatprep.mubr.f32.mxu1 %v9294_v24  ;;  %9364 = vmatmul.mubr.f32.vlgmr.msra.gmra.mrb[132].mxu0 %v9291_v36  ;;  %v17262_v36 = vld [vmem:[#allocation53_spill] sm:$0xff] }
0x2312   :  { %9434 = vmatmul.mubr.f32.vlgmr.msra.gmra.mrb[164].mxu1 %v9293_v49  ;;  %13444 = vmatpush3.bf16.msra.mxu0 %v16051_v27  ;;  %v17264_v49 = vld [vmem:[#allocation54_spill] sm:$0xff] }
0x2313   :  { %v13794_v7 = vpop.eup %13793  ;;  %13476 = vmatpush3.bf16.msra.mxu1 %v16098_v60  ;;  %13446 = vmatprep.subr.bf16.mxu0 %v16055_v46 }
0x2314   :  { %v13796_v58 = vpop.eup %13795  ;;  %13478 = vmatprep.subr.bf16.mxu1 %v16108_v30  ;;  %v9295_v38 = vmul.f32 %v13794_v7, %v17260_v56  ;;  %v17267_v7 = vld [vmem:[#allocation63_spill] sm:$0xff] }
0x2315   :  { %v13798_v47 = vpop.eup %13797  ;;  %v9297_v45 = vmul.f32 %v13796_v58, %v17260_v56  ;;  %v17268_v58 = vld [vmem:[#allocation57_spill] sm:$0xff] }
0x2316   :  { %v13800_v1 = vpop.eup %13799  ;;  %13448 = vmatpush3.bf16.msra.mxu0 %v16078_v2  ;;  %v9296_v24 = vmul.f32 %v13798_v47, %v17260_v56  ;;  %v17270_v47 = vld [vmem:[#allocation61_spill] sm:$0xff] }
0x2317   :  { %13480 = vmatpush3.bf16.msra.mxu1 %v16139_v43  ;;  %v9298_v61 = vmul.f32 %v13800_v1, %v17260_v56  ;;  %13450 = vmatprep.subr.bf16.mxu0 %v16088_v51  ;;  %v17269_v56 = vld [vmem:[#allocation64_spill] sm:$0xff]  ;;  %v17271_v1 = vld [vmem:[#allocation69_spill] sm:$0xff] }
0x2318   :  { %9503 = vmatprep.mubr.f32.mxu0 %v9296_v24  ;;  %13482 = vmatprep.subr.bf16.mxu1 %v17261_v37  ;;  %v17272_v24 = vld [vmem:[#allocation62_spill] sm:$0xff] }
0x2319   :  { %9573 = vmatprep.mubr.f32.mxu1 %v9298_v61  ;;  %v17273_v61 = vld [vmem:[#allocation70_spill] sm:$0xff] }
0x231a   :  { %13452 = vmatpush3.bf16.msra.mxu0 %v17262_v36 }
0x231b   :  { %13484 = vmatpush3.bf16.msra.mxu1 %v17263_v11  ;;  %13454 = vmatprep.subr.bf16.mxu0 %v17264_v49  ;;  %v17274_v11 = vld [vmem:[#allocation67_spill] sm:$0xff]  ;;  %v17275_v49 = vld [vmem:[#allocation73_spill] sm:$0xff] }
0x231c   :  { %13486 = vmatprep.subr.bf16.mxu1 %v17265_v16  ;;  %v17276_v16 = vld [vmem:[#allocation68_spill] sm:$0xff] }
0x231e   :  { %13456 = vmatpush3.bf16.msra.mxu0 %v17266_v28  ;;  %v17277_v28 = vld [vmem:[#allocation75_spill] sm:$0xff] }
0x231f   :  { %13488 = vmatpush3.bf16.msra.mxu1 %v17267_v7  ;;  %13458 = vmatprep.subr.bf16.mxu0 %v17268_v58  ;;  %v17278_v7 = vld [vmem:[#allocation71_spill] sm:$0xff]  ;;  %v17279_v58 = vld [vmem:[#allocation77_spill] sm:$0xff] }
0x2320   :  { %13490 = vmatprep.subr.bf16.mxu1 %v17269_v56  ;;  %v17280_v56 = vld [vmem:[#allocation72_spill] sm:$0xff] }
0x2322   :  { %13460 = vmatpush3.bf16.msra.mxu0 %v17270_v47  ;;  %v17281_v47 = vld [vmem:[#allocation78_spill] sm:$0xff] }
0x2323   :  { %13492 = vmatpush3.bf16.msra.mxu1 %v17271_v1  ;;  %13462 = vmatprep.subr.bf16.mxu0 %v17272_v24  ;;  %v17282_v1 = vld [vmem:[#allocation76_spill] sm:$0xff]  ;;  %v17283_v24 = vld [vmem:[#allocation79_spill] sm:$0xff] }
0x2324   :  { %13494 = vmatprep.subr.bf16.mxu1 %v17273_v61  ;;  %v17284_v61 = vld [vmem:[#allocation9_spill] sm:$0xff] }
0x2326   :  { %13464 = vmatpush3.bf16.msra.mxu0 %v17274_v11  ;;  %v17285_v11 = vld [vmem:[#allocation13_spill] sm:$0xff] }
0x2327   :  { %13496 = vmatpush3.bf16.msra.mxu1 %v17275_v49  ;;  %13466 = vmatprep.subr.bf16.mxu0 %v17276_v16  ;;  %v17286_v16 = vld [vmem:[#allocation10_spill] sm:$0xff] }
0x2328   :  { %13498 = vmatprep.subr.bf16.mxu1 %v17277_v28  ;;  %v17287_v28 = vld [vmem:[#allocation14_spill] sm:$0xff] }
0x232a   :  { %13468 = vmatpush3.bf16.msra.mxu0 %v17278_v7  ;;  %v17288_v7 = vld [vmem:[#allocation11_spill] sm:$0xff] }
0x232b   :  { %13500 = vmatpush3.bf16.msra.mxu1 %v17279_v58  ;;  %13470 = vmatprep.subr.bf16.mxu0 %v17280_v56  ;;  %v17289_v58 = vld [vmem:[#allocation15_spill] sm:$0xff] }
0x232c   :  { %13502 = vmatprep.subr.bf16.mxu1 %v17281_v47 }
0x232e   :  { %13472 = vmatpush3.bf16.msra.mxu0 %v17282_v1  ;;  %v17290_v1 = vld [vmem:[#allocation12_spill] sm:$0xff] }
0x232f   :  { %13504 = vmatpush3.bf16.msra.mxu1 %v17283_v24  ;;  %13506 = vmatprep.subr.bf16.mxu0 %v17284_v61  ;;  %v17291_v24 = vld [vmem:[#allocation16_spill] sm:$0xff] }
0x2330   :  { %13514 = vmatprep.subr.bf16.mxu1 %v17285_v11 }
0x2331   :  { %9504 = vmatmul.mubr.f32.vlgmr.msra.gmra.mrb[134].mxu0 %v9295_v38 }
0x2332   :  { %9574 = vmatmul.mubr.f32.vlgmr.msra.gmra.mrb[166].mxu1 %v9297_v45  ;;  %13508 = vmatpush1.bf16.msra.mxu0 %v17286_v16 }
0x2333   :  { %13516 = vmatpush1.bf16.msra.mxu1 %v17287_v28  ;;  %13510 = vmatprep.subr.bf16.mxu0 %v17288_v7 }
0x2334   :  { %13518 = vmatprep.subr.bf16.mxu1 %v17289_v58  ;;  %9647 = vmatprep.mubr.f32.mxu0 %v17144_v17 }
0x2335   :  { %9718 = vmatprep.mubr.f32.mxu1 %v17144_v17 }
0x2336   :  { %13512 = vmatpush1.bf16.msra.mxu0 %v17290_v1 }
0x2337   :  { %13520 = vmatpush1.bf16.msra.mxu1 %v17291_v24  ;;  %13522 = vmatprep.subr.bf16.mxu0 %v17204_v0 }
0x2338   :  { %13530 = vmatprep.subr.bf16.mxu1 %v17205_v39 }
0x23e4   :  { %v11403_v38 = vpop.f32.mrb[132].mxu0 }
0x23e5   :  { %v11438_v45 = vpop.f32.mrb[164].mxu1  ;;  %v11404_v11 = vpop.f32.mrb[133].mxu0 }
0x23e6   :  { %v11405_v16 = vadd.f32 %v11404_v11, %v11403_v38  ;;  %v11439_v28 = vpop.f32.mrb[165].mxu1  ;;  %v17313_v38 = vld [vmem:[#allocation61_spill] sm:$0xff]  ;;  %v17315_v11 = vld [vmem:[#allocation62_spill] sm:$0xff] }
0x23e7   :  { %v11440_v7 = vadd.f32 %v11439_v28, %v11438_v45  ;;  %v17314_v45 = vld [vmem:[#allocation69_spill] sm:$0xff]  ;;  %v17317_v28 = vld [vmem:[#allocation67_spill] sm:$0xff] }
0x23e9   :  { %v9436_v61 = vadd.f32 %v11440_v7, %v11405_v16  ;;  %v17316_v16 = vld [vmem:[#allocation70_spill] sm:$0xff]  ;;  %v17318_v7 = vld [vmem:[#allocation73_spill] sm:$0xff] }
0x2404   :  { %v11473_v58 = vpop.f32.mrb[134].mxu0 }
0x2405   :  { %v11508_v47 = vpop.f32.mrb[166].mxu1  ;;  %v11474_v56 = vpop.f32.mrb[135].mxu0 }
0x2406   :  { %v11475_v49 = vadd.f32 %v11474_v56, %v11473_v58  ;;  %v11509_v36 = vpop.f32.mrb[167].mxu1  ;;  %v17310_v56 = vld [vmem:[#allocation63_spill] sm:$0xff] }
0x2407   :  { %v11510_v37 = vadd.f32 %v11509_v36, %v11508_v47  ;;  %v17307_v36 = vld [vmem:[#allocation54_spill] sm:$0xff]  ;;  %v17312_v47 = vld [vmem:[#allocation64_spill] sm:$0xff]  ;;  %v17320_v58 = vld [vmem:[#allocation75_spill] sm:$0xff] }
0x2408   :  { %v9506_v1 = vadd.f32 %v11475_v49, %v9436_v61  ;;  %v17308_v49 = vld [vmem:[#allocation60_spill] sm:$0xff] }
0x2409   :  { %v17319_v61 = vld [vmem:[#allocation68_spill] sm:$0xff] }
0x240a   :  { %v9576_v51 = vadd.f32 %v11510_v37, %v9506_v1  ;;  %v17306_v37 = vld [vmem:[#allocation58_spill] sm:$0xff]  ;;  %v17321_v1 = vld [vmem:[#allocation71_spill] sm:$0xff] }
0x240c   :  { %v16737_v24 = vadd.f32 %v9576_v51, %v16626_v31 }
0x240e   :  { %10505 = vmatmul.mubr.msk.f32.vlgmr.msra.gmra.mrb[136].mxu0 %vm217_vm3, %v16737_v24  ;;  %10506 = vmatmul.mubr.msk.f32.vlgmr.msra.gmra.mrb[168].mxu1 %vm217_vm3, %v16737_v24 }
0x240f   :  { %13524 = vmatpush1.bf16.msra.mxu0 %v17149_v13  ;;  %13532 = vmatpush1.bf16.msra.mxu1 %v17150_v29 }
0x2410   :  { %13526 = vmatprep.subr.bf16.mxu0 %v17151_v6  ;;  %13534 = vmatprep.subr.bf16.mxu1 %v17152_v53  ;;  %v17300_v6 = vld [vmem:[#allocation51_spill] sm:$0xff] }
0x2411   :  { %9789 = vmatprep.mubr.f32.mxu0 %v17144_v17  ;;  %9860 = vmatprep.mubr.f32.mxu1 %v17144_v17 }
0x2413   :  { %13528 = vmatpush1.bf16.msra.mxu0 %v17153_v63  ;;  %13536 = vmatpush1.bf16.msra.mxu1 %v17154_v62 }
0x2414   :  { %13538 = vmatprep.subr.bf16.mxu0 %v17155_v18  ;;  %13570 = vmatprep.subr.bf16.mxu1 %v17156_v44 }
0x2416   :  { %10507 = vmatmul.mubr.msk.f32.vlgmr.msra.gmra.mrb[138].mxu0 %vm217_vm3, %v16737_v24  ;;  %10508 = vmatmul.mubr.msk.f32.vlgmr.msra.gmra.mrb[170].mxu1 %vm217_vm3, %v16737_v24 }
0x2417   :  { %13540 = vmatpush3.bf16.msra.mxu0 %v17157_v12  ;;  %13572 = vmatpush3.bf16.msra.mxu1 %v15753_v50  ;;  %v17294_v50 = vld [vmem:[#allocation40_spill] sm:$0xff] }
0x2418   :  { %13542 = vmatprep.subr.bf16.mxu0 %v17158_v10  ;;  %13574 = vmatprep.subr.bf16.mxu1 %v15755_v32  ;;  %v17295_v32 = vld [vmem:[#allocation48_spill] sm:$0xff] }
0x241b   :  { %13544 = vmatpush3.bf16.msra.mxu0 %v17159_v23  ;;  %13576 = vmatpush3.bf16.msra.mxu1 %v15788_v40  ;;  %v17293_v40 = vld [vmem:[#allocation47_spill] sm:$0xff] }
0x241c   :  { %13546 = vmatprep.subr.bf16.mxu0 %v17160_v52  ;;  %13578 = vmatprep.subr.bf16.mxu1 %v15791_v54  ;;  %v17292_v54 = vld [vmem:[#allocation39_spill] sm:$0xff]  ;;  %v17301_v52 = vld [vmem:[#allocation65_spill] sm:$0xff] }
0x241f   :  { %13548 = vmatpush3.bf16.msra.mxu0 %v17161_v41  ;;  %13580 = vmatpush3.bf16.msra.mxu1 %v15813_v19  ;;  %v17296_v19 = vld [vmem:[#allocation41_spill] sm:$0xff] }
0x2420   :  { %13550 = vmatprep.subr.bf16.mxu0 %v17162_v22  ;;  %13582 = vmatprep.subr.bf16.mxu1 %v15817_v5  ;;  %v17297_v5 = vld [vmem:[#allocation49_spill] sm:$0xff] }
0x2423   :  { %13552 = vmatpush3.bf16.msra.mxu0 %v17163_v48  ;;  %13584 = vmatpush3.bf16.msra.mxu1 %v15840_v15  ;;  %v17298_v15 = vld [vmem:[#allocation42_spill] sm:$0xff] }
0x2424   :  { %13554 = vmatprep.subr.bf16.mxu0 %v17164_v9  ;;  %13586 = vmatprep.subr.bf16.mxu1 %v15843_v42  ;;  %v17299_v42 = vld [vmem:[#allocation50_spill] sm:$0xff] }
0x2427   :  { %13556 = vmatpush3.bf16.msra.mxu0 %v17165_v55  ;;  %13588 = vmatpush3.bf16.msra.mxu1 %v17166_v26  ;;  %v17302_v55 = vld [vmem:[#allocation74_spill] sm:$0xff] }
0x2428   :  { %13558 = vmatprep.subr.bf16.mxu0 %v17167_v4  ;;  %13590 = vmatprep.subr.bf16.mxu1 %v17168_v35 }
0x242b   :  { %13560 = vmatpush3.bf16.msra.mxu0 %v17206_v3  ;;  %13592 = vmatpush3.bf16.msra.mxu1 %v17207_v20 }
0x242c   :  { %13562 = vmatprep.subr.bf16.mxu0 %v17208_v57  ;;  %13594 = vmatprep.subr.bf16.mxu1 %v17249_v21 }
0x242f   :  { %13564 = vmatpush3.bf16.msra.mxu0 %v17292_v54  ;;  %13596 = vmatpush3.bf16.msra.mxu1 %v17293_v40  ;;  %v17322_v54 = vld [vmem:[#allocation77_spill] sm:$0xff]  ;;  %v17323_v40 = vld [vmem:[#allocation72_spill] sm:$0xff] }
0x2430   :  { %13566 = vmatprep.subr.bf16.mxu0 %v17294_v50  ;;  %13598 = vmatprep.subr.bf16.mxu1 %v17295_v32  ;;  %v17324_v50 = vld [vmem:[#allocation78_spill] sm:$0xff]  ;;  %v17325_v32 = vld [vmem:[#allocation76_spill] sm:$0xff] }
0x2433   :  { %13568 = vmatpush3.bf16.msra.mxu0 %v17296_v19  ;;  %13600 = vmatpush3.bf16.msra.mxu1 %v17297_v5  ;;  %v17326_v19 = vld [vmem:[#allocation79_spill] sm:$0xff]  ;;  %v17327_v5 = vmov 0.0|0.0  }
0x2434   :  { %13602 = vmatprep.subr.bf16.mxu0 %v17298_v15  ;;  %13634 = vmatprep.subr.bf16.mxu1 %v17299_v42  ;;  %v10164_v15 = vld [vmem:[%s17328_s25] sm:$0xff]  ;;  %v10165_v42 = vld [vmem:[%s17328_s25 + $0x8] sm:$0xff] }
0x24e1   :  { %v9649_v51 = vpop.f32.mrb[136].mxu0  ;;  %v9720_v13 = vpop.f32.mrb[168].mxu1 }
0x24e2   :  { %v9650_v29 = vadd.f32 %v9649_v51, %v15974_v33  ;;  %v9721_v53 = vadd.f32 %v9720_v13, %v17300_v6  ;;  %v9651_v63 = vpop.f32.mrb[137].mxu0  ;;  %v9722_v62 = vpop.f32.mrb[169].mxu1  ;;  %v13666_v51 = vpack.c.bf16 %v10165_v42, %v10164_v15  ;;  %v10166_v13 = vld [vmem:[%s17328_s25 + $0x10] sm:$0xff] }
0x24e3   :  { %v9652_v18 = vadd.f32 %v9651_v63, %v15978_v25  ;;  %v9723_v44 = vadd.f32 %v9722_v62, %v15995_v14 }
0x24e4   :  { %13801 = vtanh.f32 %v9650_v29 }
0x24e5   :  { %13803 = vtanh.f32 %v9721_v53 }
0x24e6   :  { %13805 = vtanh.f32 %v9652_v18 }
0x24e7   :  { %13807 = vtanh.f32 %v9723_v44 }
0x24e9   :  { %v9791_v12 = vpop.f32.mrb[138].mxu0  ;;  %v9862_v10 = vpop.f32.mrb[170].mxu1 }
0x24ea   :  { %v9792_v23 = vadd.f32 %v9791_v12, %v16179_v34  ;;  %v9863_v41 = vadd.f32 %v9862_v10, %v17301_v52  ;;  %v9793_v22 = vpop.f32.mrb[139].mxu0  ;;  %v9864_v33 = vpop.f32.mrb[171].mxu1 }
0x24eb   :  { %v9794_v48 = vadd.f32 %v9793_v22, %v15987_v59  ;;  %v9865_v9 = vadd.f32 %v9864_v33, %v16013_v8 }
0x24ec   :  { %13809 = vtanh.f32 %v9792_v23 }
0x24ed   :  { %13811 = vtanh.f32 %v9863_v41 }
0x24ee   :  { %v13802_v25 = vpop.eup %13801  ;;  %13813 = vtanh.f32 %v9794_v48 }
0x24ef   :  { %v13804_v14 = vpop.eup %13803  ;;  %13815 = vtanh.f32 %v9865_v9  ;;  %v9875_v26 = vmul.f32 %v13802_v25, %v17302_v55 }
0x24f0   :  { %v13806_v4 = vpop.eup %13805  ;;  %v9877_v35 = vmul.f32 %v13804_v14, %v17302_v55 }
0x24f1   :  { %v13808_v34 = vpop.eup %13807  ;;  %v9876_v0 = vmul.f32 %v13806_v4, %v17302_v55 }
0x24f2   :  { %v9878_v39 = vmul.f32 %v13808_v34, %v17302_v55 }
0x24f3   :  { %9947 = vmatprep.mubr.f32.mxu0 %v9876_v0 }
0x24f4   :  { %10017 = vmatprep.mubr.f32.mxu1 %v9878_v39  ;;  %9948 = vmatmul.mubr.f32.vlgmr.msra.gmra.mrb[140].mxu0 %v9875_v26 }
0x24f5   :  { %10018 = vmatmul.mubr.f32.vlgmr.msra.gmra.mrb[172].mxu1 %v9877_v35  ;;  %13604 = vmatpush3.bf16.msra.mxu0 %v16051_v27 }
0x24f6   :  { %v13810_v59 = vpop.eup %13809  ;;  %13636 = vmatpush3.bf16.msra.mxu1 %v16098_v60  ;;  %13606 = vmatprep.subr.bf16.mxu0 %v16055_v46  ;;  %v17303_v60 = vld [vmem:[#allocation52_spill] sm:$0xff]  ;;  %v17304_v46 = vld [vmem:[#allocation55_spill] sm:$0xff] }
0x24f7   :  { %v13812_v8 = vpop.eup %13811  ;;  %13638 = vmatprep.subr.bf16.mxu1 %v16108_v30  ;;  %v9879_v3 = vmul.f32 %v13810_v59, %v17302_v55  ;;  %v17305_v30 = vld [vmem:[#allocation53_spill] sm:$0xff] }
0x24f8   :  { %v13814_v20 = vpop.eup %13813  ;;  %v9881_v57 = vmul.f32 %v13812_v8, %v17302_v55 }
0x24f9   :  { %v13816_v31 = vpop.eup %13815  ;;  %13608 = vmatpush3.bf16.msra.mxu0 %v16078_v2  ;;  %v9880_v21 = vmul.f32 %v13814_v20, %v17302_v55  ;;  %v17309_v2 = vld [vmem:[#allocation56_spill] sm:$0xff] }
0x24fa   :  { %13640 = vmatpush3.bf16.msra.mxu1 %v16139_v43  ;;  %v9882_v27 = vmul.f32 %v13816_v31, %v17302_v55  ;;  %13610 = vmatprep.subr.bf16.mxu0 %v17303_v60  ;;  %v17311_v43 = vld [vmem:[#allocation57_spill] sm:$0xff] }
0x24fb   :  { %10087 = vmatprep.mubr.f32.mxu0 %v9880_v21  ;;  %13642 = vmatprep.subr.bf16.mxu1 %v17304_v46 }
0x24fc   :  { %10157 = vmatprep.mubr.f32.mxu1 %v9882_v27 }
0x24fd   :  { %13612 = vmatpush3.bf16.msra.mxu0 %v17305_v30 }
0x24fe   :  { %13644 = vmatpush3.bf16.msra.mxu1 %v17306_v37  ;;  %13614 = vmatprep.subr.bf16.mxu0 %v17307_v36 }
0x24ff   :  { %13646 = vmatprep.subr.bf16.mxu1 %v17308_v49 }
0x2501   :  { %13616 = vmatpush3.bf16.msra.mxu0 %v17309_v2 }
0x2502   :  { %13648 = vmatpush3.bf16.msra.mxu1 %v17310_v56  ;;  %13618 = vmatprep.subr.bf16.mxu0 %v17311_v43 }
0x2503   :  { %13650 = vmatprep.subr.bf16.mxu1 %v17312_v47 }
0x2505   :  { %13620 = vmatpush3.bf16.msra.mxu0 %v17313_v38 }
0x2506   :  { %13652 = vmatpush3.bf16.msra.mxu1 %v17314_v45  ;;  %13622 = vmatprep.subr.bf16.mxu0 %v17315_v11 }
0x2507   :  { %13654 = vmatprep.subr.bf16.mxu1 %v17316_v16 }
0x2509   :  { %13624 = vmatpush3.bf16.msra.mxu0 %v17317_v28 }
0x250a   :  { %13656 = vmatpush3.bf16.msra.mxu1 %v17318_v7  ;;  %13626 = vmatprep.subr.bf16.mxu0 %v17319_v61 }
0x250b   :  { %13658 = vmatprep.subr.bf16.mxu1 %v17320_v58 }
0x250d   :  { %13628 = vmatpush3.bf16.msra.mxu0 %v17321_v1 }
0x250e   :  { %13660 = vmatpush3.bf16.msra.mxu1 %v17322_v54  ;;  %13630 = vmatprep.subr.bf16.mxu0 %v17323_v40 }
0x250f   :  { %13662 = vmatprep.subr.bf16.mxu1 %v17324_v50 }
0x2511   :  { %13632 = vmatpush3.bf16.msra.mxu0 %v17325_v32 }
0x2512   :  { %13664 = vmatpush3.bf16.msra.mxu1 %v17326_v19  ;;  %13665 = vmatprep.subr.bf16.mxu0 %v17327_v5 }
0x2514   :  { %10088 = vmatmul.mubr.f32.vlgmr.msra.gmra.mrb[142].mxu0 %v9879_v3 }
0x2515   :  { %10158 = vmatmul.mubr.f32.vlgmr.msra.gmra.mrb[174].mxu1 %v9881_v57  ;;  %12504 = vmatprep.mubr.msk.f32.mxu0 %vm13869_vm1, %v17144_v17  ;;  %v10167_v17 = vld [vmem:[%s17328_s25 + $0x18] sm:$0xff] }
0x2516   :  { %13667 = vmatpush3.bf16.msra.mxu0 %v13666_v51  ;;  %v13669_v29 = vpack.c.bf16 %v10167_v17, %v10166_v13 }
0x2517   :  { %13668 = vmatprep.subr.bf16.mxu0 %v17327_v5 }
0x251a   :  { %13670 = vmatpush3.bf16.msra.mxu0 %v13669_v29 }
0x25c7   :  { %v11543_v6 = vpop.f32.mrb[140].mxu0 }
0x25c8   :  { %v11578_v53 = vpop.f32.mrb[172].mxu1  ;;  %v11544_v63 = vpop.f32.mrb[141].mxu0 }
0x25c9   :  { %v11545_v62 = vadd.f32 %v11544_v63, %v11543_v6  ;;  %v11579_v18 = vpop.f32.mrb[173].mxu1 }
0x25ca   :  { %v11580_v44 = vadd.f32 %v11579_v18, %v11578_v53 }
0x25cc   :  { %v10020_v12 = vadd.f32 %v11580_v44, %v11545_v62 }
0x25e7   :  { %v11613_v10 = vpop.f32.mrb[142].mxu0 }
0x25e8   :  { %v11648_v23 = vpop.f32.mrb[174].mxu1  ;;  %v11614_v52 = vpop.f32.mrb[143].mxu0 }
0x25e9   :  { %v11615_v41 = vadd.f32 %v11614_v52, %v11613_v10  ;;  %v11649_v22 = vpop.f32.mrb[175].mxu1 }
0x25ea   :  { %v11650_v33 = vadd.f32 %v11649_v22, %v11648_v23 }
0x25eb   :  { %v10090_v48 = vadd.f32 %v11615_v41, %v10020_v12 }
0x25ed   :  { %v10160_v9 = vadd.f32 %v11650_v33, %v10090_v48 }
0x25ef   :  { %v10163_v25 = vadd.f32 %v10160_v9, %v16737_v24 }
0x25f1   :  { %12505 = vmatmul.mubr.msk.f32.vlgmr.msra.gmra.mrb[144].mxu0 %vm217_vm3, %v10163_v25 }
0x25f2   :  { %13852 = shalt.err (!%p13849_p9)
}
0x25f3   :  { %s17329_s7 = sld [smem:[#allocation94_spill]] }
0x25f9   :  { %s13853_s28 = scalar_lea.hbm %s17329_s7, 16 }
0x25fa   :  { %p13854_p10 = scmp.ne.s32.totalorder %s17329_s7, %s13853_s28  ;;  %p13857_p11 = scmp.lt.u32.totalorder %s13853_s28, %s17329_s7 }
0x25fc   :  { %p13859_p12 = pnand %p13857_p11, %p13854_p10 }
0x25fe   :  { %13862 = shalt.err (!%p13859_p12)
}
0x25ff   :  { %10264 = dma.vmem_to_hbm [thread:$0]  %s10262_s5, 16, %s17329_s7, [#allocation3]   ;;  %vm10248_vm1 = vcmask 15360  }
0x2600   :  { %s17330_s15 = sld [smem:[#allocation92_spill]]  ;;  %s17331_s16 = sld [smem:[#allocation93_spill]] }
0x2606   :  { %v10509_v24 = vld [vmem:[%s17330_s15] ss:$0 sm:$0xff] }
0x26c4   :  { %v10244_v14 = vpop.f32.mrb[144].mxu0 }
0x26c5   :  { %v10245_v55 = vadd.f32 %v10509_v24, %v10244_v14  ;;  %v12506_v26 = vpop.f32.mrb[145].mxu0 }
0x26c7   :  { %10249 = vst.msk [vmem:[%s17331_s16] sm:$0xff] %vm10248_vm1, %v10245_v55 }
0x26c8   :  { %13865 = dma.done.wait [#allocation3], 16  }
0x26c9   :  { %13866 = vsyncadd [#allocation3], 4294967280 }
0x26ca   :  { %10270 = vsyncpa [#allocation3], 1 }
0x26cb   :  { %10271 = vsyncpa [#allocation4], 1 }

</bundles_post_ra>
